<compile_context>
chip_gen: v6e
topology: v6e:2x2x1
jax: 0.10.0
libtpu: 0.0.40
codegen_flags: <defaults>
</compile_context>

<pallas_src>
import functools

import numpy as np
import jax
import jax.numpy as jnp
from jax.experimental import pallas as pl
from jax.experimental.pallas import tpu as pltpu

_EPS = 1e-5
_LANE = 128
_VMEM_LIMIT = 32 * 1024 * 1024  # <= default scoped VMEM on v6e/v7x, raised on v5e


# --------------------------- tiling helpers ----------------------------------

def _round_up(x, m):
    return (x + m - 1) // m * m


def _choose_tile(dim, align, max_tile):
    """Pick (tile, padded_dim) for one matmul dimension.

    A block equal to the full (unpadded) dim is always legal, so small dims are
    taken whole.  Larger dims get the biggest `align`-multiple tile that
    minimizes padding (usually an exact divisor, i.e. zero padding)."""
    if dim <= max_tile:
        return dim, dim
    best_t, best_p = align, _round_up(dim, align)
    t = align
    while t <= max_tile:
        p = _round_up(dim, t)
        if (p - dim, -t) < (best_p - dim, -best_t):
            best_t, best_p = t, p
        t += align
    return best_t, best_p


# --------------------------- Pallas kernels -----------------------------------

def _mm_kernel(*refs, relu, has_res):
    # Tiled matmul with K-reduction grid axis, f32 accumulator scratch and a
    # fused (bias [+ residual]) [+ ReLU] epilogue on the last K step.
    if has_res:
        x_ref, w_ref, b_ref, r_ref, o_ref, acc_ref = refs
    else:
        x_ref, w_ref, b_ref, o_ref, acc_ref = refs
        r_ref = None
    k = pl.program_id(2)

    @pl.when(k == 0)
    def _():
        acc_ref[...] = jnp.zeros_like(acc_ref)

    acc_ref[...] += jnp.dot(x_ref[...], w_ref[...],
                            preferred_element_type=jnp.float32)

    @pl.when(k == pl.num_programs(2) - 1)
    def _():
        out = acc_ref[...] + b_ref[...]          # epilogue math stays in f32
        if r_ref is not None:
            out = out + r_ref[...]
        if relu:
            out = jnp.maximum(out, 0.0)
        o_ref[...] = out.astype(o_ref.dtype)


def _max9_kernel(*refs):
    # Running elementwise max over the 9 maxpool window taps (tiled, lane-dense).
    o_ref = refs[-1]
    m = refs[0][...]
    for r in refs[1:-1]:
        m = jnp.maximum(m, r[...])
    o_ref[...] = m


def _gap_kernel(x_ref, o_ref):
    # x: (N, H*W, tc) -> o: (N, tc)   (adaptive_avg_pool2d(., 1) slice over C)
    o_ref[...] = jnp.mean(x_ref[...], axis=1)


# ------------------------------ matmul wrapper --------------------------------

def matmul_bias(x, w, b, *, relu=False, residual=None):
    """(M,K) @ (K,N) + b [+ residual] [+ ReLU], bf16 inputs / f32 accumulation.

    Tiled over (M, N, K) with double-buffered BlockSpec pipelining, a VMEM f32
    accumulator, and lane-dense (multiple-of-128) output columns."""
    M, K = x.shape
    K2, N = w.shape
    assert K == K2

    # Lane-dense output: pad Cout up to a multiple of 128 (sliced off after).
    N_pad = _round_up(N, _LANE)
    if N_pad != N:
        w = jnp.pad(w, ((0, 0), (0, N_pad - N)))
        b = jnp.pad(b, (0, N_pad - N))
        if residual is not None:
            residual = jnp.pad(residual, ((0, 0), (0, N_pad - N)))

    tm, M_pad = _choose_tile(M, 8, 256)          # sized for v7x's 64 MiB VMEM
    tn, _ = _choose_tile(N_pad, _LANE, 256)
    tk, K_pad = _choose_tile(K, _LANE, 1152)

    if M_pad != M:
        x = jnp.pad(x, ((0, M_pad - M), (0, 0)))
        if residual is not None:
            residual = jnp.pad(residual, ((0, M_pad - M), (0, 0)))
    if K_pad != K:
        x = jnp.pad(x, ((0, 0), (0, K_pad - K)))
        w = jnp.pad(w, ((0, K_pad - K), (0, 0)))

    x = x.astype(jnp.bfloat16)
    w = w.astype(jnp.bfloat16)
    b2 = b.reshape(1, N_pad).astype(jnp.float32)

    grid = (M_pad // tm, N_pad // tn, K_pad // tk)

    in_specs = [
        pl.BlockSpec((tm, tk), lambda i, j, k: (i, k)),
        pl.BlockSpec((tk, tn), lambda i, j, k: (k, j)),
        pl.BlockSpec((1, tn), lambda i, j, k: (0, j)),
    ]
    args = [x, w, b2]
    if residual is not None:
        in_specs.append(pl.BlockSpec((tm, tn), lambda i, j, k: (i, j)))
        args.append(residual.astype(jnp.float32))

    flops = 2 * M_pad * N_pad * K_pad
    bytes_accessed = (M_pad * K_pad * 2 + K_pad * N_pad * 2 + M_pad * N_pad * 4
                      + (M_pad * N_pad * 4 if residual is not None else 0))

    out = pl.pallas_call(
        functools.partial(_mm_kernel, relu=relu, has_res=residual is not None),
        out_shape=jax.ShapeDtypeStruct((M_pad, N_pad), jnp.float32),
        grid=grid,
        in_specs=in_specs,
        out_specs=pl.BlockSpec((tm, tn), lambda i, j, k: (i, j)),
        scratch_shapes=[pltpu.VMEM((tm, tn), jnp.float32)],
        compiler_params=pltpu.CompilerParams(
            dimension_semantics=("parallel", "parallel", "arbitrary"),
            vmem_limit_bytes=_VMEM_LIMIT),
        cost_estimate=pl.CostEstimate(flops=flops, transcendentals=0,
                                      bytes_accessed=bytes_accessed),
    )(*args)

    if M_pad != M or N_pad != N:
        out = out[:M, :N]
    return out


# ------------------------------ Glue ops --------------------------------------

def conv_bn(x, w, b, *, stride, pad, relu, residual=None):
    """Folded conv+BN (+residual) (+ReLU).

    x: (N,H,W,Cin) f32, w: (KH,KW,Cin,Cout), b: (Cout,),
    residual: optional (N,Ho,Wo,Cout) f32 added before the ReLU."""
    N, H, W, Cin = x.shape
    KH, KW, _, Cout = w.shape
    Ho = (H + 2 * pad - KH) // stride + 1
    Wo = (W + 2 * pad - KW) // stride + 1

    xb = x.astype(jnp.bfloat16)                  # halve im2col HBM traffic
    if pad:
        xb = jnp.pad(xb, ((0, 0), (pad, pad), (pad, pad), (0, 0)))

    # TODO(synk): fold the KH*KW tap loop into the matmul's K-reduction grid
    # (Element-offset index_map / manual DMA on the padded NHWC tensor) instead
    # of materializing the im2col matrix in HBM.
    if KH == 1 and KW == 1 and stride == 1:
        xm = xb.reshape(N * Ho * Wo, Cin)
    else:
        patches = [xb[:, dy:dy + stride * Ho:stride, dx:dx + stride * Wo:stride, :]
                   for dy in range(KH) for dx in range(KW)]
        xm = jnp.concatenate(patches, axis=-1).reshape(N * Ho * Wo, KH * KW * Cin)

    wm = w.reshape(KH * KW * Cin, Cout).astype(jnp.bfloat16)
    res = None if residual is None else residual.reshape(N * Ho * Wo, Cout)
    out = matmul_bias(xm, wm, b, relu=relu, residual=res)
    return out.reshape(N, Ho, Wo, Cout)


def maxpool_3x3_s2(x):
    """MaxPool2d(kernel=3, stride=2, padding=1), NHWC, f32."""
    N, H, W, C = x.shape
    Ho = (H + 2 - 3) // 2 + 1
    Wo = (W + 2 - 3) // 2 + 1
    xp = jnp.pad(x, ((0, 0), (1, 1), (1, 1), (0, 0)), constant_values=-jnp.inf)

    # TODO(synk): read the padded tensor directly via per-tap element offsets
    # instead of materializing 9 strided views.
    views = [xp[:, dy:dy + 2 * Ho:2, dx:dx + 2 * Wo:2, :]
             for dy in range(3) for dx in range(3)]

    M = N * Ho * Wo
    total = M * C
    if total % _LANE == 0:                       # lane-dense elementwise layout
        rows, lanes = total // _LANE, _LANE
    else:
        rows, lanes = M, C
    views = [v.reshape(rows, lanes) for v in views]

    tr, rows_pad = _choose_tile(rows, 8, 512)
    if rows_pad != rows:                         # rare fallback: one full block
        tr = rows
    spec = pl.BlockSpec((tr, lanes), lambda i: (i, 0))

    out = pl.pallas_call(
        _max9_kernel,
        out_shape=jax.ShapeDtypeStruct((rows, lanes), jnp.float32),
        grid=(rows // tr,),
        in_specs=[spec] * 9,
        out_specs=spec,
        compiler_params=pltpu.CompilerParams(
            dimension_semantics=("parallel",),
            vmem_limit_bytes=_VMEM_LIMIT),
    )(*views)
    return out.reshape(N, Ho, Wo, C)


def global_avg_pool(x):
    """adaptive_avg_pool2d(., 1): (N,H,W,C) -> (N,C), tiled over C."""
    N, H, W, C = x.shape
    xr = x.reshape(N, H * W, C)
    tc = _LANE if C % _LANE == 0 else C
    return pl.pallas_call(
        _gap_kernel,
        out_shape=jax.ShapeDtypeStruct((N, C), jnp.float32),
        grid=(C // tc,),
        in_specs=[pl.BlockSpec((N, H * W, tc), lambda c: (0, 0, c))],
        out_specs=pl.BlockSpec((N, tc), lambda c: (0, c)),
        compiler_params=pltpu.CompilerParams(
            dimension_semantics=("parallel",),
            vmem_limit_bytes=_VMEM_LIMIT),
    )(xr)


# --------------------------- Parameter init -----------------------------------

def _fold_bn(w, gamma, beta, mean, var):
    scale = gamma / jnp.sqrt(var + _EPS)
    return w * scale[None, None, None, :], beta - mean * scale


def _init_conv_bn(key, kh, kw, cin, cout):
    kconv, kg, kb, km, kv = jax.random.split(key, 5)
    fan_in = kh * kw * cin
    w = jax.random.normal(kconv, (kh, kw, cin, cout), jnp.float32) / np.sqrt(fan_in)
    gamma = jax.random.uniform(kg, (cout,), jnp.float32, 0.5, 1.5)
    beta = 0.1 * jax.random.normal(kb, (cout,), jnp.float32)
    mean = 0.1 * jax.random.normal(km, (cout,), jnp.float32)
    var = jax.random.uniform(kv, (cout,), jnp.float32, 0.5, 1.5)
    return _fold_bn(w, gamma, beta, mean, var)


# (layer name, in_ch, out_ch, num_blocks, first-block stride) — ResNet-34
_LAYER_CFG = (("layer1", 64, 64, 3, 1),
              ("layer2", 64, 128, 4, 2),
              ("layer3", 128, 256, 6, 2),
              ("layer4", 256, 512, 3, 2))


def init_params(key):
    keys = iter(jax.random.split(key, 80))
    p = {"conv1": _init_conv_bn(next(keys), 7, 7, 3, 64)}
    for name, cin, cout, nblocks, stride0 in _LAYER_CFG:
        blocks = []
        inp = cin
        for i in range(nblocks):
            stride = stride0 if i == 0 else 1
            blk = {}
            blk["w1"], blk["b1"] = _init_conv_bn(next(keys), 3, 3, inp, cout)
            blk["w2"], blk["b2"] = _init_conv_bn(next(keys), 3, 3, cout, cout)
            if stride != 1 or inp != cout:
                blk["wd"], blk["bd"] = _init_conv_bn(next(keys), 1, 1, inp, cout)
            blocks.append(blk)
            inp = cout
        p[name] = blocks
    kw, kb = jax.random.split(next(keys))
    p["l0_w"] = jax.random.normal(kw, (512, 4), jnp.float32) / np.sqrt(512.0)
    p["l0_b"] = 0.01 * jax.random.normal(kb, (4,), jnp.float32)
    return p


# ------------------------------ Forward ----------------------------------------

def resnet34_forward(x_nchw, params):
    # NCHW (PyTorch convention) -> NHWC for the kernels.
    x = jnp.transpose(x_nchw, (0, 2, 3, 1)).astype(jnp.float32)

    w, b = params["conv1"]
    x = conv_bn(x, w, b, stride=2, pad=3, relu=True)       # conv1 + bn1 + relu
    x = maxpool_3x3_s2(x)                                   # maxpool

    for name, _, _, _, stride0 in _LAYER_CFG:
        for i, blk in enumerate(params[name]):
            stride = stride0 if i == 0 else 1
            identity = x
            out = conv_bn(x, blk["w1"], blk["b1"], stride=stride, pad=1, relu=True)
            if "wd" in blk:
                identity = conv_bn(x, blk["wd"], blk["bd"],
                                   stride=stride, pad=0, relu=False)
            # conv2 + BN with residual add + ReLU fused into the matmul epilogue.
            x = conv_bn(out, blk["w2"], blk["b2"], stride=1, pad=1, relu=True,
                        residual=identity)

    pooled = global_avg_pool(x)                              # (N, 512)
    # Final FC (512 -> 4); matmul_bias pads Cout to 128 lanes and slices back.
    return matmul_bias(pooled, params["l0_w"], params["l0_b"], relu=False)


# ------------------------------ Main --------------------------------------------

if __name__ == "__main__":
    key = jax.random.PRNGKey(0)
    pkey, xkey = jax.random.split(key)
    params = init_params(pkey)

    # Small but valid: 3 input channels required by ResNet-34's conv1; 32x32
    # spatial so the final feature map is 1x1 (512 channels) before the pool.
    x = jax.random.normal(xkey, (2, 3, 32, 32), jnp.float32)

    fwd = jax.jit(resnet34_forward)
    out = jax.block_until_ready(fwd(x, params))
    assert out.shape == (2, 4) and out.dtype == jnp.float32
    print("KERNEL_OK")
</pallas_src>

<mosaic_0001>
module attributes {stable_mosaic.version = 11 : i64} {
  func.func @_mm_kernel(%arg0: i32, %arg1: i32, %arg2: i32, %arg3: memref<256x147xbf16, #tpu.memory_space<vmem>>, %arg4: memref<147x128xbf16, #tpu.memory_space<vmem>>, %arg5: memref<1x128xf32, #tpu.memory_space<vmem>>, %arg6: memref<256x128xf32, #tpu.memory_space<vmem>>, %arg7: memref<256x128xf32, #tpu.memory_space<vmem>>) attributes {dimension_semantics = [#tpu.dimension_semantics<parallel>, #tpu.dimension_semantics<parallel>, #tpu.dimension_semantics<arbitrary>], iteration_bounds = array<i64: 2, 1, 1>, scalar_prefetch = 0 : i64, scratch_operands = 1 : i64, tpu.core_type = #tpu.core_type<tc>, window_params = [{transform_indices = @transform_0, window_bounds = array<i64: 256, 147>}, {transform_indices = @transform_1, window_bounds = array<i64: 147, 128>}, {transform_indices = @transform_2, window_bounds = array<i64: 1, 128>}, {transform_indices = @transform_3, window_bounds = array<i64: 256, 128>}]} {
    %c0_i32 = arith.constant 0 : i32
    %0 = arith.cmpi eq, %arg2, %c0_i32 : i32
    %1 = arith.extui %0 : i1 to i32
    %c0_i32_0 = arith.constant 0 : i32
    %2 = arith.cmpi ne, %1, %c0_i32_0 : i32
    scf.if %2 {
      %cst_10 = arith.constant 0.000000e+00 : f32
      %12 = vector.broadcast %cst_10 : f32 to vector<256x128xf32>
      %c0_11 = arith.constant 0 : index
      %c0_12 = arith.constant 0 : index
      %13 = vector.load %arg7[%c0_11, %c0_12] : memref<256x128xf32, #tpu.memory_space<vmem>>, vector<256x128xf32>
      tpu.vector_store %arg7[%c0_11, %c0_12], %12 {strides = array<i32>} : memref<256x128xf32, #tpu.memory_space<vmem>>, vector<256x128xf32>,
    } else {
    }
    %c0 = arith.constant 0 : index
    %c0_1 = arith.constant 0 : index
    %3 = vector.load %arg7[%c0, %c0_1] : memref<256x128xf32, #tpu.memory_space<vmem>>, vector<256x128xf32>
    %c0_2 = arith.constant 0 : index
    %c0_3 = arith.constant 0 : index
    %4 = vector.load %arg3[%c0_2, %c0_3] : memref<256x147xbf16, #tpu.memory_space<vmem>>, vector<256x147xbf16>
    %c0_4 = arith.constant 0 : index
    %c0_5 = arith.constant 0 : index
    %5 = vector.load %arg4[%c0_4, %c0_5] : memref<147x128xbf16, #tpu.memory_space<vmem>>, vector<147x128xbf16>
    %cst = arith.constant dense<0.000000e+00> : vector<256x128xf32>
    %6 = tpu.matmul %4, %5, %cst {dimension_numbers = #tpu.dot_dimension_numbers<[1], [0], [0], [1], [0, 0, 1, 1], [], []>} : vector<256x147xbf16>, vector<147x128xbf16>, vector<256x128xf32> -> vector<256x128xf32>
    %7 = arith.addf %3, %6 : vector<256x128xf32>
    %c0_6 = arith.constant 0 : index
    %c0_7 = arith.constant 0 : index
    %8 = vector.load %arg7[%c0_6, %c0_7] : memref<256x128xf32, #tpu.memory_space<vmem>>, vector<256x128xf32>
    tpu.vector_store %arg7[%c0_6, %c0_7], %7 {strides = array<i32>} : memref<256x128xf32, #tpu.memory_space<vmem>>, vector<256x128xf32>,
    %c0_i32_8 = arith.constant 0 : i32
    %9 = arith.cmpi eq, %arg2, %c0_i32_8 : i32
    %10 = arith.extui %9 : i1 to i32
    %c0_i32_9 = arith.constant 0 : i32
    %11 = arith.cmpi ne, %10, %c0_i32_9 : i32
    scf.if %11 {
      %c0_10 = arith.constant 0 : index
      %c0_11 = arith.constant 0 : index
      %12 = vector.load %arg7[%c0_10, %c0_11] : memref<256x128xf32, #tpu.memory_space<vmem>>, vector<256x128xf32>
      %c0_12 = arith.constant 0 : index
      %c0_13 = arith.constant 0 : index
      %13 = vector.load %arg5[%c0_12, %c0_13] : memref<1x128xf32, #tpu.memory_space<vmem>>, vector<1x128xf32>
      %14 = vector.broadcast %13 : vector<1x128xf32> to vector<256x128xf32>
      %15 = arith.addf %12, %14 : vector<256x128xf32>
      %cst_14 = arith.constant 0.000000e+00 : f32
      %16 = vector.broadcast %cst_14 : f32 to vector<256x128xf32>
      %17 = arith.maximumf %15, %16 : vector<256x128xf32>
      %c0_15 = arith.constant 0 : index
      %c0_16 = arith.constant 0 : index
      %18 = vector.load %arg6[%c0_15, %c0_16] : memref<256x128xf32, #tpu.memory_space<vmem>>, vector<256x128xf32>
      tpu.vector_store %arg6[%c0_15, %c0_16], %17 {strides = array<i32>} : memref<256x128xf32, #tpu.memory_space<vmem>>, vector<256x128xf32>,
    } else {
    }
    return
  }
  func.func @transform_0(%arg0: i32, %arg1: i32, %arg2: i32) -> (i32, i32) {
    %c0_i32 = arith.constant 0 : i32
    return %arg0, %arg2 : i32, i32
  }
  func.func @transform_1(%arg0: i32, %arg1: i32, %arg2: i32) -> (i32, i32) {
    %c0_i32 = arith.constant 0 : i32
    return %arg2, %arg1 : i32, i32
  }
  func.func @transform_2(%arg0: i32, %arg1: i32, %arg2: i32) -> (i32, i32) {
    %c0_i32 = arith.constant 0 : i32
    %c0_i32_0 = arith.constant 0 : i32
    return %c0_i32, %arg1 : i32, i32
  }
  func.func @transform_3(%arg0: i32, %arg1: i32, %arg2: i32) -> (i32, i32) {
    %c0_i32 = arith.constant 0 : i32
    return %arg0, %arg1 : i32, i32
  }
}

module attributes {stable_mosaic.version = 11 : i64} {
  func.func @_max9_kernel(%arg0: i32, %arg1: memref<64x128xf32, #tpu.memory_space<vmem>>, %arg2: memref<64x128xf32, #tpu.memory_space<vmem>>, %arg3: memref<64x128xf32, #tpu.memory_space<vmem>>, %arg4: memref<64x128xf32, #tpu.memory_space<vmem>>, %arg5: memref<64x128xf32, #tpu.memory_space<vmem>>, %arg6: memref<64x128xf32, #tpu.memory_space<vmem>>, %arg7: memref<64x128xf32, #tpu.memory_space<vmem>>, %arg8: memref<64x128xf32, #tpu.memory_space<vmem>>, %arg9: memref<64x128xf32, #tpu.memory_space<vmem>>, %arg10: memref<64x128xf32, #tpu.memory_space<vmem>>) attributes {dimension_semantics = [#tpu.dimension_semantics<parallel>], iteration_bounds = array<i64: 1>, scalar_prefetch = 0 : i64, scratch_operands = 0 : i64, tpu.core_type = #tpu.core_type<tc>, window_params = [{transform_indices = @transform_0, window_bounds = array<i64: 64, 128>}, {transform_indices = @transform_1, window_bounds = array<i64: 64, 128>}, {transform_indices = @transform_2, window_bounds = array<i64: 64, 128>}, {transform_indices = @transform_3, window_bounds = array<i64: 64, 128>}, {transform_indices = @transform_4, window_bounds = array<i64: 64, 128>}, {transform_indices = @transform_5, window_bounds = array<i64: 64, 128>}, {transform_indices = @transform_6, window_bounds = array<i64: 64, 128>}, {transform_indices = @transform_7, window_bounds = array<i64: 64, 128>}, {transform_indices = @transform_8, window_bounds = array<i64: 64, 128>}, {transform_indices = @transform_9, window_bounds = array<i64: 64, 128>}]} {
    %c0 = arith.constant 0 : index
    %c0_0 = arith.constant 0 : index
    %0 = vector.load %arg1[%c0, %c0_0] : memref<64x128xf32, #tpu.memory_space<vmem>>, vector<64x128xf32>
    %c0_1 = arith.constant 0 : index
    %c0_2 = arith.constant 0 : index
    %1 = vector.load %arg2[%c0_1, %c0_2] : memref<64x128xf32, #tpu.memory_space<vmem>>, vector<64x128xf32>
    %2 = arith.maximumf %0, %1 : vector<64x128xf32>
    %c0_3 = arith.constant 0 : index
    %c0_4 = arith.constant 0 : index
    %3 = vector.load %arg3[%c0_3, %c0_4] : memref<64x128xf32, #tpu.memory_space<vmem>>, vector<64x128xf32>
    %4 = arith.maximumf %2, %3 : vector<64x128xf32>
    %c0_5 = arith.constant 0 : index
    %c0_6 = arith.constant 0 : index
    %5 = vector.load %arg4[%c0_5, %c0_6] : memref<64x128xf32, #tpu.memory_space<vmem>>, vector<64x128xf32>
    %6 = arith.maximumf %4, %5 : vector<64x128xf32>
    %c0_7 = arith.constant 0 : index
    %c0_8 = arith.constant 0 : index
    %7 = vector.load %arg5[%c0_7, %c0_8] : memref<64x128xf32, #tpu.memory_space<vmem>>, vector<64x128xf32>
    %8 = arith.maximumf %6, %7 : vector<64x128xf32>
    %c0_9 = arith.constant 0 : index
    %c0_10 = arith.constant 0 : index
    %9 = vector.load %arg6[%c0_9, %c0_10] : memref<64x128xf32, #tpu.memory_space<vmem>>, vector<64x128xf32>
    %10 = arith.maximumf %8, %9 : vector<64x128xf32>
    %c0_11 = arith.constant 0 : index
    %c0_12 = arith.constant 0 : index
    %11 = vector.load %arg7[%c0_11, %c0_12] : memref<64x128xf32, #tpu.memory_space<vmem>>, vector<64x128xf32>
    %12 = arith.maximumf %10, %11 : vector<64x128xf32>
    %c0_13 = arith.constant 0 : index
    %c0_14 = arith.constant 0 : index
    %13 = vector.load %arg8[%c0_13, %c0_14] : memref<64x128xf32, #tpu.memory_space<vmem>>, vector<64x128xf32>
    %14 = arith.maximumf %12, %13 : vector<64x128xf32>
    %c0_15 = arith.constant 0 : index
    %c0_16 = arith.constant 0 : index
    %15 = vector.load %arg9[%c0_15, %c0_16] : memref<64x128xf32, #tpu.memory_space<vmem>>, vector<64x128xf32>
    %16 = arith.maximumf %14, %15 : vector<64x128xf32>
    %c0_17 = arith.constant 0 : index
    %c0_18 = arith.constant 0 : index
    %17 = vector.load %arg10[%c0_17, %c0_18] : memref<64x128xf32, #tpu.memory_space<vmem>>, vector<64x128xf32>
    tpu.vector_store %arg10[%c0_17, %c0_18], %16 {strides = array<i32>} : memref<64x128xf32, #tpu.memory_space<vmem>>, vector<64x128xf32>,
    return
  }
  func.func @transform_0(%arg0: i32) -> (i32, i32) {
    %c0_i32 = arith.constant 0 : i32
    %c0_i32_0 = arith.constant 0 : i32
    return %arg0, %c0_i32 : i32, i32
  }
  func.func @transform_1(%arg0: i32) -> (i32, i32) {
    %c0_i32 = arith.constant 0 : i32
    %c0_i32_0 = arith.constant 0 : i32
    return %arg0, %c0_i32 : i32, i32
  }
  func.func @transform_2(%arg0: i32) -> (i32, i32) {
    %c0_i32 = arith.constant 0 : i32
    %c0_i32_0 = arith.constant 0 : i32
    return %arg0, %c0_i32 : i32, i32
  }
  func.func @transform_3(%arg0: i32) -> (i32, i32) {
    %c0_i32 = arith.constant 0 : i32
    %c0_i32_0 = arith.constant 0 : i32
    return %arg0, %c0_i32 : i32, i32
  }
  func.func @transform_4(%arg0: i32) -> (i32, i32) {
    %c0_i32 = arith.constant 0 : i32
    %c0_i32_0 = arith.constant 0 : i32
    return %arg0, %c0_i32 : i32, i32
  }
  func.func @transform_5(%arg0: i32) -> (i32, i32) {
    %c0_i32 = arith.constant 0 : i32
    %c0_i32_0 = arith.constant 0 : i32
    return %arg0, %c0_i32 : i32, i32
  }
  func.func @transform_6(%arg0: i32) -> (i32, i32) {
    %c0_i32 = arith.constant 0 : i32
    %c0_i32_0 = arith.constant 0 : i32
    return %arg0, %c0_i32 : i32, i32
  }
  func.func @transform_7(%arg0: i32) -> (i32, i32) {
    %c0_i32 = arith.constant 0 : i32
    %c0_i32_0 = arith.constant 0 : i32
    return %arg0, %c0_i32 : i32, i32
  }
  func.func @transform_8(%arg0: i32) -> (i32, i32) {
    %c0_i32 = arith.constant 0 : i32
    %c0_i32_0 = arith.constant 0 : i32
    return %arg0, %c0_i32 : i32, i32
  }
  func.func @transform_9(%arg0: i32) -> (i32, i32) {
    %c0_i32 = arith.constant 0 : i32
    %c0_i32_0 = arith.constant 0 : i32
    return %arg0, %c0_i32 : i32, i32
  }
}

module attributes {stable_mosaic.version = 11 : i64} {
  func.func @_mm_kernel(%arg0: i32, %arg1: i32, %arg2: i32, %arg3: memref<128x576xbf16, #tpu.memory_space<vmem>>, %arg4: memref<576x128xbf16, #tpu.memory_space<vmem>>, %arg5: memref<1x128xf32, #tpu.memory_space<vmem>>, %arg6: memref<128x128xf32, #tpu.memory_space<vmem>>, %arg7: memref<128x128xf32, #tpu.memory_space<vmem>>) attributes {dimension_semantics = [#tpu.dimension_semantics<parallel>, #tpu.dimension_semantics<parallel>, #tpu.dimension_semantics<arbitrary>], iteration_bounds = array<i64: 1, 1, 1>, scalar_prefetch = 0 : i64, scratch_operands = 1 : i64, tpu.core_type = #tpu.core_type<tc>, window_params = [{transform_indices = @transform_0, window_bounds = array<i64: 128, 576>}, {transform_indices = @transform_1, window_bounds = array<i64: 576, 128>}, {transform_indices = @transform_2, window_bounds = array<i64: 1, 128>}, {transform_indices = @transform_3, window_bounds = array<i64: 128, 128>}]} {
    %c0_i32 = arith.constant 0 : i32
    %0 = arith.cmpi eq, %arg2, %c0_i32 : i32
    %1 = arith.extui %0 : i1 to i32
    %c0_i32_0 = arith.constant 0 : i32
    %2 = arith.cmpi ne, %1, %c0_i32_0 : i32
    scf.if %2 {
      %cst_10 = arith.constant 0.000000e+00 : f32
      %12 = vector.broadcast %cst_10 : f32 to vector<128x128xf32>
      %c0_11 = arith.constant 0 : index
      %c0_12 = arith.constant 0 : index
      %13 = vector.load %arg7[%c0_11, %c0_12] : memref<128x128xf32, #tpu.memory_space<vmem>>, vector<128x128xf32>
      tpu.vector_store %arg7[%c0_11, %c0_12], %12 {strides = array<i32>} : memref<128x128xf32, #tpu.memory_space<vmem>>, vector<128x128xf32>,
    } else {
    }
    %c0 = arith.constant 0 : index
    %c0_1 = arith.constant 0 : index
    %3 = vector.load %arg7[%c0, %c0_1] : memref<128x128xf32, #tpu.memory_space<vmem>>, vector<128x128xf32>
    %c0_2 = arith.constant 0 : index
    %c0_3 = arith.constant 0 : index
    %4 = vector.load %arg3[%c0_2, %c0_3] : memref<128x576xbf16, #tpu.memory_space<vmem>>, vector<128x576xbf16>
    %c0_4 = arith.constant 0 : index
    %c0_5 = arith.constant 0 : index
    %5 = vector.load %arg4[%c0_4, %c0_5] : memref<576x128xbf16, #tpu.memory_space<vmem>>, vector<576x128xbf16>
    %cst = arith.constant dense<0.000000e+00> : vector<128x128xf32>
    %6 = tpu.matmul %4, %5, %cst {dimension_numbers = #tpu.dot_dimension_numbers<[1], [0], [0], [1], [0, 0, 1, 1], [], []>} : vector<128x576xbf16>, vector<576x128xbf16>, vector<128x128xf32> -> vector<128x128xf32>
    %7 = arith.addf %3, %6 : vector<128x128xf32>
    %c0_6 = arith.constant 0 : index
    %c0_7 = arith.constant 0 : index
    %8 = vector.load %arg7[%c0_6, %c0_7] : memref<128x128xf32, #tpu.memory_space<vmem>>, vector<128x128xf32>
    tpu.vector_store %arg7[%c0_6, %c0_7], %7 {strides = array<i32>} : memref<128x128xf32, #tpu.memory_space<vmem>>, vector<128x128xf32>,
    %c0_i32_8 = arith.constant 0 : i32
    %9 = arith.cmpi eq, %arg2, %c0_i32_8 : i32
    %10 = arith.extui %9 : i1 to i32
    %c0_i32_9 = arith.constant 0 : i32
    %11 = arith.cmpi ne, %10, %c0_i32_9 : i32
    scf.if %11 {
      %c0_10 = arith.constant 0 : index
      %c0_11 = arith.constant 0 : index
      %12 = vector.load %arg7[%c0_10, %c0_11] : memref<128x128xf32, #tpu.memory_space<vmem>>, vector<128x128xf32>
      %c0_12 = arith.constant 0 : index
      %c0_13 = arith.constant 0 : index
      %13 = vector.load %arg5[%c0_12, %c0_13] : memref<1x128xf32, #tpu.memory_space<vmem>>, vector<1x128xf32>
      %14 = vector.broadcast %13 : vector<1x128xf32> to vector<128x128xf32>
      %15 = arith.addf %12, %14 : vector<128x128xf32>
      %cst_14 = arith.constant 0.000000e+00 : f32
      %16 = vector.broadcast %cst_14 : f32 to vector<128x128xf32>
      %17 = arith.maximumf %15, %16 : vector<128x128xf32>
      %c0_15 = arith.constant 0 : index
      %c0_16 = arith.constant 0 : index
      %18 = vector.load %arg6[%c0_15, %c0_16] : memref<128x128xf32, #tpu.memory_space<vmem>>, vector<128x128xf32>
      tpu.vector_store %arg6[%c0_15, %c0_16], %17 {strides = array<i32>} : memref<128x128xf32, #tpu.memory_space<vmem>>, vector<128x128xf32>,
    } else {
    }
    return
  }
  func.func @transform_0(%arg0: i32, %arg1: i32, %arg2: i32) -> (i32, i32) {
    %c0_i32 = arith.constant 0 : i32
    return %arg0, %arg2 : i32, i32
  }
  func.func @transform_1(%arg0: i32, %arg1: i32, %arg2: i32) -> (i32, i32) {
    %c0_i32 = arith.constant 0 : i32
    return %arg2, %arg1 : i32, i32
  }
  func.func @transform_2(%arg0: i32, %arg1: i32, %arg2: i32) -> (i32, i32) {
    %c0_i32 = arith.constant 0 : i32
    %c0_i32_0 = arith.constant 0 : i32
    return %c0_i32, %arg1 : i32, i32
  }
  func.func @transform_3(%arg0: i32, %arg1: i32, %arg2: i32) -> (i32, i32) {
    %c0_i32 = arith.constant 0 : i32
    return %arg0, %arg1 : i32, i32
  }
}

module attributes {stable_mosaic.version = 11 : i64} {
  func.func @_mm_kernel(%arg0: i32, %arg1: i32, %arg2: i32, %arg3: memref<128x576xbf16, #tpu.memory_space<vmem>>, %arg4: memref<576x128xbf16, #tpu.memory_space<vmem>>, %arg5: memref<1x128xf32, #tpu.memory_space<vmem>>, %arg6: memref<128x128xf32, #tpu.memory_space<vmem>>, %arg7: memref<128x128xf32, #tpu.memory_space<vmem>>, %arg8: memref<128x128xf32, #tpu.memory_space<vmem>>) attributes {dimension_semantics = [#tpu.dimension_semantics<parallel>, #tpu.dimension_semantics<parallel>, #tpu.dimension_semantics<arbitrary>], iteration_bounds = array<i64: 1, 1, 1>, scalar_prefetch = 0 : i64, scratch_operands = 1 : i64, tpu.core_type = #tpu.core_type<tc>, window_params = [{transform_indices = @transform_0, window_bounds = array<i64: 128, 576>}, {transform_indices = @transform_1, window_bounds = array<i64: 576, 128>}, {transform_indices = @transform_2, window_bounds = array<i64: 1, 128>}, {transform_indices = @transform_3, window_bounds = array<i64: 128, 128>}, {transform_indices = @transform_4, window_bounds = array<i64: 128, 128>}]} {
    %c0_i32 = arith.constant 0 : i32
    %0 = arith.cmpi eq, %arg2, %c0_i32 : i32
    %1 = arith.extui %0 : i1 to i32
    %c0_i32_0 = arith.constant 0 : i32
    %2 = arith.cmpi ne, %1, %c0_i32_0 : i32
    scf.if %2 {
      %cst_10 = arith.constant 0.000000e+00 : f32
      %12 = vector.broadcast %cst_10 : f32 to vector<128x128xf32>
      %c0_11 = arith.constant 0 : index
      %c0_12 = arith.constant 0 : index
      %13 = vector.load %arg8[%c0_11, %c0_12] : memref<128x128xf32, #tpu.memory_space<vmem>>, vector<128x128xf32>
      tpu.vector_store %arg8[%c0_11, %c0_12], %12 {strides = array<i32>} : memref<128x128xf32, #tpu.memory_space<vmem>>, vector<128x128xf32>,
    } else {
    }
    %c0 = arith.constant 0 : index
    %c0_1 = arith.constant 0 : index
    %3 = vector.load %arg8[%c0, %c0_1] : memref<128x128xf32, #tpu.memory_space<vmem>>, vector<128x128xf32>
    %c0_2 = arith.constant 0 : index
    %c0_3 = arith.constant 0 : index
    %4 = vector.load %arg3[%c0_2, %c0_3] : memref<128x576xbf16, #tpu.memory_space<vmem>>, vector<128x576xbf16>
    %c0_4 = arith.constant 0 : index
    %c0_5 = arith.constant 0 : index
    %5 = vector.load %arg4[%c0_4, %c0_5] : memref<576x128xbf16, #tpu.memory_space<vmem>>, vector<576x128xbf16>
    %cst = arith.constant dense<0.000000e+00> : vector<128x128xf32>
    %6 = tpu.matmul %4, %5, %cst {dimension_numbers = #tpu.dot_dimension_numbers<[1], [0], [0], [1], [0, 0, 1, 1], [], []>} : vector<128x576xbf16>, vector<576x128xbf16>, vector<128x128xf32> -> vector<128x128xf32>
    %7 = arith.addf %3, %6 : vector<128x128xf32>
    %c0_6 = arith.constant 0 : index
    %c0_7 = arith.constant 0 : index
    %8 = vector.load %arg8[%c0_6, %c0_7] : memref<128x128xf32, #tpu.memory_space<vmem>>, vector<128x128xf32>
    tpu.vector_store %arg8[%c0_6, %c0_7], %7 {strides = array<i32>} : memref<128x128xf32, #tpu.memory_space<vmem>>, vector<128x128xf32>,
    %c0_i32_8 = arith.constant 0 : i32
    %9 = arith.cmpi eq, %arg2, %c0_i32_8 : i32
    %10 = arith.extui %9 : i1 to i32
    %c0_i32_9 = arith.constant 0 : i32
    %11 = arith.cmpi ne, %10, %c0_i32_9 : i32
    scf.if %11 {
      %c0_10 = arith.constant 0 : index
      %c0_11 = arith.constant 0 : index
      %12 = vector.load %arg8[%c0_10, %c0_11] : memref<128x128xf32, #tpu.memory_space<vmem>>, vector<128x128xf32>
      %c0_12 = arith.constant 0 : index
      %c0_13 = arith.constant 0 : index
      %13 = vector.load %arg5[%c0_12, %c0_13] : memref<1x128xf32, #tpu.memory_space<vmem>>, vector<1x128xf32>
      %14 = vector.broadcast %13 : vector<1x128xf32> to vector<128x128xf32>
      %15 = arith.addf %12, %14 : vector<128x128xf32>
      %c0_14 = arith.constant 0 : index
      %c0_15 = arith.constant 0 : index
      %16 = vector.load %arg6[%c0_14, %c0_15] : memref<128x128xf32, #tpu.memory_space<vmem>>, vector<128x128xf32>
      %17 = arith.addf %15, %16 : vector<128x128xf32>
      %cst_16 = arith.constant 0.000000e+00 : f32
      %18 = vector.broadcast %cst_16 : f32 to vector<128x128xf32>
      %19 = arith.maximumf %17, %18 : vector<128x128xf32>
      %c0_17 = arith.constant 0 : index
      %c0_18 = arith.constant 0 : index
      %20 = vector.load %arg7[%c0_17, %c0_18] : memref<128x128xf32, #tpu.memory_space<vmem>>, vector<128x128xf32>
      tpu.vector_store %arg7[%c0_17, %c0_18], %19 {strides = array<i32>} : memref<128x128xf32, #tpu.memory_space<vmem>>, vector<128x128xf32>,
    } else {
    }
    return
  }
  func.func @transform_0(%arg0: i32, %arg1: i32, %arg2: i32) -> (i32, i32) {
    %c0_i32 = arith.constant 0 : i32
    return %arg0, %arg2 : i32, i32
  }
  func.func @transform_1(%arg0: i32, %arg1: i32, %arg2: i32) -> (i32, i32) {
    %c0_i32 = arith.constant 0 : i32
    return %arg2, %arg1 : i32, i32
  }
  func.func @transform_2(%arg0: i32, %arg1: i32, %arg2: i32) -> (i32, i32) {
    %c0_i32 = arith.constant 0 : i32
    %c0_i32_0 = arith.constant 0 : i32
    return %c0_i32, %arg1 : i32, i32
  }
  func.func @transform_3(%arg0: i32, %arg1: i32, %arg2: i32) -> (i32, i32) {
    %c0_i32 = arith.constant 0 : i32
    return %arg0, %arg1 : i32, i32
  }
  func.func @transform_4(%arg0: i32, %arg1: i32, %arg2: i32) -> (i32, i32) {
    %c0_i32 = arith.constant 0 : i32
    return %arg0, %arg1 : i32, i32
  }
}

module attributes {stable_mosaic.version = 11 : i64} {
  func.func @_mm_kernel(%arg0: i32, %arg1: i32, %arg2: i32, %arg3: memref<32x576xbf16, #tpu.memory_space<vmem>>, %arg4: memref<576x128xbf16, #tpu.memory_space<vmem>>, %arg5: memref<1x128xf32, #tpu.memory_space<vmem>>, %arg6: memref<32x128xf32, #tpu.memory_space<vmem>>, %arg7: memref<32x128xf32, #tpu.memory_space<vmem>>) attributes {dimension_semantics = [#tpu.dimension_semantics<parallel>, #tpu.dimension_semantics<parallel>, #tpu.dimension_semantics<arbitrary>], iteration_bounds = array<i64: 1, 1, 1>, scalar_prefetch = 0 : i64, scratch_operands = 1 : i64, tpu.core_type = #tpu.core_type<tc>, window_params = [{transform_indices = @transform_0, window_bounds = array<i64: 32, 576>}, {transform_indices = @transform_1, window_bounds = array<i64: 576, 128>}, {transform_indices = @transform_2, window_bounds = array<i64: 1, 128>}, {transform_indices = @transform_3, window_bounds = array<i64: 32, 128>}]} {
    %c0_i32 = arith.constant 0 : i32
    %0 = arith.cmpi eq, %arg2, %c0_i32 : i32
    %1 = arith.extui %0 : i1 to i32
    %c0_i32_0 = arith.constant 0 : i32
    %2 = arith.cmpi ne, %1, %c0_i32_0 : i32
    scf.if %2 {
      %cst_10 = arith.constant 0.000000e+00 : f32
      %12 = vector.broadcast %cst_10 : f32 to vector<32x128xf32>
      %c0_11 = arith.constant 0 : index
      %c0_12 = arith.constant 0 : index
      %13 = vector.load %arg7[%c0_11, %c0_12] : memref<32x128xf32, #tpu.memory_space<vmem>>, vector<32x128xf32>
      tpu.vector_store %arg7[%c0_11, %c0_12], %12 {strides = array<i32>} : memref<32x128xf32, #tpu.memory_space<vmem>>, vector<32x128xf32>,
    } else {
    }
    %c0 = arith.constant 0 : index
    %c0_1 = arith.constant 0 : index
    %3 = vector.load %arg7[%c0, %c0_1] : memref<32x128xf32, #tpu.memory_space<vmem>>, vector<32x128xf32>
    %c0_2 = arith.constant 0 : index
    %c0_3 = arith.constant 0 : index
    %4 = vector.load %arg3[%c0_2, %c0_3] : memref<32x576xbf16, #tpu.memory_space<vmem>>, vector<32x576xbf16>
    %c0_4 = arith.constant 0 : index
    %c0_5 = arith.constant 0 : index
    %5 = vector.load %arg4[%c0_4, %c0_5] : memref<576x128xbf16, #tpu.memory_space<vmem>>, vector<576x128xbf16>
    %cst = arith.constant dense<0.000000e+00> : vector<32x128xf32>
    %6 = tpu.matmul %4, %5, %cst {dimension_numbers = #tpu.dot_dimension_numbers<[1], [0], [0], [1], [0, 0, 1, 1], [], []>} : vector<32x576xbf16>, vector<576x128xbf16>, vector<32x128xf32> -> vector<32x128xf32>
    %7 = arith.addf %3, %6 : vector<32x128xf32>
    %c0_6 = arith.constant 0 : index
    %c0_7 = arith.constant 0 : index
    %8 = vector.load %arg7[%c0_6, %c0_7] : memref<32x128xf32, #tpu.memory_space<vmem>>, vector<32x128xf32>
    tpu.vector_store %arg7[%c0_6, %c0_7], %7 {strides = array<i32>} : memref<32x128xf32, #tpu.memory_space<vmem>>, vector<32x128xf32>,
    %c0_i32_8 = arith.constant 0 : i32
    %9 = arith.cmpi eq, %arg2, %c0_i32_8 : i32
    %10 = arith.extui %9 : i1 to i32
    %c0_i32_9 = arith.constant 0 : i32
    %11 = arith.cmpi ne, %10, %c0_i32_9 : i32
    scf.if %11 {
      %c0_10 = arith.constant 0 : index
      %c0_11 = arith.constant 0 : index
      %12 = vector.load %arg7[%c0_10, %c0_11] : memref<32x128xf32, #tpu.memory_space<vmem>>, vector<32x128xf32>
      %c0_12 = arith.constant 0 : index
      %c0_13 = arith.constant 0 : index
      %13 = vector.load %arg5[%c0_12, %c0_13] : memref<1x128xf32, #tpu.memory_space<vmem>>, vector<1x128xf32>
      %14 = vector.broadcast %13 : vector<1x128xf32> to vector<32x128xf32>
      %15 = arith.addf %12, %14 : vector<32x128xf32>
      %cst_14 = arith.constant 0.000000e+00 : f32
      %16 = vector.broadcast %cst_14 : f32 to vector<32x128xf32>
      %17 = arith.maximumf %15, %16 : vector<32x128xf32>
      %c0_15 = arith.constant 0 : index
      %c0_16 = arith.constant 0 : index
      %18 = vector.load %arg6[%c0_15, %c0_16] : memref<32x128xf32, #tpu.memory_space<vmem>>, vector<32x128xf32>
      tpu.vector_store %arg6[%c0_15, %c0_16], %17 {strides = array<i32>} : memref<32x128xf32, #tpu.memory_space<vmem>>, vector<32x128xf32>,
    } else {
    }
    return
  }
  func.func @transform_0(%arg0: i32, %arg1: i32, %arg2: i32) -> (i32, i32) {
    %c0_i32 = arith.constant 0 : i32
    return %arg0, %arg2 : i32, i32
  }
  func.func @transform_1(%arg0: i32, %arg1: i32, %arg2: i32) -> (i32, i32) {
    %c0_i32 = arith.constant 0 : i32
    return %arg2, %arg1 : i32, i32
  }
  func.func @transform_2(%arg0: i32, %arg1: i32, %arg2: i32) -> (i32, i32) {
    %c0_i32 = arith.constant 0 : i32
    %c0_i32_0 = arith.constant 0 : i32
    return %c0_i32, %arg1 : i32, i32
  }
  func.func @transform_3(%arg0: i32, %arg1: i32, %arg2: i32) -> (i32, i32) {
    %c0_i32 = arith.constant 0 : i32
    return %arg0, %arg1 : i32, i32
  }
}

module attributes {stable_mosaic.version = 11 : i64} {
  func.func @_mm_kernel(%arg0: i32, %arg1: i32, %arg2: i32, %arg3: memref<32x64xbf16, #tpu.memory_space<vmem>>, %arg4: memref<64x128xbf16, #tpu.memory_space<vmem>>, %arg5: memref<1x128xf32, #tpu.memory_space<vmem>>, %arg6: memref<32x128xf32, #tpu.memory_space<vmem>>, %arg7: memref<32x128xf32, #tpu.memory_space<vmem>>) attributes {dimension_semantics = [#tpu.dimension_semantics<parallel>, #tpu.dimension_semantics<parallel>, #tpu.dimension_semantics<arbitrary>], iteration_bounds = array<i64: 1, 1, 1>, scalar_prefetch = 0 : i64, scratch_operands = 1 : i64, tpu.core_type = #tpu.core_type<tc>, window_params = [{transform_indices = @transform_0, window_bounds = array<i64: 32, 64>}, {transform_indices = @transform_1, window_bounds = array<i64: 64, 128>}, {transform_indices = @transform_2, window_bounds = array<i64: 1, 128>}, {transform_indices = @transform_3, window_bounds = array<i64: 32, 128>}]} {
    %c0_i32 = arith.constant 0 : i32
    %0 = arith.cmpi eq, %arg2, %c0_i32 : i32
    %1 = arith.extui %0 : i1 to i32
    %c0_i32_0 = arith.constant 0 : i32
    %2 = arith.cmpi ne, %1, %c0_i32_0 : i32
    scf.if %2 {
      %cst_10 = arith.constant 0.000000e+00 : f32
      %12 = vector.broadcast %cst_10 : f32 to vector<32x128xf32>
      %c0_11 = arith.constant 0 : index
      %c0_12 = arith.constant 0 : index
      %13 = vector.load %arg7[%c0_11, %c0_12] : memref<32x128xf32, #tpu.memory_space<vmem>>, vector<32x128xf32>
      tpu.vector_store %arg7[%c0_11, %c0_12], %12 {strides = array<i32>} : memref<32x128xf32, #tpu.memory_space<vmem>>, vector<32x128xf32>,
    } else {
    }
    %c0 = arith.constant 0 : index
    %c0_1 = arith.constant 0 : index
    %3 = vector.load %arg7[%c0, %c0_1] : memref<32x128xf32, #tpu.memory_space<vmem>>, vector<32x128xf32>
    %c0_2 = arith.constant 0 : index
    %c0_3 = arith.constant 0 : index
    %4 = vector.load %arg3[%c0_2, %c0_3] : memref<32x64xbf16, #tpu.memory_space<vmem>>, vector<32x64xbf16>
    %c0_4 = arith.constant 0 : index
    %c0_5 = arith.constant 0 : index
    %5 = vector.load %arg4[%c0_4, %c0_5] : memref<64x128xbf16, #tpu.memory_space<vmem>>, vector<64x128xbf16>
    %cst = arith.constant dense<0.000000e+00> : vector<32x128xf32>
    %6 = tpu.matmul %4, %5, %cst {dimension_numbers = #tpu.dot_dimension_numbers<[1], [0], [0], [1], [0, 0, 1, 1], [], []>} : vector<32x64xbf16>, vector<64x128xbf16>, vector<32x128xf32> -> vector<32x128xf32>
    %7 = arith.addf %3, %6 : vector<32x128xf32>
    %c0_6 = arith.constant 0 : index
    %c0_7 = arith.constant 0 : index
    %8 = vector.load %arg7[%c0_6, %c0_7] : memref<32x128xf32, #tpu.memory_space<vmem>>, vector<32x128xf32>
    tpu.vector_store %arg7[%c0_6, %c0_7], %7 {strides = array<i32>} : memref<32x128xf32, #tpu.memory_space<vmem>>, vector<32x128xf32>,
    %c0_i32_8 = arith.constant 0 : i32
    %9 = arith.cmpi eq, %arg2, %c0_i32_8 : i32
    %10 = arith.extui %9 : i1 to i32
    %c0_i32_9 = arith.constant 0 : i32
    %11 = arith.cmpi ne, %10, %c0_i32_9 : i32
    scf.if %11 {
      %c0_10 = arith.constant 0 : index
      %c0_11 = arith.constant 0 : index
      %12 = vector.load %arg7[%c0_10, %c0_11] : memref<32x128xf32, #tpu.memory_space<vmem>>, vector<32x128xf32>
      %c0_12 = arith.constant 0 : index
      %c0_13 = arith.constant 0 : index
      %13 = vector.load %arg5[%c0_12, %c0_13] : memref<1x128xf32, #tpu.memory_space<vmem>>, vector<1x128xf32>
      %14 = vector.broadcast %13 : vector<1x128xf32> to vector<32x128xf32>
      %15 = arith.addf %12, %14 : vector<32x128xf32>
      %c0_14 = arith.constant 0 : index
      %c0_15 = arith.constant 0 : index
      %16 = vector.load %arg6[%c0_14, %c0_15] : memref<32x128xf32, #tpu.memory_space<vmem>>, vector<32x128xf32>
      tpu.vector_store %arg6[%c0_14, %c0_15], %15 {strides = array<i32>} : memref<32x128xf32, #tpu.memory_space<vmem>>, vector<32x128xf32>,
    } else {
    }
    return
  }
  func.func @transform_0(%arg0: i32, %arg1: i32, %arg2: i32) -> (i32, i32) {
    %c0_i32 = arith.constant 0 : i32
    return %arg0, %arg2 : i32, i32
  }
  func.func @transform_1(%arg0: i32, %arg1: i32, %arg2: i32) -> (i32, i32) {
    %c0_i32 = arith.constant 0 : i32
    return %arg2, %arg1 : i32, i32
  }
  func.func @transform_2(%arg0: i32, %arg1: i32, %arg2: i32) -> (i32, i32) {
    %c0_i32 = arith.constant 0 : i32
    %c0_i32_0 = arith.constant 0 : i32
    return %c0_i32, %arg1 : i32, i32
  }
  func.func @transform_3(%arg0: i32, %arg1: i32, %arg2: i32) -> (i32, i32) {
    %c0_i32 = arith.constant 0 : i32
    return %arg0, %arg1 : i32, i32
  }
}

module attributes {stable_mosaic.version = 11 : i64} {
  func.func @_mm_kernel(%arg0: i32, %arg1: i32, %arg2: i32, %arg3: memref<32x1152xbf16, #tpu.memory_space<vmem>>, %arg4: memref<1152x128xbf16, #tpu.memory_space<vmem>>, %arg5: memref<1x128xf32, #tpu.memory_space<vmem>>, %arg6: memref<32x128xf32, #tpu.memory_space<vmem>>, %arg7: memref<32x128xf32, #tpu.memory_space<vmem>>, %arg8: memref<32x128xf32, #tpu.memory_space<vmem>>) attributes {dimension_semantics = [#tpu.dimension_semantics<parallel>, #tpu.dimension_semantics<parallel>, #tpu.dimension_semantics<arbitrary>], iteration_bounds = array<i64: 1, 1, 1>, scalar_prefetch = 0 : i64, scratch_operands = 1 : i64, tpu.core_type = #tpu.core_type<tc>, window_params = [{transform_indices = @transform_0, window_bounds = array<i64: 32, 1152>}, {transform_indices = @transform_1, window_bounds = array<i64: 1152, 128>}, {transform_indices = @transform_2, window_bounds = array<i64: 1, 128>}, {transform_indices = @transform_3, window_bounds = array<i64: 32, 128>}, {transform_indices = @transform_4, window_bounds = array<i64: 32, 128>}]} {
    %c0_i32 = arith.constant 0 : i32
    %0 = arith.cmpi eq, %arg2, %c0_i32 : i32
    %1 = arith.extui %0 : i1 to i32
    %c0_i32_0 = arith.constant 0 : i32
    %2 = arith.cmpi ne, %1, %c0_i32_0 : i32
    scf.if %2 {
      %cst_10 = arith.constant 0.000000e+00 : f32
      %12 = vector.broadcast %cst_10 : f32 to vector<32x128xf32>
      %c0_11 = arith.constant 0 : index
      %c0_12 = arith.constant 0 : index
      %13 = vector.load %arg8[%c0_11, %c0_12] : memref<32x128xf32, #tpu.memory_space<vmem>>, vector<32x128xf32>
      tpu.vector_store %arg8[%c0_11, %c0_12], %12 {strides = array<i32>} : memref<32x128xf32, #tpu.memory_space<vmem>>, vector<32x128xf32>,
    } else {
    }
    %c0 = arith.constant 0 : index
    %c0_1 = arith.constant 0 : index
    %3 = vector.load %arg8[%c0, %c0_1] : memref<32x128xf32, #tpu.memory_space<vmem>>, vector<32x128xf32>
    %c0_2 = arith.constant 0 : index
    %c0_3 = arith.constant 0 : index
    %4 = vector.load %arg3[%c0_2, %c0_3] : memref<32x1152xbf16, #tpu.memory_space<vmem>>, vector<32x1152xbf16>
    %c0_4 = arith.constant 0 : index
    %c0_5 = arith.constant 0 : index
    %5 = vector.load %arg4[%c0_4, %c0_5] : memref<1152x128xbf16, #tpu.memory_space<vmem>>, vector<1152x128xbf16>
    %cst = arith.constant dense<0.000000e+00> : vector<32x128xf32>
    %6 = tpu.matmul %4, %5, %cst {dimension_numbers = #tpu.dot_dimension_numbers<[1], [0], [0], [1], [0, 0, 1, 1], [], []>} : vector<32x1152xbf16>, vector<1152x128xbf16>, vector<32x128xf32> -> vector<32x128xf32>
    %7 = arith.addf %3, %6 : vector<32x128xf32>
    %c0_6 = arith.constant 0 : index
    %c0_7 = arith.constant 0 : index
    %8 = vector.load %arg8[%c0_6, %c0_7] : memref<32x128xf32, #tpu.memory_space<vmem>>, vector<32x128xf32>
    tpu.vector_store %arg8[%c0_6, %c0_7], %7 {strides = array<i32>} : memref<32x128xf32, #tpu.memory_space<vmem>>, vector<32x128xf32>,
    %c0_i32_8 = arith.constant 0 : i32
    %9 = arith.cmpi eq, %arg2, %c0_i32_8 : i32
    %10 = arith.extui %9 : i1 to i32
    %c0_i32_9 = arith.constant 0 : i32
    %11 = arith.cmpi ne, %10, %c0_i32_9 : i32
    scf.if %11 {
      %c0_10 = arith.constant 0 : index
      %c0_11 = arith.constant 0 : index
      %12 = vector.load %arg8[%c0_10, %c0_11] : memref<32x128xf32, #tpu.memory_space<vmem>>, vector<32x128xf32>
      %c0_12 = arith.constant 0 : index
      %c0_13 = arith.constant 0 : index
      %13 = vector.load %arg5[%c0_12, %c0_13] : memref<1x128xf32, #tpu.memory_space<vmem>>, vector<1x128xf32>
      %14 = vector.broadcast %13 : vector<1x128xf32> to vector<32x128xf32>
      %15 = arith.addf %12, %14 : vector<32x128xf32>
      %c0_14 = arith.constant 0 : index
      %c0_15 = arith.constant 0 : index
      %16 = vector.load %arg6[%c0_14, %c0_15] : memref<32x128xf32, #tpu.memory_space<vmem>>, vector<32x128xf32>
      %17 = arith.addf %15, %16 : vector<32x128xf32>
      %cst_16 = arith.constant 0.000000e+00 : f32
      %18 = vector.broadcast %cst_16 : f32 to vector<32x128xf32>
      %19 = arith.maximumf %17, %18 : vector<32x128xf32>
      %c0_17 = arith.constant 0 : index
      %c0_18 = arith.constant 0 : index
      %20 = vector.load %arg7[%c0_17, %c0_18] : memref<32x128xf32, #tpu.memory_space<vmem>>, vector<32x128xf32>
      tpu.vector_store %arg7[%c0_17, %c0_18], %19 {strides = array<i32>} : memref<32x128xf32, #tpu.memory_space<vmem>>, vector<32x128xf32>,
    } else {
    }
    return
  }
  func.func @transform_0(%arg0: i32, %arg1: i32, %arg2: i32) -> (i32, i32) {
    %c0_i32 = arith.constant 0 : i32
    return %arg0, %arg2 : i32, i32
  }
  func.func @transform_1(%arg0: i32, %arg1: i32, %arg2: i32) -> (i32, i32) {
    %c0_i32 = arith.constant 0 : i32
    return %arg2, %arg1 : i32, i32
  }
  func.func @transform_2(%arg0: i32, %arg1: i32, %arg2: i32) -> (i32, i32) {
    %c0_i32 = arith.constant 0 : i32
    %c0_i32_0 = arith.constant 0 : i32
    return %c0_i32, %arg1 : i32, i32
  }
  func.func @transform_3(%arg0: i32, %arg1: i32, %arg2: i32) -> (i32, i32) {
    %c0_i32 = arith.constant 0 : i32
    return %arg0, %arg1 : i32, i32
  }
  func.func @transform_4(%arg0: i32, %arg1: i32, %arg2: i32) -> (i32, i32) {
    %c0_i32 = arith.constant 0 : i32
    return %arg0, %arg1 : i32, i32
  }
}

module attributes {stable_mosaic.version = 11 : i64} {
  func.func @_mm_kernel(%arg0: i32, %arg1: i32, %arg2: i32, %arg3: memref<32x1152xbf16, #tpu.memory_space<vmem>>, %arg4: memref<1152x128xbf16, #tpu.memory_space<vmem>>, %arg5: memref<1x128xf32, #tpu.memory_space<vmem>>, %arg6: memref<32x128xf32, #tpu.memory_space<vmem>>, %arg7: memref<32x128xf32, #tpu.memory_space<vmem>>) attributes {dimension_semantics = [#tpu.dimension_semantics<parallel>, #tpu.dimension_semantics<parallel>, #tpu.dimension_semantics<arbitrary>], iteration_bounds = array<i64: 1, 1, 1>, scalar_prefetch = 0 : i64, scratch_operands = 1 : i64, tpu.core_type = #tpu.core_type<tc>, window_params = [{transform_indices = @transform_0, window_bounds = array<i64: 32, 1152>}, {transform_indices = @transform_1, window_bounds = array<i64: 1152, 128>}, {transform_indices = @transform_2, window_bounds = array<i64: 1, 128>}, {transform_indices = @transform_3, window_bounds = array<i64: 32, 128>}]} {
    %c0_i32 = arith.constant 0 : i32
    %0 = arith.cmpi eq, %arg2, %c0_i32 : i32
    %1 = arith.extui %0 : i1 to i32
    %c0_i32_0 = arith.constant 0 : i32
    %2 = arith.cmpi ne, %1, %c0_i32_0 : i32
    scf.if %2 {
      %cst_10 = arith.constant 0.000000e+00 : f32
      %12 = vector.broadcast %cst_10 : f32 to vector<32x128xf32>
      %c0_11 = arith.constant 0 : index
      %c0_12 = arith.constant 0 : index
      %13 = vector.load %arg7[%c0_11, %c0_12] : memref<32x128xf32, #tpu.memory_space<vmem>>, vector<32x128xf32>
      tpu.vector_store %arg7[%c0_11, %c0_12], %12 {strides = array<i32>} : memref<32x128xf32, #tpu.memory_space<vmem>>, vector<32x128xf32>,
    } else {
    }
    %c0 = arith.constant 0 : index
    %c0_1 = arith.constant 0 : index
    %3 = vector.load %arg7[%c0, %c0_1] : memref<32x128xf32, #tpu.memory_space<vmem>>, vector<32x128xf32>
    %c0_2 = arith.constant 0 : index
    %c0_3 = arith.constant 0 : index
    %4 = vector.load %arg3[%c0_2, %c0_3] : memref<32x1152xbf16, #tpu.memory_space<vmem>>, vector<32x1152xbf16>
    %c0_4 = arith.constant 0 : index
    %c0_5 = arith.constant 0 : index
    %5 = vector.load %arg4[%c0_4, %c0_5] : memref<1152x128xbf16, #tpu.memory_space<vmem>>, vector<1152x128xbf16>
    %cst = arith.constant dense<0.000000e+00> : vector<32x128xf32>
    %6 = tpu.matmul %4, %5, %cst {dimension_numbers = #tpu.dot_dimension_numbers<[1], [0], [0], [1], [0, 0, 1, 1], [], []>} : vector<32x1152xbf16>, vector<1152x128xbf16>, vector<32x128xf32> -> vector<32x128xf32>
    %7 = arith.addf %3, %6 : vector<32x128xf32>
    %c0_6 = arith.constant 0 : index
    %c0_7 = arith.constant 0 : index
    %8 = vector.load %arg7[%c0_6, %c0_7] : memref<32x128xf32, #tpu.memory_space<vmem>>, vector<32x128xf32>
    tpu.vector_store %arg7[%c0_6, %c0_7], %7 {strides = array<i32>} : memref<32x128xf32, #tpu.memory_space<vmem>>, vector<32x128xf32>,
    %c0_i32_8 = arith.constant 0 : i32
    %9 = arith.cmpi eq, %arg2, %c0_i32_8 : i32
    %10 = arith.extui %9 : i1 to i32
    %c0_i32_9 = arith.constant 0 : i32
    %11 = arith.cmpi ne, %10, %c0_i32_9 : i32
    scf.if %11 {
      %c0_10 = arith.constant 0 : index
      %c0_11 = arith.constant 0 : index
      %12 = vector.load %arg7[%c0_10, %c0_11] : memref<32x128xf32, #tpu.memory_space<vmem>>, vector<32x128xf32>
      %c0_12 = arith.constant 0 : index
      %c0_13 = arith.constant 0 : index
      %13 = vector.load %arg5[%c0_12, %c0_13] : memref<1x128xf32, #tpu.memory_space<vmem>>, vector<1x128xf32>
      %14 = vector.broadcast %13 : vector<1x128xf32> to vector<32x128xf32>
      %15 = arith.addf %12, %14 : vector<32x128xf32>
      %cst_14 = arith.constant 0.000000e+00 : f32
      %16 = vector.broadcast %cst_14 : f32 to vector<32x128xf32>
      %17 = arith.maximumf %15, %16 : vector<32x128xf32>
      %c0_15 = arith.constant 0 : index
      %c0_16 = arith.constant 0 : index
      %18 = vector.load %arg6[%c0_15, %c0_16] : memref<32x128xf32, #tpu.memory_space<vmem>>, vector<32x128xf32>
      tpu.vector_store %arg6[%c0_15, %c0_16], %17 {strides = array<i32>} : memref<32x128xf32, #tpu.memory_space<vmem>>, vector<32x128xf32>,
    } else {
    }
    return
  }
  func.func @transform_0(%arg0: i32, %arg1: i32, %arg2: i32) -> (i32, i32) {
    %c0_i32 = arith.constant 0 : i32
    return %arg0, %arg2 : i32, i32
  }
  func.func @transform_1(%arg0: i32, %arg1: i32, %arg2: i32) -> (i32, i32) {
    %c0_i32 = arith.constant 0 : i32
    return %arg2, %arg1 : i32, i32
  }
  func.func @transform_2(%arg0: i32, %arg1: i32, %arg2: i32) -> (i32, i32) {
    %c0_i32 = arith.constant 0 : i32
    %c0_i32_0 = arith.constant 0 : i32
    return %c0_i32, %arg1 : i32, i32
  }
  func.func @transform_3(%arg0: i32, %arg1: i32, %arg2: i32) -> (i32, i32) {
    %c0_i32 = arith.constant 0 : i32
    return %arg0, %arg1 : i32, i32
  }
}

module attributes {stable_mosaic.version = 11 : i64} {
  func.func @_mm_kernel(%arg0: i32, %arg1: i32, %arg2: i32, %arg3: memref<8x1152xbf16, #tpu.memory_space<vmem>>, %arg4: memref<1152x256xbf16, #tpu.memory_space<vmem>>, %arg5: memref<1x256xf32, #tpu.memory_space<vmem>>, %arg6: memref<8x256xf32, #tpu.memory_space<vmem>>, %arg7: memref<8x256xf32, #tpu.memory_space<vmem>>) attributes {dimension_semantics = [#tpu.dimension_semantics<parallel>, #tpu.dimension_semantics<parallel>, #tpu.dimension_semantics<arbitrary>], iteration_bounds = array<i64: 1, 1, 1>, scalar_prefetch = 0 : i64, scratch_operands = 1 : i64, tpu.core_type = #tpu.core_type<tc>, window_params = [{transform_indices = @transform_0, window_bounds = array<i64: 8, 1152>}, {transform_indices = @transform_1, window_bounds = array<i64: 1152, 256>}, {transform_indices = @transform_2, window_bounds = array<i64: 1, 256>}, {transform_indices = @transform_3, window_bounds = array<i64: 8, 256>}]} {
    %c0_i32 = arith.constant 0 : i32
    %0 = arith.cmpi eq, %arg2, %c0_i32 : i32
    %1 = arith.extui %0 : i1 to i32
    %c0_i32_0 = arith.constant 0 : i32
    %2 = arith.cmpi ne, %1, %c0_i32_0 : i32
    scf.if %2 {
      %cst_10 = arith.constant 0.000000e+00 : f32
      %12 = vector.broadcast %cst_10 : f32 to vector<8x256xf32>
      %c0_11 = arith.constant 0 : index
      %c0_12 = arith.constant 0 : index
      %13 = vector.load %arg7[%c0_11, %c0_12] : memref<8x256xf32, #tpu.memory_space<vmem>>, vector<8x256xf32>
      tpu.vector_store %arg7[%c0_11, %c0_12], %12 {strides = array<i32>} : memref<8x256xf32, #tpu.memory_space<vmem>>, vector<8x256xf32>,
    } else {
    }
    %c0 = arith.constant 0 : index
    %c0_1 = arith.constant 0 : index
    %3 = vector.load %arg7[%c0, %c0_1] : memref<8x256xf32, #tpu.memory_space<vmem>>, vector<8x256xf32>
    %c0_2 = arith.constant 0 : index
    %c0_3 = arith.constant 0 : index
    %4 = vector.load %arg3[%c0_2, %c0_3] : memref<8x1152xbf16, #tpu.memory_space<vmem>>, vector<8x1152xbf16>
    %c0_4 = arith.constant 0 : index
    %c0_5 = arith.constant 0 : index
    %5 = vector.load %arg4[%c0_4, %c0_5] : memref<1152x256xbf16, #tpu.memory_space<vmem>>, vector<1152x256xbf16>
    %cst = arith.constant dense<0.000000e+00> : vector<8x256xf32>
    %6 = tpu.matmul %4, %5, %cst {dimension_numbers = #tpu.dot_dimension_numbers<[1], [0], [0], [1], [0, 0, 1, 1], [], []>} : vector<8x1152xbf16>, vector<1152x256xbf16>, vector<8x256xf32> -> vector<8x256xf32>
    %7 = arith.addf %3, %6 : vector<8x256xf32>
    %c0_6 = arith.constant 0 : index
    %c0_7 = arith.constant 0 : index
    %8 = vector.load %arg7[%c0_6, %c0_7] : memref<8x256xf32, #tpu.memory_space<vmem>>, vector<8x256xf32>
    tpu.vector_store %arg7[%c0_6, %c0_7], %7 {strides = array<i32>} : memref<8x256xf32, #tpu.memory_space<vmem>>, vector<8x256xf32>,
    %c0_i32_8 = arith.constant 0 : i32
    %9 = arith.cmpi eq, %arg2, %c0_i32_8 : i32
    %10 = arith.extui %9 : i1 to i32
    %c0_i32_9 = arith.constant 0 : i32
    %11 = arith.cmpi ne, %10, %c0_i32_9 : i32
    scf.if %11 {
      %c0_10 = arith.constant 0 : index
      %c0_11 = arith.constant 0 : index
      %12 = vector.load %arg7[%c0_10, %c0_11] : memref<8x256xf32, #tpu.memory_space<vmem>>, vector<8x256xf32>
      %c0_12 = arith.constant 0 : index
      %c0_13 = arith.constant 0 : index
      %13 = vector.load %arg5[%c0_12, %c0_13] : memref<1x256xf32, #tpu.memory_space<vmem>>, vector<1x256xf32>
      %14 = vector.broadcast %13 : vector<1x256xf32> to vector<8x256xf32>
      %15 = arith.addf %12, %14 : vector<8x256xf32>
      %cst_14 = arith.constant 0.000000e+00 : f32
      %16 = vector.broadcast %cst_14 : f32 to vector<8x256xf32>
      %17 = arith.maximumf %15, %16 : vector<8x256xf32>
      %c0_15 = arith.constant 0 : index
      %c0_16 = arith.constant 0 : index
      %18 = vector.load %arg6[%c0_15, %c0_16] : memref<8x256xf32, #tpu.memory_space<vmem>>, vector<8x256xf32>
      tpu.vector_store %arg6[%c0_15, %c0_16], %17 {strides = array<i32>} : memref<8x256xf32, #tpu.memory_space<vmem>>, vector<8x256xf32>,
    } else {
    }
    return
  }
  func.func @transform_0(%arg0: i32, %arg1: i32, %arg2: i32) -> (i32, i32) {
    %c0_i32 = arith.constant 0 : i32
    return %arg0, %arg2 : i32, i32
  }
  func.func @transform_1(%arg0: i32, %arg1: i32, %arg2: i32) -> (i32, i32) {
    %c0_i32 = arith.constant 0 : i32
    return %arg2, %arg1 : i32, i32
  }
  func.func @transform_2(%arg0: i32, %arg1: i32, %arg2: i32) -> (i32, i32) {
    %c0_i32 = arith.constant 0 : i32
    %c0_i32_0 = arith.constant 0 : i32
    return %c0_i32, %arg1 : i32, i32
  }
  func.func @transform_3(%arg0: i32, %arg1: i32, %arg2: i32) -> (i32, i32) {
    %c0_i32 = arith.constant 0 : i32
    return %arg0, %arg1 : i32, i32
  }
}

module attributes {stable_mosaic.version = 11 : i64} {
  func.func @_mm_kernel(%arg0: i32, %arg1: i32, %arg2: i32, %arg3: memref<8x128xbf16, #tpu.memory_space<vmem>>, %arg4: memref<128x256xbf16, #tpu.memory_space<vmem>>, %arg5: memref<1x256xf32, #tpu.memory_space<vmem>>, %arg6: memref<8x256xf32, #tpu.memory_space<vmem>>, %arg7: memref<8x256xf32, #tpu.memory_space<vmem>>) attributes {dimension_semantics = [#tpu.dimension_semantics<parallel>, #tpu.dimension_semantics<parallel>, #tpu.dimension_semantics<arbitrary>], iteration_bounds = array<i64: 1, 1, 1>, scalar_prefetch = 0 : i64, scratch_operands = 1 : i64, tpu.core_type = #tpu.core_type<tc>, window_params = [{transform_indices = @transform_0, window_bounds = array<i64: 8, 128>}, {transform_indices = @transform_1, window_bounds = array<i64: 128, 256>}, {transform_indices = @transform_2, window_bounds = array<i64: 1, 256>}, {transform_indices = @transform_3, window_bounds = array<i64: 8, 256>}]} {
    %c0_i32 = arith.constant 0 : i32
    %0 = arith.cmpi eq, %arg2, %c0_i32 : i32
    %1 = arith.extui %0 : i1 to i32
    %c0_i32_0 = arith.constant 0 : i32
    %2 = arith.cmpi ne, %1, %c0_i32_0 : i32
    scf.if %2 {
      %cst_10 = arith.constant 0.000000e+00 : f32
      %12 = vector.broadcast %cst_10 : f32 to vector<8x256xf32>
      %c0_11 = arith.constant 0 : index
      %c0_12 = arith.constant 0 : index
      %13 = vector.load %arg7[%c0_11, %c0_12] : memref<8x256xf32, #tpu.memory_space<vmem>>, vector<8x256xf32>
      tpu.vector_store %arg7[%c0_11, %c0_12], %12 {strides = array<i32>} : memref<8x256xf32, #tpu.memory_space<vmem>>, vector<8x256xf32>,
    } else {
    }
    %c0 = arith.constant 0 : index
    %c0_1 = arith.constant 0 : index
    %3 = vector.load %arg7[%c0, %c0_1] : memref<8x256xf32, #tpu.memory_space<vmem>>, vector<8x256xf32>
    %c0_2 = arith.constant 0 : index
    %c0_3 = arith.constant 0 : index
    %4 = vector.load %arg3[%c0_2, %c0_3] : memref<8x128xbf16, #tpu.memory_space<vmem>>, vector<8x128xbf16>
    %c0_4 = arith.constant 0 : index
    %c0_5 = arith.constant 0 : index
    %5 = vector.load %arg4[%c0_4, %c0_5] : memref<128x256xbf16, #tpu.memory_space<vmem>>, vector<128x256xbf16>
    %cst = arith.constant dense<0.000000e+00> : vector<8x256xf32>
    %6 = tpu.matmul %4, %5, %cst {dimension_numbers = #tpu.dot_dimension_numbers<[1], [0], [0], [1], [0, 0, 1, 1], [], []>} : vector<8x128xbf16>, vector<128x256xbf16>, vector<8x256xf32> -> vector<8x256xf32>
    %7 = arith.addf %3, %6 : vector<8x256xf32>
    %c0_6 = arith.constant 0 : index
    %c0_7 = arith.constant 0 : index
    %8 = vector.load %arg7[%c0_6, %c0_7] : memref<8x256xf32, #tpu.memory_space<vmem>>, vector<8x256xf32>
    tpu.vector_store %arg7[%c0_6, %c0_7], %7 {strides = array<i32>} : memref<8x256xf32, #tpu.memory_space<vmem>>, vector<8x256xf32>,
    %c0_i32_8 = arith.constant 0 : i32
    %9 = arith.cmpi eq, %arg2, %c0_i32_8 : i32
    %10 = arith.extui %9 : i1 to i32
    %c0_i32_9 = arith.constant 0 : i32
    %11 = arith.cmpi ne, %10, %c0_i32_9 : i32
    scf.if %11 {
      %c0_10 = arith.constant 0 : index
      %c0_11 = arith.constant 0 : index
      %12 = vector.load %arg7[%c0_10, %c0_11] : memref<8x256xf32, #tpu.memory_space<vmem>>, vector<8x256xf32>
      %c0_12 = arith.constant 0 : index
      %c0_13 = arith.constant 0 : index
      %13 = vector.load %arg5[%c0_12, %c0_13] : memref<1x256xf32, #tpu.memory_space<vmem>>, vector<1x256xf32>
      %14 = vector.broadcast %13 : vector<1x256xf32> to vector<8x256xf32>
      %15 = arith.addf %12, %14 : vector<8x256xf32>
      %c0_14 = arith.constant 0 : index
      %c0_15 = arith.constant 0 : index
      %16 = vector.load %arg6[%c0_14, %c0_15] : memref<8x256xf32, #tpu.memory_space<vmem>>, vector<8x256xf32>
      tpu.vector_store %arg6[%c0_14, %c0_15], %15 {strides = array<i32>} : memref<8x256xf32, #tpu.memory_space<vmem>>, vector<8x256xf32>,
    } else {
    }
    return
  }
  func.func @transform_0(%arg0: i32, %arg1: i32, %arg2: i32) -> (i32, i32) {
    %c0_i32 = arith.constant 0 : i32
    return %arg0, %arg2 : i32, i32
  }
  func.func @transform_1(%arg0: i32, %arg1: i32, %arg2: i32) -> (i32, i32) {
    %c0_i32 = arith.constant 0 : i32
    return %arg2, %arg1 : i32, i32
  }
  func.func @transform_2(%arg0: i32, %arg1: i32, %arg2: i32) -> (i32, i32) {
    %c0_i32 = arith.constant 0 : i32
    %c0_i32_0 = arith.constant 0 : i32
    return %c0_i32, %arg1 : i32, i32
  }
  func.func @transform_3(%arg0: i32, %arg1: i32, %arg2: i32) -> (i32, i32) {
    %c0_i32 = arith.constant 0 : i32
    return %arg0, %arg1 : i32, i32
  }
}

module attributes {stable_mosaic.version = 11 : i64} {
  func.func @_mm_kernel(%arg0: i32, %arg1: i32, %arg2: i32, %arg3: memref<8x1152xbf16, #tpu.memory_space<vmem>>, %arg4: memref<1152x256xbf16, #tpu.memory_space<vmem>>, %arg5: memref<1x256xf32, #tpu.memory_space<vmem>>, %arg6: memref<8x256xf32, #tpu.memory_space<vmem>>, %arg7: memref<8x256xf32, #tpu.memory_space<vmem>>, %arg8: memref<8x256xf32, #tpu.memory_space<vmem>>) attributes {dimension_semantics = [#tpu.dimension_semantics<parallel>, #tpu.dimension_semantics<parallel>, #tpu.dimension_semantics<arbitrary>], iteration_bounds = array<i64: 1, 1, 2>, scalar_prefetch = 0 : i64, scratch_operands = 1 : i64, tpu.core_type = #tpu.core_type<tc>, window_params = [{transform_indices = @transform_0, window_bounds = array<i64: 8, 1152>}, {transform_indices = @transform_1, window_bounds = array<i64: 1152, 256>}, {transform_indices = @transform_2, window_bounds = array<i64: 1, 256>}, {transform_indices = @transform_3, window_bounds = array<i64: 8, 256>}, {transform_indices = @transform_4, window_bounds = array<i64: 8, 256>}]} {
    %c0_i32 = arith.constant 0 : i32
    %0 = arith.cmpi eq, %arg2, %c0_i32 : i32
    %1 = arith.extui %0 : i1 to i32
    %c0_i32_0 = arith.constant 0 : i32
    %2 = arith.cmpi ne, %1, %c0_i32_0 : i32
    scf.if %2 {
      %cst_9 = arith.constant 0.000000e+00 : f32
      %12 = vector.broadcast %cst_9 : f32 to vector<8x256xf32>
      %c0_10 = arith.constant 0 : index
      %c0_11 = arith.constant 0 : index
      %13 = vector.load %arg8[%c0_10, %c0_11] : memref<8x256xf32, #tpu.memory_space<vmem>>, vector<8x256xf32>
      tpu.vector_store %arg8[%c0_10, %c0_11], %12 {strides = array<i32>} : memref<8x256xf32, #tpu.memory_space<vmem>>, vector<8x256xf32>,
    } else {
    }
    %c0 = arith.constant 0 : index
    %c0_1 = arith.constant 0 : index
    %3 = vector.load %arg8[%c0, %c0_1] : memref<8x256xf32, #tpu.memory_space<vmem>>, vector<8x256xf32>
    %c0_2 = arith.constant 0 : index
    %c0_3 = arith.constant 0 : index
    %4 = vector.load %arg3[%c0_2, %c0_3] : memref<8x1152xbf16, #tpu.memory_space<vmem>>, vector<8x1152xbf16>
    %c0_4 = arith.constant 0 : index
    %c0_5 = arith.constant 0 : index
    %5 = vector.load %arg4[%c0_4, %c0_5] : memref<1152x256xbf16, #tpu.memory_space<vmem>>, vector<1152x256xbf16>
    %cst = arith.constant dense<0.000000e+00> : vector<8x256xf32>
    %6 = tpu.matmul %4, %5, %cst {dimension_numbers = #tpu.dot_dimension_numbers<[1], [0], [0], [1], [0, 0, 1, 1], [], []>} : vector<8x1152xbf16>, vector<1152x256xbf16>, vector<8x256xf32> -> vector<8x256xf32>
    %7 = arith.addf %3, %6 : vector<8x256xf32>
    %c0_6 = arith.constant 0 : index
    %c0_7 = arith.constant 0 : index
    %8 = vector.load %arg8[%c0_6, %c0_7] : memref<8x256xf32, #tpu.memory_space<vmem>>, vector<8x256xf32>
    tpu.vector_store %arg8[%c0_6, %c0_7], %7 {strides = array<i32>} : memref<8x256xf32, #tpu.memory_space<vmem>>, vector<8x256xf32>,
    %c1_i32 = arith.constant 1 : i32
    %9 = arith.cmpi eq, %arg2, %c1_i32 : i32
    %10 = arith.extui %9 : i1 to i32
    %c0_i32_8 = arith.constant 0 : i32
    %11 = arith.cmpi ne, %10, %c0_i32_8 : i32
    scf.if %11 {
      %c0_9 = arith.constant 0 : index
      %c0_10 = arith.constant 0 : index
      %12 = vector.load %arg8[%c0_9, %c0_10] : memref<8x256xf32, #tpu.memory_space<vmem>>, vector<8x256xf32>
      %c0_11 = arith.constant 0 : index
      %c0_12 = arith.constant 0 : index
      %13 = vector.load %arg5[%c0_11, %c0_12] : memref<1x256xf32, #tpu.memory_space<vmem>>, vector<1x256xf32>
      %14 = vector.broadcast %13 : vector<1x256xf32> to vector<8x256xf32>
      %15 = arith.addf %12, %14 : vector<8x256xf32>
      %c0_13 = arith.constant 0 : index
      %c0_14 = arith.constant 0 : index
      %16 = vector.load %arg6[%c0_13, %c0_14] : memref<8x256xf32, #tpu.memory_space<vmem>>, vector<8x256xf32>
      %17 = arith.addf %15, %16 : vector<8x256xf32>
      %cst_15 = arith.constant 0.000000e+00 : f32
      %18 = vector.broadcast %cst_15 : f32 to vector<8x256xf32>
      %19 = arith.maximumf %17, %18 : vector<8x256xf32>
      %c0_16 = arith.constant 0 : index
      %c0_17 = arith.constant 0 : index
      %20 = vector.load %arg7[%c0_16, %c0_17] : memref<8x256xf32, #tpu.memory_space<vmem>>, vector<8x256xf32>
      tpu.vector_store %arg7[%c0_16, %c0_17], %19 {strides = array<i32>} : memref<8x256xf32, #tpu.memory_space<vmem>>, vector<8x256xf32>,
    } else {
    }
    return
  }
  func.func @transform_0(%arg0: i32, %arg1: i32, %arg2: i32) -> (i32, i32) {
    %c0_i32 = arith.constant 0 : i32
    return %arg0, %arg2 : i32, i32
  }
  func.func @transform_1(%arg0: i32, %arg1: i32, %arg2: i32) -> (i32, i32) {
    %c0_i32 = arith.constant 0 : i32
    return %arg2, %arg1 : i32, i32
  }
  func.func @transform_2(%arg0: i32, %arg1: i32, %arg2: i32) -> (i32, i32) {
    %c0_i32 = arith.constant 0 : i32
    %c0_i32_0 = arith.constant 0 : i32
    return %c0_i32, %arg1 : i32, i32
  }
  func.func @transform_3(%arg0: i32, %arg1: i32, %arg2: i32) -> (i32, i32) {
    %c0_i32 = arith.constant 0 : i32
    return %arg0, %arg1 : i32, i32
  }
  func.func @transform_4(%arg0: i32, %arg1: i32, %arg2: i32) -> (i32, i32) {
    %c0_i32 = arith.constant 0 : i32
    return %arg0, %arg1 : i32, i32
  }
}

module attributes {stable_mosaic.version = 11 : i64} {
  func.func @_mm_kernel(%arg0: i32, %arg1: i32, %arg2: i32, %arg3: memref<8x1152xbf16, #tpu.memory_space<vmem>>, %arg4: memref<1152x256xbf16, #tpu.memory_space<vmem>>, %arg5: memref<1x256xf32, #tpu.memory_space<vmem>>, %arg6: memref<8x256xf32, #tpu.memory_space<vmem>>, %arg7: memref<8x256xf32, #tpu.memory_space<vmem>>) attributes {dimension_semantics = [#tpu.dimension_semantics<parallel>, #tpu.dimension_semantics<parallel>, #tpu.dimension_semantics<arbitrary>], iteration_bounds = array<i64: 1, 1, 2>, scalar_prefetch = 0 : i64, scratch_operands = 1 : i64, tpu.core_type = #tpu.core_type<tc>, window_params = [{transform_indices = @transform_0, window_bounds = array<i64: 8, 1152>}, {transform_indices = @transform_1, window_bounds = array<i64: 1152, 256>}, {transform_indices = @transform_2, window_bounds = array<i64: 1, 256>}, {transform_indices = @transform_3, window_bounds = array<i64: 8, 256>}]} {
    %c0_i32 = arith.constant 0 : i32
    %0 = arith.cmpi eq, %arg2, %c0_i32 : i32
    %1 = arith.extui %0 : i1 to i32
    %c0_i32_0 = arith.constant 0 : i32
    %2 = arith.cmpi ne, %1, %c0_i32_0 : i32
    scf.if %2 {
      %cst_9 = arith.constant 0.000000e+00 : f32
      %12 = vector.broadcast %cst_9 : f32 to vector<8x256xf32>
      %c0_10 = arith.constant 0 : index
      %c0_11 = arith.constant 0 : index
      %13 = vector.load %arg7[%c0_10, %c0_11] : memref<8x256xf32, #tpu.memory_space<vmem>>, vector<8x256xf32>
      tpu.vector_store %arg7[%c0_10, %c0_11], %12 {strides = array<i32>} : memref<8x256xf32, #tpu.memory_space<vmem>>, vector<8x256xf32>,
    } else {
    }
    %c0 = arith.constant 0 : index
    %c0_1 = arith.constant 0 : index
    %3 = vector.load %arg7[%c0, %c0_1] : memref<8x256xf32, #tpu.memory_space<vmem>>, vector<8x256xf32>
    %c0_2 = arith.constant 0 : index
    %c0_3 = arith.constant 0 : index
    %4 = vector.load %arg3[%c0_2, %c0_3] : memref<8x1152xbf16, #tpu.memory_space<vmem>>, vector<8x1152xbf16>
    %c0_4 = arith.constant 0 : index
    %c0_5 = arith.constant 0 : index
    %5 = vector.load %arg4[%c0_4, %c0_5] : memref<1152x256xbf16, #tpu.memory_space<vmem>>, vector<1152x256xbf16>
    %cst = arith.constant dense<0.000000e+00> : vector<8x256xf32>
    %6 = tpu.matmul %4, %5, %cst {dimension_numbers = #tpu.dot_dimension_numbers<[1], [0], [0], [1], [0, 0, 1, 1], [], []>} : vector<8x1152xbf16>, vector<1152x256xbf16>, vector<8x256xf32> -> vector<8x256xf32>
    %7 = arith.addf %3, %6 : vector<8x256xf32>
    %c0_6 = arith.constant 0 : index
    %c0_7 = arith.constant 0 : index
    %8 = vector.load %arg7[%c0_6, %c0_7] : memref<8x256xf32, #tpu.memory_space<vmem>>, vector<8x256xf32>
    tpu.vector_store %arg7[%c0_6, %c0_7], %7 {strides = array<i32>} : memref<8x256xf32, #tpu.memory_space<vmem>>, vector<8x256xf32>,
    %c1_i32 = arith.constant 1 : i32
    %9 = arith.cmpi eq, %arg2, %c1_i32 : i32
    %10 = arith.extui %9 : i1 to i32
    %c0_i32_8 = arith.constant 0 : i32
    %11 = arith.cmpi ne, %10, %c0_i32_8 : i32
    scf.if %11 {
      %c0_9 = arith.constant 0 : index
      %c0_10 = arith.constant 0 : index
      %12 = vector.load %arg7[%c0_9, %c0_10] : memref<8x256xf32, #tpu.memory_space<vmem>>, vector<8x256xf32>
      %c0_11 = arith.constant 0 : index
      %c0_12 = arith.constant 0 : index
      %13 = vector.load %arg5[%c0_11, %c0_12] : memref<1x256xf32, #tpu.memory_space<vmem>>, vector<1x256xf32>
      %14 = vector.broadcast %13 : vector<1x256xf32> to vector<8x256xf32>
      %15 = arith.addf %12, %14 : vector<8x256xf32>
      %cst_13 = arith.constant 0.000000e+00 : f32
      %16 = vector.broadcast %cst_13 : f32 to vector<8x256xf32>
      %17 = arith.maximumf %15, %16 : vector<8x256xf32>
      %c0_14 = arith.constant 0 : index
      %c0_15 = arith.constant 0 : index
      %18 = vector.load %arg6[%c0_14, %c0_15] : memref<8x256xf32, #tpu.memory_space<vmem>>, vector<8x256xf32>
      tpu.vector_store %arg6[%c0_14, %c0_15], %17 {strides = array<i32>} : memref<8x256xf32, #tpu.memory_space<vmem>>, vector<8x256xf32>,
    } else {
    }
    return
  }
  func.func @transform_0(%arg0: i32, %arg1: i32, %arg2: i32) -> (i32, i32) {
    %c0_i32 = arith.constant 0 : i32
    return %arg0, %arg2 : i32, i32
  }
  func.func @transform_1(%arg0: i32, %arg1: i32, %arg2: i32) -> (i32, i32) {
    %c0_i32 = arith.constant 0 : i32
    return %arg2, %arg1 : i32, i32
  }
  func.func @transform_2(%arg0: i32, %arg1: i32, %arg2: i32) -> (i32, i32) {
    %c0_i32 = arith.constant 0 : i32
    %c0_i32_0 = arith.constant 0 : i32
    return %c0_i32, %arg1 : i32, i32
  }
  func.func @transform_3(%arg0: i32, %arg1: i32, %arg2: i32) -> (i32, i32) {
    %c0_i32 = arith.constant 0 : i32
    return %arg0, %arg1 : i32, i32
  }
}

module attributes {stable_mosaic.version = 11 : i64} {
  func.func @_mm_kernel(%arg0: i32, %arg1: i32, %arg2: i32, %arg3: memref<2x1152xbf16, #tpu.memory_space<vmem>>, %arg4: memref<1152x256xbf16, #tpu.memory_space<vmem>>, %arg5: memref<1x256xf32, #tpu.memory_space<vmem>>, %arg6: memref<2x256xf32, #tpu.memory_space<vmem>>, %arg7: memref<2x256xf32, #tpu.memory_space<vmem>>) attributes {dimension_semantics = [#tpu.dimension_semantics<parallel>, #tpu.dimension_semantics<parallel>, #tpu.dimension_semantics<arbitrary>], iteration_bounds = array<i64: 1, 2, 2>, scalar_prefetch = 0 : i64, scratch_operands = 1 : i64, tpu.core_type = #tpu.core_type<tc>, window_params = [{transform_indices = @transform_0, window_bounds = array<i64: 2, 1152>}, {transform_indices = @transform_1, window_bounds = array<i64: 1152, 256>}, {transform_indices = @transform_2, window_bounds = array<i64: 1, 256>}, {transform_indices = @transform_3, window_bounds = array<i64: 2, 256>}]} {
    %c0_i32 = arith.constant 0 : i32
    %0 = arith.cmpi eq, %arg2, %c0_i32 : i32
    %1 = arith.extui %0 : i1 to i32
    %c0_i32_0 = arith.constant 0 : i32
    %2 = arith.cmpi ne, %1, %c0_i32_0 : i32
    scf.if %2 {
      %cst_9 = arith.constant 0.000000e+00 : f32
      %12 = vector.broadcast %cst_9 : f32 to vector<2x256xf32>
      %c0_10 = arith.constant 0 : index
      %c0_11 = arith.constant 0 : index
      %13 = vector.load %arg7[%c0_10, %c0_11] : memref<2x256xf32, #tpu.memory_space<vmem>>, vector<2x256xf32>
      tpu.vector_store %arg7[%c0_10, %c0_11], %12 {strides = array<i32>} : memref<2x256xf32, #tpu.memory_space<vmem>>, vector<2x256xf32>,
    } else {
    }
    %c0 = arith.constant 0 : index
    %c0_1 = arith.constant 0 : index
    %3 = vector.load %arg7[%c0, %c0_1] : memref<2x256xf32, #tpu.memory_space<vmem>>, vector<2x256xf32>
    %c0_2 = arith.constant 0 : index
    %c0_3 = arith.constant 0 : index
    %4 = vector.load %arg3[%c0_2, %c0_3] : memref<2x1152xbf16, #tpu.memory_space<vmem>>, vector<2x1152xbf16>
    %c0_4 = arith.constant 0 : index
    %c0_5 = arith.constant 0 : index
    %5 = vector.load %arg4[%c0_4, %c0_5] : memref<1152x256xbf16, #tpu.memory_space<vmem>>, vector<1152x256xbf16>
    %cst = arith.constant dense<0.000000e+00> : vector<2x256xf32>
    %6 = tpu.matmul %4, %5, %cst {dimension_numbers = #tpu.dot_dimension_numbers<[1], [0], [0], [1], [0, 0, 1, 1], [], []>} : vector<2x1152xbf16>, vector<1152x256xbf16>, vector<2x256xf32> -> vector<2x256xf32>
    %7 = arith.addf %3, %6 : vector<2x256xf32>
    %c0_6 = arith.constant 0 : index
    %c0_7 = arith.constant 0 : index
    %8 = vector.load %arg7[%c0_6, %c0_7] : memref<2x256xf32, #tpu.memory_space<vmem>>, vector<2x256xf32>
    tpu.vector_store %arg7[%c0_6, %c0_7], %7 {strides = array<i32>} : memref<2x256xf32, #tpu.memory_space<vmem>>, vector<2x256xf32>,
    %c1_i32 = arith.constant 1 : i32
    %9 = arith.cmpi eq, %arg2, %c1_i32 : i32
    %10 = arith.extui %9 : i1 to i32
    %c0_i32_8 = arith.constant 0 : i32
    %11 = arith.cmpi ne, %10, %c0_i32_8 : i32
    scf.if %11 {
      %c0_9 = arith.constant 0 : index
      %c0_10 = arith.constant 0 : index
      %12 = vector.load %arg7[%c0_9, %c0_10] : memref<2x256xf32, #tpu.memory_space<vmem>>, vector<2x256xf32>
      %c0_11 = arith.constant 0 : index
      %c0_12 = arith.constant 0 : index
      %13 = vector.load %arg5[%c0_11, %c0_12] : memref<1x256xf32, #tpu.memory_space<vmem>>, vector<1x256xf32>
      %14 = vector.broadcast %13 : vector<1x256xf32> to vector<2x256xf32>
      %15 = arith.addf %12, %14 : vector<2x256xf32>
      %cst_13 = arith.constant 0.000000e+00 : f32
      %16 = vector.broadcast %cst_13 : f32 to vector<2x256xf32>
      %17 = arith.maximumf %15, %16 : vector<2x256xf32>
      %c0_14 = arith.constant 0 : index
      %c0_15 = arith.constant 0 : index
      %18 = vector.load %arg6[%c0_14, %c0_15] : memref<2x256xf32, #tpu.memory_space<vmem>>, vector<2x256xf32>
      tpu.vector_store %arg6[%c0_14, %c0_15], %17 {strides = array<i32>} : memref<2x256xf32, #tpu.memory_space<vmem>>, vector<2x256xf32>,
    } else {
    }
    return
  }
  func.func @transform_0(%arg0: i32, %arg1: i32, %arg2: i32) -> (i32, i32) {
    %c0_i32 = arith.constant 0 : i32
    return %arg0, %arg2 : i32, i32
  }
  func.func @transform_1(%arg0: i32, %arg1: i32, %arg2: i32) -> (i32, i32) {
    %c0_i32 = arith.constant 0 : i32
    return %arg2, %arg1 : i32, i32
  }
  func.func @transform_2(%arg0: i32, %arg1: i32, %arg2: i32) -> (i32, i32) {
    %c0_i32 = arith.constant 0 : i32
    %c0_i32_0 = arith.constant 0 : i32
    return %c0_i32, %arg1 : i32, i32
  }
  func.func @transform_3(%arg0: i32, %arg1: i32, %arg2: i32) -> (i32, i32) {
    %c0_i32 = arith.constant 0 : i32
    return %arg0, %arg1 : i32, i32
  }
}

module attributes {stable_mosaic.version = 11 : i64} {
  func.func @_mm_kernel(%arg0: i32, %arg1: i32, %arg2: i32, %arg3: memref<2x256xbf16, #tpu.memory_space<vmem>>, %arg4: memref<256x256xbf16, #tpu.memory_space<vmem>>, %arg5: memref<1x256xf32, #tpu.memory_space<vmem>>, %arg6: memref<2x256xf32, #tpu.memory_space<vmem>>, %arg7: memref<2x256xf32, #tpu.memory_space<vmem>>) attributes {dimension_semantics = [#tpu.dimension_semantics<parallel>, #tpu.dimension_semantics<parallel>, #tpu.dimension_semantics<arbitrary>], iteration_bounds = array<i64: 1, 2, 1>, scalar_prefetch = 0 : i64, scratch_operands = 1 : i64, tpu.core_type = #tpu.core_type<tc>, window_params = [{transform_indices = @transform_0, window_bounds = array<i64: 2, 256>}, {transform_indices = @transform_1, window_bounds = array<i64: 256, 256>}, {transform_indices = @transform_2, window_bounds = array<i64: 1, 256>}, {transform_indices = @transform_3, window_bounds = array<i64: 2, 256>}]} {
    %c0_i32 = arith.constant 0 : i32
    %0 = arith.cmpi eq, %arg2, %c0_i32 : i32
    %1 = arith.extui %0 : i1 to i32
    %c0_i32_0 = arith.constant 0 : i32
    %2 = arith.cmpi ne, %1, %c0_i32_0 : i32
    scf.if %2 {
      %cst_10 = arith.constant 0.000000e+00 : f32
      %12 = vector.broadcast %cst_10 : f32 to vector<2x256xf32>
      %c0_11 = arith.constant 0 : index
      %c0_12 = arith.constant 0 : index
      %13 = vector.load %arg7[%c0_11, %c0_12] : memref<2x256xf32, #tpu.memory_space<vmem>>, vector<2x256xf32>
      tpu.vector_store %arg7[%c0_11, %c0_12], %12 {strides = array<i32>} : memref<2x256xf32, #tpu.memory_space<vmem>>, vector<2x256xf32>,
    } else {
    }
    %c0 = arith.constant 0 : index
    %c0_1 = arith.constant 0 : index
    %3 = vector.load %arg7[%c0, %c0_1] : memref<2x256xf32, #tpu.memory_space<vmem>>, vector<2x256xf32>
    %c0_2 = arith.constant 0 : index
    %c0_3 = arith.constant 0 : index
    %4 = vector.load %arg3[%c0_2, %c0_3] : memref<2x256xbf16, #tpu.memory_space<vmem>>, vector<2x256xbf16>
    %c0_4 = arith.constant 0 : index
    %c0_5 = arith.constant 0 : index
    %5 = vector.load %arg4[%c0_4, %c0_5] : memref<256x256xbf16, #tpu.memory_space<vmem>>, vector<256x256xbf16>
    %cst = arith.constant dense<0.000000e+00> : vector<2x256xf32>
    %6 = tpu.matmul %4, %5, %cst {dimension_numbers = #tpu.dot_dimension_numbers<[1], [0], [0], [1], [0, 0, 1, 1], [], []>} : vector<2x256xbf16>, vector<256x256xbf16>, vector<2x256xf32> -> vector<2x256xf32>
    %7 = arith.addf %3, %6 : vector<2x256xf32>
    %c0_6 = arith.constant 0 : index
    %c0_7 = arith.constant 0 : index
    %8 = vector.load %arg7[%c0_6, %c0_7] : memref<2x256xf32, #tpu.memory_space<vmem>>, vector<2x256xf32>
    tpu.vector_store %arg7[%c0_6, %c0_7], %7 {strides = array<i32>} : memref<2x256xf32, #tpu.memory_space<vmem>>, vector<2x256xf32>,
    %c0_i32_8 = arith.constant 0 : i32
    %9 = arith.cmpi eq, %arg2, %c0_i32_8 : i32
    %10 = arith.extui %9 : i1 to i32
    %c0_i32_9 = arith.constant 0 : i32
    %11 = arith.cmpi ne, %10, %c0_i32_9 : i32
    scf.if %11 {
      %c0_10 = arith.constant 0 : index
      %c0_11 = arith.constant 0 : index
      %12 = vector.load %arg7[%c0_10, %c0_11] : memref<2x256xf32, #tpu.memory_space<vmem>>, vector<2x256xf32>
      %c0_12 = arith.constant 0 : index
      %c0_13 = arith.constant 0 : index
      %13 = vector.load %arg5[%c0_12, %c0_13] : memref<1x256xf32, #tpu.memory_space<vmem>>, vector<1x256xf32>
      %14 = vector.broadcast %13 : vector<1x256xf32> to vector<2x256xf32>
      %15 = arith.addf %12, %14 : vector<2x256xf32>
      %c0_14 = arith.constant 0 : index
      %c0_15 = arith.constant 0 : index
      %16 = vector.load %arg6[%c0_14, %c0_15] : memref<2x256xf32, #tpu.memory_space<vmem>>, vector<2x256xf32>
      tpu.vector_store %arg6[%c0_14, %c0_15], %15 {strides = array<i32>} : memref<2x256xf32, #tpu.memory_space<vmem>>, vector<2x256xf32>,
    } else {
    }
    return
  }
  func.func @transform_0(%arg0: i32, %arg1: i32, %arg2: i32) -> (i32, i32) {
    %c0_i32 = arith.constant 0 : i32
    return %arg0, %arg2 : i32, i32
  }
  func.func @transform_1(%arg0: i32, %arg1: i32, %arg2: i32) -> (i32, i32) {
    %c0_i32 = arith.constant 0 : i32
    return %arg2, %arg1 : i32, i32
  }
  func.func @transform_2(%arg0: i32, %arg1: i32, %arg2: i32) -> (i32, i32) {
    %c0_i32 = arith.constant 0 : i32
    %c0_i32_0 = arith.constant 0 : i32
    return %c0_i32, %arg1 : i32, i32
  }
  func.func @transform_3(%arg0: i32, %arg1: i32, %arg2: i32) -> (i32, i32) {
    %c0_i32 = arith.constant 0 : i32
    return %arg0, %arg1 : i32, i32
  }
}

module attributes {stable_mosaic.version = 11 : i64} {
  func.func @_mm_kernel(%arg0: i32, %arg1: i32, %arg2: i32, %arg3: memref<2x1152xbf16, #tpu.memory_space<vmem>>, %arg4: memref<1152x256xbf16, #tpu.memory_space<vmem>>, %arg5: memref<1x256xf32, #tpu.memory_space<vmem>>, %arg6: memref<2x256xf32, #tpu.memory_space<vmem>>, %arg7: memref<2x256xf32, #tpu.memory_space<vmem>>, %arg8: memref<2x256xf32, #tpu.memory_space<vmem>>) attributes {dimension_semantics = [#tpu.dimension_semantics<parallel>, #tpu.dimension_semantics<parallel>, #tpu.dimension_semantics<arbitrary>], iteration_bounds = array<i64: 1, 2, 4>, scalar_prefetch = 0 : i64, scratch_operands = 1 : i64, tpu.core_type = #tpu.core_type<tc>, window_params = [{transform_indices = @transform_0, window_bounds = array<i64: 2, 1152>}, {transform_indices = @transform_1, window_bounds = array<i64: 1152, 256>}, {transform_indices = @transform_2, window_bounds = array<i64: 1, 256>}, {transform_indices = @transform_3, window_bounds = array<i64: 2, 256>}, {transform_indices = @transform_4, window_bounds = array<i64: 2, 256>}]} {
    %c0_i32 = arith.constant 0 : i32
    %0 = arith.cmpi eq, %arg2, %c0_i32 : i32
    %1 = arith.extui %0 : i1 to i32
    %c0_i32_0 = arith.constant 0 : i32
    %2 = arith.cmpi ne, %1, %c0_i32_0 : i32
    scf.if %2 {
      %cst_9 = arith.constant 0.000000e+00 : f32
      %12 = vector.broadcast %cst_9 : f32 to vector<2x256xf32>
      %c0_10 = arith.constant 0 : index
      %c0_11 = arith.constant 0 : index
      %13 = vector.load %arg8[%c0_10, %c0_11] : memref<2x256xf32, #tpu.memory_space<vmem>>, vector<2x256xf32>
      tpu.vector_store %arg8[%c0_10, %c0_11], %12 {strides = array<i32>} : memref<2x256xf32, #tpu.memory_space<vmem>>, vector<2x256xf32>,
    } else {
    }
    %c0 = arith.constant 0 : index
    %c0_1 = arith.constant 0 : index
    %3 = vector.load %arg8[%c0, %c0_1] : memref<2x256xf32, #tpu.memory_space<vmem>>, vector<2x256xf32>
    %c0_2 = arith.constant 0 : index
    %c0_3 = arith.constant 0 : index
    %4 = vector.load %arg3[%c0_2, %c0_3] : memref<2x1152xbf16, #tpu.memory_space<vmem>>, vector<2x1152xbf16>
    %c0_4 = arith.constant 0 : index
    %c0_5 = arith.constant 0 : index
    %5 = vector.load %arg4[%c0_4, %c0_5] : memref<1152x256xbf16, #tpu.memory_space<vmem>>, vector<1152x256xbf16>
    %cst = arith.constant dense<0.000000e+00> : vector<2x256xf32>
    %6 = tpu.matmul %4, %5, %cst {dimension_numbers = #tpu.dot_dimension_numbers<[1], [0], [0], [1], [0, 0, 1, 1], [], []>} : vector<2x1152xbf16>, vector<1152x256xbf16>, vector<2x256xf32> -> vector<2x256xf32>
    %7 = arith.addf %3, %6 : vector<2x256xf32>
    %c0_6 = arith.constant 0 : index
    %c0_7 = arith.constant 0 : index
    %8 = vector.load %arg8[%c0_6, %c0_7] : memref<2x256xf32, #tpu.memory_space<vmem>>, vector<2x256xf32>
    tpu.vector_store %arg8[%c0_6, %c0_7], %7 {strides = array<i32>} : memref<2x256xf32, #tpu.memory_space<vmem>>, vector<2x256xf32>,
    %c3_i32 = arith.constant 3 : i32
    %9 = arith.cmpi eq, %arg2, %c3_i32 : i32
    %10 = arith.extui %9 : i1 to i32
    %c0_i32_8 = arith.constant 0 : i32
    %11 = arith.cmpi ne, %10, %c0_i32_8 : i32
    scf.if %11 {
      %c0_9 = arith.constant 0 : index
      %c0_10 = arith.constant 0 : index
      %12 = vector.load %arg8[%c0_9, %c0_10] : memref<2x256xf32, #tpu.memory_space<vmem>>, vector<2x256xf32>
      %c0_11 = arith.constant 0 : index
      %c0_12 = arith.constant 0 : index
      %13 = vector.load %arg5[%c0_11, %c0_12] : memref<1x256xf32, #tpu.memory_space<vmem>>, vector<1x256xf32>
      %14 = vector.broadcast %13 : vector<1x256xf32> to vector<2x256xf32>
      %15 = arith.addf %12, %14 : vector<2x256xf32>
      %c0_13 = arith.constant 0 : index
      %c0_14 = arith.constant 0 : index
      %16 = vector.load %arg6[%c0_13, %c0_14] : memref<2x256xf32, #tpu.memory_space<vmem>>, vector<2x256xf32>
      %17 = arith.addf %15, %16 : vector<2x256xf32>
      %cst_15 = arith.constant 0.000000e+00 : f32
      %18 = vector.broadcast %cst_15 : f32 to vector<2x256xf32>
      %19 = arith.maximumf %17, %18 : vector<2x256xf32>
      %c0_16 = arith.constant 0 : index
      %c0_17 = arith.constant 0 : index
      %20 = vector.load %arg7[%c0_16, %c0_17] : memref<2x256xf32, #tpu.memory_space<vmem>>, vector<2x256xf32>
      tpu.vector_store %arg7[%c0_16, %c0_17], %19 {strides = array<i32>} : memref<2x256xf32, #tpu.memory_space<vmem>>, vector<2x256xf32>,
    } else {
    }
    return
  }
  func.func @transform_0(%arg0: i32, %arg1: i32, %arg2: i32) -> (i32, i32) {
    %c0_i32 = arith.constant 0 : i32
    return %arg0, %arg2 : i32, i32
  }
  func.func @transform_1(%arg0: i32, %arg1: i32, %arg2: i32) -> (i32, i32) {
    %c0_i32 = arith.constant 0 : i32
    return %arg2, %arg1 : i32, i32
  }
  func.func @transform_2(%arg0: i32, %arg1: i32, %arg2: i32) -> (i32, i32) {
    %c0_i32 = arith.constant 0 : i32
    %c0_i32_0 = arith.constant 0 : i32
    return %c0_i32, %arg1 : i32, i32
  }
  func.func @transform_3(%arg0: i32, %arg1: i32, %arg2: i32) -> (i32, i32) {
    %c0_i32 = arith.constant 0 : i32
    return %arg0, %arg1 : i32, i32
  }
  func.func @transform_4(%arg0: i32, %arg1: i32, %arg2: i32) -> (i32, i32) {
    %c0_i32 = arith.constant 0 : i32
    return %arg0, %arg1 : i32, i32
  }
}

module attributes {stable_mosaic.version = 11 : i64} {
  func.func @_mm_kernel(%arg0: i32, %arg1: i32, %arg2: i32, %arg3: memref<2x1152xbf16, #tpu.memory_space<vmem>>, %arg4: memref<1152x256xbf16, #tpu.memory_space<vmem>>, %arg5: memref<1x256xf32, #tpu.memory_space<vmem>>, %arg6: memref<2x256xf32, #tpu.memory_space<vmem>>, %arg7: memref<2x256xf32, #tpu.memory_space<vmem>>) attributes {dimension_semantics = [#tpu.dimension_semantics<parallel>, #tpu.dimension_semantics<parallel>, #tpu.dimension_semantics<arbitrary>], iteration_bounds = array<i64: 1, 2, 4>, scalar_prefetch = 0 : i64, scratch_operands = 1 : i64, tpu.core_type = #tpu.core_type<tc>, window_params = [{transform_indices = @transform_0, window_bounds = array<i64: 2, 1152>}, {transform_indices = @transform_1, window_bounds = array<i64: 1152, 256>}, {transform_indices = @transform_2, window_bounds = array<i64: 1, 256>}, {transform_indices = @transform_3, window_bounds = array<i64: 2, 256>}]} {
    %c0_i32 = arith.constant 0 : i32
    %0 = arith.cmpi eq, %arg2, %c0_i32 : i32
    %1 = arith.extui %0 : i1 to i32
    %c0_i32_0 = arith.constant 0 : i32
    %2 = arith.cmpi ne, %1, %c0_i32_0 : i32
    scf.if %2 {
      %cst_9 = arith.constant 0.000000e+00 : f32
      %12 = vector.broadcast %cst_9 : f32 to vector<2x256xf32>
      %c0_10 = arith.constant 0 : index
      %c0_11 = arith.constant 0 : index
      %13 = vector.load %arg7[%c0_10, %c0_11] : memref<2x256xf32, #tpu.memory_space<vmem>>, vector<2x256xf32>
      tpu.vector_store %arg7[%c0_10, %c0_11], %12 {strides = array<i32>} : memref<2x256xf32, #tpu.memory_space<vmem>>, vector<2x256xf32>,
    } else {
    }
    %c0 = arith.constant 0 : index
    %c0_1 = arith.constant 0 : index
    %3 = vector.load %arg7[%c0, %c0_1] : memref<2x256xf32, #tpu.memory_space<vmem>>, vector<2x256xf32>
    %c0_2 = arith.constant 0 : index
    %c0_3 = arith.constant 0 : index
    %4 = vector.load %arg3[%c0_2, %c0_3] : memref<2x1152xbf16, #tpu.memory_space<vmem>>, vector<2x1152xbf16>
    %c0_4 = arith.constant 0 : index
    %c0_5 = arith.constant 0 : index
    %5 = vector.load %arg4[%c0_4, %c0_5] : memref<1152x256xbf16, #tpu.memory_space<vmem>>, vector<1152x256xbf16>
    %cst = arith.constant dense<0.000000e+00> : vector<2x256xf32>
    %6 = tpu.matmul %4, %5, %cst {dimension_numbers = #tpu.dot_dimension_numbers<[1], [0], [0], [1], [0, 0, 1, 1], [], []>} : vector<2x1152xbf16>, vector<1152x256xbf16>, vector<2x256xf32> -> vector<2x256xf32>
    %7 = arith.addf %3, %6 : vector<2x256xf32>
    %c0_6 = arith.constant 0 : index
    %c0_7 = arith.constant 0 : index
    %8 = vector.load %arg7[%c0_6, %c0_7] : memref<2x256xf32, #tpu.memory_space<vmem>>, vector<2x256xf32>
    tpu.vector_store %arg7[%c0_6, %c0_7], %7 {strides = array<i32>} : memref<2x256xf32, #tpu.memory_space<vmem>>, vector<2x256xf32>,
    %c3_i32 = arith.constant 3 : i32
    %9 = arith.cmpi eq, %arg2, %c3_i32 : i32
    %10 = arith.extui %9 : i1 to i32
    %c0_i32_8 = arith.constant 0 : i32
    %11 = arith.cmpi ne, %10, %c0_i32_8 : i32
    scf.if %11 {
      %c0_9 = arith.constant 0 : index
      %c0_10 = arith.constant 0 : index
      %12 = vector.load %arg7[%c0_9, %c0_10] : memref<2x256xf32, #tpu.memory_space<vmem>>, vector<2x256xf32>
      %c0_11 = arith.constant 0 : index
      %c0_12 = arith.constant 0 : index
      %13 = vector.load %arg5[%c0_11, %c0_12] : memref<1x256xf32, #tpu.memory_space<vmem>>, vector<1x256xf32>
      %14 = vector.broadcast %13 : vector<1x256xf32> to vector<2x256xf32>
      %15 = arith.addf %12, %14 : vector<2x256xf32>
      %cst_13 = arith.constant 0.000000e+00 : f32
      %16 = vector.broadcast %cst_13 : f32 to vector<2x256xf32>
      %17 = arith.maximumf %15, %16 : vector<2x256xf32>
      %c0_14 = arith.constant 0 : index
      %c0_15 = arith.constant 0 : index
      %18 = vector.load %arg6[%c0_14, %c0_15] : memref<2x256xf32, #tpu.memory_space<vmem>>, vector<2x256xf32>
      tpu.vector_store %arg6[%c0_14, %c0_15], %17 {strides = array<i32>} : memref<2x256xf32, #tpu.memory_space<vmem>>, vector<2x256xf32>,
    } else {
    }
    return
  }
  func.func @transform_0(%arg0: i32, %arg1: i32, %arg2: i32) -> (i32, i32) {
    %c0_i32 = arith.constant 0 : i32
    return %arg0, %arg2 : i32, i32
  }
  func.func @transform_1(%arg0: i32, %arg1: i32, %arg2: i32) -> (i32, i32) {
    %c0_i32 = arith.constant 0 : i32
    return %arg2, %arg1 : i32, i32
  }
  func.func @transform_2(%arg0: i32, %arg1: i32, %arg2: i32) -> (i32, i32) {
    %c0_i32 = arith.constant 0 : i32
    %c0_i32_0 = arith.constant 0 : i32
    return %c0_i32, %arg1 : i32, i32
  }
  func.func @transform_3(%arg0: i32, %arg1: i32, %arg2: i32) -> (i32, i32) {
    %c0_i32 = arith.constant 0 : i32
    return %arg0, %arg1 : i32, i32
  }
}

module attributes {stable_mosaic.version = 11 : i64} {
  func.func @_gap_kernel(%arg0: i32, %arg1: memref<2x1x128xf32, #tpu.memory_space<vmem>>, %arg2: memref<2x128xf32, #tpu.memory_space<vmem>>) attributes {dimension_semantics = [#tpu.dimension_semantics<parallel>], iteration_bounds = array<i64: 4>, scalar_prefetch = 0 : i64, scratch_operands = 0 : i64, tpu.core_type = #tpu.core_type<tc>, window_params = [{transform_indices = @transform_0, window_bounds = array<i64: 2, 1, 128>}, {transform_indices = @transform_1, window_bounds = array<i64: 2, 128>}]} {
    %c0 = arith.constant 0 : index
    %c0_0 = arith.constant 0 : index
    %c0_1 = arith.constant 0 : index
    %0 = vector.load %arg1[%c0, %c0_0, %c0_1] : memref<2x1x128xf32, #tpu.memory_space<vmem>>, vector<2x1x128xf32>
    %cst = arith.constant dense<0.000000e+00> : vector<2x128xf32>
    %1 = vector.multi_reduction <add>, %0, %cst [1] : vector<2x1x128xf32> to vector<2x128xf32>
    %cst_2 = arith.constant 1.000000e+00 : f32
    %2 = vector.broadcast %cst_2 : f32 to vector<2x128xf32>
    %3 = arith.divf %1, %2 : vector<2x128xf32>
    %c0_3 = arith.constant 0 : index
    %c0_4 = arith.constant 0 : index
    %4 = vector.load %arg2[%c0_3, %c0_4] : memref<2x128xf32, #tpu.memory_space<vmem>>, vector<2x128xf32>
    tpu.vector_store %arg2[%c0_3, %c0_4], %3 {strides = array<i32>} : memref<2x128xf32, #tpu.memory_space<vmem>>, vector<2x128xf32>,
    return
  }
  func.func @transform_0(%arg0: i32) -> (i32, i32, i32) {
    %c0_i32 = arith.constant 0 : i32
    %c0_i32_0 = arith.constant 0 : i32
    %c0_i32_1 = arith.constant 0 : i32
    return %c0_i32, %c0_i32_0, %arg0 : i32, i32, i32
  }
  func.func @transform_1(%arg0: i32) -> (i32, i32) {
    %c0_i32 = arith.constant 0 : i32
    %c0_i32_0 = arith.constant 0 : i32
    return %c0_i32, %arg0 : i32, i32
  }
}

module attributes {stable_mosaic.version = 11 : i64} {
  func.func @_mm_kernel(%arg0: i32, %arg1: i32, %arg2: i32, %arg3: memref<2x512xbf16, #tpu.memory_space<vmem>>, %arg4: memref<512x128xbf16, #tpu.memory_space<vmem>>, %arg5: memref<1x128xf32, #tpu.memory_space<vmem>>, %arg6: memref<2x128xf32, #tpu.memory_space<vmem>>, %arg7: memref<2x128xf32, #tpu.memory_space<vmem>>) attributes {dimension_semantics = [#tpu.dimension_semantics<parallel>, #tpu.dimension_semantics<parallel>, #tpu.dimension_semantics<arbitrary>], iteration_bounds = array<i64: 1, 1, 1>, scalar_prefetch = 0 : i64, scratch_operands = 1 : i64, tpu.core_type = #tpu.core_type<tc>, window_params = [{transform_indices = @transform_0, window_bounds = array<i64: 2, 512>}, {transform_indices = @transform_1, window_bounds = array<i64: 512, 128>}, {transform_indices = @transform_2, window_bounds = array<i64: 1, 128>}, {transform_indices = @transform_3, window_bounds = array<i64: 2, 128>}]} {
    %c0_i32 = arith.constant 0 : i32
    %0 = arith.cmpi eq, %arg2, %c0_i32 : i32
    %1 = arith.extui %0 : i1 to i32
    %c0_i32_0 = arith.constant 0 : i32
    %2 = arith.cmpi ne, %1, %c0_i32_0 : i32
    scf.if %2 {
      %cst_10 = arith.constant 0.000000e+00 : f32
      %12 = vector.broadcast %cst_10 : f32 to vector<2x128xf32>
      %c0_11 = arith.constant 0 : index
      %c0_12 = arith.constant 0 : index
      %13 = vector.load %arg7[%c0_11, %c0_12] : memref<2x128xf32, #tpu.memory_space<vmem>>, vector<2x128xf32>
      tpu.vector_store %arg7[%c0_11, %c0_12], %12 {strides = array<i32>} : memref<2x128xf32, #tpu.memory_space<vmem>>, vector<2x128xf32>,
    } else {
    }
    %c0 = arith.constant 0 : index
    %c0_1 = arith.constant 0 : index
    %3 = vector.load %arg7[%c0, %c0_1] : memref<2x128xf32, #tpu.memory_space<vmem>>, vector<2x128xf32>
    %c0_2 = arith.constant 0 : index
    %c0_3 = arith.constant 0 : index
    %4 = vector.load %arg3[%c0_2, %c0_3] : memref<2x512xbf16, #tpu.memory_space<vmem>>, vector<2x512xbf16>
    %c0_4 = arith.constant 0 : index
    %c0_5 = arith.constant 0 : index
    %5 = vector.load %arg4[%c0_4, %c0_5] : memref<512x128xbf16, #tpu.memory_space<vmem>>, vector<512x128xbf16>
    %cst = arith.constant dense<0.000000e+00> : vector<2x128xf32>
    %6 = tpu.matmul %4, %5, %cst {dimension_numbers = #tpu.dot_dimension_numbers<[1], [0], [0], [1], [0, 0, 1, 1], [], []>} : vector<2x512xbf16>, vector<512x128xbf16>, vector<2x128xf32> -> vector<2x128xf32>
    %7 = arith.addf %3, %6 : vector<2x128xf32>
    %c0_6 = arith.constant 0 : index
    %c0_7 = arith.constant 0 : index
    %8 = vector.load %arg7[%c0_6, %c0_7] : memref<2x128xf32, #tpu.memory_space<vmem>>, vector<2x128xf32>
    tpu.vector_store %arg7[%c0_6, %c0_7], %7 {strides = array<i32>} : memref<2x128xf32, #tpu.memory_space<vmem>>, vector<2x128xf32>,
    %c0_i32_8 = arith.constant 0 : i32
    %9 = arith.cmpi eq, %arg2, %c0_i32_8 : i32
    %10 = arith.extui %9 : i1 to i32
    %c0_i32_9 = arith.constant 0 : i32
    %11 = arith.cmpi ne, %10, %c0_i32_9 : i32
    scf.if %11 {
      %c0_10 = arith.constant 0 : index
      %c0_11 = arith.constant 0 : index
      %12 = vector.load %arg7[%c0_10, %c0_11] : memref<2x128xf32, #tpu.memory_space<vmem>>, vector<2x128xf32>
      %c0_12 = arith.constant 0 : index
      %c0_13 = arith.constant 0 : index
      %13 = vector.load %arg5[%c0_12, %c0_13] : memref<1x128xf32, #tpu.memory_space<vmem>>, vector<1x128xf32>
      %14 = vector.broadcast %13 : vector<1x128xf32> to vector<2x128xf32>
      %15 = arith.addf %12, %14 : vector<2x128xf32>
      %c0_14 = arith.constant 0 : index
      %c0_15 = arith.constant 0 : index
      %16 = vector.load %arg6[%c0_14, %c0_15] : memref<2x128xf32, #tpu.memory_space<vmem>>, vector<2x128xf32>
      tpu.vector_store %arg6[%c0_14, %c0_15], %15 {strides = array<i32>} : memref<2x128xf32, #tpu.memory_space<vmem>>, vector<2x128xf32>,
    } else {
    }
    return
  }
  func.func @transform_0(%arg0: i32, %arg1: i32, %arg2: i32) -> (i32, i32) {
    %c0_i32 = arith.constant 0 : i32
    return %arg0, %arg2 : i32, i32
  }
  func.func @transform_1(%arg0: i32, %arg1: i32, %arg2: i32) -> (i32, i32) {
    %c0_i32 = arith.constant 0 : i32
    return %arg2, %arg1 : i32, i32
  }
  func.func @transform_2(%arg0: i32, %arg1: i32, %arg2: i32) -> (i32, i32) {
    %c0_i32 = arith.constant 0 : i32
    %c0_i32_0 = arith.constant 0 : i32
    return %c0_i32, %arg1 : i32, i32
  }
  func.func @transform_3(%arg0: i32, %arg1: i32, %arg2: i32) -> (i32, i32) {
    %c0_i32 = arith.constant 0 : i32
    return %arg0, %arg1 : i32, i32
  }
}

</mosaic_0001>

<bundles_post_ra>
// kernel: resnet34_forward.40
= control target key start
LH: loop header
LB: loop body
LE: loop exit
PB: predicated region body
PF: predicated region fallthrough
CT: control target
= control target key end

     0   :  { %s470_s0 = inlined_call_operand.vmem [shape: f32[64,128], index: 0, kind: input, shape index: {}]   ;;  %s471_s1 = inlined_call_operand.vmem [shape: f32[64,128], index: 1, kind: input, shape index: {}]   ;;  %s472_s2 = inlined_call_operand.vmem [shape: f32[64,128], index: 2, kind: input, shape index: {}]   ;;  %s473_s3 = inlined_call_operand.vmem [shape: f32[64,128], index: 3, kind: input, shape index: {}]   ;;  %s474_s4 = inlined_call_operand.vmem [shape: f32[64,128], index: 4, kind: input, shape index: {}]   ;;  %s475_s5 = inlined_call_operand.vmem [shape: f32[64,128], index: 5, kind: input, shape index: {}]   ;;  %s476_s6 = inlined_call_operand.vmem [shape: f32[64,128], index: 6, kind: input, shape index: {}]   ;;  %s477_s7 = inlined_call_operand.vmem [shape: f32[64,128], index: 7, kind: input, shape index: {}]   ;;  %s478_s8 = inlined_call_operand.vmem [shape: f32[64,128], index: 8, kind: input, shape index: {}]   ;;  %s479_s9 = inlined_call_operand.vmem [shape: f32[64,128], index: 9, kind: output, shape index: {}]  }
   0x1   :  { %v32_v0 = vld [vmem:[%s470_s0] sm:$0xff]  ;;  %v33_v6 = vld [vmem:[%s470_s0 + $0x8] sm:$0xff]  ;;  %v34_v15 = vld [vmem:[%s470_s0 + $0x10] sm:$0xff] }
   0x2   :  { %v40_v1 = vld [vmem:[%s471_s1] sm:$0xff]  ;;  %v41_v7 = vld [vmem:[%s471_s1 + $0x8] sm:$0xff]  ;;  %v42_v16 = vld [vmem:[%s471_s1 + $0x10] sm:$0xff] }
   0x3   :  { %v56_v2 = vld [vmem:[%s472_s2] sm:$0xff]  ;;  %v48_v3 = vmax.f32 %v32_v0, %v40_v1  ;;  %v57_v8 = vld [vmem:[%s472_s2 + $0x8] sm:$0xff]  ;;  %v49_v10 = vmax.f32 %v33_v6, %v41_v7  ;;  %v58_v17 = vld [vmem:[%s472_s2 + $0x10] sm:$0xff]  ;;  %v50_v20 = vmax.f32 %v34_v15, %v42_v16 }
   0x4   :  { %v72_v4 = vld [vmem:[%s473_s3] sm:$0xff]  ;;  %v73_v13 = vld [vmem:[%s473_s3 + $0x8] sm:$0xff]  ;;  %v74_v24 = vld [vmem:[%s473_s3 + $0x10] sm:$0xff] }
   0x5   :  { %v64_v5 = vmax.f32 %v48_v3, %v56_v2  ;;  %v88_v9 = vld [vmem:[%s474_s4] sm:$0xff]  ;;  %v65_v14 = vmax.f32 %v49_v10, %v57_v8  ;;  %v89_v19 = vld [vmem:[%s474_s4 + $0x8] sm:$0xff]  ;;  %v66_v26 = vmax.f32 %v50_v20, %v58_v17  ;;  %v35_v27 = vld [vmem:[%s470_s0 + $0x18] sm:$0xff] }
   0x6   :  { %v104_v12 = vld [vmem:[%s475_s5] sm:$0xff]  ;;  %v105_v23 = vld [vmem:[%s475_s5 + $0x8] sm:$0xff]  ;;  %v43_v28 = vld [vmem:[%s471_s1 + $0x18] sm:$0xff] }
   0x7   :  { %v80_v11 = vmax.f32 %v64_v5, %v72_v4  ;;  %v120_v21 = vld [vmem:[%s476_s6] sm:$0xff]  ;;  %v81_v22 = vmax.f32 %v65_v14, %v73_v13  ;;  %v59_v29 = vld [vmem:[%s472_s2 + $0x18] sm:$0xff]  ;;  %v90_v33 = vld [vmem:[%s474_s4 + $0x10] sm:$0xff]  ;;  %v51_v34 = vmax.f32 %v35_v27, %v43_v28  ;;  %v82_v37 = vmax.f32 %v66_v26, %v74_v24 }
   0x8   :  { %v136_v30 = vld [vmem:[%s477_s7] sm:$0xff]  ;;  %v121_v36 = vld [vmem:[%s476_s6 + $0x8] sm:$0xff]  ;;  %v106_v38 = vld [vmem:[%s475_s5 + $0x10] sm:$0xff] }
   0x9   :  { %v96_v18 = vmax.f32 %v80_v11, %v88_v9  ;;  %v152_v31 = vld [vmem:[%s478_s8] sm:$0xff]  ;;  %v97_v32 = vmax.f32 %v81_v22, %v89_v19  ;;  %v75_v39 = vld [vmem:[%s473_s3 + $0x18] sm:$0xff]  ;;  %v67_v41 = vmax.f32 %v51_v34, %v59_v29  ;;  %v137_v46 = vld [vmem:[%s477_s7 + $0x8] sm:$0xff]  ;;  %v98_v48 = vmax.f32 %v82_v37, %v90_v33 }
   0xa   :  { %v36_v42 = vld [vmem:[%s470_s0 + $0x20] sm:$0xff]  ;;  %v153_v47 = vld [vmem:[%s478_s8 + $0x8] sm:$0xff]  ;;  %v91_v49 = vld [vmem:[%s474_s4 + $0x18] sm:$0xff] }
   0xb   :  { %v112_v25 = vmax.f32 %v96_v18, %v104_v12  ;;  %v113_v40 = vmax.f32 %v97_v32, %v105_v23  ;;  %v44_v43 = vld [vmem:[%s471_s1 + $0x20] sm:$0xff]  ;;  %v122_v52 = vld [vmem:[%s476_s6 + $0x10] sm:$0xff]  ;;  %v83_v53 = vmax.f32 %v67_v41, %v75_v39  ;;  %v107_v54 = vld [vmem:[%s475_s5 + $0x18] sm:$0xff]  ;;  %v114_v57 = vmax.f32 %v98_v48, %v106_v38 }
   0xc   :  { %v60_v44 = vld [vmem:[%s472_s2 + $0x20] sm:$0xff]  ;;  %v52_v50 = vmax.f32 %v36_v42, %v44_v43  ;;  %v37_v59 = vld [vmem:[%s470_s0 + $0x28] sm:$0xff]  ;;  %v138_v63 = vld [vmem:[%s477_s7 + $0x10] sm:$0xff] }
   0xd   :  { %v128_v35 = vmax.f32 %v112_v25, %v120_v21  ;;  %v129_v51 = vmax.f32 %v113_v40, %v121_v36  ;;  %v76_v55 = vld [vmem:[%s473_s3 + $0x20] sm:$0xff]  ;;  %v45_v60 = vld [vmem:[%s471_s1 + $0x28] sm:$0xff]  ;;  %v154_v0 = vld [vmem:[%s478_s8 + $0x10] sm:$0xff]  ;;  %v99_v1 = vmax.f32 %v83_v53, %v91_v49  ;;  %v130_v4 = vmax.f32 %v114_v57, %v122_v52 }
   0xe   :  { %v68_v58 = vmax.f32 %v52_v50, %v60_v44  ;;  %v61_v61 = vld [vmem:[%s472_s2 + $0x28] sm:$0xff]  ;;  %v92_v2 = vld [vmem:[%s474_s4 + $0x20] sm:$0xff]  ;;  %v53_v3 = vmax.f32 %v37_v59, %v45_v60  ;;  %v123_v5 = vld [vmem:[%s476_s6 + $0x18] sm:$0xff] }
   0xf   :  { %v144_v45 = vmax.f32 %v128_v35, %v136_v30  ;;  %v145_v62 = vmax.f32 %v129_v51, %v137_v46  ;;  %v108_v7 = vld [vmem:[%s475_s5 + $0x20] sm:$0xff]  ;;  %v77_v8 = vld [vmem:[%s473_s3 + $0x28] sm:$0xff]  ;;  %v115_v10 = vmax.f32 %v99_v1, %v107_v54  ;;  %v38_v12 = vld [vmem:[%s470_s0 + $0x30] sm:$0xff]  ;;  %v146_v15 = vmax.f32 %v130_v4, %v138_v63 }
  0x10   :  { %v84_v6 = vmax.f32 %v68_v58, %v76_v55  ;;  %v69_v11 = vmax.f32 %v53_v3, %v61_v61  ;;  %v46_v13 = vld [vmem:[%s471_s1 + $0x30] sm:$0xff]  ;;  %v139_v16 = vld [vmem:[%s477_s7 + $0x18] sm:$0xff]  ;;  %v93_v19 = vld [vmem:[%s474_s4 + $0x28] sm:$0xff] }
  0x11   :  { %v160_v56 = vmax.f32 %v144_v45, %v152_v31  ;;  %v161_v9 = vmax.f32 %v145_v62, %v153_v47  ;;  %v62_v14 = vld [vmem:[%s472_s2 + $0x30] sm:$0xff]  ;;  %v155_v17 = vld [vmem:[%s478_s8 + $0x18] sm:$0xff]  ;;  %v54_v20 = vmax.f32 %v38_v12, %v46_v13  ;;  %v131_v21 = vmax.f32 %v115_v10, %v123_v5  ;;  %v124_v22 = vld [vmem:[%s476_s6 + $0x20] sm:$0xff] }
  0x12   :  { %v100_v18 = vmax.f32 %v84_v6, %v92_v2  ;;  %v85_v23 = vmax.f32 %v69_v11, %v77_v8  ;;  %v109_v24 = vld [vmem:[%s475_s5 + $0x28] sm:$0xff]  ;;  %v78_v25 = vld [vmem:[%s473_s3 + $0x30] sm:$0xff]  ;;  %v162_v26 = vmax.f32 %v146_v15, %v154_v0  ;;  %v39_v29 = vld [vmem:[%s470_s0 + $0x38] sm:$0xff] }
  0x13   :  { %168 = vst [vmem:[%s479_s9] sm:$0xff] %v160_v56  ;;  %169 = vst [vmem:[%s479_s9 + $0x8] sm:$0xff] %v161_v9  ;;  %v70_v28 = vmax.f32 %v54_v20, %v62_v14  ;;  %v47_v30 = vld [vmem:[%s471_s1 + $0x38] sm:$0xff]  ;;  %v147_v32 = vmax.f32 %v131_v21, %v139_v16  ;;  %v140_v33 = vld [vmem:[%s477_s7 + $0x20] sm:$0xff] }
  0x14   :  { %v116_v27 = vmax.f32 %v100_v18, %v108_v7  ;;  %v63_v31 = vld [vmem:[%s472_s2 + $0x38] sm:$0xff]  ;;  %v101_v34 = vmax.f32 %v85_v23, %v93_v19  ;;  %v94_v35 = vld [vmem:[%s474_s4 + $0x30] sm:$0xff]  ;;  %v55_v36 = vmax.f32 %v39_v29, %v47_v30  ;;  %170 = vst [vmem:[%s479_s9 + $0x10] sm:$0xff] %v162_v26  ;;  %v125_v38 = vld [vmem:[%s476_s6 + $0x28] sm:$0xff] }
  0x15   :  { %v86_v39 = vmax.f32 %v70_v28, %v78_v25  ;;  %v79_v40 = vld [vmem:[%s473_s3 + $0x38] sm:$0xff]  ;;  %v163_v41 = vmax.f32 %v147_v32, %v155_v17  ;;  %v156_v42 = vld [vmem:[%s478_s8 + $0x20] sm:$0xff]  ;;  %v110_v44 = vld [vmem:[%s475_s5 + $0x30] sm:$0xff] }
  0x16   :  { %v132_v37 = vmax.f32 %v116_v27, %v124_v22  ;;  %v117_v43 = vmax.f32 %v101_v34, %v109_v24  ;;  %v71_v45 = vmax.f32 %v55_v36, %v63_v31  ;;  %v141_v47 = vld [vmem:[%s477_s7 + $0x28] sm:$0xff]  ;;  %v95_v49 = vld [vmem:[%s474_s4 + $0x38] sm:$0xff]  ;;  %v126_v51 = vld [vmem:[%s476_s6 + $0x30] sm:$0xff] }
  0x17   :  { %v102_v48 = vmax.f32 %v86_v39, %v94_v35  ;;  %171 = vst [vmem:[%s479_s9 + $0x18] sm:$0xff] %v163_v41  ;;  %v157_v54 = vld [vmem:[%s478_s8 + $0x28] sm:$0xff]  ;;  %v111_v56 = vld [vmem:[%s475_s5 + $0x38] sm:$0xff]  ;;  %v142_v58 = vld [vmem:[%s477_s7 + $0x30] sm:$0xff] }
  0x18   :  { %v148_v46 = vmax.f32 %v132_v37, %v140_v33  ;;  %v133_v50 = vmax.f32 %v117_v43, %v125_v38  ;;  %v87_v52 = vmax.f32 %v71_v45, %v79_v40  ;;  %v127_v61 = vld [vmem:[%s476_s6 + $0x38] sm:$0xff]  ;;  %v158_v63 = vld [vmem:[%s478_s8 + $0x30] sm:$0xff] }
  0x19   :  { %v118_v55 = vmax.f32 %v102_v48, %v110_v44  ;;  %v143_v2 = vld [vmem:[%s477_s7 + $0x38] sm:$0xff] }
  0x1a   :  { %v164_v53 = vmax.f32 %v148_v46, %v156_v42  ;;  %v149_v57 = vmax.f32 %v133_v50, %v141_v47  ;;  %v103_v59 = vmax.f32 %v87_v52, %v95_v49  ;;  %v159_v5 = vld [vmem:[%s478_s8 + $0x38] sm:$0xff] }
  0x1b   :  { %v134_v60 = vmax.f32 %v118_v55, %v126_v51 }
  0x1c   :  { %172 = vst [vmem:[%s479_s9 + $0x20] sm:$0xff] %v164_v53  ;;  %v165_v62 = vmax.f32 %v149_v57, %v157_v54  ;;  %v119_v0 = vmax.f32 %v103_v59, %v111_v56 }
  0x1d   :  { %v150_v1 = vmax.f32 %v134_v60, %v142_v58 }
  0x1e   :  { %173 = vst [vmem:[%s479_s9 + $0x28] sm:$0xff] %v165_v62  ;;  %v135_v3 = vmax.f32 %v119_v0, %v127_v61 }
  0x1f   :  { %v166_v4 = vmax.f32 %v150_v1, %v158_v63 }
  0x20   :  { %v151_v6 = vmax.f32 %v135_v3, %v143_v2 }
  0x21   :  { %174 = vst [vmem:[%s479_s9 + $0x30] sm:$0xff] %v166_v4 }
  0x22   :  { %v167_v7 = vmax.f32 %v151_v6, %v159_v5 }
  0x24   :  { %175 = vst [vmem:[%s479_s9 + $0x38] sm:$0xff] %v167_v7 }

// kernel: resnet34_forward.39
= control target key start
LH: loop header
LB: loop body
LE: loop exit
PB: predicated region body
PF: predicated region fallthrough
CT: control target
= control target key end

     0   :  { %s1345_s12 = smov 0   ;;  %s1347_s13 = smov 0   ;;  %s1536_s0 = inlined_call_operand.vmem [shape: bf16[512,147], index: 0, kind: input, shape index: {}]   ;;  %s1537_s1 = inlined_call_operand.vmem [shape: bf16[147,128], index: 1, kind: input, shape index: {}]   ;;  %s1538_s2 = inlined_call_operand.vmem [shape: f32[1,128], index: 2, kind: input, shape index: {}]   ;;  %s1539_s3 = inlined_call_operand.vmem [shape: f32[512,128], index: 3, kind: output, shape index: {}]  }
   0x1   :  { %s1349_s14 = smov 0  }
   0x2 LB: > { %s32_s15 = sadd.s32 1, %s1317_s13  ;;  %p1127_p0 = scmp.ge.s32.totalorder %s1321_s14, 1  ;;  %s1321_s14 = sphi %s1349_s14, %s13_s14   ;;  %s1317_s13 = sphi %s1347_s13, %s1541_s13   ;;  %s1313_s12 = sphi %s1345_s12, %s1540_s12  }
   0x3   : > { %p34_p1 = scmp.ge.s32.totalorder %s32_s15, 2  ;;  %p191_p2 = scmp.lt.s32.totalorder %s1321_s14, 3 }
   0x5   : > { %s1543_s15 = smov (%p34_p1, %s32_s15), 0  ;;  %p192_p3 = pnand %p1127_p0, %p191_p2 }
   0x6   : > { %s1128_s22 = sshll.u32 (!%p192_p3), %s1313_s12, 5 }
   0x7   : > { %195 = sbr.rel (%p192_p3) target bundleno = 311 (0x137), region = 32  ;;  %p236_p4 = scmp.lt.s32.totalorder (!%p192_p3), %s1128_s22, 63 }
   0xc   : > { %v1241_v0 = vld [vmem:[%s1537_s1 + $0x38] sm:$0xff]   ;;  %v1323_v1 = vmov 0   ;;  %v1242_v2 = vld [vmem:[%s1537_s1 + $0x30] sm:$0xff]   ;;  %v1243_v3 = vld [vmem:[%s1537_s1 + $0x28] sm:$0xff]   ;;  %s1545_s22 = smov (!%p236_p4, %s1128_s22), 63  ;;  %vm588_vm0 = vcmask 154624  }
   0xd   : > { %644 = vmatprep.subr.bf16.mxu0 %v1323_v1  ;;  %1195 = vmatprep.subr.bf16.mxu1 %v1323_v1  ;;  %v1244_v4 = vld [vmem:[%s1537_s1 + $0x20] sm:$0xff]   ;;  %s1194_s25 = sshll.u32 %s1545_s22, 3  ;;  %v1245_v5 = vld [vmem:[%s1537_s1 + $0x18] sm:$0xff]   ;;  %v1246_v8 = vld [vmem:[%s1537_s1 + $0x10] sm:$0xff]   ;;  %vm637_vm1 = vcmask 1040384   ;;  %vm638_vm2 = vcmask 1041408  }
   0xe   : > { %645 = vmatpush1.bf16.msra.mxu0 %v1241_v0  ;;  %1205 = vmatpush1.bf16.msra.mxu1 %v1241_v0  ;;  %s1383_s28 = scalar_lea.vmem %s1536_s0, %s1194_s25  ;;  %v1247_v9 = vld [vmem:[%s1537_s1 + $0x8] sm:$0xff]   ;;  %v1324_v10 = vmov 65535   ;;  %v1248_v12 = vld [vmem:[%s1537_s1] sm:$0xff]   ;;  %s1463_s21 = scalar_lea.vmem %s1539_s3, %s1194_s25 }
   0xf   : > { %646 = vmatprep.subr.bf16.mxu0 %v1323_v1  ;;  %1196 = vmatprep.subr.bf16.mxu1 %v1323_v1  ;;  %v1253_v6 = vld [vmem:[%s1383_s28 + $0x4] ss:$8 sps:$4 sm:$0xff]   ;;  %v639_v11 = vsel %vm637_vm1, 4294967295, %v1324_v10  ;;  %v1249_v13 = vld [vmem:[%s1537_s1 + $0x48] ss:$0 sps:$4 sm:$0x33]  }
  0x10   : > { %v1256_v7 = vld [vmem:[%s1383_s28 + $0x84] ss:$8 sps:$4 sm:$0xff]   ;;  %1175 = vmatprep.mubr.msk.bf16.mxu0 %vm588_vm0, %v1253_v6  ;;  %v640_v14 = vsel %vm638_vm2, %v639_v11, 0  ;;  %v1251_v17 = vld [vmem:[%s1383_s28] ss:$8 sps:$4 sm:$0xff]  }
  0x11   : > { %1183 = vmatprep.mubr.msk.bf16.mxu1 %vm588_vm0, %v1256_v7  ;;  %v642_v15 = vand.u32 %v1249_v13, %v640_v14  ;;  %v1250_v16 = vld [vmem:[%s1537_s1 + $0x40] sm:$0xff]   ;;  %v1257_v19 = vld [vmem:[%s1383_s28 + $0x14] ss:$8 sps:$4 sm:$0xff]   ;;  %v1261_v21 = vld [vmem:[%s1383_s28 + $0x10] ss:$8 sps:$4 sm:$0xff]  }
  0x12   : > { %647 = vmatpush1.bf16.msra.mxu0 %v1242_v2  ;;  %1206 = vmatpush1.bf16.msra.mxu1 %v1242_v2  ;;  %v1254_v18 = vld [vmem:[%s1383_s28 + $0x80] ss:$8 sps:$4 sm:$0xff]   ;;  %v1259_v20 = vld [vmem:[%s1383_s28 + $0x94] ss:$8 sps:$4 sm:$0xff]   ;;  %v1262_v22 = vld [vmem:[%s1383_s28 + $0x90] ss:$8 sps:$4 sm:$0xff]  }
  0x13   : > { %648 = vmatprep.subr.bf16.mxu0 %v1323_v1  ;;  %1197 = vmatprep.subr.bf16.mxu1 %v1323_v1  ;;  %v1263_v23 = vld [vmem:[%s1383_s28 + $0x24] ss:$8 sps:$4 sm:$0xff]   ;;  %v1267_v25 = vld [vmem:[%s1383_s28 + $0x20] ss:$8 sps:$4 sm:$0xff]   ;;  %v1269_v27 = vld [vmem:[%s1383_s28 + $0x34] ss:$8 sps:$4 sm:$0xff]  }
  0x14   : > { %v1265_v24 = vld [vmem:[%s1383_s28 + $0xa4] ss:$8 sps:$4 sm:$0xff]   ;;  %v1268_v26 = vld [vmem:[%s1383_s28 + $0xa0] ss:$8 sps:$4 sm:$0xff]   ;;  %v1271_v28 = vld [vmem:[%s1383_s28 + $0xb4] ss:$8 sps:$4 sm:$0xff]  }
  0x15   : > { %v1273_v29 = vld [vmem:[%s1383_s28 + $0x30] ss:$8 sps:$4 sm:$0xff]   ;;  %v1275_v31 = vld [vmem:[%s1383_s28 + $0x44] ss:$8 sps:$4 sm:$0xff]   ;;  %v1279_v33 = vld [vmem:[%s1383_s28 + $0x40] ss:$8 sps:$4 sm:$0xff]  }
  0x16   : > { %649 = vmatpush1.bf16.msra.mxu0 %v1243_v3  ;;  %1207 = vmatpush1.bf16.msra.mxu1 %v1243_v3  ;;  %v1274_v30 = vld [vmem:[%s1383_s28 + $0xb0] ss:$8 sps:$4 sm:$0xff]   ;;  %v1277_v32 = vld [vmem:[%s1383_s28 + $0xc4] ss:$8 sps:$4 sm:$0xff]   ;;  %v1280_v34 = vld [vmem:[%s1383_s28 + $0xc0] ss:$8 sps:$4 sm:$0xff]  }
  0x17   : > { %650 = vmatprep.subr.bf16.mxu0 %v1323_v1  ;;  %1198 = vmatprep.subr.bf16.mxu1 %v1323_v1  ;;  %v1281_v35 = vld [vmem:[%s1383_s28 + $0x54] ss:$8 sps:$4 sm:$0xff]   ;;  %v1285_v37 = vld [vmem:[%s1383_s28 + $0x50] ss:$8 sps:$4 sm:$0xff]   ;;  %v1287_v39 = vld [vmem:[%s1383_s28 + $0x64] ss:$8 sps:$4 sm:$0xff]  }
  0x18   : > { %v1283_v36 = vld [vmem:[%s1383_s28 + $0xd4] ss:$8 sps:$4 sm:$0xff]   ;;  %v1286_v38 = vld [vmem:[%s1383_s28 + $0xd0] ss:$8 sps:$4 sm:$0xff]   ;;  %v1289_v40 = vld [vmem:[%s1383_s28 + $0xe4] ss:$8 sps:$4 sm:$0xff]  }
  0x19   : > { %v1291_v41 = vld [vmem:[%s1383_s28 + $0x60] ss:$8 sps:$4 sm:$0xff]   ;;  %v1293_v43 = vld [vmem:[%s1383_s28 + $0x74] ss:$8 sps:$4 sm:$0xff]   ;;  %v1297_v45 = vld [vmem:[%s1383_s28 + $0x70] ss:$8 sps:$4 sm:$0xff]  }
  0x1a   : > { %651 = vmatpush1.bf16.msra.mxu0 %v1244_v4  ;;  %1208 = vmatpush1.bf16.msra.mxu1 %v1244_v4  ;;  %v1292_v42 = vld [vmem:[%s1383_s28 + $0xe0] ss:$8 sps:$4 sm:$0xff]   ;;  %v1295_v44 = vld [vmem:[%s1383_s28 + $0xf4] ss:$8 sps:$4 sm:$0xff]   ;;  %v1298_v46 = vld [vmem:[%s1383_s28 + $0xf0] ss:$8 sps:$4 sm:$0xff]  }
  0x1b   : > { %652 = vmatprep.subr.bf16.mxu0 %v1323_v1  ;;  %1199 = vmatprep.subr.bf16.mxu1 %v1323_v1  ;;  %v1454_v47 = vld [vmem:[%s1538_s2] ss:$0 sm:$0xff] }
  0x1e   : > { %653 = vmatpush1.bf16.msra.mxu0 %v1245_v5  ;;  %1209 = vmatpush1.bf16.msra.mxu1 %v1245_v5 }
  0x1f   : > { %654 = vmatprep.subr.bf16.mxu0 %v1323_v1  ;;  %1200 = vmatprep.subr.bf16.mxu1 %v1323_v1 }
  0x22   : > { %655 = vmatpush1.bf16.msra.mxu0 %v1246_v8  ;;  %1210 = vmatpush1.bf16.msra.mxu1 %v1246_v8 }
  0x23   : > { %656 = vmatprep.subr.bf16.mxu0 %v1323_v1  ;;  %1201 = vmatprep.subr.bf16.mxu1 %v1323_v1 }
  0x26   : > { %657 = vmatpush1.bf16.msra.mxu0 %v1247_v9  ;;  %1211 = vmatpush1.bf16.msra.mxu1 %v1247_v9 }
  0x27   : > { %658 = vmatprep.subr.bf16.mxu0 %v1323_v1  ;;  %1202 = vmatprep.subr.bf16.mxu1 %v1323_v1 }
  0x2a   : > { %659 = vmatpush1.bf16.msra.mxu0 %v1248_v12  ;;  %1212 = vmatpush1.bf16.msra.mxu1 %v1248_v12 }
  0x2b   : > { %672 = vmatprep.subr.bf16.mxu0 %v1323_v1  ;;  %1203 = vmatprep.subr.bf16.mxu1 %v1323_v1 }
  0x2e   : > { %673 = vmatpush2.bf16.msra.mxu0 %v642_v15  ;;  %1213 = vmatpush2.bf16.msra.mxu1 %v642_v15 }
  0x2f   : > { %674 = vmatprep.subr.bf16.mxu0 %v1323_v1  ;;  %1204 = vmatprep.subr.bf16.mxu1 %v1323_v1 }
  0x32   : > { %675 = vmatpush2.bf16.msra.mxu0 %v1250_v16  ;;  %1214 = vmatpush2.bf16.msra.mxu1 %v1250_v16 }
  0x35   : > { %677 = vmatmul.mubr.bf16.vlgmr.msra.gmra.mxu0 %v1251_v17  ;;  %741 = vmatmul.mubr.bf16.vlgmr.msra.gmra.mxu1 %v1254_v18 }
  0x36   : > { %1176 = vmatprep.mubr.msk.bf16.mxu0 %vm588_vm0, %v1257_v19  ;;  %1184 = vmatprep.mubr.msk.bf16.mxu1 %vm588_vm0, %v1259_v20 }
  0x3d   : > { %685 = vmatmul.mubr.bf16.gmra.mxu0 %v1261_v21  ;;  %749 = vmatmul.mubr.bf16.gmra.mxu1 %v1262_v22 }
  0x3e   : > { %1177 = vmatprep.mubr.msk.bf16.mxu0 %vm588_vm0, %v1263_v23  ;;  %1185 = vmatprep.mubr.msk.bf16.mxu1 %vm588_vm0, %v1265_v24 }
  0x45   : > { %693 = vmatmul.mubr.bf16.gmra.mxu0 %v1267_v25  ;;  %757 = vmatmul.mubr.bf16.gmra.mxu1 %v1268_v26 }
  0x46   : > { %1178 = vmatprep.mubr.msk.bf16.mxu0 %vm588_vm0, %v1269_v27  ;;  %1186 = vmatprep.mubr.msk.bf16.mxu1 %vm588_vm0, %v1271_v28 }
  0x4d   : > { %701 = vmatmul.mubr.bf16.gmra.mxu0 %v1273_v29  ;;  %765 = vmatmul.mubr.bf16.gmra.mxu1 %v1274_v30 }
  0x4e   : > { %1179 = vmatprep.mubr.msk.bf16.mxu0 %vm588_vm0, %v1275_v31  ;;  %1187 = vmatprep.mubr.msk.bf16.mxu1 %vm588_vm0, %v1277_v32 }
  0x55   : > { %709 = vmatmul.mubr.bf16.gmra.mxu0 %v1279_v33  ;;  %773 = vmatmul.mubr.bf16.gmra.mxu1 %v1280_v34 }
  0x56   : > { %1180 = vmatprep.mubr.msk.bf16.mxu0 %vm588_vm0, %v1281_v35  ;;  %1188 = vmatprep.mubr.msk.bf16.mxu1 %vm588_vm0, %v1283_v36 }
  0x5d   : > { %717 = vmatmul.mubr.bf16.gmra.mxu0 %v1285_v37  ;;  %781 = vmatmul.mubr.bf16.gmra.mxu1 %v1286_v38 }
  0x5e   : > { %1181 = vmatprep.mubr.msk.bf16.mxu0 %vm588_vm0, %v1287_v39  ;;  %1189 = vmatprep.mubr.msk.bf16.mxu1 %vm588_vm0, %v1289_v40 }
  0x65   : > { %725 = vmatmul.mubr.bf16.gmra.mxu0 %v1291_v41  ;;  %789 = vmatmul.mubr.bf16.gmra.mxu1 %v1292_v42 }
  0x66   : > { %1182 = vmatprep.mubr.msk.bf16.mxu0 %vm588_vm0, %v1293_v43  ;;  %1190 = vmatprep.mubr.msk.bf16.mxu1 %vm588_vm0, %v1295_v44 }
  0x6d   : > { %733 = vmatmul.mubr.bf16.gmra.mxu0 %v1297_v45  ;;  %797 = vmatmul.mubr.bf16.gmra.mxu1 %v1298_v46 }
  0xf5   : > { %v678_v48 = vpop.f32.mrf.mxu0  ;;  %v742_v49 = vpop.f32.mrf.mxu1 }
  0xf6   : > { %v911_v50 = vadd.f32 %v1454_v47, %v678_v48  ;;  %v927_v51 = vadd.f32 %v1454_v47, %v742_v49 }
  0xf7   : > { %v680_v52 = vpop.f32.mrf.mxu0  ;;  %v744_v53 = vpop.f32.mrf.mxu1 }
  0xf8   : > { %v943_v54 = vmax.f32 %v911_v50, 0.0  ;;  %v959_v55 = vmax.f32 %v927_v51, 0.0 }
  0xf9   : > { %v681_v56 = vpop.f32.mrf.mxu0  ;;  %v745_v57 = vpop.f32.mrf.mxu1 }
  0xfa   : > { %975 = vst [vmem:[%s1463_s21] sm:$0xff] %v943_v54  ;;  %991 = vst [vmem:[%s1463_s21 + $0x80] sm:$0xff] %v959_v55  ;;  %v912_v58 = vadd.f32 %v1454_v47, %v681_v56  ;;  %v928_v59 = vadd.f32 %v1454_v47, %v745_v57 }
  0xfb   : > { %v683_v60 = vpop.f32.mrf.mxu0  ;;  %v747_v61 = vpop.f32.mrf.mxu1 }
  0xfc   : > { %v944_v62 = vmax.f32 %v912_v58, 0.0  ;;  %v960_v63 = vmax.f32 %v928_v59, 0.0 }
  0xfd   : > { %v686_v0 = vpop.f32.mrf.mxu0  ;;  %v750_v1 = vpop.f32.mrf.mxu1 }
  0xfe   : > { %976 = vst [vmem:[%s1463_s21 + $0x8] sm:$0xff] %v944_v62  ;;  %992 = vst [vmem:[%s1463_s21 + $0x88] sm:$0xff] %v960_v63  ;;  %v913_v2 = vadd.f32 %v1454_v47, %v686_v0  ;;  %v929_v3 = vadd.f32 %v1454_v47, %v750_v1 }
  0xff   : > { %v688_v4 = vpop.f32.mrf.mxu0  ;;  %v752_v5 = vpop.f32.mrf.mxu1 }
 0x100   : > { %v945_v6 = vmax.f32 %v913_v2, 0.0  ;;  %v961_v7 = vmax.f32 %v929_v3, 0.0 }
 0x101   : > { %v689_v8 = vpop.f32.mrf.mxu0  ;;  %v753_v9 = vpop.f32.mrf.mxu1 }
 0x102   : > { %977 = vst [vmem:[%s1463_s21 + $0x10] sm:$0xff] %v945_v6  ;;  %993 = vst [vmem:[%s1463_s21 + $0x90] sm:$0xff] %v961_v7  ;;  %v914_v10 = vadd.f32 %v1454_v47, %v689_v8  ;;  %v930_v11 = vadd.f32 %v1454_v47, %v753_v9 }
 0x103   : > { %v691_v12 = vpop.f32.mrf.mxu0  ;;  %v755_v13 = vpop.f32.mrf.mxu1 }
 0x104   : > { %v946_v14 = vmax.f32 %v914_v10, 0.0  ;;  %v962_v15 = vmax.f32 %v930_v11, 0.0 }
 0x105   : > { %v694_v16 = vpop.f32.mrf.mxu0  ;;  %v758_v17 = vpop.f32.mrf.mxu1 }
 0x106   : > { %978 = vst [vmem:[%s1463_s21 + $0x18] sm:$0xff] %v946_v14  ;;  %994 = vst [vmem:[%s1463_s21 + $0x98] sm:$0xff] %v962_v15  ;;  %v915_v18 = vadd.f32 %v1454_v47, %v694_v16  ;;  %v931_v19 = vadd.f32 %v1454_v47, %v758_v17 }
 0x107   : > { %v696_v20 = vpop.f32.mrf.mxu0  ;;  %v760_v21 = vpop.f32.mrf.mxu1 }
 0x108   : > { %v947_v22 = vmax.f32 %v915_v18, 0.0  ;;  %v963_v23 = vmax.f32 %v931_v19, 0.0 }
 0x109   : > { %v697_v24 = vpop.f32.mrf.mxu0  ;;  %v761_v25 = vpop.f32.mrf.mxu1 }
 0x10a   : > { %979 = vst [vmem:[%s1463_s21 + $0x20] sm:$0xff] %v947_v22  ;;  %995 = vst [vmem:[%s1463_s21 + $0xa0] sm:$0xff] %v963_v23  ;;  %v916_v26 = vadd.f32 %v1454_v47, %v697_v24  ;;  %v932_v27 = vadd.f32 %v1454_v47, %v761_v25 }
 0x10b   : > { %v699_v28 = vpop.f32.mrf.mxu0  ;;  %v763_v29 = vpop.f32.mrf.mxu1 }
 0x10c   : > { %v948_v30 = vmax.f32 %v916_v26, 0.0  ;;  %v964_v31 = vmax.f32 %v932_v27, 0.0 }
 0x10d   : > { %v702_v32 = vpop.f32.mrf.mxu0  ;;  %v766_v33 = vpop.f32.mrf.mxu1 }
 0x10e   : > { %980 = vst [vmem:[%s1463_s21 + $0x28] sm:$0xff] %v948_v30  ;;  %996 = vst [vmem:[%s1463_s21 + $0xa8] sm:$0xff] %v964_v31  ;;  %v917_v34 = vadd.f32 %v1454_v47, %v702_v32  ;;  %v933_v35 = vadd.f32 %v1454_v47, %v766_v33 }
 0x10f   : > { %v704_v36 = vpop.f32.mrf.mxu0  ;;  %v768_v37 = vpop.f32.mrf.mxu1 }
 0x110   : > { %v949_v38 = vmax.f32 %v917_v34, 0.0  ;;  %v965_v39 = vmax.f32 %v933_v35, 0.0 }
 0x111   : > { %v705_v40 = vpop.f32.mrf.mxu0  ;;  %v769_v41 = vpop.f32.mrf.mxu1 }
 0x112   : > { %981 = vst [vmem:[%s1463_s21 + $0x30] sm:$0xff] %v949_v38  ;;  %997 = vst [vmem:[%s1463_s21 + $0xb0] sm:$0xff] %v965_v39  ;;  %v918_v42 = vadd.f32 %v1454_v47, %v705_v40  ;;  %v934_v43 = vadd.f32 %v1454_v47, %v769_v41 }
 0x113   : > { %v707_v44 = vpop.f32.mrf.mxu0  ;;  %v771_v45 = vpop.f32.mrf.mxu1 }
 0x114   : > { %v950_v46 = vmax.f32 %v918_v42, 0.0  ;;  %v966_v48 = vmax.f32 %v934_v43, 0.0 }
 0x115   : > { %v710_v49 = vpop.f32.mrf.mxu0  ;;  %v774_v50 = vpop.f32.mrf.mxu1 }
 0x116   : > { %982 = vst [vmem:[%s1463_s21 + $0x38] sm:$0xff] %v950_v46  ;;  %998 = vst [vmem:[%s1463_s21 + $0xb8] sm:$0xff] %v966_v48  ;;  %v919_v51 = vadd.f32 %v1454_v47, %v710_v49  ;;  %v935_v52 = vadd.f32 %v1454_v47, %v774_v50 }
 0x117   : > { %v712_v53 = vpop.f32.mrf.mxu0  ;;  %v776_v54 = vpop.f32.mrf.mxu1 }
 0x118   : > { %v951_v55 = vmax.f32 %v919_v51, 0.0  ;;  %v967_v56 = vmax.f32 %v935_v52, 0.0 }
 0x119   : > { %v713_v57 = vpop.f32.mrf.mxu0  ;;  %v777_v58 = vpop.f32.mrf.mxu1 }
 0x11a   : > { %983 = vst [vmem:[%s1463_s21 + $0x40] sm:$0xff] %v951_v55  ;;  %999 = vst [vmem:[%s1463_s21 + $0xc0] sm:$0xff] %v967_v56  ;;  %v920_v59 = vadd.f32 %v1454_v47, %v713_v57  ;;  %v936_v60 = vadd.f32 %v1454_v47, %v777_v58 }
 0x11b   : > { %v715_v61 = vpop.f32.mrf.mxu0  ;;  %v779_v62 = vpop.f32.mrf.mxu1 }
 0x11c   : > { %v952_v63 = vmax.f32 %v920_v59, 0.0  ;;  %v968_v0 = vmax.f32 %v936_v60, 0.0 }
 0x11d   : > { %v718_v1 = vpop.f32.mrf.mxu0  ;;  %v782_v2 = vpop.f32.mrf.mxu1 }
 0x11e   : > { %984 = vst [vmem:[%s1463_s21 + $0x48] sm:$0xff] %v952_v63  ;;  %1000 = vst [vmem:[%s1463_s21 + $0xc8] sm:$0xff] %v968_v0  ;;  %v921_v3 = vadd.f32 %v1454_v47, %v718_v1  ;;  %v937_v4 = vadd.f32 %v1454_v47, %v782_v2 }
 0x11f   : > { %v720_v5 = vpop.f32.mrf.mxu0  ;;  %v784_v6 = vpop.f32.mrf.mxu1 }
 0x120   : > { %v953_v7 = vmax.f32 %v921_v3, 0.0  ;;  %v969_v8 = vmax.f32 %v937_v4, 0.0 }
 0x121   : > { %v721_v9 = vpop.f32.mrf.mxu0  ;;  %v785_v10 = vpop.f32.mrf.mxu1 }
 0x122   : > { %985 = vst [vmem:[%s1463_s21 + $0x50] sm:$0xff] %v953_v7  ;;  %1001 = vst [vmem:[%s1463_s21 + $0xd0] sm:$0xff] %v969_v8  ;;  %v922_v11 = vadd.f32 %v1454_v47, %v721_v9  ;;  %v938_v12 = vadd.f32 %v1454_v47, %v785_v10 }
 0x123   : > { %v723_v13 = vpop.f32.mrf.mxu0  ;;  %v787_v14 = vpop.f32.mrf.mxu1 }
 0x124   : > { %v954_v15 = vmax.f32 %v922_v11, 0.0  ;;  %v970_v16 = vmax.f32 %v938_v12, 0.0 }
 0x125   : > { %v726_v17 = vpop.f32.mrf.mxu0  ;;  %v790_v18 = vpop.f32.mrf.mxu1 }
 0x126   : > { %986 = vst [vmem:[%s1463_s21 + $0x58] sm:$0xff] %v954_v15  ;;  %1002 = vst [vmem:[%s1463_s21 + $0xd8] sm:$0xff] %v970_v16  ;;  %v923_v19 = vadd.f32 %v1454_v47, %v726_v17  ;;  %v939_v20 = vadd.f32 %v1454_v47, %v790_v18 }
 0x127   : > { %v728_v21 = vpop.f32.mrf.mxu0  ;;  %v792_v22 = vpop.f32.mrf.mxu1 }
 0x128   : > { %v955_v23 = vmax.f32 %v923_v19, 0.0  ;;  %v971_v24 = vmax.f32 %v939_v20, 0.0 }
 0x129   : > { %v729_v25 = vpop.f32.mrf.mxu0  ;;  %v793_v26 = vpop.f32.mrf.mxu1 }
 0x12a   : > { %987 = vst [vmem:[%s1463_s21 + $0x60] sm:$0xff] %v955_v23  ;;  %1003 = vst [vmem:[%s1463_s21 + $0xe0] sm:$0xff] %v971_v24  ;;  %v924_v27 = vadd.f32 %v1454_v47, %v729_v25  ;;  %v940_v28 = vadd.f32 %v1454_v47, %v793_v26 }
 0x12b   : > { %v731_v29 = vpop.f32.mrf.mxu0  ;;  %v795_v30 = vpop.f32.mrf.mxu1 }
 0x12c   : > { %v956_v31 = vmax.f32 %v924_v27, 0.0  ;;  %v972_v32 = vmax.f32 %v940_v28, 0.0 }
 0x12d   : > { %v734_v33 = vpop.f32.mrf.mxu0  ;;  %v798_v34 = vpop.f32.mrf.mxu1 }
 0x12e   : > { %988 = vst [vmem:[%s1463_s21 + $0x68] sm:$0xff] %v956_v31  ;;  %1004 = vst [vmem:[%s1463_s21 + $0xe8] sm:$0xff] %v972_v32  ;;  %v925_v35 = vadd.f32 %v1454_v47, %v734_v33  ;;  %v941_v36 = vadd.f32 %v1454_v47, %v798_v34 }
 0x12f   : > { %v736_v37 = vpop.f32.mrf.mxu0  ;;  %v800_v38 = vpop.f32.mrf.mxu1 }
 0x130   : > { %v957_v39 = vmax.f32 %v925_v35, 0.0  ;;  %v973_v40 = vmax.f32 %v941_v36, 0.0 }
 0x131   : > { %v737_v41 = vpop.f32.mrf.mxu0  ;;  %v801_v42 = vpop.f32.mrf.mxu1 }
 0x132   : > { %989 = vst [vmem:[%s1463_s21 + $0x70] sm:$0xff] %v957_v39  ;;  %1005 = vst [vmem:[%s1463_s21 + $0xf0] sm:$0xff] %v973_v40  ;;  %v926_v43 = vadd.f32 %v1454_v47, %v737_v41  ;;  %v942_v44 = vadd.f32 %v1454_v47, %v801_v42 }
 0x133   : > { %v739_v45 = vpop.f32.mrf.mxu0  ;;  %v803_v46 = vpop.f32.mrf.mxu1 }
 0x134   : > { %v958_v48 = vmax.f32 %v926_v43, 0.0  ;;  %v974_v49 = vmax.f32 %v942_v44, 0.0 }
 0x136   : > { %990 = vst [vmem:[%s1463_s21 + $0x78] sm:$0xff] %v958_v48  ;;  %1006 = vst [vmem:[%s1463_s21 + $0xf8] sm:$0xff] %v974_v49 }
 0x137 PF: > { %s13_s14 = sadd.s32 1, %s1321_s14   ;;  %s1540_s12 = smov %s1317_s13 }
 0x138   : > { %p10_p5 = scmp.ge.s32.totalorder %s13_s14, 4   ;;  %s1541_s13 = smov %s1543_s15 }
 0x13a   :  { %12 = sbr.rel (!%p10_p5) target bundleno = 2 (0x2), region = 76 }

// kernel: resnet34_forward.41
= control target key start
LH: loop header
LB: loop body
LE: loop exit
PB: predicated region body
PF: predicated region fallthrough
CT: control target
= control target key end

     0   :  { %vm587_vm0 = vcmask 523264   ;;  %s1726_s1 = inlined_call_operand.vmem [shape: bf16[576,128], index: 1, kind: input, shape index: {}]   ;;  %s1727_s0 = inlined_call_operand.vmem [shape: bf16[128,576], index: 0, kind: input, shape index: {}]   ;;  %s1728_s2 = inlined_call_operand.vmem [shape: f32[1,128], index: 2, kind: input, shape index: {}]   ;;  %s1729_s3 = inlined_call_operand.vmem [shape: f32[128,128], index: 3, kind: output, shape index: {}]  }
   0x1   :  { %v1270_v0 = vld [vmem:[%s1726_s1 + $0x78] sm:$0xff]   ;;  %v1274_v4 = vld [vmem:[%s1726_s1 + $0x70] sm:$0xff]   ;;  %v1278_v8 = vld [vmem:[%s1726_s1 + $0x68] sm:$0xff]  }
   0x2   :  { %v1271_v1 = vld [vmem:[%s1726_s1 + $0xf8] sm:$0xff]   ;;  %1098 = vmatprep.subr.bf16.mxu0 %v1270_v0  ;;  %v1275_v5 = vld [vmem:[%s1726_s1 + $0xf0] sm:$0xff]   ;;  %v1279_v9 = vld [vmem:[%s1726_s1 + $0xe8] sm:$0xff]  }
   0x3   :  { %v1272_v2 = vld [vmem:[%s1726_s1 + $0x38] sm:$0xff]   ;;  %1162 = vmatprep.subr.bf16.mxu1 %v1271_v1  ;;  %v1276_v6 = vld [vmem:[%s1726_s1 + $0x30] sm:$0xff]   ;;  %v1280_v10 = vld [vmem:[%s1726_s1 + $0x28] sm:$0xff]  }
   0x4   :  { %v1273_v3 = vld [vmem:[%s1726_s1 + $0xb8] sm:$0xff]   ;;  %1099 = vmatpush3.bf16.msra.mxu0 %v1272_v2  ;;  %v1277_v7 = vld [vmem:[%s1726_s1 + $0xb0] sm:$0xff]   ;;  %v1281_v11 = vld [vmem:[%s1726_s1 + $0xa8] sm:$0xff]  }
   0x5   :  { %1163 = vmatpush3.bf16.msra.mxu1 %v1273_v3  ;;  %1100 = vmatprep.subr.bf16.mxu0 %v1274_v4  ;;  %v1282_v12 = vld [vmem:[%s1726_s1 + $0x60] sm:$0xff]   ;;  %v1286_v16 = vld [vmem:[%s1726_s1 + $0x58] sm:$0xff]   ;;  %v1290_v20 = vld [vmem:[%s1726_s1 + $0x50] sm:$0xff]  }
   0x6   :  { %1164 = vmatprep.subr.bf16.mxu1 %v1275_v5  ;;  %v1283_v13 = vld [vmem:[%s1726_s1 + $0xe0] sm:$0xff]   ;;  %v1287_v17 = vld [vmem:[%s1726_s1 + $0xd8] sm:$0xff]   ;;  %v1291_v21 = vld [vmem:[%s1726_s1 + $0xd0] sm:$0xff]  }
   0x7   :  { %v1284_v14 = vld [vmem:[%s1726_s1 + $0x20] sm:$0xff]   ;;  %v1288_v18 = vld [vmem:[%s1726_s1 + $0x18] sm:$0xff]   ;;  %v1292_v22 = vld [vmem:[%s1726_s1 + $0x10] sm:$0xff]  }
   0x8   :  { %1101 = vmatpush3.bf16.msra.mxu0 %v1276_v6  ;;  %v1285_v15 = vld [vmem:[%s1726_s1 + $0xa0] sm:$0xff]   ;;  %v1289_v19 = vld [vmem:[%s1726_s1 + $0x98] sm:$0xff]   ;;  %v1293_v23 = vld [vmem:[%s1726_s1 + $0x90] sm:$0xff]  }
   0x9   :  { %1165 = vmatpush3.bf16.msra.mxu1 %v1277_v7  ;;  %1102 = vmatprep.subr.bf16.mxu0 %v1278_v8  ;;  %v1294_v24 = vld [vmem:[%s1726_s1 + $0x48] sm:$0xff]   ;;  %v1298_v28 = vld [vmem:[%s1726_s1 + $0x40] sm:$0xff]   ;;  %v1308_v36 = vld [vmem:[%s1726_s1 + $0x118] sm:$0xff]  }
   0xa   :  { %1166 = vmatprep.subr.bf16.mxu1 %v1279_v9  ;;  %v1295_v25 = vld [vmem:[%s1726_s1 + $0xc8] sm:$0xff]   ;;  %v1299_v29 = vld [vmem:[%s1726_s1 + $0xc0] sm:$0xff]   ;;  %v1321_v42 = vld [vmem:[%s1726_s1 + $0x110] sm:$0xff]  }
   0xb   :  { %v1296_v26 = vld [vmem:[%s1726_s1 + $0x8] sm:$0xff]   ;;  %v1300_v30 = vld [vmem:[%s1726_s1] sm:$0xff]   ;;  %v1317_v43 = vld [vmem:[%s1727_s0 + $0x5c] ss:$20 sps:$4 sm:$0xff]  }
   0xc   :  { %1103 = vmatpush3.bf16.msra.mxu0 %v1280_v10  ;;  %v1297_v27 = vld [vmem:[%s1726_s1 + $0x88] sm:$0xff]   ;;  %v1301_v31 = vld [vmem:[%s1726_s1 + $0x80] sm:$0xff]   ;;  %v1322_v47 = vld [vmem:[%s1727_s0 + $0x7c] ss:$20 sps:$4 sm:$0xff]  }
   0xd   :  { %1167 = vmatpush3.bf16.msra.mxu1 %v1281_v11  ;;  %1104 = vmatprep.subr.bf16.mxu0 %v1282_v12  ;;  %v1302_v32 = vld [vmem:[%s1727_s0] ss:$20 sps:$4 sm:$0xff]   ;;  %v1304_v33 = vld [vmem:[%s1727_s0 + $0x4] ss:$20 sps:$4 sm:$0xff]   ;;  %v1305_v34 = vld [vmem:[%s1727_s0 + $0x8] ss:$20 sps:$4 sm:$0xff]  }
   0xe   :  { %1168 = vmatprep.subr.bf16.mxu1 %v1283_v13  ;;  %v1307_v35 = vld [vmem:[%s1727_s0 + $0xc] ss:$20 sps:$4 sm:$0xff]   ;;  %644 = vmatprep.mubr.bf16.mxu0 %v1304_v33  ;;  %v1311_v38 = vld [vmem:[%s1727_s0 + $0x34] ss:$20 sps:$4 sm:$0xff]   ;;  %v1314_v40 = vld [vmem:[%s1727_s0 + $0x30] ss:$20 sps:$4 sm:$0xff]  }
   0xf   :  { %741 = vmatprep.mubr.bf16.mxu1 %v1307_v35  ;;  %v1309_v37 = vld [vmem:[%s1727_s0 + $0x2c] ss:$20 sps:$4 sm:$0xff]   ;;  %v1313_v39 = vld [vmem:[%s1727_s0 + $0x28] ss:$20 sps:$4 sm:$0xff]   ;;  %v1319_v44 = vld [vmem:[%s1727_s0 + $0x50] ss:$20 sps:$4 sm:$0xff]  }
  0x10   :  { %1105 = vmatpush3.bf16.msra.mxu0 %v1284_v14  ;;  %v1315_v41 = vld [vmem:[%s1727_s0 + $0x54] ss:$20 sps:$4 sm:$0xff]   ;;  %v1320_v45 = vld [vmem:[%s1727_s0 + $0x58] ss:$20 sps:$4 sm:$0xff]   ;;  %v1347_v49 = vld [vmem:[%s1726_s1 + $0x100] sm:$0xff]  }
  0x11   :  { %1169 = vmatpush3.bf16.msra.mxu1 %v1285_v15  ;;  %1106 = vmatprep.subr.bf16.mxu0 %v1286_v16  ;;  %v1334_v46 = vld [vmem:[%s1726_s1 + $0x108] sm:$0xff]   ;;  %v1324_v48 = vld [vmem:[%s1727_s0 + $0x84] ss:$20 sps:$4 sm:$0xff]   ;;  %v1327_v51 = vld [vmem:[%s1727_s0 + $0x80] ss:$20 sps:$4 sm:$0xff]  }
  0x12   :  { %1170 = vmatprep.subr.bf16.mxu1 %v1287_v17  ;;  %v1326_v50 = vld [vmem:[%s1727_s0 + $0x78] ss:$20 sps:$4 sm:$0xff]   ;;  %v1332_v54 = vld [vmem:[%s1727_s0 + $0xa0] ss:$20 sps:$4 sm:$0xff]   ;;  %v1333_v55 = vld [vmem:[%s1727_s0 + $0xa8] ss:$20 sps:$4 sm:$0xff]  }
  0x13   :  { %v1328_v52 = vld [vmem:[%s1727_s0 + $0xa4] ss:$20 sps:$4 sm:$0xff]   ;;  %v1330_v53 = vld [vmem:[%s1727_s0 + $0xac] ss:$20 sps:$4 sm:$0xff]   ;;  %v1337_v57 = vld [vmem:[%s1727_s0 + $0xd4] ss:$20 sps:$4 sm:$0xff]  }
  0x14   :  { %1107 = vmatpush3.bf16.msra.mxu0 %v1288_v18  ;;  %v1335_v56 = vld [vmem:[%s1727_s0 + $0xcc] ss:$20 sps:$4 sm:$0xff]   ;;  %v1339_v58 = vld [vmem:[%s1727_s0 + $0xc8] ss:$20 sps:$4 sm:$0xff]   ;;  %v1340_v59 = vld [vmem:[%s1727_s0 + $0xd0] ss:$20 sps:$4 sm:$0xff]  }
  0x15   :  { %1171 = vmatpush3.bf16.msra.mxu1 %v1289_v19  ;;  %1108 = vmatprep.subr.bf16.mxu0 %v1290_v20  ;;  %v1341_v60 = vld [vmem:[%s1727_s0 + $0xf4] ss:$20 sps:$4 sm:$0xff]   ;;  %v1343_v61 = vld [vmem:[%s1727_s0 + $0xfc] ss:$20 sps:$4 sm:$0xff]   ;;  %v1346_v63 = vld [vmem:[%s1727_s0 + $0xf8] ss:$20 sps:$4 sm:$0xff]  }
  0x16   :  { %1172 = vmatprep.subr.bf16.mxu1 %v1291_v21  ;;  %v1345_v62 = vld [vmem:[%s1727_s0 + $0xf0] ss:$20 sps:$4 sm:$0xff]   ;;  %v1352_v2 = vld [vmem:[%s1727_s0 + $0x118] ss:$20 sps:$4 sm:$0xff]   ;;  %v1353_v3 = vld [vmem:[%s1727_s0 + $0x120] ss:$20 sps:$4 sm:$0xff]  }
  0x17   :  { %v1348_v0 = vld [vmem:[%s1727_s0 + $0x11c] ss:$20 sps:$4 sm:$0xff]   ;;  %v1350_v1 = vld [vmem:[%s1727_s0 + $0x124] ss:$20 sps:$4 sm:$0xff]   ;;  %v1358_v8 = vld [vmem:[%s1727_s0 + $0x60] ss:$20 sps:$4 sm:$0xff]  }
  0x18   :  { %1109 = vmatpush3.bf16.msra.mxu0 %v1292_v22  ;;  %v1354_v4 = vld [vmem:[%s1727_s0 + $0x10] ss:$20 sps:$4 sm:$0xff]   ;;  %v1356_v6 = vld [vmem:[%s1727_s0 + $0x38] ss:$20 sps:$4 sm:$0xff]   ;;  %v1359_v9 = vld [vmem:[%s1727_s0 + $0x100] ss:$20 sps:$4 sm:$0xff]  }
  0x19   :  { %1173 = vmatpush3.bf16.msra.mxu1 %v1293_v23  ;;  %1110 = vmatprep.subr.bf16.mxu0 %v1294_v24  ;;  %v1355_v5 = vld [vmem:[%s1727_s0 + $0xb0] ss:$20 sps:$4 sm:$0xff]   ;;  %v1357_v7 = vld [vmem:[%s1727_s0 + $0xd8] ss:$20 sps:$4 sm:$0xff]   ;;  %v1360_v10 = vld [vmem:[%s1727_s0 + $0x88] ss:$20 sps:$4 sm:$0xff]  }
  0x1a   :  { %1174 = vmatprep.subr.bf16.mxu1 %v1295_v25  ;;  %v1361_v11 = vld [vmem:[%s1727_s0 + $0x128] ss:$20 sps:$4 sm:$0xff]  }
  0x1c   :  { %1111 = vmatpush3.bf16.msra.mxu0 %v1296_v26 }
  0x1d   :  { %1175 = vmatpush3.bf16.msra.mxu1 %v1297_v27  ;;  %1112 = vmatprep.subr.bf16.mxu0 %v1298_v28 }
  0x1e   :  { %1176 = vmatprep.subr.bf16.mxu1 %v1299_v29 }
  0x20   :  { %1113 = vmatpush3.bf16.msra.mxu0 %v1300_v30 }
  0x21   :  { %1177 = vmatpush3.bf16.msra.mxu1 %v1301_v31  ;;  %1238 = vmatprep.subr.bf16.mxu0 %v1308_v36 }
  0x22   :  { %1262 = vmatprep.subr.bf16.mxu1 %v1308_v36 }
  0x23   :  { %645 = vmatmul.mubr.bf16.vlgmr.msra.gmra.mxu0 %v1302_v32 }
  0x24   :  { %742 = vmatmul.mubr.bf16.vlgmr.msra.gmra.mxu1 %v1305_v34  ;;  %1239 = vmatpush3.bf16.msra.mxu0 %v1308_v36 }
  0x25   :  { %1266 = vmatpush3.bf16.msra.mxu1 %v1308_v36  ;;  %652 = vmatprep.mubr.bf16.mxu0 %v1309_v37 }
  0x26   :  { %749 = vmatprep.mubr.bf16.mxu1 %v1311_v38  ;;  %1240 = vmatprep.subr.bf16.mxu0 %v1321_v42 }
  0x27   :  { %1263 = vmatprep.subr.bf16.mxu1 %v1321_v42 }
  0x28   :  { %1241 = vmatpush3.bf16.msra.mxu0 %v1321_v42 }
  0x29   :  { %1267 = vmatpush3.bf16.msra.mxu1 %v1321_v42  ;;  %1242 = vmatprep.subr.bf16.mxu0 %v1334_v46 }
  0x2a   :  { %1264 = vmatprep.subr.bf16.mxu1 %v1334_v46 }
  0x2b   :  { %653 = vmatmul.mubr.bf16.gmra.mxu0 %v1313_v39 }
  0x2c   :  { %750 = vmatmul.mubr.bf16.gmra.mxu1 %v1314_v40  ;;  %660 = vmatprep.mubr.bf16.mxu0 %v1315_v41 }
  0x2d   :  { %757 = vmatprep.mubr.bf16.mxu1 %v1317_v43  ;;  %1243 = vmatpush3.bf16.msra.mxu0 %v1334_v46 }
  0x2e   :  { %1268 = vmatpush3.bf16.msra.mxu1 %v1334_v46  ;;  %1244 = vmatprep.subr.bf16.mxu0 %v1347_v49 }
  0x2f   :  { %1265 = vmatprep.subr.bf16.mxu1 %v1347_v49 }
  0x31   :  { %1245 = vmatpush3.bf16.msra.mxu0 %v1347_v49 }
  0x32   :  { %1269 = vmatpush3.bf16.msra.mxu1 %v1347_v49 }
  0x33   :  { %661 = vmatmul.mubr.bf16.gmra.mxu0 %v1319_v44 }
  0x34   :  { %758 = vmatmul.mubr.bf16.gmra.mxu1 %v1320_v45  ;;  %668 = vmatprep.mubr.bf16.mxu0 %v1322_v47 }
  0x35   :  { %765 = vmatprep.mubr.bf16.mxu1 %v1324_v48 }
  0x3b   :  { %669 = vmatmul.mubr.bf16.gmra.mxu0 %v1326_v50 }
  0x3c   :  { %766 = vmatmul.mubr.bf16.gmra.mxu1 %v1327_v51  ;;  %676 = vmatprep.mubr.bf16.mxu0 %v1328_v52 }
  0x3d   :  { %773 = vmatprep.mubr.bf16.mxu1 %v1330_v53 }
  0x43   :  { %677 = vmatmul.mubr.bf16.gmra.mxu0 %v1332_v54 }
  0x44   :  { %774 = vmatmul.mubr.bf16.gmra.mxu1 %v1333_v55  ;;  %684 = vmatprep.mubr.bf16.mxu0 %v1335_v56 }
  0x45   :  { %781 = vmatprep.mubr.bf16.mxu1 %v1337_v57 }
  0x4b   :  { %685 = vmatmul.mubr.bf16.gmra.mxu0 %v1339_v58 }
  0x4c   :  { %782 = vmatmul.mubr.bf16.gmra.mxu1 %v1340_v59  ;;  %692 = vmatprep.mubr.bf16.mxu0 %v1341_v60 }
  0x4d   :  { %789 = vmatprep.mubr.bf16.mxu1 %v1343_v61 }
  0x53   :  { %693 = vmatmul.mubr.bf16.gmra.mxu0 %v1345_v62 }
  0x54   :  { %790 = vmatmul.mubr.bf16.gmra.mxu1 %v1346_v63  ;;  %700 = vmatprep.mubr.bf16.mxu0 %v1348_v0 }
  0x55   :  { %797 = vmatprep.mubr.bf16.mxu1 %v1350_v1 }
  0x5b   :  { %701 = vmatmul.mubr.bf16.gmra.mxu0 %v1352_v2 }
  0x5c   :  { %798 = vmatmul.mubr.bf16.gmra.mxu1 %v1353_v3  ;;  %1246 = vmatprep.mubr.msk.bf16.mxu0 %vm587_vm0, %v1354_v4 }
  0x5d   :  { %1254 = vmatprep.mubr.msk.bf16.mxu1 %vm587_vm0, %v1355_v5 }
  0x63   :  { %1247 = vmatmul.mubr.msk.bf16.vlgmr.msra.gmra.mxu0 %vm587_vm0, %v1356_v6 }
  0x64   :  { %1255 = vmatmul.mubr.msk.bf16.vlgmr.msra.gmra.mxu1 %vm587_vm0, %v1357_v7  ;;  %1250 = vmatprep.mubr.msk.bf16.mxu0 %vm587_vm0, %v1358_v8 }
  0x65   :  { %1258 = vmatprep.mubr.msk.bf16.mxu1 %vm587_vm0, %v1359_v9 }
  0x6b   :  { %1251 = vmatmul.mubr.msk.bf16.gmra.mxu0 %vm587_vm0, %v1360_v10 }
  0x6c   :  { %1259 = vmatmul.mubr.msk.bf16.gmra.mxu1 %vm587_vm0, %v1361_v11 }
  0xe3   :  { %v1114_v12 = vpop.f32.mrf.mxu0 }
  0xe4   :  { %v1178_v13 = vpop.f32.mrf.mxu1 }
  0xe5   :  { %v1115_v14 = vpop.f32.mrf.mxu0 }
  0xe6   :  { %v1179_v15 = vpop.f32.mrf.mxu1  ;;  %v1116_v5 = vadd.f32 %v1115_v14, %v1114_v12 }
  0xe7   :  { %v1117_v16 = vpop.f32.mrf.mxu0  ;;  %v1180_v6 = vadd.f32 %v1179_v15, %v1178_v13 }
  0xe8   :  { %v1181_v17 = vpop.f32.mrf.mxu1 }
  0xe9   :  { %v1118_v18 = vpop.f32.mrf.mxu0  ;;  %v744_v13 = vadd.f32 %v1180_v6, %v1116_v5 }
  0xea   :  { %v1182_v19 = vpop.f32.mrf.mxu1  ;;  %v1119_v7 = vadd.f32 %v1118_v18, %v1117_v16 }
  0xeb   :  { %v1120_v20 = vpop.f32.mrf.mxu0  ;;  %v1183_v8 = vadd.f32 %v1182_v19, %v1181_v17 }
  0xec   :  { %v1184_v21 = vpop.f32.mrf.mxu1 }
  0xed   :  { %v1121_v22 = vpop.f32.mrf.mxu0  ;;  %v747_v15 = vadd.f32 %v1183_v8, %v1119_v7 }
  0xee   :  { %v1185_v23 = vpop.f32.mrf.mxu1  ;;  %v1122_v10 = vadd.f32 %v1121_v22, %v1120_v20 }
  0xef   :  { %v1123_v24 = vpop.f32.mrf.mxu0  ;;  %v1186_v11 = vadd.f32 %v1185_v23, %v1184_v21 }
  0xf0   :  { %v1187_v25 = vpop.f32.mrf.mxu1 }
  0xf1   :  { %v1124_v26 = vpop.f32.mrf.mxu0  ;;  %v752_v19 = vadd.f32 %v1186_v11, %v1122_v10 }
  0xf2   :  { %v1188_v27 = vpop.f32.mrf.mxu1 }
  0xf3   :  { %v1126_v28 = vpop.f32.mrf.mxu0 }
  0xf4   :  { %v1190_v29 = vpop.f32.mrf.mxu1 }
  0xf5   :  { %v1127_v30 = vpop.f32.mrf.mxu0 }
  0xf6   :  { %v1191_v31 = vpop.f32.mrf.mxu1 }
  0xf7   :  { %v1618_v32 = vpop.f32.mrf.mxu0 }
  0xf8   :  { %1730 = vst [vmem:[#allocation3_spill] sm:$0xff] %v1618_v32  ;;  %v1620_v33 = vpop.f32.mrf.mxu1 }
  0xf9   :  { %1731 = vst [vmem:[#allocation4_spill] sm:$0xff] %v1620_v33  ;;  %v1130_v34 = vpop.f32.mrf.mxu0  ;;  %v1192_v33 = vadd.f32 %v1191_v31, %v1190_v29 }
  0xfa   :  { %v1194_v35 = vpop.f32.mrf.mxu1 }
  0xfb   :  { %v1132_v36 = vpop.f32.mrf.mxu0 }
  0xfc   :  { %v1196_v37 = vpop.f32.mrf.mxu1 }
  0xfd   :  { %v1133_v38 = vpop.f32.mrf.mxu0 }
  0xfe   :  { %v1197_v39 = vpop.f32.mrf.mxu1 }
  0xff   :  { %v1622_v40 = vpop.f32.mrf.mxu0  ;;  %v1198_v12 = vadd.f32 %v1197_v39, %v1196_v37  ;;  %v1740_v21 = vld [vmem:[#allocation3_spill] sm:$0xff] }
 0x100   :  { %1732 = vst [vmem:[#allocation5_spill] sm:$0xff] %v1622_v40  ;;  %v1624_v41 = vpop.f32.mrf.mxu1  ;;  %v1128_v40 = vadd.f32 %v1127_v30, %v1126_v28  ;;  %v1639_v22 = vadd.f32 %v1130_v34, %v1740_v21  ;;  %v1741_v23 = vld [vmem:[#allocation4_spill] sm:$0xff] }
 0x101   :  { %1733 = vst [vmem:[#allocation6_spill] sm:$0xff] %v1624_v41  ;;  %v1626_v42 = vpop.f32.mrf.mxu0  ;;  %v1189_v41 = vadd.f32 %v1188_v27, %v1187_v25 }
 0x102   :  { %1734 = vst [vmem:[#allocation7_spill] sm:$0xff] %v1626_v42  ;;  %v1628_v43 = vpop.f32.mrf.mxu1  ;;  %v1644_v27 = vadd.f32 %v1192_v33, %v1128_v40 }
 0x103   :  { %1735 = vst [vmem:[#allocation8_spill] sm:$0xff] %v1628_v43  ;;  %v1138_v44 = vpop.f32.mrf.mxu0  ;;  %v1125_v43 = vadd.f32 %v1124_v26, %v1123_v24  ;;  %v1642_v24 = vadd.f32 %v1194_v35, %v1741_v23 }
 0x104   :  { %v1202_v45 = vpop.f32.mrf.mxu1 }
 0x105   :  { %v1139_v46 = vpop.f32.mrf.mxu0  ;;  %v755_v20 = vadd.f32 %v1189_v41, %v1125_v43 }
 0x106   :  { %v1203_v47 = vpop.f32.mrf.mxu1  ;;  %v1140_v16 = vadd.f32 %v1139_v46, %v1138_v44 }
 0x107   :  { %v1141_v48 = vpop.f32.mrf.mxu0  ;;  %v1204_v18 = vadd.f32 %v1203_v47, %v1202_v45  ;;  %v1742_v46 = vld [vmem:[#allocation5_spill] sm:$0xff] }
 0x108   :  { %v1205_v49 = vpop.f32.mrf.mxu1 }
 0x109   :  { %v1142_v50 = vpop.f32.mrf.mxu0  ;;  %v776_v40 = vadd.f32 %v1204_v18, %v1140_v16  ;;  %v1743_v47 = vld [vmem:[#allocation7_spill] sm:$0xff] }
 0x10a   :  { %v1206_v51 = vpop.f32.mrf.mxu1  ;;  %v1143_v25 = vadd.f32 %v1142_v50, %v1141_v48  ;;  %v1137_v48 = vadd.f32 %v1743_v47, %v1742_v46  ;;  %v1745_v50 = vld [vmem:[#allocation8_spill] sm:$0xff]  ;;  %v763_v47 = vadd.f32 %v1642_v24, %v1639_v22 }
 0x10b   :  { %v1144_v52 = vpop.f32.mrf.mxu0  ;;  %v1207_v28 = vadd.f32 %v1206_v51, %v1205_v49  ;;  %v1744_v49 = vld [vmem:[#allocation6_spill] sm:$0xff] }
 0x10c   :  { %v1208_v53 = vpop.f32.mrf.mxu1  ;;  %v1201_v51 = vadd.f32 %v1745_v50, %v1744_v49 }
 0x10d   :  { %v1145_v54 = vpop.f32.mrf.mxu0 }
 0x10e   :  { %v1209_v55 = vpop.f32.mrf.mxu1  ;;  %v1146_v32 = vadd.f32 %v1145_v54, %v1144_v52 }
 0x10f   :  { %v1147_v56 = vpop.f32.mrf.mxu0 }
 0x110   :  { %v1211_v57 = vpop.f32.mrf.mxu1 }
 0x111   :  { %v1148_v58 = vpop.f32.mrf.mxu0 }
 0x112   :  { %v1212_v59 = vpop.f32.mrf.mxu1  ;;  %v1149_v29 = vadd.f32 %v1148_v58, %v1147_v56 }
 0x113   :  { %v1150_v60 = vpop.f32.mrf.mxu0  ;;  %v1213_v30 = vadd.f32 %v1212_v59, %v1211_v57 }
 0x114   :  { %v1214_v61 = vpop.f32.mrf.mxu1 }
 0x115   :  { %v1151_v62 = vpop.f32.mrf.mxu0  ;;  %v787_v57 = vadd.f32 %v1213_v30, %v1149_v29 }
 0x116   :  { %v1215_v63 = vpop.f32.mrf.mxu1 }
 0x117   :  { %v1630_v0 = vpop.f32.mrf.mxu0  ;;  %v1216_v34 = vadd.f32 %v1215_v63, %v1214_v61 }
 0x118   :  { %1736 = vst [vmem:[#allocation9_spill] sm:$0xff] %v1630_v0  ;;  %v1632_v1 = vpop.f32.mrf.mxu1 }
 0x119   :  { %1737 = vst [vmem:[#allocation10_spill] sm:$0xff] %v1632_v1  ;;  %v1634_v2 = vpop.f32.mrf.mxu0  ;;  %v1210_v1 = vadd.f32 %v1209_v55, %v1208_v53 }
 0x11a   :  { %1738 = vst [vmem:[#allocation11_spill] sm:$0xff] %v1634_v2  ;;  %v1636_v3 = vpop.f32.mrf.mxu1 }
 0x11b   :  { %1739 = vst [vmem:[#allocation12_spill] sm:$0xff] %v1636_v3  ;;  %v1156_v4 = vpop.f32.mrf.mxu0  ;;  %v1134_v3 = vadd.f32 %v1133_v38, %v1132_v36  ;;  %v1649_v36 = vld [vmem:[%s1728_s2] ss:$0 sm:$0xff]  ;;  %v784_v37 = vadd.f32 %v1210_v1, %v1146_v32  ;;  %v1152_v38 = vadd.f32 %v1151_v62, %v1150_v60 }
 0x11c   :  { %v1220_v9 = vpop.f32.mrf.mxu1 }
 0x11d   :  { %v1157_v42 = vpop.f32.mrf.mxu0  ;;  %v768_v35 = vadd.f32 %v1198_v12, %v1134_v3  ;;  %v792_v62 = vadd.f32 %v1216_v34, %v1152_v38 }
 0x11e   :  { %v1221_v0 = vpop.f32.mrf.mxu1  ;;  %v1158_v43 = vadd.f32 %v1157_v42, %v1156_v4  ;;  %v779_v42 = vadd.f32 %v1207_v28, %v1143_v25 }
 0x11f   :  { %v1159_v2 = vpop.f32.mrf.mxu0  ;;  %v1222_v44 = vadd.f32 %v1221_v0, %v1220_v9 }
 0x120   :  { %v1223_v14 = vpop.f32.mrf.mxu1  ;;  %v1748_v21 = vld [vmem:[#allocation10_spill] sm:$0xff] }
 0x121   :  { %v1160_v17 = vpop.f32.mrf.mxu0  ;;  %v800_v4 = vadd.f32 %v1222_v44, %v1158_v43  ;;  %v1747_v18 = vld [vmem:[#allocation11_spill] sm:$0xff] }
 0x122   :  { %v1224_v26 = vpop.f32.mrf.mxu1  ;;  %v1161_v5 = vadd.f32 %v1160_v17, %v1159_v2  ;;  %v1746_v2 = vld [vmem:[#allocation9_spill] sm:$0xff]  ;;  %v1749_v23 = vld [vmem:[#allocation12_spill] sm:$0xff] }
 0x123   :  { %v1248_v31 = vpop.f32.mrf.mxu0  ;;  %v1225_v10 = vadd.f32 %v1224_v26, %v1223_v14  ;;  %v1155_v17 = vadd.f32 %v1747_v18, %v1746_v2  ;;  %v1219_v25 = vadd.f32 %v1749_v23, %v1748_v21 }
 0x124   :  { %v849_v39 = vadd.f32 %v1248_v31, %v752_v19  ;;  %v1256_v41 = vpop.f32.mrf.mxu1 }
 0x125   :  { %v881_v45 = vadd.f32 %v1256_v41, %v784_v37  ;;  %v840_v33 = vpop.f32.mrf.mxu0 }
 0x126   :  { %v963_v52 = vadd.f32 %v1649_v36, %v849_v39  ;;  %v841_v53 = vadd.f32 %v840_v33, %v744_v13  ;;  %v872_v32 = vpop.f32.mrf.mxu1  ;;  %v771_v39 = vadd.f32 %v1201_v51, %v1137_v48 }
 0x127   :  { %v971_v54 = vadd.f32 %v1649_v36, %v881_v45  ;;  %v873_v55 = vadd.f32 %v872_v32, %v776_v40  ;;  %v1249_v56 = vpop.f32.mrf.mxu0  ;;  %v803_v45 = vadd.f32 %v1225_v10, %v1161_v5 }
 0x128   :  { %v979_v58 = vmax.f32 %v963_v52, 0.0  ;;  %v961_v59 = vadd.f32 %v1649_v36, %v841_v53  ;;  %v852_v60 = vadd.f32 %v1249_v56, %v755_v20  ;;  %v1257_v61 = vpop.f32.mrf.mxu1  ;;  %v795_v52 = vadd.f32 %v1219_v25, %v1155_v17 }
 0x129   :  { %v987_v63 = vmax.f32 %v971_v54, 0.0  ;;  %v969_v0 = vadd.f32 %v1649_v36, %v873_v55  ;;  %v884_v1 = vadd.f32 %v1257_v61, %v787_v57  ;;  %v843_v3 = vpop.f32.mrf.mxu0 }
 0x12a   :  { %995 = vst [vmem:[%s1729_s3 + $0x10] sm:$0xff] %v979_v58  ;;  %v977_v6 = vmax.f32 %v961_v59, 0.0  ;;  %v964_v7 = vadd.f32 %v1649_v36, %v852_v60  ;;  %v844_v8 = vadd.f32 %v843_v3, %v747_v15  ;;  %v875_v9 = vpop.f32.mrf.mxu1 }
 0x12b   :  { %1003 = vst [vmem:[%s1729_s3 + $0x50] sm:$0xff] %v987_v63  ;;  %v985_v11 = vmax.f32 %v969_v0, 0.0  ;;  %v972_v12 = vadd.f32 %v1649_v36, %v884_v1  ;;  %v876_v13 = vadd.f32 %v875_v9, %v779_v42  ;;  %v1252_v16 = vpop.f32.mrf.mxu0 }
 0x12c   :  { %993 = vst [vmem:[%s1729_s3] sm:$0xff] %v977_v6  ;;  %v980_v19 = vmax.f32 %v964_v7, 0.0  ;;  %v962_v15 = vadd.f32 %v1649_v36, %v844_v8  ;;  %v865_v14 = vadd.f32 %v1252_v16, %v768_v35  ;;  %v1260_v20 = vpop.f32.mrf.mxu1 }
 0x12d   :  { %1001 = vst [vmem:[%s1729_s3 + $0x40] sm:$0xff] %v985_v11  ;;  %v988_v26 = vmax.f32 %v972_v12, 0.0  ;;  %v970_v28 = vadd.f32 %v1649_v36, %v876_v13  ;;  %v897_v29 = vadd.f32 %v1260_v20, %v800_v4  ;;  %v856_v30 = vpop.f32.mrf.mxu0 }
 0x12e   :  { %996 = vst [vmem:[%s1729_s3 + $0x18] sm:$0xff] %v980_v19  ;;  %v978_v31 = vmax.f32 %v962_v15, 0.0  ;;  %v967_v37 = vadd.f32 %v1649_v36, %v865_v14  ;;  %v857_v38 = vadd.f32 %v856_v30, %v1644_v27  ;;  %v888_v34 = vpop.f32.mrf.mxu1 }
 0x12f   :  { %1004 = vst [vmem:[%s1729_s3 + $0x58] sm:$0xff] %v988_v26  ;;  %v986_v41 = vmax.f32 %v970_v28, 0.0  ;;  %v975_v35 = vadd.f32 %v1649_v36, %v897_v29  ;;  %v889_v43 = vadd.f32 %v888_v34, %v792_v62  ;;  %v1253_v44 = vpop.f32.mrf.mxu0 }
 0x130   :  { %994 = vst [vmem:[%s1729_s3 + $0x8] sm:$0xff] %v978_v31  ;;  %v983_v33 = vmax.f32 %v967_v37, 0.0  ;;  %v965_v40 = vadd.f32 %v1649_v36, %v857_v38  ;;  %v868_v27 = vadd.f32 %v1253_v44, %v771_v39  ;;  %v1261_v46 = vpop.f32.mrf.mxu1 }
 0x131   :  { %1002 = vst [vmem:[%s1729_s3 + $0x48] sm:$0xff] %v986_v41  ;;  %v991_v48 = vmax.f32 %v975_v35, 0.0  ;;  %v973_v49 = vadd.f32 %v1649_v36, %v889_v43  ;;  %v900_v50 = vadd.f32 %v1261_v46, %v803_v45  ;;  %v859_v51 = vpop.f32.mrf.mxu0 }
 0x132   :  { %999 = vst [vmem:[%s1729_s3 + $0x30] sm:$0xff] %v983_v33  ;;  %v981_v53 = vmax.f32 %v965_v40, 0.0  ;;  %v968_v32 = vadd.f32 %v1649_v36, %v868_v27  ;;  %v860_v54 = vadd.f32 %v859_v51, %v763_v47  ;;  %v891_v55 = vpop.f32.mrf.mxu1 }
 0x133   :  { %1007 = vst [vmem:[%s1729_s3 + $0x70] sm:$0xff] %v991_v48  ;;  %v989_v22 = vmax.f32 %v973_v49, 0.0  ;;  %v976_v24 = vadd.f32 %v1649_v36, %v900_v50  ;;  %v892_v56 = vadd.f32 %v891_v55, %v795_v52 }
 0x134   :  { %997 = vst [vmem:[%s1729_s3 + $0x20] sm:$0xff] %v981_v53  ;;  %v984_v57 = vmax.f32 %v968_v32, 0.0  ;;  %v966_v42 = vadd.f32 %v1649_v36, %v860_v54 }
 0x135   :  { %1005 = vst [vmem:[%s1729_s3 + $0x60] sm:$0xff] %v989_v22  ;;  %v992_v58 = vmax.f32 %v976_v24, 0.0  ;;  %v974_v59 = vadd.f32 %v1649_v36, %v892_v56 }
 0x136   :  { %1000 = vst [vmem:[%s1729_s3 + $0x38] sm:$0xff] %v984_v57  ;;  %v982_v60 = vmax.f32 %v966_v42, 0.0 }
 0x137   :  { %1008 = vst [vmem:[%s1729_s3 + $0x78] sm:$0xff] %v992_v58  ;;  %v990_v61 = vmax.f32 %v974_v59, 0.0 }
 0x138   :  { %998 = vst [vmem:[%s1729_s3 + $0x28] sm:$0xff] %v982_v60 }
 0x139   :  { %1006 = vst [vmem:[%s1729_s3 + $0x68] sm:$0xff] %v990_v61 }

// kernel: resnet34_forward.42
= control target key start
LH: loop header
LB: loop body
LE: loop exit
PB: predicated region body
PF: predicated region fallthrough
CT: control target
= control target key end

     0   :  { %vm590_vm0 = vcmask 523264   ;;  %s1793_s1 = inlined_call_operand.vmem [shape: bf16[576,128], index: 1, kind: input, shape index: {}]   ;;  %s1794_s0 = inlined_call_operand.vmem [shape: bf16[128,576], index: 0, kind: input, shape index: {}]   ;;  %s1795_s2 = inlined_call_operand.vmem [shape: f32[1,128], index: 2, kind: input, shape index: {}]   ;;  %s1796_s3 = inlined_call_operand.vmem [shape: f32[128,128], index: 3, kind: input, shape index: {}]   ;;  %s1797_s4 = inlined_call_operand.vmem [shape: f32[128,128], index: 4, kind: output, shape index: {}]  }
   0x1   :  { %v1305_v0 = vld [vmem:[%s1793_s1 + $0x78] sm:$0xff]   ;;  %v1309_v4 = vld [vmem:[%s1793_s1 + $0x70] sm:$0xff]   ;;  %v1313_v8 = vld [vmem:[%s1793_s1 + $0x68] sm:$0xff]  }
   0x2   :  { %v1306_v1 = vld [vmem:[%s1793_s1 + $0xf8] sm:$0xff]   ;;  %1133 = vmatprep.subr.bf16.mxu0 %v1305_v0  ;;  %v1310_v5 = vld [vmem:[%s1793_s1 + $0xf0] sm:$0xff]   ;;  %v1314_v9 = vld [vmem:[%s1793_s1 + $0xe8] sm:$0xff]  }
   0x3   :  { %v1307_v2 = vld [vmem:[%s1793_s1 + $0x38] sm:$0xff]   ;;  %1197 = vmatprep.subr.bf16.mxu1 %v1306_v1  ;;  %v1311_v6 = vld [vmem:[%s1793_s1 + $0x30] sm:$0xff]   ;;  %v1315_v10 = vld [vmem:[%s1793_s1 + $0x28] sm:$0xff]  }
   0x4   :  { %v1308_v3 = vld [vmem:[%s1793_s1 + $0xb8] sm:$0xff]   ;;  %1134 = vmatpush3.bf16.msra.mxu0 %v1307_v2  ;;  %v1312_v7 = vld [vmem:[%s1793_s1 + $0xb0] sm:$0xff]   ;;  %v1316_v11 = vld [vmem:[%s1793_s1 + $0xa8] sm:$0xff]  }
   0x5   :  { %1198 = vmatpush3.bf16.msra.mxu1 %v1308_v3  ;;  %1135 = vmatprep.subr.bf16.mxu0 %v1309_v4  ;;  %v1317_v12 = vld [vmem:[%s1793_s1 + $0x60] sm:$0xff]   ;;  %v1321_v16 = vld [vmem:[%s1793_s1 + $0x58] sm:$0xff]   ;;  %v1325_v20 = vld [vmem:[%s1793_s1 + $0x50] sm:$0xff]  }
   0x6   :  { %1199 = vmatprep.subr.bf16.mxu1 %v1310_v5  ;;  %v1318_v13 = vld [vmem:[%s1793_s1 + $0xe0] sm:$0xff]   ;;  %v1322_v17 = vld [vmem:[%s1793_s1 + $0xd8] sm:$0xff]   ;;  %v1326_v21 = vld [vmem:[%s1793_s1 + $0xd0] sm:$0xff]  }
   0x7   :  { %v1319_v14 = vld [vmem:[%s1793_s1 + $0x20] sm:$0xff]   ;;  %v1323_v18 = vld [vmem:[%s1793_s1 + $0x18] sm:$0xff]   ;;  %v1327_v22 = vld [vmem:[%s1793_s1 + $0x10] sm:$0xff]  }
   0x8   :  { %1136 = vmatpush3.bf16.msra.mxu0 %v1311_v6  ;;  %v1320_v15 = vld [vmem:[%s1793_s1 + $0xa0] sm:$0xff]   ;;  %v1324_v19 = vld [vmem:[%s1793_s1 + $0x98] sm:$0xff]   ;;  %v1328_v23 = vld [vmem:[%s1793_s1 + $0x90] sm:$0xff]  }
   0x9   :  { %1200 = vmatpush3.bf16.msra.mxu1 %v1312_v7  ;;  %1137 = vmatprep.subr.bf16.mxu0 %v1313_v8  ;;  %v1329_v24 = vld [vmem:[%s1793_s1 + $0x48] sm:$0xff]   ;;  %v1333_v28 = vld [vmem:[%s1793_s1 + $0x40] sm:$0xff]   ;;  %v1343_v36 = vld [vmem:[%s1793_s1 + $0x118] sm:$0xff]  }
   0xa   :  { %1201 = vmatprep.subr.bf16.mxu1 %v1314_v9  ;;  %v1330_v25 = vld [vmem:[%s1793_s1 + $0xc8] sm:$0xff]   ;;  %v1334_v29 = vld [vmem:[%s1793_s1 + $0xc0] sm:$0xff]   ;;  %v1356_v42 = vld [vmem:[%s1793_s1 + $0x110] sm:$0xff]  }
   0xb   :  { %v1331_v26 = vld [vmem:[%s1793_s1 + $0x8] sm:$0xff]   ;;  %v1335_v30 = vld [vmem:[%s1793_s1] sm:$0xff]   ;;  %v1352_v43 = vld [vmem:[%s1794_s0 + $0x5c] ss:$20 sps:$4 sm:$0xff]  }
   0xc   :  { %1138 = vmatpush3.bf16.msra.mxu0 %v1315_v10  ;;  %v1332_v27 = vld [vmem:[%s1793_s1 + $0x88] sm:$0xff]   ;;  %v1336_v31 = vld [vmem:[%s1793_s1 + $0x80] sm:$0xff]   ;;  %v1357_v47 = vld [vmem:[%s1794_s0 + $0x7c] ss:$20 sps:$4 sm:$0xff]  }
   0xd   :  { %1202 = vmatpush3.bf16.msra.mxu1 %v1316_v11  ;;  %1139 = vmatprep.subr.bf16.mxu0 %v1317_v12  ;;  %v1337_v32 = vld [vmem:[%s1794_s0] ss:$20 sps:$4 sm:$0xff]   ;;  %v1339_v33 = vld [vmem:[%s1794_s0 + $0x4] ss:$20 sps:$4 sm:$0xff]   ;;  %v1340_v34 = vld [vmem:[%s1794_s0 + $0x8] ss:$20 sps:$4 sm:$0xff]  }
   0xe   :  { %1203 = vmatprep.subr.bf16.mxu1 %v1318_v13  ;;  %v1342_v35 = vld [vmem:[%s1794_s0 + $0xc] ss:$20 sps:$4 sm:$0xff]   ;;  %647 = vmatprep.mubr.bf16.mxu0 %v1339_v33  ;;  %v1346_v38 = vld [vmem:[%s1794_s0 + $0x34] ss:$20 sps:$4 sm:$0xff]   ;;  %v1349_v40 = vld [vmem:[%s1794_s0 + $0x30] ss:$20 sps:$4 sm:$0xff]  }
   0xf   :  { %744 = vmatprep.mubr.bf16.mxu1 %v1342_v35  ;;  %v1344_v37 = vld [vmem:[%s1794_s0 + $0x2c] ss:$20 sps:$4 sm:$0xff]   ;;  %v1348_v39 = vld [vmem:[%s1794_s0 + $0x28] ss:$20 sps:$4 sm:$0xff]   ;;  %v1354_v44 = vld [vmem:[%s1794_s0 + $0x50] ss:$20 sps:$4 sm:$0xff]  }
  0x10   :  { %1140 = vmatpush3.bf16.msra.mxu0 %v1319_v14  ;;  %v1350_v41 = vld [vmem:[%s1794_s0 + $0x54] ss:$20 sps:$4 sm:$0xff]   ;;  %v1355_v45 = vld [vmem:[%s1794_s0 + $0x58] ss:$20 sps:$4 sm:$0xff]   ;;  %v1382_v49 = vld [vmem:[%s1793_s1 + $0x100] sm:$0xff]  }
  0x11   :  { %1204 = vmatpush3.bf16.msra.mxu1 %v1320_v15  ;;  %1141 = vmatprep.subr.bf16.mxu0 %v1321_v16  ;;  %v1369_v46 = vld [vmem:[%s1793_s1 + $0x108] sm:$0xff]   ;;  %v1359_v48 = vld [vmem:[%s1794_s0 + $0x84] ss:$20 sps:$4 sm:$0xff]   ;;  %v1362_v51 = vld [vmem:[%s1794_s0 + $0x80] ss:$20 sps:$4 sm:$0xff]  }
  0x12   :  { %1205 = vmatprep.subr.bf16.mxu1 %v1322_v17  ;;  %v1361_v50 = vld [vmem:[%s1794_s0 + $0x78] ss:$20 sps:$4 sm:$0xff]   ;;  %v1367_v54 = vld [vmem:[%s1794_s0 + $0xa0] ss:$20 sps:$4 sm:$0xff]   ;;  %v1368_v55 = vld [vmem:[%s1794_s0 + $0xa8] ss:$20 sps:$4 sm:$0xff]  }
  0x13   :  { %v1363_v52 = vld [vmem:[%s1794_s0 + $0xa4] ss:$20 sps:$4 sm:$0xff]   ;;  %v1365_v53 = vld [vmem:[%s1794_s0 + $0xac] ss:$20 sps:$4 sm:$0xff]   ;;  %v1372_v57 = vld [vmem:[%s1794_s0 + $0xd4] ss:$20 sps:$4 sm:$0xff]  }
  0x14   :  { %1142 = vmatpush3.bf16.msra.mxu0 %v1323_v18  ;;  %v1370_v56 = vld [vmem:[%s1794_s0 + $0xcc] ss:$20 sps:$4 sm:$0xff]   ;;  %v1374_v58 = vld [vmem:[%s1794_s0 + $0xc8] ss:$20 sps:$4 sm:$0xff]   ;;  %v1375_v59 = vld [vmem:[%s1794_s0 + $0xd0] ss:$20 sps:$4 sm:$0xff]  }
  0x15   :  { %1206 = vmatpush3.bf16.msra.mxu1 %v1324_v19  ;;  %1143 = vmatprep.subr.bf16.mxu0 %v1325_v20  ;;  %v1376_v60 = vld [vmem:[%s1794_s0 + $0xf4] ss:$20 sps:$4 sm:$0xff]   ;;  %v1378_v61 = vld [vmem:[%s1794_s0 + $0xfc] ss:$20 sps:$4 sm:$0xff]   ;;  %v1381_v63 = vld [vmem:[%s1794_s0 + $0xf8] ss:$20 sps:$4 sm:$0xff]  }
  0x16   :  { %1207 = vmatprep.subr.bf16.mxu1 %v1326_v21  ;;  %v1380_v62 = vld [vmem:[%s1794_s0 + $0xf0] ss:$20 sps:$4 sm:$0xff]   ;;  %v1387_v2 = vld [vmem:[%s1794_s0 + $0x118] ss:$20 sps:$4 sm:$0xff]   ;;  %v1388_v3 = vld [vmem:[%s1794_s0 + $0x120] ss:$20 sps:$4 sm:$0xff]  }
  0x17   :  { %v1383_v0 = vld [vmem:[%s1794_s0 + $0x11c] ss:$20 sps:$4 sm:$0xff]   ;;  %v1385_v1 = vld [vmem:[%s1794_s0 + $0x124] ss:$20 sps:$4 sm:$0xff]   ;;  %v1393_v8 = vld [vmem:[%s1794_s0 + $0x60] ss:$20 sps:$4 sm:$0xff]  }
  0x18   :  { %1144 = vmatpush3.bf16.msra.mxu0 %v1327_v22  ;;  %v1389_v4 = vld [vmem:[%s1794_s0 + $0x10] ss:$20 sps:$4 sm:$0xff]   ;;  %v1391_v6 = vld [vmem:[%s1794_s0 + $0x38] ss:$20 sps:$4 sm:$0xff]   ;;  %v1394_v9 = vld [vmem:[%s1794_s0 + $0x100] ss:$20 sps:$4 sm:$0xff]  }
  0x19   :  { %1208 = vmatpush3.bf16.msra.mxu1 %v1328_v23  ;;  %1145 = vmatprep.subr.bf16.mxu0 %v1329_v24  ;;  %v1390_v5 = vld [vmem:[%s1794_s0 + $0xb0] ss:$20 sps:$4 sm:$0xff]   ;;  %v1392_v7 = vld [vmem:[%s1794_s0 + $0xd8] ss:$20 sps:$4 sm:$0xff]   ;;  %v1395_v10 = vld [vmem:[%s1794_s0 + $0x88] ss:$20 sps:$4 sm:$0xff]  }
  0x1a   :  { %1209 = vmatprep.subr.bf16.mxu1 %v1330_v25  ;;  %v1396_v11 = vld [vmem:[%s1794_s0 + $0x128] ss:$20 sps:$4 sm:$0xff]  }
  0x1c   :  { %1146 = vmatpush3.bf16.msra.mxu0 %v1331_v26 }
  0x1d   :  { %1210 = vmatpush3.bf16.msra.mxu1 %v1332_v27  ;;  %1147 = vmatprep.subr.bf16.mxu0 %v1333_v28 }
  0x1e   :  { %1211 = vmatprep.subr.bf16.mxu1 %v1334_v29 }
  0x20   :  { %1148 = vmatpush3.bf16.msra.mxu0 %v1335_v30 }
  0x21   :  { %1212 = vmatpush3.bf16.msra.mxu1 %v1336_v31  ;;  %1273 = vmatprep.subr.bf16.mxu0 %v1343_v36 }
  0x22   :  { %1297 = vmatprep.subr.bf16.mxu1 %v1343_v36 }
  0x23   :  { %648 = vmatmul.mubr.bf16.vlgmr.msra.gmra.mxu0 %v1337_v32 }
  0x24   :  { %745 = vmatmul.mubr.bf16.vlgmr.msra.gmra.mxu1 %v1340_v34  ;;  %1274 = vmatpush3.bf16.msra.mxu0 %v1343_v36 }
  0x25   :  { %1301 = vmatpush3.bf16.msra.mxu1 %v1343_v36  ;;  %655 = vmatprep.mubr.bf16.mxu0 %v1344_v37 }
  0x26   :  { %752 = vmatprep.mubr.bf16.mxu1 %v1346_v38  ;;  %1275 = vmatprep.subr.bf16.mxu0 %v1356_v42 }
  0x27   :  { %1298 = vmatprep.subr.bf16.mxu1 %v1356_v42 }
  0x28   :  { %1276 = vmatpush3.bf16.msra.mxu0 %v1356_v42 }
  0x29   :  { %1302 = vmatpush3.bf16.msra.mxu1 %v1356_v42  ;;  %1277 = vmatprep.subr.bf16.mxu0 %v1369_v46 }
  0x2a   :  { %1299 = vmatprep.subr.bf16.mxu1 %v1369_v46 }
  0x2b   :  { %656 = vmatmul.mubr.bf16.gmra.mxu0 %v1348_v39 }
  0x2c   :  { %753 = vmatmul.mubr.bf16.gmra.mxu1 %v1349_v40  ;;  %663 = vmatprep.mubr.bf16.mxu0 %v1350_v41 }
  0x2d   :  { %760 = vmatprep.mubr.bf16.mxu1 %v1352_v43  ;;  %1278 = vmatpush3.bf16.msra.mxu0 %v1369_v46 }
  0x2e   :  { %1303 = vmatpush3.bf16.msra.mxu1 %v1369_v46  ;;  %1279 = vmatprep.subr.bf16.mxu0 %v1382_v49 }
  0x2f   :  { %1300 = vmatprep.subr.bf16.mxu1 %v1382_v49 }
  0x31   :  { %1280 = vmatpush3.bf16.msra.mxu0 %v1382_v49 }
  0x32   :  { %1304 = vmatpush3.bf16.msra.mxu1 %v1382_v49 }
  0x33   :  { %664 = vmatmul.mubr.bf16.gmra.mxu0 %v1354_v44 }
  0x34   :  { %761 = vmatmul.mubr.bf16.gmra.mxu1 %v1355_v45  ;;  %671 = vmatprep.mubr.bf16.mxu0 %v1357_v47 }
  0x35   :  { %768 = vmatprep.mubr.bf16.mxu1 %v1359_v48 }
  0x3b   :  { %672 = vmatmul.mubr.bf16.gmra.mxu0 %v1361_v50 }
  0x3c   :  { %769 = vmatmul.mubr.bf16.gmra.mxu1 %v1362_v51  ;;  %679 = vmatprep.mubr.bf16.mxu0 %v1363_v52 }
  0x3d   :  { %776 = vmatprep.mubr.bf16.mxu1 %v1365_v53 }
  0x43   :  { %680 = vmatmul.mubr.bf16.gmra.mxu0 %v1367_v54 }
  0x44   :  { %777 = vmatmul.mubr.bf16.gmra.mxu1 %v1368_v55  ;;  %687 = vmatprep.mubr.bf16.mxu0 %v1370_v56 }
  0x45   :  { %784 = vmatprep.mubr.bf16.mxu1 %v1372_v57 }
  0x4b   :  { %688 = vmatmul.mubr.bf16.gmra.mxu0 %v1374_v58 }
  0x4c   :  { %785 = vmatmul.mubr.bf16.gmra.mxu1 %v1375_v59  ;;  %695 = vmatprep.mubr.bf16.mxu0 %v1376_v60 }
  0x4d   :  { %792 = vmatprep.mubr.bf16.mxu1 %v1378_v61 }
  0x53   :  { %696 = vmatmul.mubr.bf16.gmra.mxu0 %v1380_v62 }
  0x54   :  { %793 = vmatmul.mubr.bf16.gmra.mxu1 %v1381_v63  ;;  %703 = vmatprep.mubr.bf16.mxu0 %v1383_v0 }
  0x55   :  { %800 = vmatprep.mubr.bf16.mxu1 %v1385_v1 }
  0x5b   :  { %704 = vmatmul.mubr.bf16.gmra.mxu0 %v1387_v2 }
  0x5c   :  { %801 = vmatmul.mubr.bf16.gmra.mxu1 %v1388_v3  ;;  %1281 = vmatprep.mubr.msk.bf16.mxu0 %vm590_vm0, %v1389_v4 }
  0x5d   :  { %1289 = vmatprep.mubr.msk.bf16.mxu1 %vm590_vm0, %v1390_v5 }
  0x63   :  { %1282 = vmatmul.mubr.msk.bf16.vlgmr.msra.gmra.mxu0 %vm590_vm0, %v1391_v6 }
  0x64   :  { %1290 = vmatmul.mubr.msk.bf16.vlgmr.msra.gmra.mxu1 %vm590_vm0, %v1392_v7  ;;  %1285 = vmatprep.mubr.msk.bf16.mxu0 %vm590_vm0, %v1393_v8 }
  0x65   :  { %1293 = vmatprep.mubr.msk.bf16.mxu1 %vm590_vm0, %v1394_v9 }
  0x6b   :  { %1286 = vmatmul.mubr.msk.bf16.gmra.mxu0 %vm590_vm0, %v1395_v10 }
  0x6c   :  { %1294 = vmatmul.mubr.msk.bf16.gmra.mxu1 %vm590_vm0, %v1396_v11 }
  0xe3   :  { %v1149_v12 = vpop.f32.mrf.mxu0 }
  0xe4   :  { %v1213_v13 = vpop.f32.mrf.mxu1 }
  0xe5   :  { %v1150_v14 = vpop.f32.mrf.mxu0 }
  0xe6   :  { %v1214_v15 = vpop.f32.mrf.mxu1  ;;  %v1151_v3 = vadd.f32 %v1150_v14, %v1149_v12 }
  0xe7   :  { %v1152_v16 = vpop.f32.mrf.mxu0  ;;  %v1215_v4 = vadd.f32 %v1214_v15, %v1213_v13 }
  0xe8   :  { %v1216_v17 = vpop.f32.mrf.mxu1 }
  0xe9   :  { %v1153_v18 = vpop.f32.mrf.mxu0 }
  0xea   :  { %v1217_v19 = vpop.f32.mrf.mxu1  ;;  %v1154_v5 = vadd.f32 %v1153_v18, %v1152_v16 }
  0xeb   :  { %v1155_v20 = vpop.f32.mrf.mxu0  ;;  %v1218_v6 = vadd.f32 %v1217_v19, %v1216_v17 }
  0xec   :  { %v1219_v21 = vpop.f32.mrf.mxu1 }
  0xed   :  { %v1156_v22 = vpop.f32.mrf.mxu0 }
  0xee   :  { %v1220_v23 = vpop.f32.mrf.mxu1  ;;  %v1157_v8 = vadd.f32 %v1156_v22, %v1155_v20 }
  0xef   :  { %v1158_v24 = vpop.f32.mrf.mxu0  ;;  %v1221_v9 = vadd.f32 %v1220_v23, %v1219_v21 }
  0xf0   :  { %v1222_v25 = vpop.f32.mrf.mxu1 }
  0xf1   :  { %v1159_v26 = vpop.f32.mrf.mxu0 }
  0xf2   :  { %v1223_v27 = vpop.f32.mrf.mxu1  ;;  %v1160_v10 = vadd.f32 %v1159_v26, %v1158_v24  ;;  %v755_v26 = vadd.f32 %v1221_v9, %v1157_v8 }
  0xf3   :  { %v1161_v28 = vpop.f32.mrf.mxu0  ;;  %v1224_v11 = vadd.f32 %v1223_v27, %v1222_v25  ;;  %v747_v25 = vadd.f32 %v1215_v4, %v1151_v3 }
  0xf4   :  { %v1225_v29 = vpop.f32.mrf.mxu1 }
  0xf5   :  { %v1162_v30 = vpop.f32.mrf.mxu0  ;;  %v758_v27 = vadd.f32 %v1224_v11, %v1160_v10  ;;  %v988_v11 = vld [vmem:[%s1796_s3 + $0x40] sm:$0xff] }
  0xf6   :  { %v1226_v31 = vpop.f32.mrf.mxu1  ;;  %v1163_v14 = vadd.f32 %v1162_v30, %v1161_v28  ;;  %v1658_v28 = vadd.f32 %v1218_v6, %v1154_v5 }
  0xf7   :  { %v1164_v32 = vpop.f32.mrf.mxu0  ;;  %v1227_v13 = vadd.f32 %v1226_v31, %v1225_v29 }
  0xf8   :  { %v1228_v33 = vpop.f32.mrf.mxu1 }
  0xf9   :  { %v1165_v34 = vpop.f32.mrf.mxu0 }
  0xfa   :  { %v1229_v35 = vpop.f32.mrf.mxu1  ;;  %v1166_v15 = vadd.f32 %v1165_v34, %v1164_v32  ;;  %v1660_v32 = vadd.f32 %v1227_v13, %v1163_v14 }
  0xfb   :  { %v1167_v36 = vpop.f32.mrf.mxu0  ;;  %v1230_v16 = vadd.f32 %v1229_v35, %v1228_v33 }
  0xfc   :  { %v1231_v37 = vpop.f32.mrf.mxu1 }
  0xfd   :  { %v1168_v38 = vpop.f32.mrf.mxu0  ;;  %v1662_v34 = vadd.f32 %v1230_v16, %v1166_v15 }
  0xfe   :  { %v1232_v39 = vpop.f32.mrf.mxu1  ;;  %v1169_v17 = vadd.f32 %v1168_v38, %v1167_v36 }
  0xff   :  { %v1170_v40 = vpop.f32.mrf.mxu0  ;;  %v1233_v19 = vadd.f32 %v1232_v39, %v1231_v37 }
 0x100   :  { %v1234_v41 = vpop.f32.mrf.mxu1 }
 0x101   :  { %v1171_v42 = vpop.f32.mrf.mxu0  ;;  %v1664_v38 = vadd.f32 %v1233_v19, %v1169_v17 }
 0x102   :  { %v1235_v43 = vpop.f32.mrf.mxu1  ;;  %v1172_v30 = vadd.f32 %v1171_v42, %v1170_v40 }
 0x103   :  { %v1173_v44 = vpop.f32.mrf.mxu0  ;;  %v1236_v29 = vadd.f32 %v1235_v43, %v1234_v41  ;;  %v1669_v43 = vld [vmem:[%s1795_s2] ss:$0 sm:$0xff] }
 0x104   :  { %v1237_v45 = vpop.f32.mrf.mxu1 }
 0x105   :  { %v1174_v46 = vpop.f32.mrf.mxu0 }
 0x106   :  { %v1238_v47 = vpop.f32.mrf.mxu1  ;;  %v1175_v33 = vadd.f32 %v1174_v46, %v1173_v44 }
 0x107   :  { %v1176_v48 = vpop.f32.mrf.mxu0  ;;  %v1239_v35 = vadd.f32 %v1238_v47, %v1237_v45 }
 0x108   :  { %v1240_v49 = vpop.f32.mrf.mxu1 }
 0x109   :  { %v1177_v50 = vpop.f32.mrf.mxu0 }
 0x10a   :  { %v1241_v51 = vpop.f32.mrf.mxu1  ;;  %v1178_v36 = vadd.f32 %v1177_v50, %v1176_v48  ;;  %v1671_v48 = vadd.f32 %v1236_v29, %v1172_v30 }
 0x10b   :  { %v1179_v52 = vpop.f32.mrf.mxu0  ;;  %v1242_v39 = vadd.f32 %v1241_v51, %v1240_v49  ;;  %v982_v51 = vld [vmem:[%s1796_s3 + $0x10] sm:$0xff] }
 0x10c   :  { %v1243_v53 = vpop.f32.mrf.mxu1 }
 0x10d   :  { %v1180_v54 = vpop.f32.mrf.mxu0 }
 0x10e   :  { %v1244_v55 = vpop.f32.mrf.mxu1  ;;  %v1181_v22 = vadd.f32 %v1180_v54, %v1179_v52 }
 0x10f   :  { %v1182_v56 = vpop.f32.mrf.mxu0  ;;  %v1245_v21 = vadd.f32 %v1244_v55, %v1243_v53 }
 0x110   :  { %v1246_v57 = vpop.f32.mrf.mxu1 }
 0x111   :  { %v1183_v58 = vpop.f32.mrf.mxu0  ;;  %v787_v55 = vadd.f32 %v1245_v21, %v1181_v22 }
 0x112   :  { %v1247_v59 = vpop.f32.mrf.mxu1  ;;  %v1184_v52 = vadd.f32 %v1183_v58, %v1182_v56  ;;  %v779_v58 = vadd.f32 %v1239_v35, %v1175_v33 }
 0x113   :  { %v1185_v60 = vpop.f32.mrf.mxu0  ;;  %v1248_v53 = vadd.f32 %v1247_v59, %v1246_v57 }
 0x114   :  { %v1249_v61 = vpop.f32.mrf.mxu1 }
 0x115   :  { %v1186_v62 = vpop.f32.mrf.mxu0 }
 0x116   :  { %v1250_v63 = vpop.f32.mrf.mxu1  ;;  %v1187_v3 = vadd.f32 %v1186_v62, %v1185_v60  ;;  %v990_v60 = vld [vmem:[%s1796_s3 + $0x50] sm:$0xff] }
 0x117   :  { %v1188_v0 = vpop.f32.mrf.mxu0  ;;  %v1251_v4 = vadd.f32 %v1250_v63, %v1249_v61  ;;  %v790_v63 = vadd.f32 %v1248_v53, %v1184_v52 }
 0x118   :  { %v1252_v1 = vpop.f32.mrf.mxu1 }
 0x119   :  { %v1189_v2 = vpop.f32.mrf.mxu0 }
 0x11a   :  { %v1253_v7 = vpop.f32.mrf.mxu1  ;;  %v1190_v40 = vadd.f32 %v1189_v2, %v1188_v0  ;;  %v782_v0 = vadd.f32 %v1242_v39, %v1178_v36  ;;  %v980_v2 = vld [vmem:[%s1796_s3] sm:$0xff] }
 0x11b   :  { %v1191_v12 = vpop.f32.mrf.mxu0  ;;  %v1254_v41 = vadd.f32 %v1253_v7, %v1252_v1  ;;  %v795_v7 = vadd.f32 %v1251_v4, %v1187_v3  ;;  %v986_v4 = vld [vmem:[%s1796_s3 + $0x30] sm:$0xff] }
 0x11c   :  { %v1255_v18 = vpop.f32.mrf.mxu1 }
 0x11d   :  { %v1192_v20 = vpop.f32.mrf.mxu0  ;;  %v1684_v8 = vadd.f32 %v1254_v41, %v1190_v40 }
 0x11e   :  { %v1256_v23 = vpop.f32.mrf.mxu1  ;;  %v1193_v44 = vadd.f32 %v1192_v20, %v1191_v12 }
 0x11f   :  { %v1194_v24 = vpop.f32.mrf.mxu0  ;;  %v1257_v45 = vadd.f32 %v1256_v23, %v1255_v18  ;;  %v983_v18 = vld [vmem:[%s1796_s3 + $0x18] sm:$0xff] }
 0x120   :  { %v1258_v31 = vpop.f32.mrf.mxu1 }
 0x121   :  { %v1195_v37 = vpop.f32.mrf.mxu0  ;;  %v803_v13 = vadd.f32 %v1257_v45, %v1193_v44  ;;  %v994_v45 = vld [vmem:[%s1796_s3 + $0x70] sm:$0xff] }
 0x122   :  { %v1259_v54 = vpop.f32.mrf.mxu1  ;;  %v1196_v49 = vadd.f32 %v1195_v37, %v1194_v24  ;;  %v991_v24 = vld [vmem:[%s1796_s3 + $0x58] sm:$0xff] }
 0x123   :  { %v1283_v42 = vpop.f32.mrf.mxu0  ;;  %v1260_v50 = vadd.f32 %v1259_v54, %v1258_v31  ;;  %v981_v31 = vld [vmem:[%s1796_s3 + $0x8] sm:$0xff] }
 0x124   :  { %v852_v46 = vadd.f32 %v1283_v42, %v755_v26  ;;  %v1291_v47 = vpop.f32.mrf.mxu1 }
 0x125   :  { %v884_v56 = vadd.f32 %v1291_v47, %v787_v55  ;;  %v843_v57 = vpop.f32.mrf.mxu0  ;;  %v806_v20 = vadd.f32 %v1260_v50, %v1196_v49 }
 0x126   :  { %v966_v59 = vadd.f32 %v1669_v43, %v852_v46  ;;  %v844_v61 = vadd.f32 %v843_v57, %v747_v25  ;;  %v875_v62 = vpop.f32.mrf.mxu1 }
 0x127   :  { %v974_v1 = vadd.f32 %v1669_v43, %v884_v56  ;;  %v876_v5 = vadd.f32 %v875_v62, %v779_v58  ;;  %v1284_v6 = vpop.f32.mrf.mxu0  ;;  %v984_v56 = vld [vmem:[%s1796_s3 + $0x20] sm:$0xff] }
 0x128   :  { %v998_v9 = vadd.f32 %v982_v51, %v966_v59  ;;  %v964_v10 = vadd.f32 %v1669_v43, %v844_v61  ;;  %v855_v12 = vadd.f32 %v1284_v6, %v758_v27  ;;  %v1292_v14 = vpop.f32.mrf.mxu1  ;;  %v992_v61 = vld [vmem:[%s1796_s3 + $0x60] sm:$0xff] }
 0x129   :  { %v1006_v15 = vadd.f32 %v990_v60, %v974_v1  ;;  %v972_v16 = vadd.f32 %v1669_v43, %v876_v5  ;;  %v887_v17 = vadd.f32 %v1292_v14, %v790_v63  ;;  %v846_v19 = vpop.f32.mrf.mxu0  ;;  %v987_v5 = vld [vmem:[%s1796_s3 + $0x38] sm:$0xff] }
 0x12a   :  { %v1014_v22 = vmax.f32 %v998_v9, 0.0  ;;  %v996_v21 = vadd.f32 %v980_v2, %v964_v10  ;;  %v967_v23 = vadd.f32 %v1669_v43, %v855_v12  ;;  %v847_v26 = vadd.f32 %v846_v19, %v1658_v28  ;;  %v878_v25 = vpop.f32.mrf.mxu1  ;;  %v989_v28 = vld [vmem:[%s1796_s3 + $0x48] sm:$0xff] }
 0x12b   :  { %v1022_v27 = vmax.f32 %v1006_v15, 0.0  ;;  %v1004_v30 = vadd.f32 %v988_v11, %v972_v16  ;;  %v975_v29 = vadd.f32 %v1669_v43, %v887_v17  ;;  %v879_v33 = vadd.f32 %v878_v25, %v782_v0  ;;  %v1287_v35 = vpop.f32.mrf.mxu0  ;;  %v995_v11 = vld [vmem:[%s1796_s3 + $0x78] sm:$0xff] }
 0x12c   :  { %1030 = vst [vmem:[%s1797_s4 + $0x10] sm:$0xff] %v1014_v22  ;;  %v1012_v36 = vmax.f32 %v996_v21, 0.0  ;;  %v999_v37 = vadd.f32 %v983_v18, %v967_v23  ;;  %v965_v39 = vadd.f32 %v1669_v43, %v847_v26  ;;  %v868_v52 = vadd.f32 %v1287_v35, %v1664_v38  ;;  %v1295_v53 = vpop.f32.mrf.mxu1  ;;  %v985_v18 = vld [vmem:[%s1796_s3 + $0x28] sm:$0xff] }
 0x12d   :  { %1038 = vst [vmem:[%s1797_s4 + $0x50] sm:$0xff] %v1022_v27  ;;  %v1020_v54 = vmax.f32 %v1004_v30, 0.0  ;;  %v1007_v55 = vadd.f32 %v991_v24, %v975_v29  ;;  %v973_v3 = vadd.f32 %v1669_v43, %v879_v33  ;;  %v900_v40 = vadd.f32 %v1295_v53, %v803_v13  ;;  %v859_v41 = vpop.f32.mrf.mxu0  ;;  %v993_v22 = vld [vmem:[%s1796_s3 + $0x68] sm:$0xff] }
 0x12e   :  { %1028 = vst [vmem:[%s1797_s4] sm:$0xff] %v1012_v36  ;;  %v1015_v38 = vmax.f32 %v999_v37, 0.0  ;;  %v997_v42 = vadd.f32 %v981_v31, %v965_v39  ;;  %v970_v44 = vadd.f32 %v1669_v43, %v868_v52  ;;  %v860_v46 = vadd.f32 %v859_v41, %v1660_v32  ;;  %v891_v47 = vpop.f32.mrf.mxu1 }
 0x12f   :  { %1036 = vst [vmem:[%s1797_s4 + $0x40] sm:$0xff] %v1020_v54  ;;  %v1023_v49 = vmax.f32 %v1007_v55, 0.0  ;;  %v1005_v50 = vadd.f32 %v989_v28, %v973_v3  ;;  %v978_v51 = vadd.f32 %v1669_v43, %v900_v40  ;;  %v892_v57 = vadd.f32 %v891_v47, %v795_v7  ;;  %v1288_v58 = vpop.f32.mrf.mxu0 }
 0x130   :  { %1031 = vst [vmem:[%s1797_s4 + $0x18] sm:$0xff] %v1015_v38  ;;  %v1013_v32 = vmax.f32 %v997_v42, 0.0  ;;  %v1002_v59 = vadd.f32 %v986_v4, %v970_v44  ;;  %v968_v60 = vadd.f32 %v1669_v43, %v860_v46  ;;  %v871_v62 = vadd.f32 %v1288_v58, %v1671_v48  ;;  %v1296_v63 = vpop.f32.mrf.mxu1 }
 0x131   :  { %1039 = vst [vmem:[%s1797_s4 + $0x58] sm:$0xff] %v1023_v49  ;;  %v1021_v0 = vmax.f32 %v1005_v50, 0.0  ;;  %v1010_v1 = vadd.f32 %v994_v45, %v978_v51  ;;  %v976_v2 = vadd.f32 %v1669_v43, %v892_v57  ;;  %v903_v6 = vadd.f32 %v1296_v63, %v806_v20  ;;  %v862_v7 = vpop.f32.mrf.mxu0 }
 0x132   :  { %1029 = vst [vmem:[%s1797_s4 + $0x8] sm:$0xff] %v1013_v32  ;;  %v1018_v48 = vmax.f32 %v1002_v59, 0.0  ;;  %v1000_v9 = vadd.f32 %v984_v56, %v968_v60  ;;  %v971_v10 = vadd.f32 %v1669_v43, %v871_v62  ;;  %v863_v12 = vadd.f32 %v862_v7, %v1662_v34  ;;  %v894_v14 = vpop.f32.mrf.mxu1 }
 0x133   :  { %1037 = vst [vmem:[%s1797_s4 + $0x48] sm:$0xff] %v1021_v0  ;;  %v1026_v13 = vmax.f32 %v1010_v1, 0.0  ;;  %v1008_v15 = vadd.f32 %v992_v61, %v976_v2  ;;  %v979_v16 = vadd.f32 %v1669_v43, %v903_v6  ;;  %v895_v17 = vadd.f32 %v894_v14, %v1684_v8 }
 0x134   :  { %1034 = vst [vmem:[%s1797_s4 + $0x30] sm:$0xff] %v1018_v48  ;;  %v1016_v34 = vmax.f32 %v1000_v9, 0.0  ;;  %v1003_v19 = vadd.f32 %v987_v5, %v971_v10  ;;  %v969_v20 = vadd.f32 %v1669_v43, %v863_v12 }
 0x135   :  { %1042 = vst [vmem:[%s1797_s4 + $0x70] sm:$0xff] %v1026_v13  ;;  %v1024_v21 = vmax.f32 %v1008_v15, 0.0  ;;  %v1011_v23 = vadd.f32 %v995_v11, %v979_v16  ;;  %v977_v8 = vadd.f32 %v1669_v43, %v895_v17 }
 0x136   :  { %1032 = vst [vmem:[%s1797_s4 + $0x20] sm:$0xff] %v1016_v34  ;;  %v1019_v24 = vmax.f32 %v1003_v19, 0.0  ;;  %v1001_v26 = vadd.f32 %v985_v18, %v969_v20 }
 0x137   :  { %1040 = vst [vmem:[%s1797_s4 + $0x60] sm:$0xff] %v1024_v21  ;;  %v1027_v25 = vmax.f32 %v1011_v23, 0.0  ;;  %v1009_v27 = vadd.f32 %v993_v22, %v977_v8 }
 0x138   :  { %1035 = vst [vmem:[%s1797_s4 + $0x38] sm:$0xff] %v1019_v24  ;;  %v1017_v30 = vmax.f32 %v1001_v26, 0.0 }
 0x139   :  { %1043 = vst [vmem:[%s1797_s4 + $0x78] sm:$0xff] %v1027_v25  ;;  %v1025_v43 = vmax.f32 %v1009_v27, 0.0 }
 0x13a   :  { %1033 = vst [vmem:[%s1797_s4 + $0x28] sm:$0xff] %v1017_v30 }
 0x13b   :  { %1041 = vst [vmem:[%s1797_s4 + $0x68] sm:$0xff] %v1025_v43 }

// kernel: resnet34_forward.47
= control target key start
LH: loop header
LB: loop body
LE: loop exit
PB: predicated region body
PF: predicated region fallthrough
CT: control target
= control target key end

     0   :  { %vm377_vm0 = vcmask 523264   ;;  %s915_s1 = inlined_call_operand.vmem [shape: bf16[576,128], index: 1, kind: input, shape index: {}]   ;;  %s916_s0 = inlined_call_operand.vmem [shape: bf16[32,576], index: 0, kind: input, shape index: {}]   ;;  %s917_s2 = inlined_call_operand.vmem [shape: f32[1,128], index: 2, kind: input, shape index: {}]   ;;  %s918_s3 = inlined_call_operand.vmem [shape: f32[32,128], index: 3, kind: output, shape index: {}]  }
   0x1   :  { %v692_v0 = vld [vmem:[%s915_s1 + $0x78] sm:$0xff]   ;;  %v696_v4 = vld [vmem:[%s915_s1 + $0x70] sm:$0xff]   ;;  %v700_v8 = vld [vmem:[%s915_s1 + $0x68] sm:$0xff]  }
   0x2   :  { %v693_v1 = vld [vmem:[%s915_s1 + $0xf8] sm:$0xff]   ;;  %618 = vmatprep.subr.bf16.mxu0 %v692_v0  ;;  %v697_v5 = vld [vmem:[%s915_s1 + $0xf0] sm:$0xff]   ;;  %v701_v9 = vld [vmem:[%s915_s1 + $0xe8] sm:$0xff]  }
   0x3   :  { %v694_v2 = vld [vmem:[%s915_s1 + $0x38] sm:$0xff]   ;;  %646 = vmatprep.subr.bf16.mxu1 %v693_v1  ;;  %v698_v6 = vld [vmem:[%s915_s1 + $0x30] sm:$0xff]   ;;  %v702_v10 = vld [vmem:[%s915_s1 + $0x28] sm:$0xff]  }
   0x4   :  { %v695_v3 = vld [vmem:[%s915_s1 + $0xb8] sm:$0xff]   ;;  %619 = vmatpush3.bf16.msra.mxu0 %v694_v2  ;;  %v699_v7 = vld [vmem:[%s915_s1 + $0xb0] sm:$0xff]   ;;  %v703_v11 = vld [vmem:[%s915_s1 + $0xa8] sm:$0xff]  }
   0x5   :  { %647 = vmatpush3.bf16.msra.mxu1 %v695_v3  ;;  %620 = vmatprep.subr.bf16.mxu0 %v696_v4  ;;  %v704_v12 = vld [vmem:[%s915_s1 + $0x60] sm:$0xff]   ;;  %v708_v16 = vld [vmem:[%s915_s1 + $0x58] sm:$0xff]   ;;  %v712_v20 = vld [vmem:[%s915_s1 + $0x50] sm:$0xff]  }
   0x6   :  { %648 = vmatprep.subr.bf16.mxu1 %v697_v5  ;;  %v705_v13 = vld [vmem:[%s915_s1 + $0xe0] sm:$0xff]   ;;  %v709_v17 = vld [vmem:[%s915_s1 + $0xd8] sm:$0xff]   ;;  %v713_v21 = vld [vmem:[%s915_s1 + $0xd0] sm:$0xff]  }
   0x7   :  { %v706_v14 = vld [vmem:[%s915_s1 + $0x20] sm:$0xff]   ;;  %v710_v18 = vld [vmem:[%s915_s1 + $0x18] sm:$0xff]   ;;  %v714_v22 = vld [vmem:[%s915_s1 + $0x10] sm:$0xff]  }
   0x8   :  { %621 = vmatpush3.bf16.msra.mxu0 %v698_v6  ;;  %v707_v15 = vld [vmem:[%s915_s1 + $0xa0] sm:$0xff]   ;;  %v711_v19 = vld [vmem:[%s915_s1 + $0x98] sm:$0xff]   ;;  %v715_v23 = vld [vmem:[%s915_s1 + $0x90] sm:$0xff]  }
   0x9   :  { %649 = vmatpush3.bf16.msra.mxu1 %v699_v7  ;;  %622 = vmatprep.subr.bf16.mxu0 %v700_v8  ;;  %v716_v24 = vld [vmem:[%s915_s1 + $0x48] sm:$0xff]   ;;  %v720_v28 = vld [vmem:[%s915_s1 + $0x40] sm:$0xff]   ;;  %v730_v36 = vld [vmem:[%s915_s1 + $0x118] sm:$0xff]  }
   0xa   :  { %650 = vmatprep.subr.bf16.mxu1 %v701_v9  ;;  %v717_v25 = vld [vmem:[%s915_s1 + $0xc8] sm:$0xff]   ;;  %v721_v29 = vld [vmem:[%s915_s1 + $0xc0] sm:$0xff]   ;;  %v731_v37 = vld [vmem:[%s915_s1 + $0x110] sm:$0xff]  }
   0xb   :  { %v718_v26 = vld [vmem:[%s915_s1 + $0x8] sm:$0xff]   ;;  %v722_v30 = vld [vmem:[%s915_s1] sm:$0xff]  }
   0xc   :  { %623 = vmatpush3.bf16.msra.mxu0 %v702_v10  ;;  %v719_v27 = vld [vmem:[%s915_s1 + $0x88] sm:$0xff]   ;;  %v723_v31 = vld [vmem:[%s915_s1 + $0x80] sm:$0xff]  }
   0xd   :  { %651 = vmatpush3.bf16.msra.mxu1 %v703_v11  ;;  %624 = vmatprep.subr.bf16.mxu0 %v704_v12  ;;  %v724_v32 = vld [vmem:[%s916_s0] ss:$20 sps:$4 sm:$0xff]   ;;  %v726_v33 = vld [vmem:[%s916_s0 + $0x4] ss:$20 sps:$4 sm:$0xff]   ;;  %v727_v34 = vld [vmem:[%s916_s0 + $0x8] ss:$20 sps:$4 sm:$0xff]  }
   0xe   :  { %652 = vmatprep.subr.bf16.mxu1 %v705_v13  ;;  %v729_v35 = vld [vmem:[%s916_s0 + $0xc] ss:$20 sps:$4 sm:$0xff]   ;;  %416 = vmatprep.mubr.bf16.mxu0 %v726_v33  ;;  %v734_v39 = vld [vmem:[%s916_s0 + $0x34] ss:$20 sps:$4 sm:$0xff]   ;;  %v737_v42 = vld [vmem:[%s916_s0 + $0x30] ss:$20 sps:$4 sm:$0xff]  }
   0xf   :  { %465 = vmatprep.mubr.bf16.mxu1 %v729_v35  ;;  %v732_v38 = vld [vmem:[%s916_s0 + $0x2c] ss:$20 sps:$4 sm:$0xff]   ;;  %v736_v40 = vld [vmem:[%s916_s0 + $0x28] ss:$20 sps:$4 sm:$0xff]   ;;  %v740_v43 = vld [vmem:[%s916_s0 + $0x10] ss:$20 sps:$4 sm:$0xff]  }
  0x10   :  { %625 = vmatpush3.bf16.msra.mxu0 %v706_v14  ;;  %v738_v41 = vld [vmem:[%s915_s1 + $0x108] sm:$0xff]   ;;  %v739_v44 = vld [vmem:[%s915_s1 + $0x100] sm:$0xff]  }
  0x11   :  { %653 = vmatpush3.bf16.msra.mxu1 %v707_v15  ;;  %626 = vmatprep.subr.bf16.mxu0 %v708_v16  ;;  %v741_v45 = vld [vmem:[%s916_s0 + $0x38] ss:$20 sps:$4 sm:$0xff]   ;;  %v617_v6 = vld [vmem:[%s917_s2] ss:$0 sm:$0xff] }
  0x12   :  { %654 = vmatprep.subr.bf16.mxu1 %v709_v17 }
  0x14   :  { %627 = vmatpush3.bf16.msra.mxu0 %v710_v18 }
  0x15   :  { %655 = vmatpush3.bf16.msra.mxu1 %v711_v19  ;;  %628 = vmatprep.subr.bf16.mxu0 %v712_v20 }
  0x16   :  { %656 = vmatprep.subr.bf16.mxu1 %v713_v21 }
  0x18   :  { %629 = vmatpush3.bf16.msra.mxu0 %v714_v22 }
  0x19   :  { %657 = vmatpush3.bf16.msra.mxu1 %v715_v23  ;;  %630 = vmatprep.subr.bf16.mxu0 %v716_v24 }
  0x1a   :  { %658 = vmatprep.subr.bf16.mxu1 %v717_v25 }
  0x1c   :  { %631 = vmatpush3.bf16.msra.mxu0 %v718_v26 }
  0x1d   :  { %659 = vmatpush3.bf16.msra.mxu1 %v719_v27  ;;  %632 = vmatprep.subr.bf16.mxu0 %v720_v28 }
  0x1e   :  { %660 = vmatprep.subr.bf16.mxu1 %v721_v29 }
  0x20   :  { %633 = vmatpush3.bf16.msra.mxu0 %v722_v30 }
  0x21   :  { %661 = vmatpush3.bf16.msra.mxu1 %v723_v31  ;;  %680 = vmatprep.subr.bf16.mxu0 %v730_v36 }
  0x23   :  { %417 = vmatmul.mubr.bf16.vlgmr.msra.gmra.mxu0 %v724_v32 }
  0x24   :  { %466 = vmatmul.mubr.bf16.vlgmr.msra.gmra.mxu1 %v727_v34  ;;  %681 = vmatpush3.bf16.msra.mxu0 %v730_v36 }
  0x25   :  { %682 = vmatprep.subr.bf16.mxu0 %v731_v37  ;;  %424 = vmatprep.mubr.bf16.mxu0 %v732_v38 }
  0x26   :  { %473 = vmatprep.mubr.bf16.mxu1 %v734_v39 }
  0x28   :  { %683 = vmatpush3.bf16.msra.mxu0 %v731_v37 }
  0x29   :  { %684 = vmatprep.subr.bf16.mxu0 %v738_v41 }
  0x2b   :  { %425 = vmatmul.mubr.bf16.gmra.mxu0 %v736_v40 }
  0x2c   :  { %474 = vmatmul.mubr.bf16.gmra.mxu1 %v737_v42  ;;  %688 = vmatprep.mubr.msk.bf16.mxu0 %vm377_vm0, %v740_v43 }
  0x2d   :  { %685 = vmatpush3.bf16.msra.mxu0 %v738_v41 }
  0x2e   :  { %686 = vmatprep.subr.bf16.mxu0 %v739_v44 }
  0x31   :  { %687 = vmatpush3.bf16.msra.mxu0 %v739_v44 }
  0x34   :  { %689 = vmatmul.mubr.msk.bf16.vlgmr.msra.gmra.mxu0 %vm377_vm0, %v741_v45 }
  0xe3   :  { %v634_v46 = vpop.f32.mrf.mxu0 }
  0xe4   :  { %v662_v47 = vpop.f32.mrf.mxu1 }
  0xe5   :  { %v635_v48 = vpop.f32.mrf.mxu0 }
  0xe6   :  { %v663_v49 = vpop.f32.mrf.mxu1  ;;  %v636_v62 = vadd.f32 %v635_v48, %v634_v46 }
  0xe7   :  { %v637_v50 = vpop.f32.mrf.mxu0  ;;  %v664_v63 = vadd.f32 %v663_v49, %v662_v47 }
  0xe8   :  { %v665_v51 = vpop.f32.mrf.mxu1 }
  0xe9   :  { %v638_v52 = vpop.f32.mrf.mxu0  ;;  %v468_v10 = vadd.f32 %v664_v63, %v636_v62 }
  0xea   :  { %v666_v53 = vpop.f32.mrf.mxu1  ;;  %v639_v7 = vadd.f32 %v638_v52, %v637_v50 }
  0xeb   :  { %v640_v54 = vpop.f32.mrf.mxu0  ;;  %v667_v8 = vadd.f32 %v666_v53, %v665_v51 }
  0xec   :  { %v668_v55 = vpop.f32.mrf.mxu1 }
  0xed   :  { %v641_v56 = vpop.f32.mrf.mxu0  ;;  %v471_v19 = vadd.f32 %v667_v8, %v639_v7 }
  0xee   :  { %v669_v57 = vpop.f32.mrf.mxu1  ;;  %v642_v58 = vadd.f32 %v641_v56, %v640_v54 }
  0xef   :  { %v670_v59 = vadd.f32 %v669_v57, %v668_v55  ;;  %v643_v60 = vpop.f32.mrf.mxu0 }
  0xf0   :  { %v671_v61 = vpop.f32.mrf.mxu1 }
  0xf1   :  { %v644_v0 = vpop.f32.mrf.mxu0  ;;  %v476_v4 = vadd.f32 %v670_v59, %v642_v58 }
  0xf2   :  { %v672_v1 = vpop.f32.mrf.mxu1  ;;  %v645_v2 = vadd.f32 %v644_v0, %v643_v60 }
  0xf3   :  { %v673_v3 = vadd.f32 %v672_v1, %v671_v61 }
  0xf4   :  { %v690_v5 = vpop.f32.mrf.mxu0 }
  0xf5   :  { %v525_v9 = vadd.f32 %v690_v5, %v476_v4  ;;  %v479_v14 = vadd.f32 %v673_v3, %v645_v2 }
  0xf6   :  { %v516_v11 = vpop.f32.mrf.mxu0 }
  0xf7   :  { %v555_v12 = vadd.f32 %v617_v6, %v525_v9  ;;  %v517_v13 = vadd.f32 %v516_v11, %v468_v10 }
  0xf8   :  { %v691_v15 = vpop.f32.mrf.mxu0 }
  0xf9   :  { %v559_v16 = vmax.f32 %v555_v12, 0.0  ;;  %v553_v17 = vadd.f32 %v617_v6, %v517_v13  ;;  %v528_v18 = vadd.f32 %v691_v15, %v479_v14 }
  0xfa   :  { %v519_v20 = vpop.f32.mrf.mxu0 }
  0xfb   :  { %563 = vst [vmem:[%s918_s3 + $0x10] sm:$0xff] %v559_v16  ;;  %v557_v21 = vmax.f32 %v553_v17, 0.0  ;;  %v556_v22 = vadd.f32 %v617_v6, %v528_v18  ;;  %v520_v23 = vadd.f32 %v519_v20, %v471_v19 }
  0xfd   :  { %561 = vst [vmem:[%s918_s3] sm:$0xff] %v557_v21  ;;  %v560_v24 = vmax.f32 %v556_v22, 0.0  ;;  %v554_v25 = vadd.f32 %v617_v6, %v520_v23 }
  0xff   :  { %564 = vst [vmem:[%s918_s3 + $0x18] sm:$0xff] %v560_v24  ;;  %v558_v26 = vmax.f32 %v554_v25, 0.0 }
 0x101   :  { %562 = vst [vmem:[%s918_s3 + $0x8] sm:$0xff] %v558_v26 }

// kernel: resnet34_forward.48
= control target key start
LH: loop header
LB: loop body
LE: loop exit
PB: predicated region body
PF: predicated region fallthrough
CT: control target
= control target key end

     0   :  { %vm73_vm0 = vcmask 523264   ;;  %s249_s1 = inlined_call_operand.vmem [shape: bf16[64,128], index: 1, kind: input, shape index: {}]   ;;  %s250_s0 = inlined_call_operand.vmem [shape: bf16[32,64], index: 0, kind: input, shape index: {}]   ;;  %s251_s2 = inlined_call_operand.vmem [shape: f32[1,128], index: 2, kind: input, shape index: {}]   ;;  %s252_s3 = inlined_call_operand.vmem [shape: f32[32,128], index: 3, kind: output, shape index: {}]  }
   0x1   :  { %v190_v0 = vld [vmem:[%s249_s1 + $0x18] sm:$0xff]   ;;  %v191_v1 = vld [vmem:[%s249_s1 + $0x10] sm:$0xff]   ;;  %v192_v2 = vld [vmem:[%s249_s1 + $0x8] sm:$0xff]  }
   0x2   :  { %178 = vmatprep.subr.bf16.mxu0 %v190_v0  ;;  %v194_v3 = vld [vmem:[%s250_s0] sm:$0xff]   ;;  %v195_v5 = vld [vmem:[%s250_s0 + $0x8] sm:$0xff]  }
   0x3   :  { %179 = vmatpush3.bf16.msra.mxu0 %v190_v0  ;;  %186 = vmatprep.mubr.msk.bf16.mxu0 %vm73_vm0, %v194_v3  ;;  %v193_v4 = vld [vmem:[%s249_s1] sm:$0xff]  }
   0x4   :  { %180 = vmatprep.subr.bf16.mxu0 %v191_v1  ;;  %v171_v6 = vld [vmem:[%s251_s2] ss:$0 sm:$0xff] }
   0x7   :  { %181 = vmatpush3.bf16.msra.mxu0 %v191_v1 }
   0x8   :  { %182 = vmatprep.subr.bf16.mxu0 %v192_v2 }
   0xb   :  { %183 = vmatpush3.bf16.msra.mxu0 %v192_v2 }
   0xc   :  { %184 = vmatprep.subr.bf16.mxu0 %v193_v4 }
   0xf   :  { %185 = vmatpush3.bf16.msra.mxu0 %v193_v4 }
  0x12   :  { %187 = vmatmul.mubr.msk.bf16.vlgmr.msra.gmra.mxu0 %vm73_vm0, %v195_v5 }
  0xd2   :  { %v188_v7 = vpop.f32.mrf.mxu0 }
  0xd3   :  { %v153_v8 = vadd.f32 %v188_v7, %v171_v6 }
  0xd4   :  { %v114_v9 = vpop.f32.mrf.mxu0 }
  0xd5   :  { %157 = vst [vmem:[%s252_s3 + $0x10] sm:$0xff] %v153_v8  ;;  %v151_v10 = vadd.f32 %v171_v6, %v114_v9 }
  0xd6   :  { %v189_v11 = vpop.f32.mrf.mxu0 }
  0xd7   :  { %155 = vst [vmem:[%s252_s3] sm:$0xff] %v151_v10  ;;  %v154_v12 = vadd.f32 %v189_v11, %v171_v6 }
  0xd8   :  { %v117_v13 = vpop.f32.mrf.mxu0 }
  0xd9   :  { %158 = vst [vmem:[%s252_s3 + $0x18] sm:$0xff] %v154_v12  ;;  %v152_v14 = vadd.f32 %v171_v6, %v117_v13 }
  0xdb   :  { %156 = vst [vmem:[%s252_s3 + $0x8] sm:$0xff] %v152_v14 }

// kernel: resnet34_forward.49
= control target key start
LH: loop header
LB: loop body
LE: loop exit
PB: predicated region body
PF: predicated region fallthrough
CT: control target
= control target key end

     0   :  { %s1662_s1 = inlined_call_operand.vmem [shape: bf16[1152,128], index: 1, kind: input, shape index: {}]   ;;  %s1663_s0 = inlined_call_operand.vmem [shape: bf16[32,1152], index: 0, kind: input, shape index: {}]   ;;  %s1664_s2 = inlined_call_operand.vmem [shape: f32[1,128], index: 2, kind: input, shape index: {}]   ;;  %s1665_s3 = inlined_call_operand.vmem [shape: f32[32,128], index: 3, kind: input, shape index: {}]   ;;  %s1666_s4 = inlined_call_operand.vmem [shape: f32[32,128], index: 4, kind: output, shape index: {}]  }
   0x1   :  { %v1242_v0 = vld [vmem:[%s1662_s1 + $0x78] sm:$0xff]   ;;  %v1246_v4 = vld [vmem:[%s1662_s1 + $0x70] sm:$0xff]   ;;  %v1250_v8 = vld [vmem:[%s1662_s1 + $0x68] sm:$0xff]  }
   0x2   :  { %v1243_v1 = vld [vmem:[%s1662_s1 + $0xf8] sm:$0xff]   ;;  %1100 = vmatprep.subr.bf16.mxu0 %v1242_v0  ;;  %v1247_v5 = vld [vmem:[%s1662_s1 + $0xf0] sm:$0xff]   ;;  %v1251_v9 = vld [vmem:[%s1662_s1 + $0xe8] sm:$0xff]  }
   0x3   :  { %v1244_v2 = vld [vmem:[%s1662_s1 + $0x38] sm:$0xff]   ;;  %1128 = vmatprep.subr.bf16.mxu1 %v1243_v1  ;;  %v1248_v6 = vld [vmem:[%s1662_s1 + $0x30] sm:$0xff]   ;;  %v1252_v10 = vld [vmem:[%s1662_s1 + $0x28] sm:$0xff]  }
   0x4   :  { %v1245_v3 = vld [vmem:[%s1662_s1 + $0xb8] sm:$0xff]   ;;  %1101 = vmatpush3.bf16.msra.mxu0 %v1244_v2  ;;  %v1249_v7 = vld [vmem:[%s1662_s1 + $0xb0] sm:$0xff]   ;;  %v1253_v11 = vld [vmem:[%s1662_s1 + $0xa8] sm:$0xff]  }
   0x5   :  { %1129 = vmatpush3.bf16.msra.mxu1 %v1245_v3  ;;  %1102 = vmatprep.subr.bf16.mxu0 %v1246_v4  ;;  %v1254_v12 = vld [vmem:[%s1662_s1 + $0x60] sm:$0xff]   ;;  %v1258_v16 = vld [vmem:[%s1662_s1 + $0x58] sm:$0xff]   ;;  %v1262_v20 = vld [vmem:[%s1662_s1 + $0x50] sm:$0xff]  }
   0x6   :  { %1130 = vmatprep.subr.bf16.mxu1 %v1247_v5  ;;  %v1255_v13 = vld [vmem:[%s1662_s1 + $0xe0] sm:$0xff]   ;;  %v1259_v17 = vld [vmem:[%s1662_s1 + $0xd8] sm:$0xff]   ;;  %v1263_v21 = vld [vmem:[%s1662_s1 + $0xd0] sm:$0xff]  }
   0x7   :  { %v1256_v14 = vld [vmem:[%s1662_s1 + $0x20] sm:$0xff]   ;;  %v1260_v18 = vld [vmem:[%s1662_s1 + $0x18] sm:$0xff]   ;;  %v1264_v22 = vld [vmem:[%s1662_s1 + $0x10] sm:$0xff]  }
   0x8   :  { %1103 = vmatpush3.bf16.msra.mxu0 %v1248_v6  ;;  %v1257_v15 = vld [vmem:[%s1662_s1 + $0xa0] sm:$0xff]   ;;  %v1261_v19 = vld [vmem:[%s1662_s1 + $0x98] sm:$0xff]   ;;  %v1265_v23 = vld [vmem:[%s1662_s1 + $0x90] sm:$0xff]  }
   0x9   :  { %1131 = vmatpush3.bf16.msra.mxu1 %v1249_v7  ;;  %1104 = vmatprep.subr.bf16.mxu0 %v1250_v8  ;;  %v1266_v24 = vld [vmem:[%s1662_s1 + $0x48] sm:$0xff]   ;;  %v1270_v28 = vld [vmem:[%s1662_s1 + $0x40] sm:$0xff]   ;;  %v1280_v36 = vld [vmem:[%s1662_s1 + $0x178] sm:$0xff]  }
   0xa   :  { %1132 = vmatprep.subr.bf16.mxu1 %v1251_v9  ;;  %v1267_v25 = vld [vmem:[%s1662_s1 + $0xc8] sm:$0xff]   ;;  %v1271_v29 = vld [vmem:[%s1662_s1 + $0xc0] sm:$0xff]   ;;  %v1281_v37 = vld [vmem:[%s1662_s1 + $0x138] sm:$0xff]  }
   0xb   :  { %v1268_v26 = vld [vmem:[%s1662_s1 + $0x8] sm:$0xff]   ;;  %v1272_v30 = vld [vmem:[%s1662_s1] sm:$0xff]   ;;  %v1282_v38 = vld [vmem:[%s1662_s1 + $0x1f8] sm:$0xff]  }
   0xc   :  { %1105 = vmatpush3.bf16.msra.mxu0 %v1252_v10  ;;  %v1269_v27 = vld [vmem:[%s1662_s1 + $0x88] sm:$0xff]   ;;  %v1273_v31 = vld [vmem:[%s1662_s1 + $0x80] sm:$0xff]   ;;  %v1283_v39 = vld [vmem:[%s1662_s1 + $0x1b8] sm:$0xff]  }
   0xd   :  { %1133 = vmatpush3.bf16.msra.mxu1 %v1253_v11  ;;  %1106 = vmatprep.subr.bf16.mxu0 %v1254_v12  ;;  %v1274_v32 = vld [vmem:[%s1663_s0] ss:$36 sps:$4 sm:$0xff]   ;;  %v1277_v34 = vld [vmem:[%s1663_s0 + $0x8] ss:$36 sps:$4 sm:$0xff]   ;;  %v1284_v40 = vld [vmem:[%s1662_s1 + $0x170] sm:$0xff]  }
   0xe   :  { %1134 = vmatprep.subr.bf16.mxu1 %v1255_v13  ;;  %v1276_v33 = vld [vmem:[%s1663_s0 + $0x4] ss:$36 sps:$4 sm:$0xff]   ;;  %v1279_v35 = vld [vmem:[%s1663_s0 + $0xc] ss:$36 sps:$4 sm:$0xff]   ;;  %v1296_v52 = vld [vmem:[%s1662_s1 + $0x158] sm:$0xff]  }
   0xf   :  { %750 = vmatprep.mubr.bf16.mxu0 %v1276_v33  ;;  %799 = vmatprep.mubr.bf16.mxu1 %v1279_v35  ;;  %v1285_v41 = vld [vmem:[%s1662_s1 + $0x130] sm:$0xff]   ;;  %v1288_v44 = vld [vmem:[%s1662_s1 + $0x168] sm:$0xff]   ;;  %v1292_v48 = vld [vmem:[%s1662_s1 + $0x160] sm:$0xff]  }
  0x10   :  { %1107 = vmatpush3.bf16.msra.mxu0 %v1256_v14  ;;  %v1286_v42 = vld [vmem:[%s1662_s1 + $0x1f0] sm:$0xff]   ;;  %v1289_v45 = vld [vmem:[%s1662_s1 + $0x128] sm:$0xff]   ;;  %v1293_v49 = vld [vmem:[%s1662_s1 + $0x120] sm:$0xff]  }
  0x11   :  { %1135 = vmatpush3.bf16.msra.mxu1 %v1257_v15  ;;  %1108 = vmatprep.subr.bf16.mxu0 %v1258_v16  ;;  %v1287_v43 = vld [vmem:[%s1662_s1 + $0x1b0] sm:$0xff]   ;;  %v1290_v46 = vld [vmem:[%s1662_s1 + $0x1e8] sm:$0xff]   ;;  %v1294_v50 = vld [vmem:[%s1662_s1 + $0x1e0] sm:$0xff]  }
  0x12   :  { %1136 = vmatprep.subr.bf16.mxu1 %v1259_v17  ;;  %v1291_v47 = vld [vmem:[%s1662_s1 + $0x1a8] sm:$0xff]   ;;  %v1295_v51 = vld [vmem:[%s1662_s1 + $0x1a0] sm:$0xff]   ;;  %v1297_v53 = vld [vmem:[%s1662_s1 + $0x118] sm:$0xff]  }
  0x13   :  { %v1298_v54 = vld [vmem:[%s1663_s0 + $0x4c] ss:$36 sps:$4 sm:$0xff]   ;;  %v1300_v55 = vld [vmem:[%s1663_s0 + $0x54] ss:$36 sps:$4 sm:$0xff]   ;;  %v1314_v4 = vld [vmem:[%s1662_s1 + $0x140] sm:$0xff]  }
  0x14   :  { %1109 = vmatpush3.bf16.msra.mxu0 %v1260_v18  ;;  %v1302_v56 = vld [vmem:[%s1662_s1 + $0x1d8] sm:$0xff]   ;;  %v1303_v57 = vld [vmem:[%s1663_s0 + $0x48] ss:$36 sps:$4 sm:$0xff]   ;;  %v1304_v58 = vld [vmem:[%s1663_s0 + $0x50] ss:$36 sps:$4 sm:$0xff]  }
  0x15   :  { %1137 = vmatpush3.bf16.msra.mxu1 %v1261_v19  ;;  %1110 = vmatprep.subr.bf16.mxu0 %v1262_v20  ;;  %v1305_v59 = vld [vmem:[%s1662_s1 + $0x198] sm:$0xff]   ;;  %v1306_v60 = vld [vmem:[%s1662_s1 + $0x150] sm:$0xff]   ;;  %v1310_v0 = vld [vmem:[%s1662_s1 + $0x148] sm:$0xff]  }
  0x16   :  { %1138 = vmatprep.subr.bf16.mxu1 %v1263_v21  ;;  %v1307_v61 = vld [vmem:[%s1662_s1 + $0x110] sm:$0xff]   ;;  %v1311_v1 = vld [vmem:[%s1662_s1 + $0x108] sm:$0xff]   ;;  %v1315_v5 = vld [vmem:[%s1662_s1 + $0x100] sm:$0xff]  }
  0x17   :  { %v1308_v62 = vld [vmem:[%s1662_s1 + $0x1d0] sm:$0xff]   ;;  %v1312_v2 = vld [vmem:[%s1662_s1 + $0x1c8] sm:$0xff]   ;;  %v1316_v6 = vld [vmem:[%s1662_s1 + $0x1c0] sm:$0xff]  }
  0x18   :  { %1111 = vmatpush3.bf16.msra.mxu0 %v1264_v22  ;;  %v1309_v63 = vld [vmem:[%s1662_s1 + $0x190] sm:$0xff]   ;;  %v1313_v3 = vld [vmem:[%s1662_s1 + $0x188] sm:$0xff]   ;;  %v1320_v9 = vld [vmem:[%s1662_s1 + $0x180] sm:$0xff]  }
  0x19   :  { %1139 = vmatpush3.bf16.msra.mxu1 %v1265_v23  ;;  %1112 = vmatprep.subr.bf16.mxu0 %v1266_v24  ;;  %v1317_v7 = vld [vmem:[%s1663_s0 + $0x10] ss:$36 sps:$4 sm:$0xff]   ;;  %v1321_v10 = vld [vmem:[%s1662_s1 + $0x238] sm:$0xff]   ;;  %v1329_v16 = vld [vmem:[%s1662_s1 + $0x228] sm:$0xff]  }
  0x1a   :  { %1140 = vmatprep.subr.bf16.mxu1 %v1267_v25  ;;  %v1319_v8 = vld [vmem:[%s1663_s0 + $0x14] ss:$36 sps:$4 sm:$0xff]   ;;  %v1324_v12 = vld [vmem:[%s1663_s0 + $0x1c] ss:$36 sps:$4 sm:$0xff]   ;;  %v1330_v17 = vld [vmem:[%s1663_s0 + $0x64] ss:$36 sps:$4 sm:$0xff]  }
  0x1b   :  { %v1322_v11 = vld [vmem:[%s1663_s0 + $0x18] ss:$36 sps:$4 sm:$0xff]   ;;  %v1325_v13 = vld [vmem:[%s1662_s1 + $0x230] sm:$0xff]   ;;  %v1332_v18 = vld [vmem:[%s1663_s0 + $0x60] ss:$36 sps:$4 sm:$0xff]  }
  0x1c   :  { %1113 = vmatpush3.bf16.msra.mxu0 %v1268_v26  ;;  %v1326_v14 = vld [vmem:[%s1663_s0 + $0x5c] ss:$36 sps:$4 sm:$0xff]   ;;  %v1335_v22 = vld [vmem:[%s1662_s1 + $0x210] sm:$0xff]   ;;  %v1336_v23 = vld [vmem:[%s1662_s1 + $0x208] sm:$0xff]  }
  0x1d   :  { %1141 = vmatpush3.bf16.msra.mxu1 %v1269_v27  ;;  %1114 = vmatprep.subr.bf16.mxu0 %v1270_v28  ;;  %v1328_v15 = vld [vmem:[%s1663_s0 + $0x58] ss:$36 sps:$4 sm:$0xff]   ;;  %v1333_v19 = vld [vmem:[%s1662_s1 + $0x220] sm:$0xff]   ;;  %v1339_v25 = vld [vmem:[%s1663_s0 + $0x68] ss:$36 sps:$4 sm:$0xff]  }
  0x1e   :  { %1142 = vmatprep.subr.bf16.mxu1 %v1271_v29  ;;  %v1334_v20 = vld [vmem:[%s1662_s1 + $0x218] sm:$0xff]   ;;  %v1338_v21 = vld [vmem:[%s1663_s0 + $0x20] ss:$36 sps:$4 sm:$0xff]  }
  0x1f   :  { %v1337_v24 = vld [vmem:[%s1662_s1 + $0x200] sm:$0xff]  }
  0x20   :  { %1115 = vmatpush3.bf16.msra.mxu0 %v1272_v30 }
  0x21   :  { %1143 = vmatpush3.bf16.msra.mxu1 %v1273_v31  ;;  %1156 = vmatprep.subr.bf16.mxu0 %v1280_v36 }
  0x22   :  { %1184 = vmatprep.subr.bf16.mxu1 %v1282_v38 }
  0x23   :  { %751 = vmatmul.mubr.bf16.vlgmr.msra.gmra.mxu0 %v1274_v32 }
  0x24   :  { %800 = vmatmul.mubr.bf16.vlgmr.msra.gmra.mxu1 %v1277_v34  ;;  %1157 = vmatpush3.bf16.msra.mxu0 %v1281_v37 }
  0x25   :  { %1185 = vmatpush3.bf16.msra.mxu1 %v1283_v39  ;;  %1158 = vmatprep.subr.bf16.mxu0 %v1284_v40 }
  0x26   :  { %1186 = vmatprep.subr.bf16.mxu1 %v1286_v42  ;;  %758 = vmatprep.mubr.bf16.mxu0 %v1298_v54 }
  0x27   :  { %807 = vmatprep.mubr.bf16.mxu1 %v1300_v55 }
  0x28   :  { %1159 = vmatpush3.bf16.msra.mxu0 %v1285_v41 }
  0x29   :  { %1187 = vmatpush3.bf16.msra.mxu1 %v1287_v43  ;;  %1160 = vmatprep.subr.bf16.mxu0 %v1288_v44 }
  0x2a   :  { %1188 = vmatprep.subr.bf16.mxu1 %v1290_v46 }
  0x2b   :  { %759 = vmatmul.mubr.bf16.gmra.mxu0 %v1303_v57 }
  0x2c   :  { %1161 = vmatpush3.bf16.msra.mxu0 %v1289_v45  ;;  %808 = vmatmul.mubr.bf16.gmra.mxu1 %v1304_v58 }
  0x2d   :  { %1189 = vmatpush3.bf16.msra.mxu1 %v1291_v47  ;;  %1162 = vmatprep.subr.bf16.mxu0 %v1292_v48 }
  0x2e   :  { %1190 = vmatprep.subr.bf16.mxu1 %v1294_v50  ;;  %848 = vmatprep.mubr.bf16.mxu0 %v1319_v8 }
  0x2f   :  { %897 = vmatprep.mubr.bf16.mxu1 %v1324_v12 }
  0x30   :  { %1163 = vmatpush3.bf16.msra.mxu0 %v1293_v49 }
  0x31   :  { %1191 = vmatpush3.bf16.msra.mxu1 %v1295_v51  ;;  %1164 = vmatprep.subr.bf16.mxu0 %v1296_v52 }
  0x32   :  { %1192 = vmatprep.subr.bf16.mxu1 %v1302_v56 }
  0x34   :  { %1165 = vmatpush3.bf16.msra.mxu0 %v1297_v53 }
  0x35   :  { %1193 = vmatpush3.bf16.msra.mxu1 %v1305_v59  ;;  %1166 = vmatprep.subr.bf16.mxu0 %v1306_v60 }
  0x36   :  { %1194 = vmatprep.subr.bf16.mxu1 %v1308_v62 }
  0x38   :  { %1167 = vmatpush3.bf16.msra.mxu0 %v1307_v61 }
  0x39   :  { %1195 = vmatpush3.bf16.msra.mxu1 %v1309_v63  ;;  %1168 = vmatprep.subr.bf16.mxu0 %v1310_v0 }
  0x3a   :  { %1196 = vmatprep.subr.bf16.mxu1 %v1312_v2 }
  0x3c   :  { %1169 = vmatpush3.bf16.msra.mxu0 %v1311_v1 }
  0x3d   :  { %1197 = vmatpush3.bf16.msra.mxu1 %v1313_v3  ;;  %1170 = vmatprep.subr.bf16.mxu0 %v1314_v4 }
  0x3e   :  { %1198 = vmatprep.subr.bf16.mxu1 %v1316_v6 }
  0x40   :  { %1171 = vmatpush3.bf16.msra.mxu0 %v1315_v5 }
  0x41   :  { %1199 = vmatpush3.bf16.msra.mxu1 %v1320_v9  ;;  %1222 = vmatprep.subr.bf16.mxu0 %v1321_v10 }
  0x43   :  { %849 = vmatmul.mubr.bf16.vlgmr.msra.gmra.mxu0 %v1317_v7 }
  0x44   :  { %1223 = vmatpush3.bf16.msra.mxu0 %v1321_v10  ;;  %898 = vmatmul.mubr.bf16.vlgmr.msra.gmra.mxu1 %v1322_v11 }
  0x45   :  { %1224 = vmatprep.subr.bf16.mxu0 %v1325_v13  ;;  %856 = vmatprep.mubr.bf16.mxu0 %v1326_v14 }
  0x46   :  { %905 = vmatprep.mubr.bf16.mxu1 %v1330_v17 }
  0x48   :  { %1225 = vmatpush3.bf16.msra.mxu0 %v1325_v13 }
  0x49   :  { %1226 = vmatprep.subr.bf16.mxu0 %v1329_v16 }
  0x4b   :  { %857 = vmatmul.mubr.bf16.gmra.mxu0 %v1328_v15 }
  0x4c   :  { %1227 = vmatpush3.bf16.msra.mxu0 %v1329_v16  ;;  %906 = vmatmul.mubr.bf16.gmra.mxu1 %v1332_v18  ;;  %v1099_v18 = vld [vmem:[%s1664_s2] ss:$0 sm:$0xff] }
  0x4d   :  { %1228 = vmatprep.subr.bf16.mxu0 %v1333_v19  ;;  %1238 = vmatprep.mubr.bf16.mxu0 %v1338_v21 }
  0x50   :  { %1229 = vmatpush3.bf16.msra.mxu0 %v1333_v19 }
  0x51   :  { %1230 = vmatprep.subr.bf16.mxu0 %v1334_v20 }
  0x54   :  { %1231 = vmatpush3.bf16.msra.mxu0 %v1334_v20 }
  0x55   :  { %1232 = vmatprep.subr.bf16.mxu0 %v1335_v22 }
  0x58   :  { %1233 = vmatpush3.bf16.msra.mxu0 %v1335_v22 }
  0x59   :  { %1234 = vmatprep.subr.bf16.mxu0 %v1336_v23 }
  0x5c   :  { %1235 = vmatpush3.bf16.msra.mxu0 %v1336_v23  ;;  %v991_v23 = vld [vmem:[%s1665_s3 + $0x10] sm:$0xff] }
  0x5d   :  { %1236 = vmatprep.subr.bf16.mxu0 %v1337_v24 }
  0x60   :  { %1237 = vmatpush3.bf16.msra.mxu0 %v1337_v24 }
  0x63   :  { %1239 = vmatmul.mubr.bf16.vlgmr.msra.gmra.mxu0 %v1339_v25 }
  0xe3   :  { %v1116_v26 = vpop.f32.mrf.mxu0 }
  0xe4   :  { %v1144_v27 = vpop.f32.mrf.mxu1 }
  0xe5   :  { %v1117_v28 = vpop.f32.mrf.mxu0 }
  0xe6   :  { %v1145_v29 = vpop.f32.mrf.mxu1  ;;  %v1118_v57 = vadd.f32 %v1117_v28, %v1116_v26  ;;  %v989_v28 = vld [vmem:[%s1665_s3] sm:$0xff] }
  0xe7   :  { %v1119_v30 = vpop.f32.mrf.mxu0  ;;  %v1146_v58 = vadd.f32 %v1145_v29, %v1144_v27 }
  0xe8   :  { %v1147_v31 = vpop.f32.mrf.mxu1 }
  0xe9   :  { %v1120_v32 = vpop.f32.mrf.mxu0  ;;  %v802_v2 = vadd.f32 %v1146_v58, %v1118_v57 }
  0xea   :  { %v1148_v34 = vpop.f32.mrf.mxu1  ;;  %v1121_v3 = vadd.f32 %v1120_v32, %v1119_v30 }
  0xeb   :  { %v1122_v33 = vpop.f32.mrf.mxu0  ;;  %v1149_v4 = vadd.f32 %v1148_v34, %v1147_v31  ;;  %v992_v34 = vld [vmem:[%s1665_s3 + $0x18] sm:$0xff] }
  0xec   :  { %v1150_v35 = vpop.f32.mrf.mxu1 }
  0xed   :  { %v1123_v36 = vpop.f32.mrf.mxu0  ;;  %v805_v13 = vadd.f32 %v1149_v4, %v1121_v3 }
  0xee   :  { %v1151_v37 = vpop.f32.mrf.mxu1  ;;  %v1124_v55 = vadd.f32 %v1123_v36, %v1122_v33 }
  0xef   :  { %v1125_v38 = vpop.f32.mrf.mxu0  ;;  %v1152_v56 = vadd.f32 %v1151_v37, %v1150_v35 }
  0xf0   :  { %v1153_v39 = vpop.f32.mrf.mxu1 }
  0xf1   :  { %v1126_v40 = vpop.f32.mrf.mxu0  ;;  %v810_v62 = vadd.f32 %v1152_v56, %v1124_v55 }
  0xf2   :  { %v1154_v42 = vpop.f32.mrf.mxu1  ;;  %v1127_v63 = vadd.f32 %v1126_v40, %v1125_v38  ;;  %v990_v40 = vld [vmem:[%s1665_s3 + $0x8] sm:$0xff] }
  0xf3   :  { %v1155_v0 = vadd.f32 %v1154_v42, %v1153_v39 }
  0xf5   :  { %v813_v9 = vadd.f32 %v1155_v0, %v1127_v63 }
 0x103   :  { %v1172_v41 = vpop.f32.mrf.mxu0 }
 0x104   :  { %v1200_v44 = vpop.f32.mrf.mxu1 }
 0x105   :  { %v1173_v43 = vpop.f32.mrf.mxu0 }
 0x106   :  { %v1201_v46 = vpop.f32.mrf.mxu1  ;;  %v1174_v1 = vadd.f32 %v1173_v43, %v1172_v41 }
 0x107   :  { %v1175_v45 = vpop.f32.mrf.mxu0  ;;  %v1202_v11 = vadd.f32 %v1201_v46, %v1200_v44 }
 0x108   :  { %v1203_v48 = vpop.f32.mrf.mxu1  ;;  %v851_v10 = vadd.f32 %v1174_v1, %v802_v2 }
 0x109   :  { %v1176_v47 = vpop.f32.mrf.mxu0 }
 0x10a   :  { %v1204_v50 = vpop.f32.mrf.mxu1  ;;  %v1177_v12 = vadd.f32 %v1176_v47, %v1175_v45  ;;  %v900_v22 = vadd.f32 %v1202_v11, %v851_v10 }
 0x10b   :  { %v1178_v49 = vpop.f32.mrf.mxu0  ;;  %v1205_v20 = vadd.f32 %v1204_v50, %v1203_v48 }
 0x10c   :  { %v1206_v52 = vpop.f32.mrf.mxu1  ;;  %v854_v19 = vadd.f32 %v1177_v12, %v805_v13 }
 0x10d   :  { %v1179_v51 = vpop.f32.mrf.mxu0 }
 0x10e   :  { %v1207_v54 = vpop.f32.mrf.mxu1  ;;  %v1180_v59 = vadd.f32 %v1179_v51, %v1178_v49  ;;  %v903_v33 = vadd.f32 %v1205_v20, %v854_v19 }
 0x10f   :  { %v1181_v53 = vpop.f32.mrf.mxu0  ;;  %v1208_v6 = vadd.f32 %v1207_v54, %v1206_v52 }
 0x110   :  { %v1209_v61 = vpop.f32.mrf.mxu1  ;;  %v859_v5 = vadd.f32 %v1180_v59, %v810_v62 }
 0x111   :  { %v1182_v60 = vpop.f32.mrf.mxu0 }
 0x112   :  { %v1183_v7 = vadd.f32 %v1182_v60, %v1181_v53  ;;  %v1210_v8 = vpop.f32.mrf.mxu1  ;;  %v908_v16 = vadd.f32 %v1208_v6, %v859_v5 }
 0x113   :  { %v1211_v15 = vadd.f32 %v1210_v8, %v1209_v61 }
 0x114   :  { %v862_v14 = vadd.f32 %v1183_v7, %v813_v9 }
 0x116   :  { %v911_v27 = vadd.f32 %v1211_v15, %v862_v14 }
 0x123   :  { %v1240_v17 = vpop.f32.mrf.mxu0 }
 0x124   :  { %v957_v21 = vadd.f32 %v1240_v17, %v908_v16 }
 0x125   :  { %v948_v24 = vpop.f32.mrf.mxu0 }
 0x126   :  { %v987_v25 = vadd.f32 %v1099_v18, %v957_v21  ;;  %v949_v26 = vadd.f32 %v948_v24, %v900_v22 }
 0x127   :  { %v1241_v29 = vpop.f32.mrf.mxu0 }
 0x128   :  { %v995_v30 = vadd.f32 %v991_v23, %v987_v25  ;;  %v985_v31 = vadd.f32 %v1099_v18, %v949_v26  ;;  %v960_v32 = vadd.f32 %v1241_v29, %v911_v27 }
 0x129   :  { %v951_v35 = vpop.f32.mrf.mxu0 }
 0x12a   :  { %v999_v36 = vmax.f32 %v995_v30, 0.0  ;;  %v993_v37 = vadd.f32 %v989_v28, %v985_v31  ;;  %v988_v38 = vadd.f32 %v1099_v18, %v960_v32  ;;  %v952_v39 = vadd.f32 %v951_v35, %v903_v33 }
 0x12c   :  { %1003 = vst [vmem:[%s1666_s4 + $0x10] sm:$0xff] %v999_v36  ;;  %v997_v41 = vmax.f32 %v993_v37, 0.0  ;;  %v996_v42 = vadd.f32 %v992_v34, %v988_v38  ;;  %v986_v43 = vadd.f32 %v1099_v18, %v952_v39 }
 0x12e   :  { %1001 = vst [vmem:[%s1666_s4] sm:$0xff] %v997_v41  ;;  %v1000_v44 = vmax.f32 %v996_v42, 0.0  ;;  %v994_v45 = vadd.f32 %v990_v40, %v986_v43 }
 0x130   :  { %1004 = vst [vmem:[%s1666_s4 + $0x18] sm:$0xff] %v1000_v44  ;;  %v998_v46 = vmax.f32 %v994_v45, 0.0 }
 0x132   :  { %1002 = vst [vmem:[%s1666_s4 + $0x8] sm:$0xff] %v998_v46 }

// kernel: resnet34_forward.50
= control target key start
LH: loop header
LB: loop body
LE: loop exit
PB: predicated region body
PF: predicated region fallthrough
CT: control target
= control target key end

     0   :  { %s1634_s1 = inlined_call_operand.vmem [shape: bf16[1152,128], index: 1, kind: input, shape index: {}]   ;;  %s1635_s0 = inlined_call_operand.vmem [shape: bf16[32,1152], index: 0, kind: input, shape index: {}]   ;;  %s1636_s2 = inlined_call_operand.vmem [shape: f32[1,128], index: 2, kind: input, shape index: {}]   ;;  %s1637_s3 = inlined_call_operand.vmem [shape: f32[32,128], index: 3, kind: output, shape index: {}]  }
   0x1   :  { %v1231_v0 = vld [vmem:[%s1634_s1 + $0x78] sm:$0xff]   ;;  %v1235_v4 = vld [vmem:[%s1634_s1 + $0x70] sm:$0xff]   ;;  %v1239_v8 = vld [vmem:[%s1634_s1 + $0x68] sm:$0xff]  }
   0x2   :  { %v1232_v1 = vld [vmem:[%s1634_s1 + $0xf8] sm:$0xff]   ;;  %1089 = vmatprep.subr.bf16.mxu0 %v1231_v0  ;;  %v1236_v5 = vld [vmem:[%s1634_s1 + $0xf0] sm:$0xff]   ;;  %v1240_v9 = vld [vmem:[%s1634_s1 + $0xe8] sm:$0xff]  }
   0x3   :  { %v1233_v2 = vld [vmem:[%s1634_s1 + $0x38] sm:$0xff]   ;;  %1117 = vmatprep.subr.bf16.mxu1 %v1232_v1  ;;  %v1237_v6 = vld [vmem:[%s1634_s1 + $0x30] sm:$0xff]   ;;  %v1241_v10 = vld [vmem:[%s1634_s1 + $0x28] sm:$0xff]  }
   0x4   :  { %v1234_v3 = vld [vmem:[%s1634_s1 + $0xb8] sm:$0xff]   ;;  %1090 = vmatpush3.bf16.msra.mxu0 %v1233_v2  ;;  %v1238_v7 = vld [vmem:[%s1634_s1 + $0xb0] sm:$0xff]   ;;  %v1242_v11 = vld [vmem:[%s1634_s1 + $0xa8] sm:$0xff]  }
   0x5   :  { %1118 = vmatpush3.bf16.msra.mxu1 %v1234_v3  ;;  %1091 = vmatprep.subr.bf16.mxu0 %v1235_v4  ;;  %v1243_v12 = vld [vmem:[%s1634_s1 + $0x60] sm:$0xff]   ;;  %v1247_v16 = vld [vmem:[%s1634_s1 + $0x58] sm:$0xff]   ;;  %v1251_v20 = vld [vmem:[%s1634_s1 + $0x50] sm:$0xff]  }
   0x6   :  { %1119 = vmatprep.subr.bf16.mxu1 %v1236_v5  ;;  %v1244_v13 = vld [vmem:[%s1634_s1 + $0xe0] sm:$0xff]   ;;  %v1248_v17 = vld [vmem:[%s1634_s1 + $0xd8] sm:$0xff]   ;;  %v1252_v21 = vld [vmem:[%s1634_s1 + $0xd0] sm:$0xff]  }
   0x7   :  { %v1245_v14 = vld [vmem:[%s1634_s1 + $0x20] sm:$0xff]   ;;  %v1249_v18 = vld [vmem:[%s1634_s1 + $0x18] sm:$0xff]   ;;  %v1253_v22 = vld [vmem:[%s1634_s1 + $0x10] sm:$0xff]  }
   0x8   :  { %1092 = vmatpush3.bf16.msra.mxu0 %v1237_v6  ;;  %v1246_v15 = vld [vmem:[%s1634_s1 + $0xa0] sm:$0xff]   ;;  %v1250_v19 = vld [vmem:[%s1634_s1 + $0x98] sm:$0xff]   ;;  %v1254_v23 = vld [vmem:[%s1634_s1 + $0x90] sm:$0xff]  }
   0x9   :  { %1120 = vmatpush3.bf16.msra.mxu1 %v1238_v7  ;;  %1093 = vmatprep.subr.bf16.mxu0 %v1239_v8  ;;  %v1255_v24 = vld [vmem:[%s1634_s1 + $0x48] sm:$0xff]   ;;  %v1259_v28 = vld [vmem:[%s1634_s1 + $0x40] sm:$0xff]   ;;  %v1269_v36 = vld [vmem:[%s1634_s1 + $0x178] sm:$0xff]  }
   0xa   :  { %1121 = vmatprep.subr.bf16.mxu1 %v1240_v9  ;;  %v1256_v25 = vld [vmem:[%s1634_s1 + $0xc8] sm:$0xff]   ;;  %v1260_v29 = vld [vmem:[%s1634_s1 + $0xc0] sm:$0xff]   ;;  %v1270_v37 = vld [vmem:[%s1634_s1 + $0x138] sm:$0xff]  }
   0xb   :  { %v1257_v26 = vld [vmem:[%s1634_s1 + $0x8] sm:$0xff]   ;;  %v1261_v30 = vld [vmem:[%s1634_s1] sm:$0xff]   ;;  %v1271_v38 = vld [vmem:[%s1634_s1 + $0x1f8] sm:$0xff]  }
   0xc   :  { %1094 = vmatpush3.bf16.msra.mxu0 %v1241_v10  ;;  %v1258_v27 = vld [vmem:[%s1634_s1 + $0x88] sm:$0xff]   ;;  %v1262_v31 = vld [vmem:[%s1634_s1 + $0x80] sm:$0xff]   ;;  %v1272_v39 = vld [vmem:[%s1634_s1 + $0x1b8] sm:$0xff]  }
   0xd   :  { %1122 = vmatpush3.bf16.msra.mxu1 %v1242_v11  ;;  %1095 = vmatprep.subr.bf16.mxu0 %v1243_v12  ;;  %v1263_v32 = vld [vmem:[%s1635_s0] ss:$36 sps:$4 sm:$0xff]   ;;  %v1266_v34 = vld [vmem:[%s1635_s0 + $0x8] ss:$36 sps:$4 sm:$0xff]   ;;  %v1273_v40 = vld [vmem:[%s1634_s1 + $0x170] sm:$0xff]  }
   0xe   :  { %1123 = vmatprep.subr.bf16.mxu1 %v1244_v13  ;;  %v1265_v33 = vld [vmem:[%s1635_s0 + $0x4] ss:$36 sps:$4 sm:$0xff]   ;;  %v1268_v35 = vld [vmem:[%s1635_s0 + $0xc] ss:$36 sps:$4 sm:$0xff]   ;;  %v1285_v52 = vld [vmem:[%s1634_s1 + $0x158] sm:$0xff]  }
   0xf   :  { %747 = vmatprep.mubr.bf16.mxu0 %v1265_v33  ;;  %796 = vmatprep.mubr.bf16.mxu1 %v1268_v35  ;;  %v1274_v41 = vld [vmem:[%s1634_s1 + $0x130] sm:$0xff]   ;;  %v1277_v44 = vld [vmem:[%s1634_s1 + $0x168] sm:$0xff]   ;;  %v1281_v48 = vld [vmem:[%s1634_s1 + $0x160] sm:$0xff]  }
  0x10   :  { %1096 = vmatpush3.bf16.msra.mxu0 %v1245_v14  ;;  %v1275_v42 = vld [vmem:[%s1634_s1 + $0x1f0] sm:$0xff]   ;;  %v1278_v45 = vld [vmem:[%s1634_s1 + $0x128] sm:$0xff]   ;;  %v1282_v49 = vld [vmem:[%s1634_s1 + $0x120] sm:$0xff]  }
  0x11   :  { %1124 = vmatpush3.bf16.msra.mxu1 %v1246_v15  ;;  %1097 = vmatprep.subr.bf16.mxu0 %v1247_v16  ;;  %v1276_v43 = vld [vmem:[%s1634_s1 + $0x1b0] sm:$0xff]   ;;  %v1279_v46 = vld [vmem:[%s1634_s1 + $0x1e8] sm:$0xff]   ;;  %v1283_v50 = vld [vmem:[%s1634_s1 + $0x1e0] sm:$0xff]  }
  0x12   :  { %1125 = vmatprep.subr.bf16.mxu1 %v1248_v17  ;;  %v1280_v47 = vld [vmem:[%s1634_s1 + $0x1a8] sm:$0xff]   ;;  %v1284_v51 = vld [vmem:[%s1634_s1 + $0x1a0] sm:$0xff]   ;;  %v1286_v53 = vld [vmem:[%s1634_s1 + $0x118] sm:$0xff]  }
  0x13   :  { %v1287_v54 = vld [vmem:[%s1635_s0 + $0x4c] ss:$36 sps:$4 sm:$0xff]   ;;  %v1289_v55 = vld [vmem:[%s1635_s0 + $0x54] ss:$36 sps:$4 sm:$0xff]   ;;  %v1303_v4 = vld [vmem:[%s1634_s1 + $0x140] sm:$0xff]  }
  0x14   :  { %1098 = vmatpush3.bf16.msra.mxu0 %v1249_v18  ;;  %v1291_v56 = vld [vmem:[%s1634_s1 + $0x1d8] sm:$0xff]   ;;  %v1292_v57 = vld [vmem:[%s1635_s0 + $0x48] ss:$36 sps:$4 sm:$0xff]   ;;  %v1293_v58 = vld [vmem:[%s1635_s0 + $0x50] ss:$36 sps:$4 sm:$0xff]  }
  0x15   :  { %1126 = vmatpush3.bf16.msra.mxu1 %v1250_v19  ;;  %1099 = vmatprep.subr.bf16.mxu0 %v1251_v20  ;;  %v1294_v59 = vld [vmem:[%s1634_s1 + $0x198] sm:$0xff]   ;;  %v1295_v60 = vld [vmem:[%s1634_s1 + $0x150] sm:$0xff]   ;;  %v1299_v0 = vld [vmem:[%s1634_s1 + $0x148] sm:$0xff]  }
  0x16   :  { %1127 = vmatprep.subr.bf16.mxu1 %v1252_v21  ;;  %v1296_v61 = vld [vmem:[%s1634_s1 + $0x110] sm:$0xff]   ;;  %v1300_v1 = vld [vmem:[%s1634_s1 + $0x108] sm:$0xff]   ;;  %v1304_v5 = vld [vmem:[%s1634_s1 + $0x100] sm:$0xff]  }
  0x17   :  { %v1297_v62 = vld [vmem:[%s1634_s1 + $0x1d0] sm:$0xff]   ;;  %v1301_v2 = vld [vmem:[%s1634_s1 + $0x1c8] sm:$0xff]   ;;  %v1305_v6 = vld [vmem:[%s1634_s1 + $0x1c0] sm:$0xff]  }
  0x18   :  { %1100 = vmatpush3.bf16.msra.mxu0 %v1253_v22  ;;  %v1298_v63 = vld [vmem:[%s1634_s1 + $0x190] sm:$0xff]   ;;  %v1302_v3 = vld [vmem:[%s1634_s1 + $0x188] sm:$0xff]   ;;  %v1309_v9 = vld [vmem:[%s1634_s1 + $0x180] sm:$0xff]  }
  0x19   :  { %1128 = vmatpush3.bf16.msra.mxu1 %v1254_v23  ;;  %1101 = vmatprep.subr.bf16.mxu0 %v1255_v24  ;;  %v1306_v7 = vld [vmem:[%s1635_s0 + $0x10] ss:$36 sps:$4 sm:$0xff]   ;;  %v1310_v10 = vld [vmem:[%s1634_s1 + $0x238] sm:$0xff]   ;;  %v1318_v16 = vld [vmem:[%s1634_s1 + $0x228] sm:$0xff]  }
  0x1a   :  { %1129 = vmatprep.subr.bf16.mxu1 %v1256_v25  ;;  %v1308_v8 = vld [vmem:[%s1635_s0 + $0x14] ss:$36 sps:$4 sm:$0xff]   ;;  %v1313_v12 = vld [vmem:[%s1635_s0 + $0x1c] ss:$36 sps:$4 sm:$0xff]   ;;  %v1319_v17 = vld [vmem:[%s1635_s0 + $0x64] ss:$36 sps:$4 sm:$0xff]  }
  0x1b   :  { %v1311_v11 = vld [vmem:[%s1635_s0 + $0x18] ss:$36 sps:$4 sm:$0xff]   ;;  %v1314_v13 = vld [vmem:[%s1634_s1 + $0x230] sm:$0xff]   ;;  %v1321_v18 = vld [vmem:[%s1635_s0 + $0x60] ss:$36 sps:$4 sm:$0xff]  }
  0x1c   :  { %1102 = vmatpush3.bf16.msra.mxu0 %v1257_v26  ;;  %v1315_v14 = vld [vmem:[%s1635_s0 + $0x5c] ss:$36 sps:$4 sm:$0xff]   ;;  %v1324_v22 = vld [vmem:[%s1634_s1 + $0x210] sm:$0xff]   ;;  %v1325_v23 = vld [vmem:[%s1634_s1 + $0x208] sm:$0xff]  }
  0x1d   :  { %1130 = vmatpush3.bf16.msra.mxu1 %v1258_v27  ;;  %1103 = vmatprep.subr.bf16.mxu0 %v1259_v28  ;;  %v1317_v15 = vld [vmem:[%s1635_s0 + $0x58] ss:$36 sps:$4 sm:$0xff]   ;;  %v1322_v19 = vld [vmem:[%s1634_s1 + $0x220] sm:$0xff]   ;;  %v1328_v25 = vld [vmem:[%s1635_s0 + $0x68] ss:$36 sps:$4 sm:$0xff]  }
  0x1e   :  { %1131 = vmatprep.subr.bf16.mxu1 %v1260_v29  ;;  %v1323_v20 = vld [vmem:[%s1634_s1 + $0x218] sm:$0xff]   ;;  %v1327_v21 = vld [vmem:[%s1635_s0 + $0x20] ss:$36 sps:$4 sm:$0xff]  }
  0x1f   :  { %v1326_v24 = vld [vmem:[%s1634_s1 + $0x200] sm:$0xff]  }
  0x20   :  { %1104 = vmatpush3.bf16.msra.mxu0 %v1261_v30 }
  0x21   :  { %1132 = vmatpush3.bf16.msra.mxu1 %v1262_v31  ;;  %1145 = vmatprep.subr.bf16.mxu0 %v1269_v36 }
  0x22   :  { %1173 = vmatprep.subr.bf16.mxu1 %v1271_v38 }
  0x23   :  { %748 = vmatmul.mubr.bf16.vlgmr.msra.gmra.mxu0 %v1263_v32 }
  0x24   :  { %797 = vmatmul.mubr.bf16.vlgmr.msra.gmra.mxu1 %v1266_v34  ;;  %1146 = vmatpush3.bf16.msra.mxu0 %v1270_v37 }
  0x25   :  { %1174 = vmatpush3.bf16.msra.mxu1 %v1272_v39  ;;  %1147 = vmatprep.subr.bf16.mxu0 %v1273_v40 }
  0x26   :  { %1175 = vmatprep.subr.bf16.mxu1 %v1275_v42  ;;  %755 = vmatprep.mubr.bf16.mxu0 %v1287_v54 }
  0x27   :  { %804 = vmatprep.mubr.bf16.mxu1 %v1289_v55 }
  0x28   :  { %1148 = vmatpush3.bf16.msra.mxu0 %v1274_v41 }
  0x29   :  { %1176 = vmatpush3.bf16.msra.mxu1 %v1276_v43  ;;  %1149 = vmatprep.subr.bf16.mxu0 %v1277_v44 }
  0x2a   :  { %1177 = vmatprep.subr.bf16.mxu1 %v1279_v46 }
  0x2b   :  { %756 = vmatmul.mubr.bf16.gmra.mxu0 %v1292_v57 }
  0x2c   :  { %1150 = vmatpush3.bf16.msra.mxu0 %v1278_v45  ;;  %805 = vmatmul.mubr.bf16.gmra.mxu1 %v1293_v58 }
  0x2d   :  { %1178 = vmatpush3.bf16.msra.mxu1 %v1280_v47  ;;  %1151 = vmatprep.subr.bf16.mxu0 %v1281_v48 }
  0x2e   :  { %1179 = vmatprep.subr.bf16.mxu1 %v1283_v50  ;;  %845 = vmatprep.mubr.bf16.mxu0 %v1308_v8 }
  0x2f   :  { %894 = vmatprep.mubr.bf16.mxu1 %v1313_v12 }
  0x30   :  { %1152 = vmatpush3.bf16.msra.mxu0 %v1282_v49 }
  0x31   :  { %1180 = vmatpush3.bf16.msra.mxu1 %v1284_v51  ;;  %1153 = vmatprep.subr.bf16.mxu0 %v1285_v52 }
  0x32   :  { %1181 = vmatprep.subr.bf16.mxu1 %v1291_v56 }
  0x34   :  { %1154 = vmatpush3.bf16.msra.mxu0 %v1286_v53 }
  0x35   :  { %1182 = vmatpush3.bf16.msra.mxu1 %v1294_v59  ;;  %1155 = vmatprep.subr.bf16.mxu0 %v1295_v60 }
  0x36   :  { %1183 = vmatprep.subr.bf16.mxu1 %v1297_v62 }
  0x38   :  { %1156 = vmatpush3.bf16.msra.mxu0 %v1296_v61 }
  0x39   :  { %1184 = vmatpush3.bf16.msra.mxu1 %v1298_v63  ;;  %1157 = vmatprep.subr.bf16.mxu0 %v1299_v0 }
  0x3a   :  { %1185 = vmatprep.subr.bf16.mxu1 %v1301_v2 }
  0x3c   :  { %1158 = vmatpush3.bf16.msra.mxu0 %v1300_v1 }
  0x3d   :  { %1186 = vmatpush3.bf16.msra.mxu1 %v1302_v3  ;;  %1159 = vmatprep.subr.bf16.mxu0 %v1303_v4 }
  0x3e   :  { %1187 = vmatprep.subr.bf16.mxu1 %v1305_v6 }
  0x40   :  { %1160 = vmatpush3.bf16.msra.mxu0 %v1304_v5 }
  0x41   :  { %1188 = vmatpush3.bf16.msra.mxu1 %v1309_v9  ;;  %1211 = vmatprep.subr.bf16.mxu0 %v1310_v10 }
  0x43   :  { %846 = vmatmul.mubr.bf16.vlgmr.msra.gmra.mxu0 %v1306_v7 }
  0x44   :  { %1212 = vmatpush3.bf16.msra.mxu0 %v1310_v10  ;;  %895 = vmatmul.mubr.bf16.vlgmr.msra.gmra.mxu1 %v1311_v11 }
  0x45   :  { %1213 = vmatprep.subr.bf16.mxu0 %v1314_v13  ;;  %853 = vmatprep.mubr.bf16.mxu0 %v1315_v14 }
  0x46   :  { %902 = vmatprep.mubr.bf16.mxu1 %v1319_v17 }
  0x48   :  { %1214 = vmatpush3.bf16.msra.mxu0 %v1314_v13 }
  0x49   :  { %1215 = vmatprep.subr.bf16.mxu0 %v1318_v16 }
  0x4b   :  { %854 = vmatmul.mubr.bf16.gmra.mxu0 %v1317_v15 }
  0x4c   :  { %1216 = vmatpush3.bf16.msra.mxu0 %v1318_v16  ;;  %903 = vmatmul.mubr.bf16.gmra.mxu1 %v1321_v18  ;;  %v1088_v18 = vld [vmem:[%s1636_s2] ss:$0 sm:$0xff] }
  0x4d   :  { %1217 = vmatprep.subr.bf16.mxu0 %v1322_v19  ;;  %1227 = vmatprep.mubr.bf16.mxu0 %v1327_v21 }
  0x50   :  { %1218 = vmatpush3.bf16.msra.mxu0 %v1322_v19 }
  0x51   :  { %1219 = vmatprep.subr.bf16.mxu0 %v1323_v20 }
  0x54   :  { %1220 = vmatpush3.bf16.msra.mxu0 %v1323_v20 }
  0x55   :  { %1221 = vmatprep.subr.bf16.mxu0 %v1324_v22 }
  0x58   :  { %1222 = vmatpush3.bf16.msra.mxu0 %v1324_v22 }
  0x59   :  { %1223 = vmatprep.subr.bf16.mxu0 %v1325_v23 }
  0x5c   :  { %1224 = vmatpush3.bf16.msra.mxu0 %v1325_v23 }
  0x5d   :  { %1225 = vmatprep.subr.bf16.mxu0 %v1326_v24 }
  0x60   :  { %1226 = vmatpush3.bf16.msra.mxu0 %v1326_v24 }
  0x63   :  { %1228 = vmatmul.mubr.bf16.vlgmr.msra.gmra.mxu0 %v1328_v25 }
  0xe3   :  { %v1105_v26 = vpop.f32.mrf.mxu0 }
  0xe4   :  { %v1133_v27 = vpop.f32.mrf.mxu1 }
  0xe5   :  { %v1106_v28 = vpop.f32.mrf.mxu0 }
  0xe6   :  { %v1134_v29 = vpop.f32.mrf.mxu1  ;;  %v1107_v57 = vadd.f32 %v1106_v28, %v1105_v26 }
  0xe7   :  { %v1108_v30 = vpop.f32.mrf.mxu0  ;;  %v1135_v58 = vadd.f32 %v1134_v29, %v1133_v27 }
  0xe8   :  { %v1136_v31 = vpop.f32.mrf.mxu1 }
  0xe9   :  { %v1109_v32 = vpop.f32.mrf.mxu0  ;;  %v799_v2 = vadd.f32 %v1135_v58, %v1107_v57 }
  0xea   :  { %v1137_v34 = vpop.f32.mrf.mxu1  ;;  %v1110_v3 = vadd.f32 %v1109_v32, %v1108_v30 }
  0xeb   :  { %v1111_v33 = vpop.f32.mrf.mxu0  ;;  %v1138_v4 = vadd.f32 %v1137_v34, %v1136_v31 }
  0xec   :  { %v1139_v35 = vpop.f32.mrf.mxu1 }
  0xed   :  { %v1112_v36 = vpop.f32.mrf.mxu0  ;;  %v802_v13 = vadd.f32 %v1138_v4, %v1110_v3 }
  0xee   :  { %v1140_v37 = vpop.f32.mrf.mxu1  ;;  %v1113_v55 = vadd.f32 %v1112_v36, %v1111_v33 }
  0xef   :  { %v1114_v38 = vpop.f32.mrf.mxu0  ;;  %v1141_v56 = vadd.f32 %v1140_v37, %v1139_v35 }
  0xf0   :  { %v1142_v39 = vpop.f32.mrf.mxu1 }
  0xf1   :  { %v1115_v40 = vpop.f32.mrf.mxu0  ;;  %v807_v62 = vadd.f32 %v1141_v56, %v1113_v55 }
  0xf2   :  { %v1143_v42 = vpop.f32.mrf.mxu1  ;;  %v1116_v63 = vadd.f32 %v1115_v40, %v1114_v38 }
  0xf3   :  { %v1144_v0 = vadd.f32 %v1143_v42, %v1142_v39 }
  0xf5   :  { %v810_v9 = vadd.f32 %v1144_v0, %v1116_v63 }
 0x103   :  { %v1161_v41 = vpop.f32.mrf.mxu0 }
 0x104   :  { %v1189_v44 = vpop.f32.mrf.mxu1 }
 0x105   :  { %v1162_v43 = vpop.f32.mrf.mxu0 }
 0x106   :  { %v1190_v46 = vpop.f32.mrf.mxu1  ;;  %v1163_v1 = vadd.f32 %v1162_v43, %v1161_v41 }
 0x107   :  { %v1164_v45 = vpop.f32.mrf.mxu0  ;;  %v1191_v11 = vadd.f32 %v1190_v46, %v1189_v44 }
 0x108   :  { %v1192_v48 = vpop.f32.mrf.mxu1  ;;  %v848_v10 = vadd.f32 %v1163_v1, %v799_v2 }
 0x109   :  { %v1165_v47 = vpop.f32.mrf.mxu0 }
 0x10a   :  { %v1193_v50 = vpop.f32.mrf.mxu1  ;;  %v1166_v12 = vadd.f32 %v1165_v47, %v1164_v45  ;;  %v897_v22 = vadd.f32 %v1191_v11, %v848_v10 }
 0x10b   :  { %v1167_v49 = vpop.f32.mrf.mxu0  ;;  %v1194_v20 = vadd.f32 %v1193_v50, %v1192_v48 }
 0x10c   :  { %v1195_v52 = vpop.f32.mrf.mxu1  ;;  %v851_v19 = vadd.f32 %v1166_v12, %v802_v13 }
 0x10d   :  { %v1168_v51 = vpop.f32.mrf.mxu0 }
 0x10e   :  { %v1196_v54 = vpop.f32.mrf.mxu1  ;;  %v1169_v59 = vadd.f32 %v1168_v51, %v1167_v49  ;;  %v900_v31 = vadd.f32 %v1194_v20, %v851_v19 }
 0x10f   :  { %v1170_v53 = vpop.f32.mrf.mxu0  ;;  %v1197_v6 = vadd.f32 %v1196_v54, %v1195_v52 }
 0x110   :  { %v1198_v61 = vpop.f32.mrf.mxu1  ;;  %v856_v5 = vadd.f32 %v1169_v59, %v807_v62 }
 0x111   :  { %v1171_v60 = vpop.f32.mrf.mxu0 }
 0x112   :  { %v1172_v7 = vadd.f32 %v1171_v60, %v1170_v53  ;;  %v1199_v8 = vpop.f32.mrf.mxu1  ;;  %v905_v16 = vadd.f32 %v1197_v6, %v856_v5 }
 0x113   :  { %v1200_v15 = vadd.f32 %v1199_v8, %v1198_v61 }
 0x114   :  { %v859_v14 = vadd.f32 %v1172_v7, %v810_v9 }
 0x116   :  { %v908_v26 = vadd.f32 %v1200_v15, %v859_v14 }
 0x123   :  { %v1229_v17 = vpop.f32.mrf.mxu0 }
 0x124   :  { %v954_v21 = vadd.f32 %v1229_v17, %v905_v16 }
 0x125   :  { %v945_v23 = vpop.f32.mrf.mxu0 }
 0x126   :  { %v984_v24 = vadd.f32 %v1088_v18, %v954_v21  ;;  %v946_v25 = vadd.f32 %v945_v23, %v897_v22 }
 0x127   :  { %v1230_v27 = vpop.f32.mrf.mxu0 }
 0x128   :  { %v988_v28 = vmax.f32 %v984_v24, 0.0  ;;  %v982_v29 = vadd.f32 %v1088_v18, %v946_v25  ;;  %v957_v30 = vadd.f32 %v1230_v27, %v908_v26 }
 0x129   :  { %v948_v32 = vpop.f32.mrf.mxu0 }
 0x12a   :  { %992 = vst [vmem:[%s1637_s3 + $0x10] sm:$0xff] %v988_v28  ;;  %v986_v33 = vmax.f32 %v982_v29, 0.0  ;;  %v985_v34 = vadd.f32 %v1088_v18, %v957_v30  ;;  %v949_v35 = vadd.f32 %v948_v32, %v900_v31 }
 0x12c   :  { %990 = vst [vmem:[%s1637_s3] sm:$0xff] %v986_v33  ;;  %v989_v36 = vmax.f32 %v985_v34, 0.0  ;;  %v983_v37 = vadd.f32 %v1088_v18, %v949_v35 }
 0x12e   :  { %993 = vst [vmem:[%s1637_s3 + $0x18] sm:$0xff] %v989_v36  ;;  %v987_v38 = vmax.f32 %v983_v37, 0.0 }
 0x130   :  { %991 = vst [vmem:[%s1637_s3 + $0x8] sm:$0xff] %v987_v38 }

// kernel: resnet34_forward.56
= control target key start
LH: loop header
LB: loop body
LE: loop exit
PB: predicated region body
PF: predicated region fallthrough
CT: control target
= control target key end

     0   :  { %s2028_s1 = inlined_call_operand.vmem [shape: bf16[1152,256], index: 1, kind: input, shape index: {}]   ;;  %s2029_s0 = inlined_call_operand.vmem [shape: bf16[8,1152], index: 0, kind: input, shape index: {}]   ;;  %s2030_s2 = inlined_call_operand.vmem [shape: f32[1,256], index: 2, kind: input, shape index: {}]   ;;  %s2031_s3 = inlined_call_operand.vmem [shape: f32[8,256], index: 3, kind: output, shape index: {}]  }
   0x1   :  { %v1314_v0 = vld [vmem:[%s2028_s1 + $0x74] ss:$8 sps:$4 sm:$0xff]   ;;  %v1318_v2 = vld [vmem:[%s2028_s1 + $0x70] ss:$8 sps:$4 sm:$0xff]   ;;  %v1320_v4 = vld [vmem:[%s2028_s1 + $0x64] ss:$8 sps:$4 sm:$0xff]  }
   0x2   :  { %v1316_v1 = vld [vmem:[%s2028_s1 + $0x174] ss:$8 sps:$4 sm:$0xff]   ;;  %924 = vmatprep.subr.bf16.mxu0 %v1314_v0  ;;  %v1319_v3 = vld [vmem:[%s2028_s1 + $0x170] ss:$8 sps:$4 sm:$0xff]   ;;  %v1322_v5 = vld [vmem:[%s2028_s1 + $0x164] ss:$8 sps:$4 sm:$0xff]  }
   0x3   :  { %965 = vmatprep.subr.bf16.mxu1 %v1316_v1  ;;  %925 = vmatpush1.bf16.msra.mxu0 %v1318_v2  ;;  %v1324_v6 = vld [vmem:[%s2028_s1 + $0x60] ss:$8 sps:$4 sm:$0xff]   ;;  %v1326_v8 = vld [vmem:[%s2028_s1 + $0x54] ss:$8 sps:$4 sm:$0xff]   ;;  %v1330_v10 = vld [vmem:[%s2028_s1 + $0x50] ss:$8 sps:$4 sm:$0xff]  }
   0x4   :  { %966 = vmatpush1.bf16.msra.mxu1 %v1319_v3  ;;  %926 = vmatprep.subr.bf16.mxu0 %v1320_v4  ;;  %v1325_v7 = vld [vmem:[%s2028_s1 + $0x160] ss:$8 sps:$4 sm:$0xff]   ;;  %v1328_v9 = vld [vmem:[%s2028_s1 + $0x154] ss:$8 sps:$4 sm:$0xff]   ;;  %v1331_v11 = vld [vmem:[%s2028_s1 + $0x150] ss:$8 sps:$4 sm:$0xff]  }
   0x5   :  { %967 = vmatprep.subr.bf16.mxu1 %v1322_v5  ;;  %v1332_v12 = vld [vmem:[%s2028_s1 + $0x44] ss:$8 sps:$4 sm:$0xff]   ;;  %v1336_v14 = vld [vmem:[%s2028_s1 + $0x40] ss:$8 sps:$4 sm:$0xff]   ;;  %v1338_v16 = vld [vmem:[%s2028_s1 + $0x34] ss:$8 sps:$4 sm:$0xff]  }
   0x6   :  { %v1334_v13 = vld [vmem:[%s2028_s1 + $0x144] ss:$8 sps:$4 sm:$0xff]   ;;  %v1337_v15 = vld [vmem:[%s2028_s1 + $0x140] ss:$8 sps:$4 sm:$0xff]   ;;  %v1340_v17 = vld [vmem:[%s2028_s1 + $0x134] ss:$8 sps:$4 sm:$0xff]  }
   0x7   :  { %927 = vmatpush1.bf16.msra.mxu0 %v1324_v6  ;;  %v1342_v18 = vld [vmem:[%s2028_s1 + $0x30] ss:$8 sps:$4 sm:$0xff]   ;;  %v1344_v20 = vld [vmem:[%s2028_s1 + $0x24] ss:$8 sps:$4 sm:$0xff]   ;;  %v1348_v22 = vld [vmem:[%s2028_s1 + $0x20] ss:$8 sps:$4 sm:$0xff]  }
   0x8   :  { %968 = vmatpush1.bf16.msra.mxu1 %v1325_v7  ;;  %928 = vmatprep.subr.bf16.mxu0 %v1326_v8  ;;  %v1343_v19 = vld [vmem:[%s2028_s1 + $0x130] ss:$8 sps:$4 sm:$0xff]   ;;  %v1346_v21 = vld [vmem:[%s2028_s1 + $0x124] ss:$8 sps:$4 sm:$0xff]   ;;  %v1349_v23 = vld [vmem:[%s2028_s1 + $0x120] ss:$8 sps:$4 sm:$0xff]  }
   0x9   :  { %969 = vmatprep.subr.bf16.mxu1 %v1328_v9  ;;  %v1350_v24 = vld [vmem:[%s2028_s1 + $0x14] ss:$8 sps:$4 sm:$0xff]   ;;  %v1354_v26 = vld [vmem:[%s2028_s1 + $0x10] ss:$8 sps:$4 sm:$0xff]   ;;  %v1356_v28 = vld [vmem:[%s2028_s1 + $0x4] ss:$8 sps:$4 sm:$0xff]  }
   0xa   :  { %v1352_v25 = vld [vmem:[%s2028_s1 + $0x114] ss:$8 sps:$4 sm:$0xff]   ;;  %v1355_v27 = vld [vmem:[%s2028_s1 + $0x110] ss:$8 sps:$4 sm:$0xff]   ;;  %v1358_v29 = vld [vmem:[%s2028_s1 + $0x104] ss:$8 sps:$4 sm:$0xff]  }
   0xb   :  { %929 = vmatpush1.bf16.msra.mxu0 %v1330_v10  ;;  %v1360_v30 = vld [vmem:[%s2028_s1] ss:$8 sps:$4 sm:$0xff]   ;;  %v1362_v32 = vld [vmem:[%s2028_s1 + $0xf4] ss:$8 sps:$4 sm:$0xff]   ;;  %v1366_v34 = vld [vmem:[%s2028_s1 + $0xf0] ss:$8 sps:$4 sm:$0xff]  }
   0xc   :  { %970 = vmatpush1.bf16.msra.mxu1 %v1331_v11  ;;  %930 = vmatprep.subr.bf16.mxu0 %v1332_v12  ;;  %v1361_v31 = vld [vmem:[%s2028_s1 + $0x100] ss:$8 sps:$4 sm:$0xff]   ;;  %v1364_v33 = vld [vmem:[%s2028_s1 + $0x1f4] ss:$8 sps:$4 sm:$0xff]   ;;  %v1367_v35 = vld [vmem:[%s2028_s1 + $0x1f0] ss:$8 sps:$4 sm:$0xff]  }
   0xd   :  { %971 = vmatprep.subr.bf16.mxu1 %v1334_v13  ;;  %v1368_v36 = vld [vmem:[%s2028_s1 + $0xe4] ss:$8 sps:$4 sm:$0xff]   ;;  %v1372_v38 = vld [vmem:[%s2028_s1 + $0xe0] ss:$8 sps:$4 sm:$0xff]   ;;  %v1374_v40 = vld [vmem:[%s2028_s1 + $0xd4] ss:$8 sps:$4 sm:$0xff]  }
   0xe   :  { %v1370_v37 = vld [vmem:[%s2028_s1 + $0x1e4] ss:$8 sps:$4 sm:$0xff]   ;;  %v1373_v39 = vld [vmem:[%s2028_s1 + $0x1e0] ss:$8 sps:$4 sm:$0xff]   ;;  %v1376_v41 = vld [vmem:[%s2028_s1 + $0x1d4] ss:$8 sps:$4 sm:$0xff]  }
   0xf   :  { %931 = vmatpush1.bf16.msra.mxu0 %v1336_v14  ;;  %v1378_v42 = vld [vmem:[%s2028_s1 + $0xd0] ss:$8 sps:$4 sm:$0xff]   ;;  %v1380_v44 = vld [vmem:[%s2028_s1 + $0xc4] ss:$8 sps:$4 sm:$0xff]   ;;  %v1384_v49 = vld [vmem:[%s2028_s1 + $0xc0] ss:$8 sps:$4 sm:$0xff]  }
  0x10   :  { %972 = vmatpush1.bf16.msra.mxu1 %v1337_v15  ;;  %932 = vmatprep.subr.bf16.mxu0 %v1338_v16  ;;  %v1379_v43 = vld [vmem:[%s2028_s1 + $0x1d0] ss:$8 sps:$4 sm:$0xff]   ;;  %v1382_v45 = vld [vmem:[%s2028_s1 + $0x1c4] ss:$8 sps:$4 sm:$0xff]   ;;  %v1385_v50 = vld [vmem:[%s2028_s1 + $0x1c0] ss:$8 sps:$4 sm:$0xff]  }
  0x11   :  { %973 = vmatprep.subr.bf16.mxu1 %v1340_v17  ;;  %v23_v46 = vld [vmem:[%s2029_s0] sm:$0xff]  ;;  %v24_v48 = vld [vmem:[%s2029_s0 + $0x8] sm:$0xff]  ;;  %v1386_v52 = vld [vmem:[%s2028_s1 + $0xb4] ss:$8 sps:$4 sm:$0xff]  }
  0x12   :  { %v1161_v47 = vcombine.high %v23_v46, %v23_v46  ;;  %v1163_v51 = vcombine.high %v24_v48, %v24_v48  ;;  %v1388_v53 = vld [vmem:[%s2028_s1 + $0x1b4] ss:$8 sps:$4 sm:$0xff]   ;;  %v1390_v54 = vld [vmem:[%s2028_s1 + $0xb0] ss:$8 sps:$4 sm:$0xff]   ;;  %v1392_v56 = vld [vmem:[%s2028_s1 + $0xa4] ss:$8 sps:$4 sm:$0xff]   ;;  %v1160_v6 = vcombine.low %v23_v46, %v23_v46  ;;  %v1162_v7 = vcombine.low %v24_v48, %v24_v48 }
  0x13   :  { %933 = vmatpush1.bf16.msra.mxu0 %v1342_v18  ;;  %v1391_v55 = vld [vmem:[%s2028_s1 + $0x1b0] ss:$8 sps:$4 sm:$0xff]   ;;  %v1394_v57 = vld [vmem:[%s2028_s1 + $0x1a4] ss:$8 sps:$4 sm:$0xff]   ;;  %v1396_v58 = vld [vmem:[%s2028_s1 + $0xa0] ss:$8 sps:$4 sm:$0xff]  }
  0x14   :  { %974 = vmatpush1.bf16.msra.mxu1 %v1343_v19  ;;  %934 = vmatprep.subr.bf16.mxu0 %v1344_v20  ;;  %v1397_v59 = vld [vmem:[%s2028_s1 + $0x1a0] ss:$8 sps:$4 sm:$0xff]   ;;  %v1398_v60 = vld [vmem:[%s2028_s1 + $0x94] ss:$8 sps:$4 sm:$0xff]   ;;  %v1402_v62 = vld [vmem:[%s2028_s1 + $0x90] ss:$8 sps:$4 sm:$0xff]  }
  0x15   :  { %975 = vmatprep.subr.bf16.mxu1 %v1346_v21  ;;  %956 = vmatprep.mubr.bf16.mxu0 %v1161_v47  ;;  %v1400_v61 = vld [vmem:[%s2028_s1 + $0x194] ss:$8 sps:$4 sm:$0xff]   ;;  %v1403_v63 = vld [vmem:[%s2028_s1 + $0x190] ss:$8 sps:$4 sm:$0xff]   ;;  %v1404_v0 = vld [vmem:[%s2028_s1 + $0x84] ss:$8 sps:$4 sm:$0xff]  }
  0x16   :  { %997 = vmatprep.mubr.bf16.mxu1 %v1163_v51  ;;  %v1406_v1 = vld [vmem:[%s2028_s1 + $0x184] ss:$8 sps:$4 sm:$0xff]   ;;  %v1408_v2 = vld [vmem:[%s2028_s1 + $0x80] ss:$8 sps:$4 sm:$0xff]   ;;  %v1416_v4 = vld [vmem:[%s2028_s1 + $0x274] ss:$8 sps:$4 sm:$0xff]  }
  0x17   :  { %935 = vmatpush1.bf16.msra.mxu0 %v1348_v22  ;;  %v1409_v3 = vld [vmem:[%s2028_s1 + $0x180] ss:$8 sps:$4 sm:$0xff]   ;;  %v1419_v5 = vld [vmem:[%s2028_s1 + $0x374] ss:$8 sps:$4 sm:$0xff]   ;;  %v1414_v8 = vld [vmem:[%s2028_s1 + $0x270] ss:$8 sps:$4 sm:$0xff]  }
  0x18   :  { %976 = vmatpush1.bf16.msra.mxu1 %v1349_v23  ;;  %936 = vmatprep.subr.bf16.mxu0 %v1350_v24  ;;  %v1417_v9 = vld [vmem:[%s2028_s1 + $0x370] ss:$8 sps:$4 sm:$0xff]   ;;  %v1422_v10 = vld [vmem:[%s2028_s1 + $0x264] ss:$8 sps:$4 sm:$0xff]   ;;  %v1420_v12 = vld [vmem:[%s2028_s1 + $0x260] ss:$8 sps:$4 sm:$0xff]  }
  0x19   :  { %977 = vmatprep.subr.bf16.mxu1 %v1352_v25  ;;  %v1425_v11 = vld [vmem:[%s2028_s1 + $0x364] ss:$8 sps:$4 sm:$0xff]   ;;  %v1423_v13 = vld [vmem:[%s2028_s1 + $0x360] ss:$8 sps:$4 sm:$0xff]   ;;  %v1428_v14 = vld [vmem:[%s2028_s1 + $0x254] ss:$8 sps:$4 sm:$0xff]  }
  0x1a   :  { %v1431_v15 = vld [vmem:[%s2028_s1 + $0x354] ss:$8 sps:$4 sm:$0xff]   ;;  %v1426_v16 = vld [vmem:[%s2028_s1 + $0x250] ss:$8 sps:$4 sm:$0xff]   ;;  %v1434_v18 = vld [vmem:[%s2028_s1 + $0x244] ss:$8 sps:$4 sm:$0xff]  }
  0x1b   :  { %937 = vmatpush1.bf16.msra.mxu0 %v1354_v26  ;;  %v1429_v17 = vld [vmem:[%s2028_s1 + $0x350] ss:$8 sps:$4 sm:$0xff]   ;;  %v1437_v19 = vld [vmem:[%s2028_s1 + $0x344] ss:$8 sps:$4 sm:$0xff]   ;;  %v1432_v20 = vld [vmem:[%s2028_s1 + $0x240] ss:$8 sps:$4 sm:$0xff]  }
  0x1c   :  { %978 = vmatpush1.bf16.msra.mxu1 %v1355_v27  ;;  %938 = vmatprep.subr.bf16.mxu0 %v1356_v28  ;;  %v1435_v21 = vld [vmem:[%s2028_s1 + $0x340] ss:$8 sps:$4 sm:$0xff]   ;;  %v1440_v22 = vld [vmem:[%s2028_s1 + $0x234] ss:$8 sps:$4 sm:$0xff]   ;;  %v1438_v24 = vld [vmem:[%s2028_s1 + $0x230] ss:$8 sps:$4 sm:$0xff]  }
  0x1d   :  { %979 = vmatprep.subr.bf16.mxu1 %v1358_v29  ;;  %v1443_v23 = vld [vmem:[%s2028_s1 + $0x334] ss:$8 sps:$4 sm:$0xff]   ;;  %v1441_v25 = vld [vmem:[%s2028_s1 + $0x330] ss:$8 sps:$4 sm:$0xff]   ;;  %v1446_v26 = vld [vmem:[%s2028_s1 + $0x224] ss:$8 sps:$4 sm:$0xff]  }
  0x1e   :  { %v1449_v27 = vld [vmem:[%s2028_s1 + $0x324] ss:$8 sps:$4 sm:$0xff]   ;;  %v1444_v28 = vld [vmem:[%s2028_s1 + $0x220] ss:$8 sps:$4 sm:$0xff]   ;;  %v1479_v51 = vld [vmem:[%s2028_s1 + $0x3d4] ss:$8 sps:$4 sm:$0xff]  }
  0x1f   :  { %939 = vmatpush1.bf16.msra.mxu0 %v1360_v30  ;;  %v1447_v29 = vld [vmem:[%s2028_s1 + $0x320] ss:$8 sps:$4 sm:$0xff]   ;;  %v1452_v30 = vld [vmem:[%s2028_s1 + $0x214] ss:$8 sps:$4 sm:$0xff]   ;;  %v1470_v46 = vld [vmem:[%s2028_s1 + $0x2e4] ss:$8 sps:$4 sm:$0xff]  }
  0x20   :  { %980 = vmatpush1.bf16.msra.mxu1 %v1361_v31  ;;  %940 = vmatprep.subr.bf16.mxu0 %v1362_v32  ;;  %v1455_v31 = vld [vmem:[%s2028_s1 + $0x314] ss:$8 sps:$4 sm:$0xff]   ;;  %v1473_v47 = vld [vmem:[%s2028_s1 + $0x3e4] ss:$8 sps:$4 sm:$0xff]   ;;  %v1468_v48 = vld [vmem:[%s2028_s1 + $0x2e0] ss:$8 sps:$4 sm:$0xff]  }
  0x21   :  { %981 = vmatprep.subr.bf16.mxu1 %v1364_v33  ;;  %v1839_v32 = vld [vmem:[%s2029_s0 + $0x10] sm:$0xff] }
  0x22   :  { %v1450_v33 = vld [vmem:[%s2028_s1 + $0x210] ss:$8 sps:$4 sm:$0xff]  }
  0x23   :  { %941 = vmatpush2.bf16.msra.mxu0 %v1366_v34  ;;  %v1453_v34 = vld [vmem:[%s2028_s1 + $0x310] ss:$8 sps:$4 sm:$0xff]  }
  0x24   :  { %982 = vmatpush2.bf16.msra.mxu1 %v1367_v35  ;;  %942 = vmatprep.subr.bf16.mxu0 %v1368_v36  ;;  %v1165_v35 = vcombine.high %v1839_v32, %v1839_v32  ;;  %v1852_v36 = vld [vmem:[%s2029_s0 + $0x18] sm:$0xff] }
  0x25   :  { %983 = vmatprep.subr.bf16.mxu1 %v1370_v37  ;;  %v1458_v37 = vld [vmem:[%s2028_s1 + $0x204] ss:$8 sps:$4 sm:$0xff]  }
  0x27   :  { %943 = vmatpush2.bf16.msra.mxu0 %v1372_v38  ;;  %v1167_v38 = vcombine.high %v1852_v36, %v1852_v36 }
  0x28   :  { %984 = vmatpush2.bf16.msra.mxu1 %v1373_v39  ;;  %944 = vmatprep.subr.bf16.mxu0 %v1374_v40  ;;  %v1461_v39 = vld [vmem:[%s2028_s1 + $0x304] ss:$8 sps:$4 sm:$0xff]   ;;  %v1456_v40 = vld [vmem:[%s2028_s1 + $0x200] ss:$8 sps:$4 sm:$0xff]  }
  0x29   :  { %985 = vmatprep.subr.bf16.mxu1 %v1376_v41  ;;  %v1459_v41 = vld [vmem:[%s2028_s1 + $0x300] ss:$8 sps:$4 sm:$0xff]  }
  0x2b   :  { %945 = vmatpush2.bf16.msra.mxu0 %v1378_v42  ;;  %v1464_v42 = vld [vmem:[%s2028_s1 + $0x2f4] ss:$8 sps:$4 sm:$0xff]  }
  0x2c   :  { %986 = vmatpush2.bf16.msra.mxu1 %v1379_v43  ;;  %946 = vmatprep.subr.bf16.mxu0 %v1380_v44  ;;  %v1467_v43 = vld [vmem:[%s2028_s1 + $0x3f4] ss:$8 sps:$4 sm:$0xff]   ;;  %v1462_v44 = vld [vmem:[%s2028_s1 + $0x2f0] ss:$8 sps:$4 sm:$0xff]  }
  0x2d   :  { %987 = vmatprep.subr.bf16.mxu1 %v1382_v45  ;;  %v1465_v45 = vld [vmem:[%s2028_s1 + $0x3f0] ss:$8 sps:$4 sm:$0xff]  }
  0x2f   :  { %947 = vmatpush2.bf16.msra.mxu0 %v1384_v49  ;;  %v1471_v49 = vld [vmem:[%s2028_s1 + $0x3e0] ss:$8 sps:$4 sm:$0xff]  }
  0x30   :  { %988 = vmatpush2.bf16.msra.mxu1 %v1385_v50  ;;  %948 = vmatprep.subr.bf16.mxu0 %v1386_v52  ;;  %v1476_v50 = vld [vmem:[%s2028_s1 + $0x2d4] ss:$8 sps:$4 sm:$0xff]   ;;  %v1474_v52 = vld [vmem:[%s2028_s1 + $0x2d0] ss:$8 sps:$4 sm:$0xff]  }
  0x31   :  { %989 = vmatprep.subr.bf16.mxu1 %v1388_v53  ;;  %v1477_v53 = vld [vmem:[%s2028_s1 + $0x3d0] ss:$8 sps:$4 sm:$0xff]  }
  0x33   :  { %949 = vmatpush2.bf16.msra.mxu0 %v1390_v54  ;;  %v1482_v54 = vld [vmem:[%s2028_s1 + $0x2c4] ss:$8 sps:$4 sm:$0xff]  }
  0x34   :  { %990 = vmatpush2.bf16.msra.mxu1 %v1391_v55  ;;  %950 = vmatprep.subr.bf16.mxu0 %v1392_v56  ;;  %v1485_v55 = vld [vmem:[%s2028_s1 + $0x3c4] ss:$8 sps:$4 sm:$0xff]   ;;  %v1480_v56 = vld [vmem:[%s2028_s1 + $0x2c0] ss:$8 sps:$4 sm:$0xff]  }
  0x35   :  { %991 = vmatprep.subr.bf16.mxu1 %v1394_v57  ;;  %v1483_v57 = vld [vmem:[%s2028_s1 + $0x3c0] ss:$8 sps:$4 sm:$0xff]  }
  0x37   :  { %951 = vmatpush2.bf16.msra.mxu0 %v1396_v58  ;;  %v1488_v58 = vld [vmem:[%s2028_s1 + $0x2b4] ss:$8 sps:$4 sm:$0xff]  }
  0x38   :  { %992 = vmatpush2.bf16.msra.mxu1 %v1397_v59  ;;  %952 = vmatprep.subr.bf16.mxu0 %v1398_v60  ;;  %v1491_v59 = vld [vmem:[%s2028_s1 + $0x3b4] ss:$8 sps:$4 sm:$0xff]   ;;  %v1486_v60 = vld [vmem:[%s2028_s1 + $0x2b0] ss:$8 sps:$4 sm:$0xff]  }
  0x39   :  { %993 = vmatprep.subr.bf16.mxu1 %v1400_v61  ;;  %v1489_v61 = vld [vmem:[%s2028_s1 + $0x3b0] ss:$8 sps:$4 sm:$0xff]  }
  0x3b   :  { %953 = vmatpush2.bf16.msra.mxu0 %v1402_v62  ;;  %v1494_v62 = vld [vmem:[%s2028_s1 + $0x2a4] ss:$8 sps:$4 sm:$0xff]  }
  0x3c   :  { %994 = vmatpush2.bf16.msra.mxu1 %v1403_v63  ;;  %954 = vmatprep.subr.bf16.mxu0 %v1404_v0  ;;  %v1497_v63 = vld [vmem:[%s2028_s1 + $0x3a4] ss:$8 sps:$4 sm:$0xff]   ;;  %v1492_v0 = vld [vmem:[%s2028_s1 + $0x2a0] ss:$8 sps:$4 sm:$0xff]  }
  0x3d   :  { %995 = vmatprep.subr.bf16.mxu1 %v1406_v1  ;;  %v1495_v1 = vld [vmem:[%s2028_s1 + $0x3a0] ss:$8 sps:$4 sm:$0xff]  }
  0x3f   :  { %955 = vmatpush2.bf16.msra.mxu0 %v1408_v2  ;;  %v1500_v2 = vld [vmem:[%s2028_s1 + $0x294] ss:$8 sps:$4 sm:$0xff]  }
  0x40   :  { %996 = vmatpush2.bf16.msra.mxu1 %v1409_v3  ;;  %1006 = vmatprep.subr.bf16.mxu0 %v1416_v4  ;;  %v1503_v3 = vld [vmem:[%s2028_s1 + $0x394] ss:$8 sps:$4 sm:$0xff]   ;;  %v1498_v4 = vld [vmem:[%s2028_s1 + $0x290] ss:$8 sps:$4 sm:$0xff]  }
  0x41   :  { %1047 = vmatprep.subr.bf16.mxu1 %v1419_v5  ;;  %v1501_v5 = vld [vmem:[%s2028_s1 + $0x390] ss:$8 sps:$4 sm:$0xff]  }
  0x42   :  { %957 = vmatmul.mubr.bf16.vlgmr.msra.gmra.mxu0 %v1160_v6  ;;  %v1506_v6 = vld [vmem:[%s2028_s1 + $0x284] ss:$8 sps:$4 sm:$0xff]  }
  0x43   :  { %998 = vmatmul.mubr.bf16.vlgmr.msra.gmra.mxu1 %v1162_v7  ;;  %1007 = vmatpush1.bf16.msra.mxu0 %v1414_v8  ;;  %v1509_v7 = vld [vmem:[%s2028_s1 + $0x384] ss:$8 sps:$4 sm:$0xff]   ;;  %v1504_v8 = vld [vmem:[%s2028_s1 + $0x280] ss:$8 sps:$4 sm:$0xff]  }
  0x44   :  { %1048 = vmatpush1.bf16.msra.mxu1 %v1417_v9  ;;  %1008 = vmatprep.subr.bf16.mxu0 %v1422_v10  ;;  %v1507_v9 = vld [vmem:[%s2028_s1 + $0x380] ss:$8 sps:$4 sm:$0xff]   ;;  %v1514_v10 = vld [vmem:[%s2028_s1 + $0x474] ss:$8 sps:$4 sm:$0xff]  }
  0x45   :  { %1049 = vmatprep.subr.bf16.mxu1 %v1425_v11  ;;  %1038 = vmatprep.mubr.bf16.mxu0 %v1165_v35  ;;  %v1164_v11 = vcombine.low %v1839_v32, %v1839_v32 }
  0x46   :  { %1079 = vmatprep.mubr.bf16.mxu1 %v1167_v38 }
  0x47   :  { %1009 = vmatpush1.bf16.msra.mxu0 %v1420_v12  ;;  %v1166_v12 = vcombine.low %v1852_v36, %v1852_v36 }
  0x48   :  { %1050 = vmatpush1.bf16.msra.mxu1 %v1423_v13  ;;  %1010 = vmatprep.subr.bf16.mxu0 %v1428_v14  ;;  %v1512_v13 = vld [vmem:[%s2028_s1 + $0x470] ss:$8 sps:$4 sm:$0xff]   ;;  %v1519_v14 = vld [vmem:[%s2028_s1 + $0x464] ss:$8 sps:$4 sm:$0xff]  }
  0x49   :  { %1051 = vmatprep.subr.bf16.mxu1 %v1431_v15  ;;  %v1517_v15 = vld [vmem:[%s2028_s1 + $0x460] ss:$8 sps:$4 sm:$0xff]  }
  0x4b   :  { %1011 = vmatpush1.bf16.msra.mxu0 %v1426_v16  ;;  %v1539_v16 = vmov 0  }
  0x4c   :  { %1052 = vmatpush1.bf16.msra.mxu1 %v1429_v17  ;;  %1012 = vmatprep.subr.bf16.mxu0 %v1434_v18  ;;  %v1522_v17 = vld [vmem:[%s2028_s1 + $0x454] ss:$8 sps:$4 sm:$0xff]   ;;  %v1520_v18 = vld [vmem:[%s2028_s1 + $0x450] ss:$8 sps:$4 sm:$0xff]  }
  0x4d   :  { %1053 = vmatprep.subr.bf16.mxu1 %v1437_v19  ;;  %v1525_v19 = vld [vmem:[%s2028_s1 + $0x444] ss:$8 sps:$4 sm:$0xff]  }
  0x4f   :  { %1013 = vmatpush1.bf16.msra.mxu0 %v1432_v20  ;;  %v1523_v20 = vld [vmem:[%s2028_s1 + $0x440] ss:$8 sps:$4 sm:$0xff]  }
  0x50   :  { %1054 = vmatpush1.bf16.msra.mxu1 %v1435_v21  ;;  %1014 = vmatprep.subr.bf16.mxu0 %v1440_v22  ;;  %v1528_v21 = vld [vmem:[%s2028_s1 + $0x434] ss:$8 sps:$4 sm:$0xff]   ;;  %v1526_v22 = vld [vmem:[%s2028_s1 + $0x430] ss:$8 sps:$4 sm:$0xff]  }
  0x51   :  { %1055 = vmatprep.subr.bf16.mxu1 %v1443_v23  ;;  %v1531_v23 = vld [vmem:[%s2028_s1 + $0x424] ss:$8 sps:$4 sm:$0xff]  }
  0x53   :  { %1015 = vmatpush1.bf16.msra.mxu0 %v1438_v24  ;;  %v1529_v24 = vld [vmem:[%s2028_s1 + $0x420] ss:$8 sps:$4 sm:$0xff]  }
  0x54   :  { %1056 = vmatpush1.bf16.msra.mxu1 %v1441_v25  ;;  %1016 = vmatprep.subr.bf16.mxu0 %v1446_v26  ;;  %v1534_v25 = vld [vmem:[%s2028_s1 + $0x414] ss:$8 sps:$4 sm:$0xff]   ;;  %v1532_v26 = vld [vmem:[%s2028_s1 + $0x410] ss:$8 sps:$4 sm:$0xff]  }
  0x55   :  { %1057 = vmatprep.subr.bf16.mxu1 %v1449_v27  ;;  %v1537_v27 = vld [vmem:[%s2028_s1 + $0x404] ss:$8 sps:$4 sm:$0xff]  }
  0x57   :  { %1017 = vmatpush1.bf16.msra.mxu0 %v1444_v28  ;;  %v1535_v28 = vld [vmem:[%s2028_s1 + $0x400] ss:$8 sps:$4 sm:$0xff]  }
  0x58   :  { %1058 = vmatpush1.bf16.msra.mxu1 %v1447_v29  ;;  %1018 = vmatprep.subr.bf16.mxu0 %v1452_v30  ;;  %v1538_v29 = vld [vmem:[%s2029_s0 + $0x20] ss:$0 sps:$4 sm:$0xff]  }
  0x59   :  { %1059 = vmatprep.subr.bf16.mxu1 %v1455_v31 }
  0x5b   :  { %1019 = vmatpush1.bf16.msra.mxu0 %v1450_v33 }
  0x5c   :  { %1060 = vmatpush1.bf16.msra.mxu1 %v1453_v34  ;;  %1020 = vmatprep.subr.bf16.mxu0 %v1458_v37 }
  0x5d   :  { %1061 = vmatprep.subr.bf16.mxu1 %v1461_v39 }
  0x5f   :  { %1021 = vmatpush1.bf16.msra.mxu0 %v1456_v40 }
  0x60   :  { %1062 = vmatpush1.bf16.msra.mxu1 %v1459_v41  ;;  %1022 = vmatprep.subr.bf16.mxu0 %v1464_v42 }
  0x61   :  { %1063 = vmatprep.subr.bf16.mxu1 %v1467_v43 }
  0x63   :  { %1023 = vmatpush2.bf16.msra.mxu0 %v1462_v44 }
  0x64   :  { %1064 = vmatpush2.bf16.msra.mxu1 %v1465_v45  ;;  %1024 = vmatprep.subr.bf16.mxu0 %v1470_v46 }
  0x65   :  { %1065 = vmatprep.subr.bf16.mxu1 %v1473_v47 }
  0x67   :  { %1025 = vmatpush2.bf16.msra.mxu0 %v1468_v48  ;;  %v1140_v48 = vlaneseq }
  0x68   :  { %1066 = vmatpush2.bf16.msra.mxu1 %v1471_v49  ;;  %1026 = vmatprep.subr.bf16.mxu0 %v1476_v50 }
  0x69   :  { %1067 = vmatprep.subr.bf16.mxu1 %v1479_v51  ;;  %v1141_v49 = vshrl.u32 %v1140_v48, 7 }
  0x6b   :  { %1027 = vmatpush2.bf16.msra.mxu0 %v1474_v52  ;;  %v1142_v51 = vsub.s32 0, %v1141_v49  ;;  %v1138_v52 = vld [vmem:[%s2030_s2] sm:$0x3] }
  0x6c   :  { %1068 = vmatpush2.bf16.msra.mxu1 %v1477_v53  ;;  %1028 = vmatprep.subr.bf16.mxu0 %v1482_v54  ;;  %v1146_v54 = vsub.s32 1, %v1141_v49 }
  0x6d   :  { %1069 = vmatprep.subr.bf16.mxu1 %v1485_v55 }
  0x6f   :  { %1029 = vmatpush2.bf16.msra.mxu0 %v1480_v56  ;;  %v1143_v56 = vrot.slane %v1138_v52, %v1142_v51 }
  0x70   :  { %1070 = vmatpush2.bf16.msra.mxu1 %v1483_v57  ;;  %1030 = vmatprep.subr.bf16.mxu0 %v1488_v58 }
  0x71   :  { %1071 = vmatprep.subr.bf16.mxu1 %v1491_v59 }
  0x73   :  { %1031 = vmatpush2.bf16.msra.mxu0 %v1486_v60  ;;  %v1147_v60 = vrot.slane %v1138_v52, %v1146_v54 }
  0x74   :  { %1072 = vmatpush2.bf16.msra.mxu1 %v1489_v61  ;;  %1032 = vmatprep.subr.bf16.mxu0 %v1494_v62 }
  0x75   :  { %1073 = vmatprep.subr.bf16.mxu1 %v1497_v63 }
  0x77   :  { %1033 = vmatpush2.bf16.msra.mxu0 %v1492_v0 }
  0x78   :  { %1074 = vmatpush2.bf16.msra.mxu1 %v1495_v1  ;;  %1034 = vmatprep.subr.bf16.mxu0 %v1500_v2 }
  0x79   :  { %1075 = vmatprep.subr.bf16.mxu1 %v1503_v3 }
  0x7b   :  { %1035 = vmatpush2.bf16.msra.mxu0 %v1498_v4 }
  0x7c   :  { %1076 = vmatpush2.bf16.msra.mxu1 %v1501_v5  ;;  %1036 = vmatprep.subr.bf16.mxu0 %v1506_v6 }
  0x7d   :  { %1077 = vmatprep.subr.bf16.mxu1 %v1509_v7 }
  0x7f   :  { %1037 = vmatpush2.bf16.msra.mxu0 %v1504_v8 }
  0x80   :  { %1078 = vmatpush2.bf16.msra.mxu1 %v1507_v9  ;;  %1088 = vmatprep.subr.bf16.mxu0 %v1514_v10 }
  0x82   :  { %1039 = vmatmul.mubr.bf16.vlgmr.msra.gmra.mxu0 %v1164_v11 }
  0x83   :  { %1080 = vmatmul.mubr.bf16.vlgmr.msra.gmra.mxu1 %v1166_v12  ;;  %1089 = vmatpush1.bf16.msra.mxu0 %v1512_v13 }
  0x84   :  { %1120 = vmatprep.mubr.bf16.mxu0 %v1539_v16  ;;  %1090 = vmatprep.subr.bf16.mxu0 %v1519_v14 }
  0x87   :  { %1091 = vmatpush1.bf16.msra.mxu0 %v1517_v15 }
  0x88   :  { %1092 = vmatprep.subr.bf16.mxu0 %v1522_v17 }
  0x8b   :  { %1093 = vmatpush1.bf16.msra.mxu0 %v1520_v18 }
  0x8c   :  { %1094 = vmatprep.subr.bf16.mxu0 %v1525_v19 }
  0x8f   :  { %1095 = vmatpush1.bf16.msra.mxu0 %v1523_v20 }
  0x90   :  { %1096 = vmatprep.subr.bf16.mxu0 %v1528_v21 }
  0x93   :  { %1097 = vmatpush1.bf16.msra.mxu0 %v1526_v22 }
  0x94   :  { %1098 = vmatprep.subr.bf16.mxu0 %v1531_v23 }
  0x97   :  { %1099 = vmatpush1.bf16.msra.mxu0 %v1529_v24 }
  0x98   :  { %1100 = vmatprep.subr.bf16.mxu0 %v1534_v25 }
  0x9b   :  { %1101 = vmatpush1.bf16.msra.mxu0 %v1532_v26 }
  0x9c   :  { %1102 = vmatprep.subr.bf16.mxu0 %v1537_v27 }
  0x9f   :  { %1103 = vmatpush1.bf16.msra.mxu0 %v1535_v28 }
  0xa2   :  { %1121 = vmatmul.mubr.bf16.vlgmr.msra.gmra.mxu0 %v1538_v29 }
 0x102   :  { %v958_v30 = vpop.f32.mrf.mxu0 }
 0x103   :  { %v999_v31 = vpop.f32.mrf.mxu1 }
 0x104   :  { %v1000_v32 = vadd.f32 %v999_v31, %v958_v30  ;;  %v960_v33 = vpop.f32.mrf.mxu0 }
 0x105   :  { %v1001_v34 = vpop.f32.mrf.mxu1 }
 0x106   :  { %v1002_v35 = vadd.f32 %v1001_v34, %v960_v33  ;;  %v962_v36 = vpop.f32.mrf.mxu0 }
 0x107   :  { %v1003_v37 = vpop.f32.mrf.mxu1 }
 0x108   :  { %v963_v38 = vpop.f32.mrf.mxu0 }
 0x109   :  { %v1004_v39 = vpop.f32.mrf.mxu1 }
 0x142   :  { %v1040_v40 = vpop.f32.mrf.mxu0 }
 0x143   :  { %v1081_v41 = vpop.f32.mrf.mxu1  ;;  %v1041_v50 = vadd.f32 %v1040_v40, %v1000_v32 }
 0x144   :  { %v1042_v42 = vpop.f32.mrf.mxu0 }
 0x145   :  { %v1083_v43 = vpop.f32.mrf.mxu1  ;;  %v1043_v53 = vadd.f32 %v1042_v42, %v1002_v35  ;;  %v1082_v55 = vadd.f32 %v1081_v41, %v1041_v50 }
 0x146   :  { %v1044_v44 = vpop.f32.mrf.mxu0 }
 0x147   :  { %v1085_v45 = vpop.f32.mrf.mxu1  ;;  %v1084_v58 = vadd.f32 %v1083_v43, %v1043_v53 }
 0x148   :  { %v1045_v46 = vpop.f32.mrf.mxu0 }
 0x149   :  { %v1086_v47 = vpop.f32.mrf.mxu1 }
 0x162   :  { %v1122_v57 = vpop.f32.mrf.mxu0 }
 0x163   :  { %v1123_v59 = vadd.f32 %v1122_v57, %v1082_v55 }
 0x164   :  { %v1124_v61 = vpop.f32.mrf.mxu0 }
 0x165   :  { %v1150_v62 = vadd.f32 %v1143_v56, %v1123_v59  ;;  %v1125_v63 = vadd.f32 %v1124_v61, %v1084_v58 }
 0x166   :  { %v1126_v0 = vpop.f32.mrf.mxu0 }
 0x167   :  { %v1152_v1 = vmax.f32 %v1150_v62, 0.0  ;;  %v1151_v2 = vadd.f32 %v1147_v60, %v1125_v63 }
 0x168   :  { %v1127_v3 = vpop.f32.mrf.mxu0 }
 0x169   :  { %1154 = vst [vmem:[%s2031_s3] sm:$0xff] %v1152_v1  ;;  %v1153_v4 = vmax.f32 %v1151_v2, 0.0 }
 0x16b   :  { %1155 = vst [vmem:[%s2031_s3 + $0x8] sm:$0xff] %v1153_v4 }

// kernel: resnet34_forward.57
= control target key start
LH: loop header
LB: loop body
LE: loop exit
PB: predicated region body
PF: predicated region fallthrough
CT: control target
= control target key end

     0   :  { %v231_v1 = vmov 0   ;;  %v172_v18 = vlaneseq  ;;  %s312_s1 = inlined_call_operand.vmem [shape: bf16[128,256], index: 1, kind: input, shape index: {}]   ;;  %s313_s0 = inlined_call_operand.vmem [shape: bf16[8,128], index: 0, kind: input, shape index: {}]   ;;  %s314_s2 = inlined_call_operand.vmem [shape: f32[1,256], index: 2, kind: input, shape index: {}]   ;;  %s315_s3 = inlined_call_operand.vmem [shape: f32[8,256], index: 3, kind: output, shape index: {}]  }
   0x1   :  { %v207_v0 = vld [vmem:[%s312_s1 + $0x74] ss:$8 sps:$4 sm:$0xff]   ;;  %152 = vmatprep.mubr.bf16.mxu0 %v231_v1  ;;  %v209_v2 = vld [vmem:[%s312_s1 + $0x70] ss:$8 sps:$4 sm:$0xff]   ;;  %v210_v3 = vld [vmem:[%s312_s1 + $0x64] ss:$8 sps:$4 sm:$0xff]  }
   0x2   :  { %120 = vmatprep.subr.bf16.mxu0 %v207_v0  ;;  %v212_v4 = vld [vmem:[%s312_s1 + $0x60] ss:$8 sps:$4 sm:$0xff]   ;;  %v213_v5 = vld [vmem:[%s312_s1 + $0x54] ss:$8 sps:$4 sm:$0xff]   ;;  %v215_v6 = vld [vmem:[%s312_s1 + $0x50] ss:$8 sps:$4 sm:$0xff]  }
   0x3   :  { %121 = vmatpush1.bf16.msra.mxu0 %v209_v2  ;;  %v216_v7 = vld [vmem:[%s312_s1 + $0x44] ss:$8 sps:$4 sm:$0xff]   ;;  %v218_v8 = vld [vmem:[%s312_s1 + $0x40] ss:$8 sps:$4 sm:$0xff]   ;;  %v219_v9 = vld [vmem:[%s312_s1 + $0x34] ss:$8 sps:$4 sm:$0xff]  }
   0x4   :  { %122 = vmatprep.subr.bf16.mxu0 %v210_v3  ;;  %v221_v10 = vld [vmem:[%s312_s1 + $0x30] ss:$8 sps:$4 sm:$0xff]   ;;  %v222_v11 = vld [vmem:[%s312_s1 + $0x24] ss:$8 sps:$4 sm:$0xff]   ;;  %v224_v12 = vld [vmem:[%s312_s1 + $0x20] ss:$8 sps:$4 sm:$0xff]  }
   0x5   :  { %v225_v13 = vld [vmem:[%s312_s1 + $0x14] ss:$8 sps:$4 sm:$0xff]   ;;  %v227_v14 = vld [vmem:[%s312_s1 + $0x10] ss:$8 sps:$4 sm:$0xff]   ;;  %v228_v15 = vld [vmem:[%s312_s1 + $0x4] ss:$8 sps:$4 sm:$0xff]  }
   0x6   :  { %v230_v16 = vld [vmem:[%s312_s1] ss:$8 sps:$4 sm:$0xff]   ;;  %v173_v19 = vshrl.u32 %v172_v18, 7 }
   0x7   :  { %123 = vmatpush1.bf16.msra.mxu0 %v212_v4  ;;  %v23_v17 = vld [vmem:[%s313_s0] sm:$0xf] }
   0x8   :  { %124 = vmatprep.subr.bf16.mxu0 %v213_v5  ;;  %v174_v20 = vsub.s32 0, %v173_v19  ;;  %v170_v21 = vld [vmem:[%s314_s2] sm:$0x3]  ;;  %v178_v22 = vsub.s32 1, %v173_v19 }
   0xa   :  { %v175_v23 = vrot.slane %v170_v21, %v174_v20  ;;  %v179_v24 = vrot.slane %v170_v21, %v178_v22 }
   0xb   :  { %125 = vmatpush1.bf16.msra.mxu0 %v215_v6 }
   0xc   :  { %126 = vmatprep.subr.bf16.mxu0 %v216_v7 }
   0xf   :  { %127 = vmatpush1.bf16.msra.mxu0 %v218_v8 }
  0x10   :  { %128 = vmatprep.subr.bf16.mxu0 %v219_v9 }
  0x13   :  { %129 = vmatpush1.bf16.msra.mxu0 %v221_v10 }
  0x14   :  { %130 = vmatprep.subr.bf16.mxu0 %v222_v11 }
  0x17   :  { %131 = vmatpush1.bf16.msra.mxu0 %v224_v12 }
  0x18   :  { %132 = vmatprep.subr.bf16.mxu0 %v225_v13 }
  0x1b   :  { %133 = vmatpush1.bf16.msra.mxu0 %v227_v14 }
  0x1c   :  { %134 = vmatprep.subr.bf16.mxu0 %v228_v15 }
  0x1f   :  { %135 = vmatpush1.bf16.msra.mxu0 %v230_v16 }
  0x22   :  { %153 = vmatmul.mubr.bf16.vlgmr.msra.gmra.mxu0 %v23_v17 }
  0xe2   :  { %v154_v25 = vpop.f32.mrf.mxu0 }
  0xe3   :  { %v182_v26 = vadd.f32 %v175_v23, %v154_v25 }
  0xe4   :  { %v156_v27 = vpop.f32.mrf.mxu0 }
  0xe5   :  { %184 = vst [vmem:[%s315_s3] sm:$0xff] %v182_v26  ;;  %v183_v28 = vadd.f32 %v179_v24, %v156_v27 }
  0xe6   :  { %v158_v29 = vpop.f32.mrf.mxu0 }
  0xe7   :  { %185 = vst [vmem:[%s315_s3 + $0x8] sm:$0xff] %v183_v28 }
  0xe8   :  { %v159_v30 = vpop.f32.mrf.mxu0 }

// kernel: resnet34_forward.58
= control target key start
LH: loop header
LB: loop body
LE: loop exit
PB: predicated region body
PF: predicated region fallthrough
CT: control target
= control target key end

     0   :  { %s2096_s15 = smov 0   ;;  %s2098_s16 = smov 0   ;;  %s2315_s0 = inlined_call_operand.vmem [shape: bf16[8,2304], index: 0, kind: input, shape index: {}]   ;;  %s2316_s1 = inlined_call_operand.vmem [shape: bf16[2304,256], index: 1, kind: input, shape index: {}]   ;;  %s2317_s2 = inlined_call_operand.vmem [shape: f32[1,256], index: 2, kind: input, shape index: {}]   ;;  %s2318_s3 = inlined_call_operand.vmem [shape: f32[8,256], index: 3, kind: input, shape index: {}]   ;;  %s2319_s4 = inlined_call_operand.vmem [shape: f32[8,256], index: 4, kind: output, shape index: {}]  }
   0x1   :  { %s2100_s17 = smov 0  }
   0x2 LB: > { %s26_s18 = sadd.s32 1, %s2063_s16  ;;  %p1630_p0 = scmp.ge.s32.totalorder %s2067_s17, 1  ;;  %s2067_s17 = sphi %s2100_s17, %s14_s17   ;;  %s2063_s16 = sphi %s2098_s16, %s2321_s16   ;;  %s2059_s15 = sphi %s2096_s15, %s2320_s15  }
   0x3   : > { %p27_p1 = scmp.ge.s32.totalorder %s26_s18, 2  ;;  %p236_p2 = scmp.lt.s32.totalorder %s2067_s17, 3 }
   0x5   : > { %s2323_s18 = smov (%p27_p1, %s26_s18), 0  ;;  %p237_p3 = pnand %p1630_p0, %p236_p2 }
   0x6   : > { %s293_s19 = smul.u32 (!%p237_p3), 9, %s2059_s15  ;;  %p1634_p6 = scmp.ne.s32.totalorder (!%p237_p3), %s2059_s15, 0 }
   0x7   : > { %240 = sbr.rel (%p237_p3) target bundleno = 398 (0x18e), region = 36 }
   0x8   : > { %s303_s20 = smul.u32 (!%p237_p3), 144, %s2059_s15  ;;  %p296_p4 = scmp.lt.s32.totalorder (!%p237_p3), %s293_s19, 17 }
   0xa   : > { %p305_p5 = scmp.lt.s32.totalorder (!%p237_p3), %s303_s20, 287 }
   0xc   : > { %s2325_s19 = smov (!%p296_p4, %s293_s19), 17  ;;  %s2327_s20 = smov (!%p305_p5, %s303_s20), 287 }
   0xd   : > { %s1631_s21 = sshll.u32 %s2325_s19, 2  ;;  %s1793_s25 = sshll.u32 %s2327_s20, 3 }
   0xe   : > { %s2121_s24 = scalar_lea.vmem %s2315_s0, %s1631_s21  ;;  %s2126_s28 = scalar_lea.vmem %s2316_s1, %s1793_s25 }
   0xf   : > { %344 = sbr.rel (%p1634_p6) target bundleno = 22 (0x16), region = 40 }
  0x14   : > { %v2069_v0 = vmov 0.0  }
  0x15   : > { %345 = vst [vmem:[#allocation2] sm:$0xff] %v2069_v0  ;;  %346 = vst [vmem:[#allocation2 + $0x8] sm:$0xff] %v2069_v0 }
  0x16 PF: > { %v1820_v1 = vld [vmem:[%s2126_s28 + $0x74] ss:$8 sps:$4 sm:$0xff]   ;;  %v1824_v3 = vld [vmem:[%s2126_s28 + $0x70] ss:$8 sps:$4 sm:$0xff]   ;;  %v1826_v5 = vld [vmem:[%s2126_s28 + $0x64] ss:$8 sps:$4 sm:$0xff]  }
  0x17   : > { %v1822_v2 = vld [vmem:[%s2126_s28 + $0x174] ss:$8 sps:$4 sm:$0xff]   ;;  %1250 = vmatprep.subr.bf16.mxu0 %v1820_v1  ;;  %v1825_v4 = vld [vmem:[%s2126_s28 + $0x170] ss:$8 sps:$4 sm:$0xff]   ;;  %v1828_v6 = vld [vmem:[%s2126_s28 + $0x164] ss:$8 sps:$4 sm:$0xff]  }
  0x18   : > { %1291 = vmatprep.subr.bf16.mxu1 %v1822_v2  ;;  %1251 = vmatpush1.bf16.msra.mxu0 %v1824_v3  ;;  %v1830_v7 = vld [vmem:[%s2126_s28 + $0x60] ss:$8 sps:$4 sm:$0xff]   ;;  %v1832_v9 = vld [vmem:[%s2126_s28 + $0x54] ss:$8 sps:$4 sm:$0xff]   ;;  %v1836_v11 = vld [vmem:[%s2126_s28 + $0x50] ss:$8 sps:$4 sm:$0xff]  }
  0x19   : > { %1292 = vmatpush1.bf16.msra.mxu1 %v1825_v4  ;;  %1252 = vmatprep.subr.bf16.mxu0 %v1826_v5  ;;  %v1831_v8 = vld [vmem:[%s2126_s28 + $0x160] ss:$8 sps:$4 sm:$0xff]   ;;  %v1834_v10 = vld [vmem:[%s2126_s28 + $0x154] ss:$8 sps:$4 sm:$0xff]   ;;  %v1837_v12 = vld [vmem:[%s2126_s28 + $0x150] ss:$8 sps:$4 sm:$0xff]  }
  0x1a   : > { %1293 = vmatprep.subr.bf16.mxu1 %v1828_v6  ;;  %v1838_v13 = vld [vmem:[%s2126_s28 + $0x44] ss:$8 sps:$4 sm:$0xff]   ;;  %v1842_v15 = vld [vmem:[%s2126_s28 + $0x40] ss:$8 sps:$4 sm:$0xff]   ;;  %v1844_v17 = vld [vmem:[%s2126_s28 + $0x34] ss:$8 sps:$4 sm:$0xff]  }
  0x1b   : > { %v1840_v14 = vld [vmem:[%s2126_s28 + $0x144] ss:$8 sps:$4 sm:$0xff]   ;;  %v1843_v16 = vld [vmem:[%s2126_s28 + $0x140] ss:$8 sps:$4 sm:$0xff]   ;;  %v1846_v18 = vld [vmem:[%s2126_s28 + $0x134] ss:$8 sps:$4 sm:$0xff]  }
  0x1c   : > { %1253 = vmatpush1.bf16.msra.mxu0 %v1830_v7  ;;  %v1848_v19 = vld [vmem:[%s2126_s28 + $0x30] ss:$8 sps:$4 sm:$0xff]   ;;  %v1850_v21 = vld [vmem:[%s2126_s28 + $0x24] ss:$8 sps:$4 sm:$0xff]   ;;  %v1854_v23 = vld [vmem:[%s2126_s28 + $0x20] ss:$8 sps:$4 sm:$0xff]  }
  0x1d   : > { %1294 = vmatpush1.bf16.msra.mxu1 %v1831_v8  ;;  %1254 = vmatprep.subr.bf16.mxu0 %v1832_v9  ;;  %v1849_v20 = vld [vmem:[%s2126_s28 + $0x130] ss:$8 sps:$4 sm:$0xff]   ;;  %v1852_v22 = vld [vmem:[%s2126_s28 + $0x124] ss:$8 sps:$4 sm:$0xff]   ;;  %v1855_v24 = vld [vmem:[%s2126_s28 + $0x120] ss:$8 sps:$4 sm:$0xff]  }
  0x1e   : > { %1295 = vmatprep.subr.bf16.mxu1 %v1834_v10  ;;  %v1856_v25 = vld [vmem:[%s2126_s28 + $0x14] ss:$8 sps:$4 sm:$0xff]   ;;  %v1860_v27 = vld [vmem:[%s2126_s28 + $0x10] ss:$8 sps:$4 sm:$0xff]   ;;  %v1862_v29 = vld [vmem:[%s2126_s28 + $0x4] ss:$8 sps:$4 sm:$0xff]  }
  0x1f   : > { %v1858_v26 = vld [vmem:[%s2126_s28 + $0x114] ss:$8 sps:$4 sm:$0xff]   ;;  %v1861_v28 = vld [vmem:[%s2126_s28 + $0x110] ss:$8 sps:$4 sm:$0xff]   ;;  %v1864_v30 = vld [vmem:[%s2126_s28 + $0x104] ss:$8 sps:$4 sm:$0xff]  }
  0x20   : > { %1255 = vmatpush1.bf16.msra.mxu0 %v1836_v11  ;;  %v1866_v31 = vld [vmem:[%s2126_s28] ss:$8 sps:$4 sm:$0xff]   ;;  %v1868_v33 = vld [vmem:[%s2126_s28 + $0xf4] ss:$8 sps:$4 sm:$0xff]   ;;  %v1872_v35 = vld [vmem:[%s2126_s28 + $0xf0] ss:$8 sps:$4 sm:$0xff]  }
  0x21   : > { %1296 = vmatpush1.bf16.msra.mxu1 %v1837_v12  ;;  %1256 = vmatprep.subr.bf16.mxu0 %v1838_v13  ;;  %v1867_v32 = vld [vmem:[%s2126_s28 + $0x100] ss:$8 sps:$4 sm:$0xff]   ;;  %v1870_v34 = vld [vmem:[%s2126_s28 + $0x1f4] ss:$8 sps:$4 sm:$0xff]   ;;  %v1873_v36 = vld [vmem:[%s2126_s28 + $0x1f0] ss:$8 sps:$4 sm:$0xff]  }
  0x22   : > { %1297 = vmatprep.subr.bf16.mxu1 %v1840_v14  ;;  %v1874_v37 = vld [vmem:[%s2126_s28 + $0xe4] ss:$8 sps:$4 sm:$0xff]   ;;  %v1878_v39 = vld [vmem:[%s2126_s28 + $0xe0] ss:$8 sps:$4 sm:$0xff]   ;;  %v1880_v41 = vld [vmem:[%s2126_s28 + $0xd4] ss:$8 sps:$4 sm:$0xff]  }
  0x23   : > { %v1876_v38 = vld [vmem:[%s2126_s28 + $0x1e4] ss:$8 sps:$4 sm:$0xff]   ;;  %v1879_v40 = vld [vmem:[%s2126_s28 + $0x1e0] ss:$8 sps:$4 sm:$0xff]   ;;  %v1882_v42 = vld [vmem:[%s2126_s28 + $0x1d4] ss:$8 sps:$4 sm:$0xff]  }
  0x24   : > { %1257 = vmatpush1.bf16.msra.mxu0 %v1842_v15  ;;  %v1884_v43 = vld [vmem:[%s2126_s28 + $0xd0] ss:$8 sps:$4 sm:$0xff]   ;;  %v1886_v45 = vld [vmem:[%s2126_s28 + $0xc4] ss:$8 sps:$4 sm:$0xff]   ;;  %v1890_v50 = vld [vmem:[%s2126_s28 + $0xc0] ss:$8 sps:$4 sm:$0xff]  }
  0x25   : > { %1298 = vmatpush1.bf16.msra.mxu1 %v1843_v16  ;;  %1258 = vmatprep.subr.bf16.mxu0 %v1844_v17  ;;  %v1885_v44 = vld [vmem:[%s2126_s28 + $0x1d0] ss:$8 sps:$4 sm:$0xff]   ;;  %v1888_v46 = vld [vmem:[%s2126_s28 + $0x1c4] ss:$8 sps:$4 sm:$0xff]   ;;  %v1891_v51 = vld [vmem:[%s2126_s28 + $0x1c0] ss:$8 sps:$4 sm:$0xff]  }
  0x26   : > { %1299 = vmatprep.subr.bf16.mxu1 %v1846_v18  ;;  %v349_v47 = vld [vmem:[%s2121_s24] sm:$0xff]  ;;  %v350_v49 = vld [vmem:[%s2121_s24 + $0x8] sm:$0xff]  ;;  %v1892_v53 = vld [vmem:[%s2126_s28 + $0xb4] ss:$8 sps:$4 sm:$0xff]   ;;  %p1788_p7 = scmp.ne.s32.totalorder %s2059_s15, 1 }
  0x27   : > { %v1636_v48 = vcombine.high %v349_v47, %v349_v47  ;;  %v1638_v52 = vcombine.high %v350_v49, %v350_v49  ;;  %v1894_v54 = vld [vmem:[%s2126_s28 + $0x1b4] ss:$8 sps:$4 sm:$0xff]   ;;  %v1896_v55 = vld [vmem:[%s2126_s28 + $0xb0] ss:$8 sps:$4 sm:$0xff]   ;;  %v1898_v57 = vld [vmem:[%s2126_s28 + $0xa4] ss:$8 sps:$4 sm:$0xff]   ;;  %v1635_v7 = vcombine.low %v349_v47, %v349_v47  ;;  %v1637_v8 = vcombine.low %v350_v49, %v350_v49 }
  0x28   : > { %1259 = vmatpush1.bf16.msra.mxu0 %v1848_v19  ;;  %v1897_v56 = vld [vmem:[%s2126_s28 + $0x1b0] ss:$8 sps:$4 sm:$0xff]   ;;  %v1900_v58 = vld [vmem:[%s2126_s28 + $0x1a4] ss:$8 sps:$4 sm:$0xff]   ;;  %v1902_v59 = vld [vmem:[%s2126_s28 + $0xa0] ss:$8 sps:$4 sm:$0xff]  }
  0x29   : > { %1300 = vmatpush1.bf16.msra.mxu1 %v1849_v20  ;;  %1260 = vmatprep.subr.bf16.mxu0 %v1850_v21  ;;  %v1903_v60 = vld [vmem:[%s2126_s28 + $0x1a0] ss:$8 sps:$4 sm:$0xff]   ;;  %v1904_v61 = vld [vmem:[%s2126_s28 + $0x94] ss:$8 sps:$4 sm:$0xff]   ;;  %v1908_v63 = vld [vmem:[%s2126_s28 + $0x90] ss:$8 sps:$4 sm:$0xff]  }
  0x2a   : > { %1301 = vmatprep.subr.bf16.mxu1 %v1852_v22  ;;  %1282 = vmatprep.mubr.bf16.mxu0 %v1636_v48  ;;  %v1906_v62 = vld [vmem:[%s2126_s28 + $0x194] ss:$8 sps:$4 sm:$0xff]   ;;  %v1909_v0 = vld [vmem:[%s2126_s28 + $0x190] ss:$8 sps:$4 sm:$0xff]   ;;  %v1910_v1 = vld [vmem:[%s2126_s28 + $0x84] ss:$8 sps:$4 sm:$0xff]  }
  0x2b   : > { %1323 = vmatprep.mubr.bf16.mxu1 %v1638_v52  ;;  %v1912_v2 = vld [vmem:[%s2126_s28 + $0x184] ss:$8 sps:$4 sm:$0xff]   ;;  %v1914_v3 = vld [vmem:[%s2126_s28 + $0x80] ss:$8 sps:$4 sm:$0xff]   ;;  %v1922_v5 = vld [vmem:[%s2126_s28 + $0x274] ss:$8 sps:$4 sm:$0xff]  }
  0x2c   : > { %1261 = vmatpush1.bf16.msra.mxu0 %v1854_v23  ;;  %v1915_v4 = vld [vmem:[%s2126_s28 + $0x180] ss:$8 sps:$4 sm:$0xff]   ;;  %v1925_v6 = vld [vmem:[%s2126_s28 + $0x374] ss:$8 sps:$4 sm:$0xff]   ;;  %v1920_v9 = vld [vmem:[%s2126_s28 + $0x270] ss:$8 sps:$4 sm:$0xff]  }
  0x2d   : > { %1302 = vmatpush1.bf16.msra.mxu1 %v1855_v24  ;;  %1262 = vmatprep.subr.bf16.mxu0 %v1856_v25  ;;  %v1923_v10 = vld [vmem:[%s2126_s28 + $0x370] ss:$8 sps:$4 sm:$0xff]   ;;  %v1928_v11 = vld [vmem:[%s2126_s28 + $0x264] ss:$8 sps:$4 sm:$0xff]   ;;  %v1926_v13 = vld [vmem:[%s2126_s28 + $0x260] ss:$8 sps:$4 sm:$0xff]  }
  0x2e   : > { %1303 = vmatprep.subr.bf16.mxu1 %v1858_v26  ;;  %v1931_v12 = vld [vmem:[%s2126_s28 + $0x364] ss:$8 sps:$4 sm:$0xff]   ;;  %v1929_v14 = vld [vmem:[%s2126_s28 + $0x360] ss:$8 sps:$4 sm:$0xff]   ;;  %v1934_v15 = vld [vmem:[%s2126_s28 + $0x254] ss:$8 sps:$4 sm:$0xff]  }
  0x2f   : > { %v1937_v16 = vld [vmem:[%s2126_s28 + $0x354] ss:$8 sps:$4 sm:$0xff]   ;;  %v1932_v17 = vld [vmem:[%s2126_s28 + $0x250] ss:$8 sps:$4 sm:$0xff]   ;;  %v1940_v19 = vld [vmem:[%s2126_s28 + $0x244] ss:$8 sps:$4 sm:$0xff]  }
  0x30   : > { %1263 = vmatpush1.bf16.msra.mxu0 %v1860_v27  ;;  %v1935_v18 = vld [vmem:[%s2126_s28 + $0x350] ss:$8 sps:$4 sm:$0xff]   ;;  %v1943_v20 = vld [vmem:[%s2126_s28 + $0x344] ss:$8 sps:$4 sm:$0xff]   ;;  %v1938_v21 = vld [vmem:[%s2126_s28 + $0x240] ss:$8 sps:$4 sm:$0xff]  }
  0x31   : > { %1304 = vmatpush1.bf16.msra.mxu1 %v1861_v28  ;;  %1264 = vmatprep.subr.bf16.mxu0 %v1862_v29  ;;  %v1941_v22 = vld [vmem:[%s2126_s28 + $0x340] ss:$8 sps:$4 sm:$0xff]   ;;  %v1946_v23 = vld [vmem:[%s2126_s28 + $0x234] ss:$8 sps:$4 sm:$0xff]   ;;  %v1944_v25 = vld [vmem:[%s2126_s28 + $0x230] ss:$8 sps:$4 sm:$0xff]  }
  0x32   : > { %1305 = vmatprep.subr.bf16.mxu1 %v1864_v30  ;;  %v1949_v24 = vld [vmem:[%s2126_s28 + $0x334] ss:$8 sps:$4 sm:$0xff]   ;;  %v1947_v26 = vld [vmem:[%s2126_s28 + $0x330] ss:$8 sps:$4 sm:$0xff]   ;;  %v1952_v27 = vld [vmem:[%s2126_s28 + $0x224] ss:$8 sps:$4 sm:$0xff]  }
  0x33   : > { %v1955_v28 = vld [vmem:[%s2126_s28 + $0x324] ss:$8 sps:$4 sm:$0xff]   ;;  %v1950_v29 = vld [vmem:[%s2126_s28 + $0x220] ss:$8 sps:$4 sm:$0xff]   ;;  %v1985_v52 = vld [vmem:[%s2126_s28 + $0x3d4] ss:$8 sps:$4 sm:$0xff]  }
  0x34   : > { %1265 = vmatpush1.bf16.msra.mxu0 %v1866_v31  ;;  %v1953_v30 = vld [vmem:[%s2126_s28 + $0x320] ss:$8 sps:$4 sm:$0xff]   ;;  %v1958_v31 = vld [vmem:[%s2126_s28 + $0x214] ss:$8 sps:$4 sm:$0xff]   ;;  %v1976_v47 = vld [vmem:[%s2126_s28 + $0x2e4] ss:$8 sps:$4 sm:$0xff]  }
  0x35   : > { %1306 = vmatpush1.bf16.msra.mxu1 %v1867_v32  ;;  %1266 = vmatprep.subr.bf16.mxu0 %v1868_v33  ;;  %v1961_v32 = vld [vmem:[%s2126_s28 + $0x314] ss:$8 sps:$4 sm:$0xff]   ;;  %v1979_v48 = vld [vmem:[%s2126_s28 + $0x3e4] ss:$8 sps:$4 sm:$0xff]   ;;  %v1974_v49 = vld [vmem:[%s2126_s28 + $0x2e0] ss:$8 sps:$4 sm:$0xff]  }
  0x36   : > { %1307 = vmatprep.subr.bf16.mxu1 %v1870_v34  ;;  %v2222_v33 = vld [vmem:[%s2121_s24 + $0x10] sm:$0xff] }
  0x37   : > { %v1956_v34 = vld [vmem:[%s2126_s28 + $0x210] ss:$8 sps:$4 sm:$0xff]  }
  0x38   : > { %1267 = vmatpush2.bf16.msra.mxu0 %v1872_v35  ;;  %v1959_v35 = vld [vmem:[%s2126_s28 + $0x310] ss:$8 sps:$4 sm:$0xff]  }
  0x39   : > { %1308 = vmatpush2.bf16.msra.mxu1 %v1873_v36  ;;  %1268 = vmatprep.subr.bf16.mxu0 %v1874_v37  ;;  %v1640_v36 = vcombine.high %v2222_v33, %v2222_v33  ;;  %v2229_v37 = vld [vmem:[%s2121_s24 + $0x18] sm:$0xff] }
  0x3a   : > { %1309 = vmatprep.subr.bf16.mxu1 %v1876_v38  ;;  %v1964_v38 = vld [vmem:[%s2126_s28 + $0x204] ss:$8 sps:$4 sm:$0xff]  }
  0x3c   : > { %1269 = vmatpush2.bf16.msra.mxu0 %v1878_v39  ;;  %v1642_v39 = vcombine.high %v2229_v37, %v2229_v37 }
  0x3d   : > { %1310 = vmatpush2.bf16.msra.mxu1 %v1879_v40  ;;  %1270 = vmatprep.subr.bf16.mxu0 %v1880_v41  ;;  %v1967_v40 = vld [vmem:[%s2126_s28 + $0x304] ss:$8 sps:$4 sm:$0xff]   ;;  %v1962_v41 = vld [vmem:[%s2126_s28 + $0x200] ss:$8 sps:$4 sm:$0xff]  }
  0x3e   : > { %1311 = vmatprep.subr.bf16.mxu1 %v1882_v42  ;;  %v1965_v42 = vld [vmem:[%s2126_s28 + $0x300] ss:$8 sps:$4 sm:$0xff]  }
  0x40   : > { %1271 = vmatpush2.bf16.msra.mxu0 %v1884_v43  ;;  %v1970_v43 = vld [vmem:[%s2126_s28 + $0x2f4] ss:$8 sps:$4 sm:$0xff]  }
  0x41   : > { %1312 = vmatpush2.bf16.msra.mxu1 %v1885_v44  ;;  %1272 = vmatprep.subr.bf16.mxu0 %v1886_v45  ;;  %v1973_v44 = vld [vmem:[%s2126_s28 + $0x3f4] ss:$8 sps:$4 sm:$0xff]   ;;  %v1968_v45 = vld [vmem:[%s2126_s28 + $0x2f0] ss:$8 sps:$4 sm:$0xff]  }
  0x42   : > { %1313 = vmatprep.subr.bf16.mxu1 %v1888_v46  ;;  %v1971_v46 = vld [vmem:[%s2126_s28 + $0x3f0] ss:$8 sps:$4 sm:$0xff]  }
  0x44   : > { %1273 = vmatpush2.bf16.msra.mxu0 %v1890_v50  ;;  %v1977_v50 = vld [vmem:[%s2126_s28 + $0x3e0] ss:$8 sps:$4 sm:$0xff]  }
  0x45   : > { %1314 = vmatpush2.bf16.msra.mxu1 %v1891_v51  ;;  %1274 = vmatprep.subr.bf16.mxu0 %v1892_v53  ;;  %v1982_v51 = vld [vmem:[%s2126_s28 + $0x2d4] ss:$8 sps:$4 sm:$0xff]   ;;  %v1980_v53 = vld [vmem:[%s2126_s28 + $0x2d0] ss:$8 sps:$4 sm:$0xff]  }
  0x46   : > { %1315 = vmatprep.subr.bf16.mxu1 %v1894_v54  ;;  %v1983_v54 = vld [vmem:[%s2126_s28 + $0x3d0] ss:$8 sps:$4 sm:$0xff]  }
  0x48   : > { %1275 = vmatpush2.bf16.msra.mxu0 %v1896_v55  ;;  %v1988_v55 = vld [vmem:[%s2126_s28 + $0x2c4] ss:$8 sps:$4 sm:$0xff]  }
  0x49   : > { %1316 = vmatpush2.bf16.msra.mxu1 %v1897_v56  ;;  %1276 = vmatprep.subr.bf16.mxu0 %v1898_v57  ;;  %v1991_v56 = vld [vmem:[%s2126_s28 + $0x3c4] ss:$8 sps:$4 sm:$0xff]   ;;  %v1986_v57 = vld [vmem:[%s2126_s28 + $0x2c0] ss:$8 sps:$4 sm:$0xff]  }
  0x4a   : > { %1317 = vmatprep.subr.bf16.mxu1 %v1900_v58  ;;  %v1989_v58 = vld [vmem:[%s2126_s28 + $0x3c0] ss:$8 sps:$4 sm:$0xff]  }
  0x4c   : > { %1277 = vmatpush2.bf16.msra.mxu0 %v1902_v59  ;;  %v1994_v59 = vld [vmem:[%s2126_s28 + $0x2b4] ss:$8 sps:$4 sm:$0xff]  }
  0x4d   : > { %1318 = vmatpush2.bf16.msra.mxu1 %v1903_v60  ;;  %1278 = vmatprep.subr.bf16.mxu0 %v1904_v61  ;;  %v1997_v60 = vld [vmem:[%s2126_s28 + $0x3b4] ss:$8 sps:$4 sm:$0xff]   ;;  %v1992_v61 = vld [vmem:[%s2126_s28 + $0x2b0] ss:$8 sps:$4 sm:$0xff]  }
  0x4e   : > { %1319 = vmatprep.subr.bf16.mxu1 %v1906_v62  ;;  %v1995_v62 = vld [vmem:[%s2126_s28 + $0x3b0] ss:$8 sps:$4 sm:$0xff]  }
  0x50   : > { %1279 = vmatpush2.bf16.msra.mxu0 %v1908_v63  ;;  %v2000_v63 = vld [vmem:[%s2126_s28 + $0x2a4] ss:$8 sps:$4 sm:$0xff]  }
  0x51   : > { %1320 = vmatpush2.bf16.msra.mxu1 %v1909_v0  ;;  %1280 = vmatprep.subr.bf16.mxu0 %v1910_v1  ;;  %v2003_v0 = vld [vmem:[%s2126_s28 + $0x3a4] ss:$8 sps:$4 sm:$0xff]   ;;  %v1998_v1 = vld [vmem:[%s2126_s28 + $0x2a0] ss:$8 sps:$4 sm:$0xff]  }
  0x52   : > { %1321 = vmatprep.subr.bf16.mxu1 %v1912_v2  ;;  %v2001_v2 = vld [vmem:[%s2126_s28 + $0x3a0] ss:$8 sps:$4 sm:$0xff]  }
  0x54   : > { %1281 = vmatpush2.bf16.msra.mxu0 %v1914_v3  ;;  %v2006_v3 = vld [vmem:[%s2126_s28 + $0x294] ss:$8 sps:$4 sm:$0xff]  }
  0x55   : > { %1322 = vmatpush2.bf16.msra.mxu1 %v1915_v4  ;;  %1332 = vmatprep.subr.bf16.mxu0 %v1922_v5  ;;  %v2009_v4 = vld [vmem:[%s2126_s28 + $0x394] ss:$8 sps:$4 sm:$0xff]   ;;  %v2004_v5 = vld [vmem:[%s2126_s28 + $0x290] ss:$8 sps:$4 sm:$0xff]  }
  0x56   : > { %1373 = vmatprep.subr.bf16.mxu1 %v1925_v6  ;;  %v2007_v6 = vld [vmem:[%s2126_s28 + $0x390] ss:$8 sps:$4 sm:$0xff]  }
  0x57   : > { %1283 = vmatmul.mubr.bf16.vlgmr.msra.gmra.mxu0 %v1635_v7  ;;  %v2012_v7 = vld [vmem:[%s2126_s28 + $0x284] ss:$8 sps:$4 sm:$0xff]  }
  0x58   : > { %1324 = vmatmul.mubr.bf16.vlgmr.msra.gmra.mxu1 %v1637_v8  ;;  %1333 = vmatpush1.bf16.msra.mxu0 %v1920_v9  ;;  %v2015_v8 = vld [vmem:[%s2126_s28 + $0x384] ss:$8 sps:$4 sm:$0xff]   ;;  %v2010_v9 = vld [vmem:[%s2126_s28 + $0x280] ss:$8 sps:$4 sm:$0xff]  }
  0x59   : > { %1374 = vmatpush1.bf16.msra.mxu1 %v1923_v10  ;;  %1334 = vmatprep.subr.bf16.mxu0 %v1928_v11  ;;  %v2013_v10 = vld [vmem:[%s2126_s28 + $0x380] ss:$8 sps:$4 sm:$0xff]   ;;  %v2020_v11 = vld [vmem:[%s2126_s28 + $0x474] ss:$8 sps:$4 sm:$0xff]  }
  0x5a   : > { %1375 = vmatprep.subr.bf16.mxu1 %v1931_v12  ;;  %1364 = vmatprep.mubr.bf16.mxu0 %v1640_v36  ;;  %v1639_v12 = vcombine.low %v2222_v33, %v2222_v33 }
  0x5b   : > { %1405 = vmatprep.mubr.bf16.mxu1 %v1642_v39 }
  0x5c   : > { %1335 = vmatpush1.bf16.msra.mxu0 %v1926_v13  ;;  %v1641_v13 = vcombine.low %v2229_v37, %v2229_v37 }
  0x5d   : > { %1376 = vmatpush1.bf16.msra.mxu1 %v1929_v14  ;;  %1336 = vmatprep.subr.bf16.mxu0 %v1934_v15  ;;  %v2018_v14 = vld [vmem:[%s2126_s28 + $0x470] ss:$8 sps:$4 sm:$0xff]   ;;  %v2025_v15 = vld [vmem:[%s2126_s28 + $0x464] ss:$8 sps:$4 sm:$0xff]  }
  0x5e   : > { %1377 = vmatprep.subr.bf16.mxu1 %v1937_v16  ;;  %v2023_v16 = vld [vmem:[%s2126_s28 + $0x460] ss:$8 sps:$4 sm:$0xff]  }
  0x60   : > { %1337 = vmatpush1.bf16.msra.mxu0 %v1932_v17  ;;  %v2070_v17 = vmov 0  }
  0x61   : > { %1378 = vmatpush1.bf16.msra.mxu1 %v1935_v18  ;;  %1338 = vmatprep.subr.bf16.mxu0 %v1940_v19  ;;  %v2028_v18 = vld [vmem:[%s2126_s28 + $0x454] ss:$8 sps:$4 sm:$0xff]   ;;  %v2026_v19 = vld [vmem:[%s2126_s28 + $0x450] ss:$8 sps:$4 sm:$0xff]  }
  0x62   : > { %1379 = vmatprep.subr.bf16.mxu1 %v1943_v20  ;;  %v2031_v20 = vld [vmem:[%s2126_s28 + $0x444] ss:$8 sps:$4 sm:$0xff]  }
  0x64   : > { %1339 = vmatpush1.bf16.msra.mxu0 %v1938_v21  ;;  %v2029_v21 = vld [vmem:[%s2126_s28 + $0x440] ss:$8 sps:$4 sm:$0xff]  }
  0x65   : > { %1380 = vmatpush1.bf16.msra.mxu1 %v1941_v22  ;;  %1340 = vmatprep.subr.bf16.mxu0 %v1946_v23  ;;  %v2034_v22 = vld [vmem:[%s2126_s28 + $0x434] ss:$8 sps:$4 sm:$0xff]   ;;  %v2032_v23 = vld [vmem:[%s2126_s28 + $0x430] ss:$8 sps:$4 sm:$0xff]  }
  0x66   : > { %1381 = vmatprep.subr.bf16.mxu1 %v1949_v24  ;;  %v2037_v24 = vld [vmem:[%s2126_s28 + $0x424] ss:$8 sps:$4 sm:$0xff]  }
  0x68   : > { %1341 = vmatpush1.bf16.msra.mxu0 %v1944_v25  ;;  %v2035_v25 = vld [vmem:[%s2126_s28 + $0x420] ss:$8 sps:$4 sm:$0xff]  }
  0x69   : > { %1382 = vmatpush1.bf16.msra.mxu1 %v1947_v26  ;;  %1342 = vmatprep.subr.bf16.mxu0 %v1952_v27  ;;  %v2040_v26 = vld [vmem:[%s2126_s28 + $0x414] ss:$8 sps:$4 sm:$0xff]   ;;  %v2038_v27 = vld [vmem:[%s2126_s28 + $0x410] ss:$8 sps:$4 sm:$0xff]  }
  0x6a   : > { %1383 = vmatprep.subr.bf16.mxu1 %v1955_v28  ;;  %v2043_v28 = vld [vmem:[%s2126_s28 + $0x404] ss:$8 sps:$4 sm:$0xff]  }
  0x6c   : > { %1343 = vmatpush1.bf16.msra.mxu0 %v1950_v29  ;;  %v2041_v29 = vld [vmem:[%s2126_s28 + $0x400] ss:$8 sps:$4 sm:$0xff]  }
  0x6d   : > { %1384 = vmatpush1.bf16.msra.mxu1 %v1953_v30  ;;  %1344 = vmatprep.subr.bf16.mxu0 %v1958_v31  ;;  %v2044_v30 = vld [vmem:[%s2121_s24 + $0x20] ss:$0 sps:$4 sm:$0xff]  }
  0x6e   : > { %1385 = vmatprep.subr.bf16.mxu1 %v1961_v32 }
  0x70   : > { %1345 = vmatpush1.bf16.msra.mxu0 %v1956_v34 }
  0x71   : > { %1386 = vmatpush1.bf16.msra.mxu1 %v1959_v35  ;;  %1346 = vmatprep.subr.bf16.mxu0 %v1964_v38 }
  0x72   : > { %1387 = vmatprep.subr.bf16.mxu1 %v1967_v40 }
  0x74   : > { %1347 = vmatpush1.bf16.msra.mxu0 %v1962_v41 }
  0x75   : > { %1388 = vmatpush1.bf16.msra.mxu1 %v1965_v42  ;;  %1348 = vmatprep.subr.bf16.mxu0 %v1970_v43 }
  0x76   : > { %1389 = vmatprep.subr.bf16.mxu1 %v1973_v44 }
  0x78   : > { %1349 = vmatpush2.bf16.msra.mxu0 %v1968_v45 }
  0x79   : > { %1390 = vmatpush2.bf16.msra.mxu1 %v1971_v46  ;;  %1350 = vmatprep.subr.bf16.mxu0 %v1976_v47 }
  0x7a   : > { %1391 = vmatprep.subr.bf16.mxu1 %v1979_v48 }
  0x7c   : > { %1351 = vmatpush2.bf16.msra.mxu0 %v1974_v49 }
  0x7d   : > { %1392 = vmatpush2.bf16.msra.mxu1 %v1977_v50  ;;  %1352 = vmatprep.subr.bf16.mxu0 %v1982_v51 }
  0x7e   : > { %1393 = vmatprep.subr.bf16.mxu1 %v1985_v52  ;;  %v347_v52 = vld [vmem:[#allocation2] sm:$0xff] }
  0x80   : > { %1353 = vmatpush2.bf16.msra.mxu0 %v1980_v53 }
  0x81   : > { %1394 = vmatpush2.bf16.msra.mxu1 %v1983_v54  ;;  %1354 = vmatprep.subr.bf16.mxu0 %v1988_v55 }
  0x82   : > { %1395 = vmatprep.subr.bf16.mxu1 %v1991_v56  ;;  %v348_v56 = vld [vmem:[#allocation2 + $0x8] sm:$0xff] }
  0x84   : > { %1355 = vmatpush2.bf16.msra.mxu0 %v1986_v57 }
  0x85   : > { %1396 = vmatpush2.bf16.msra.mxu1 %v1989_v58  ;;  %1356 = vmatprep.subr.bf16.mxu0 %v1994_v59 }
  0x86   : > { %1397 = vmatprep.subr.bf16.mxu1 %v1997_v60 }
  0x88   : > { %1357 = vmatpush2.bf16.msra.mxu0 %v1992_v61 }
  0x89   : > { %1398 = vmatpush2.bf16.msra.mxu1 %v1995_v62  ;;  %1358 = vmatprep.subr.bf16.mxu0 %v2000_v63 }
  0x8a   : > { %1399 = vmatprep.subr.bf16.mxu1 %v2003_v0 }
  0x8c   : > { %1359 = vmatpush2.bf16.msra.mxu0 %v1998_v1 }
  0x8d   : > { %1400 = vmatpush2.bf16.msra.mxu1 %v2001_v2  ;;  %1360 = vmatprep.subr.bf16.mxu0 %v2006_v3 }
  0x8e   : > { %1401 = vmatprep.subr.bf16.mxu1 %v2009_v4 }
  0x90   : > { %1361 = vmatpush2.bf16.msra.mxu0 %v2004_v5 }
  0x91   : > { %1402 = vmatpush2.bf16.msra.mxu1 %v2007_v6  ;;  %1362 = vmatprep.subr.bf16.mxu0 %v2012_v7 }
  0x92   : > { %1403 = vmatprep.subr.bf16.mxu1 %v2015_v8 }
  0x94   : > { %1363 = vmatpush2.bf16.msra.mxu0 %v2010_v9 }
  0x95   : > { %1404 = vmatpush2.bf16.msra.mxu1 %v2013_v10  ;;  %1414 = vmatprep.subr.bf16.mxu0 %v2020_v11 }
  0x97   : > { %1365 = vmatmul.mubr.bf16.vlgmr.msra.gmra.mxu0 %v1639_v12 }
  0x98   : > { %1406 = vmatmul.mubr.bf16.vlgmr.msra.gmra.mxu1 %v1641_v13  ;;  %1415 = vmatpush1.bf16.msra.mxu0 %v2018_v14 }
  0x99   : > { %1446 = vmatprep.mubr.bf16.mxu0 %v2070_v17  ;;  %1416 = vmatprep.subr.bf16.mxu0 %v2025_v15 }
  0x9c   : > { %1417 = vmatpush1.bf16.msra.mxu0 %v2023_v16 }
  0x9d   : > { %1418 = vmatprep.subr.bf16.mxu0 %v2028_v18 }
  0xa0   : > { %1419 = vmatpush1.bf16.msra.mxu0 %v2026_v19 }
  0xa1   : > { %1420 = vmatprep.subr.bf16.mxu0 %v2031_v20 }
  0xa4   : > { %1421 = vmatpush1.bf16.msra.mxu0 %v2029_v21 }
  0xa5   : > { %1422 = vmatprep.subr.bf16.mxu0 %v2034_v22 }
  0xa8   : > { %1423 = vmatpush1.bf16.msra.mxu0 %v2032_v23 }
  0xa9   : > { %1424 = vmatprep.subr.bf16.mxu0 %v2037_v24 }
  0xac   : > { %1425 = vmatpush1.bf16.msra.mxu0 %v2035_v25 }
  0xad   : > { %1426 = vmatprep.subr.bf16.mxu0 %v2040_v26 }
  0xb0   : > { %1427 = vmatpush1.bf16.msra.mxu0 %v2038_v27 }
  0xb1   : > { %1428 = vmatprep.subr.bf16.mxu0 %v2043_v28 }
  0xb4   : > { %1429 = vmatpush1.bf16.msra.mxu0 %v2041_v29 }
  0xb7   : > { %1447 = vmatmul.mubr.bf16.vlgmr.msra.gmra.mxu0 %v2044_v30 }
 0x117   : > { %v1284_v31 = vpop.f32.mrf.mxu0 }
 0x118   : > { %v1325_v32 = vpop.f32.mrf.mxu1 }
 0x119   : > { %v1326_v33 = vadd.f32 %v1325_v32, %v1284_v31  ;;  %v1286_v34 = vpop.f32.mrf.mxu0 }
 0x11a   : > { %v1327_v35 = vpop.f32.mrf.mxu1 }
 0x11b   : > { %v1328_v36 = vadd.f32 %v1327_v35, %v1286_v34  ;;  %v1288_v37 = vpop.f32.mrf.mxu0 }
 0x11c   : > { %v1329_v38 = vpop.f32.mrf.mxu1 }
 0x11d   : > { %v1289_v39 = vpop.f32.mrf.mxu0 }
 0x11e   : > { %v1330_v40 = vpop.f32.mrf.mxu1 }
 0x157   : > { %v1366_v41 = vpop.f32.mrf.mxu0 }
 0x158   : > { %v1407_v42 = vpop.f32.mrf.mxu1  ;;  %v1367_v49 = vadd.f32 %v1366_v41, %v1326_v33 }
 0x159   : > { %v1368_v43 = vpop.f32.mrf.mxu0 }
 0x15a   : > { %v1409_v44 = vpop.f32.mrf.mxu1  ;;  %v1369_v50 = vadd.f32 %v1368_v43, %v1328_v36  ;;  %v1408_v51 = vadd.f32 %v1407_v42, %v1367_v49 }
 0x15b   : > { %v1370_v45 = vpop.f32.mrf.mxu0 }
 0x15c   : > { %v1411_v46 = vpop.f32.mrf.mxu1  ;;  %v1410_v54 = vadd.f32 %v1409_v44, %v1369_v50 }
 0x15d   : > { %v1371_v47 = vpop.f32.mrf.mxu0 }
 0x15e   : > { %v1412_v48 = vpop.f32.mrf.mxu1 }
 0x177   : > { %v1448_v53 = vpop.f32.mrf.mxu0 }
 0x178   : > { %v1449_v55 = vadd.f32 %v1448_v53, %v1408_v51 }
 0x179   : > { %v1450_v57 = vpop.f32.mrf.mxu0 }
 0x17a   : > { %v1455_v58 = vadd.f32 %v1449_v55, %v347_v52  ;;  %v1451_v59 = vadd.f32 %v1450_v57, %v1410_v54  ;;  %1462 = sbr.rel (%p1788_p7) target bundleno = 398 (0x18e), region = 44 }
 0x17b   : > { %v1452_v60 = vpop.f32.mrf.mxu0 }
 0x17c   : > { %1457 = vst [vmem:[#allocation2] sm:$0xff] %v1455_v58  ;;  %v1456_v61 = vadd.f32 %v1451_v59, %v348_v56 }
 0x17d   : > { %v1453_v62 = vpop.f32.mrf.mxu0 }
 0x17e   : > { %1458 = vst [vmem:[#allocation2 + $0x8] sm:$0xff] %v1456_v61 }
 0x17f   : > { %v1467_v63 = vlaneseq  ;;  %v1465_v1 = vld [vmem:[%s2317_s2] sm:$0x3]  ;;  %v1480_v9 = vld [vmem:[%s2318_s3 + $0x8] sm:$0xff] }
 0x180   : > { %v1479_v8 = vld [vmem:[%s2318_s3] sm:$0xff] }
 0x181   : > { %v1468_v0 = vshrl.u32 %v1467_v63, 7 }
 0x183   : > { %v1469_v2 = vsub.s32 0, %v1468_v0  ;;  %v1473_v3 = vsub.s32 1, %v1468_v0  ;;  %v1463_v4 = vld [vmem:[#allocation2] sm:$0xff] }
 0x185   : > { %v1464_v5 = vld [vmem:[#allocation2 + $0x8] sm:$0xff]  ;;  %v1470_v6 = vrot.slane %v1465_v1, %v1469_v2  ;;  %v1474_v7 = vrot.slane %v1465_v1, %v1473_v3 }
 0x187   : > { %v1477_v10 = vadd.f32 %v1470_v6, %v1463_v4  ;;  %v1478_v11 = vadd.f32 %v1474_v7, %v1464_v5 }
 0x189   : > { %v1481_v12 = vadd.f32 %v1479_v8, %v1477_v10  ;;  %v1482_v13 = vadd.f32 %v1480_v9, %v1478_v11 }
 0x18b   : > { %v1483_v14 = vmax.f32 %v1481_v12, 0.0  ;;  %v1484_v15 = vmax.f32 %v1482_v13, 0.0 }
 0x18d   : > { %1485 = vst [vmem:[%s2319_s4] sm:$0xff] %v1483_v14  ;;  %1486 = vst [vmem:[%s2319_s4 + $0x8] sm:$0xff] %v1484_v15 }
 0x18e PF: > { %s14_s17 = sadd.s32 1, %s2067_s17   ;;  %s2320_s15 = smov %s2063_s16 }
 0x18f   : > { %p11_p8 = scmp.ge.s32.totalorder %s14_s17, 4   ;;  %s2321_s16 = smov %s2323_s18 }
 0x191   :  { %13 = sbr.rel (!%p11_p8) target bundleno = 2 (0x2), region = 83 }

// kernel: resnet34_forward.59
= control target key start
LH: loop header
LB: loop body
LE: loop exit
PB: predicated region body
PF: predicated region fallthrough
CT: control target
= control target key end

     0   :  { %s2002_s12 = smov 0   ;;  %s2004_s13 = smov 0   ;;  %s2215_s0 = inlined_call_operand.vmem [shape: bf16[8,2304], index: 0, kind: input, shape index: {}]   ;;  %s2216_s1 = inlined_call_operand.vmem [shape: bf16[2304,256], index: 1, kind: input, shape index: {}]   ;;  %s2217_s2 = inlined_call_operand.vmem [shape: f32[1,256], index: 2, kind: input, shape index: {}]   ;;  %s2218_s3 = inlined_call_operand.vmem [shape: f32[8,256], index: 3, kind: output, shape index: {}]  }
   0x1   :  { %s2006_s14 = smov 0  }
   0x2 LB: > { %s25_s15 = sadd.s32 1, %s1974_s13  ;;  %p1541_p0 = scmp.ge.s32.totalorder %s1978_s14, 1  ;;  %s1978_s14 = sphi %s2006_s14, %s13_s14   ;;  %s1974_s13 = sphi %s2004_s13, %s2220_s13   ;;  %s1970_s12 = sphi %s2002_s12, %s2219_s12  }
   0x3   : > { %p26_p1 = scmp.ge.s32.totalorder %s25_s15, 2  ;;  %p194_p2 = scmp.lt.s32.totalorder %s1978_s14, 3 }
   0x5   : > { %s2222_s15 = smov (%p26_p1, %s25_s15), 0  ;;  %p195_p3 = pnand %p1541_p0, %p194_p2 }
   0x6   : > { %s240_s16 = smul.u32 (!%p195_p3), 9, %s1970_s12  ;;  %p1545_p6 = scmp.ne.s32.totalorder (!%p195_p3), %s1970_s12, 0 }
   0x7   : > { %198 = sbr.rel (%p195_p3) target bundleno = 396 (0x18c), region = 32 }
   0x8   : > { %s250_s17 = smul.u32 (!%p195_p3), 144, %s1970_s12  ;;  %p243_p4 = scmp.lt.s32.totalorder (!%p195_p3), %s240_s16, 17 }
   0xa   : > { %p252_p5 = scmp.lt.s32.totalorder (!%p195_p3), %s250_s17, 287 }
   0xc   : > { %s2224_s16 = smov (!%p243_p4, %s240_s16), 17  ;;  %s2226_s17 = smov (!%p252_p5, %s250_s17), 287 }
   0xd   : > { %s1542_s18 = sshll.u32 %s2224_s16, 2  ;;  %s1704_s22 = sshll.u32 %s2226_s17, 3 }
   0xe   : > { %s2027_s21 = scalar_lea.vmem %s2215_s0, %s1542_s18  ;;  %s2032_s25 = scalar_lea.vmem %s2216_s1, %s1704_s22 }
   0xf   : > { %281 = sbr.rel (%p1545_p6) target bundleno = 22 (0x16), region = 36 }
  0x14   : > { %v1980_v0 = vmov 0.0  }
  0x15   : > { %282 = vst [vmem:[#allocation2] sm:$0xff] %v1980_v0  ;;  %283 = vst [vmem:[#allocation2 + $0x8] sm:$0xff] %v1980_v0 }
  0x16 PF: > { %v1731_v1 = vld [vmem:[%s2032_s25 + $0x74] ss:$8 sps:$4 sm:$0xff]   ;;  %v1735_v3 = vld [vmem:[%s2032_s25 + $0x70] ss:$8 sps:$4 sm:$0xff]   ;;  %v1737_v5 = vld [vmem:[%s2032_s25 + $0x64] ss:$8 sps:$4 sm:$0xff]  }
  0x17   : > { %v1733_v2 = vld [vmem:[%s2032_s25 + $0x174] ss:$8 sps:$4 sm:$0xff]   ;;  %1187 = vmatprep.subr.bf16.mxu0 %v1731_v1  ;;  %v1736_v4 = vld [vmem:[%s2032_s25 + $0x170] ss:$8 sps:$4 sm:$0xff]   ;;  %v1739_v6 = vld [vmem:[%s2032_s25 + $0x164] ss:$8 sps:$4 sm:$0xff]  }
  0x18   : > { %1228 = vmatprep.subr.bf16.mxu1 %v1733_v2  ;;  %1188 = vmatpush1.bf16.msra.mxu0 %v1735_v3  ;;  %v1741_v7 = vld [vmem:[%s2032_s25 + $0x60] ss:$8 sps:$4 sm:$0xff]   ;;  %v1743_v9 = vld [vmem:[%s2032_s25 + $0x54] ss:$8 sps:$4 sm:$0xff]   ;;  %v1747_v11 = vld [vmem:[%s2032_s25 + $0x50] ss:$8 sps:$4 sm:$0xff]  }
  0x19   : > { %1229 = vmatpush1.bf16.msra.mxu1 %v1736_v4  ;;  %1189 = vmatprep.subr.bf16.mxu0 %v1737_v5  ;;  %v1742_v8 = vld [vmem:[%s2032_s25 + $0x160] ss:$8 sps:$4 sm:$0xff]   ;;  %v1745_v10 = vld [vmem:[%s2032_s25 + $0x154] ss:$8 sps:$4 sm:$0xff]   ;;  %v1748_v12 = vld [vmem:[%s2032_s25 + $0x150] ss:$8 sps:$4 sm:$0xff]  }
  0x1a   : > { %1230 = vmatprep.subr.bf16.mxu1 %v1739_v6  ;;  %v1749_v13 = vld [vmem:[%s2032_s25 + $0x44] ss:$8 sps:$4 sm:$0xff]   ;;  %v1753_v15 = vld [vmem:[%s2032_s25 + $0x40] ss:$8 sps:$4 sm:$0xff]   ;;  %v1755_v17 = vld [vmem:[%s2032_s25 + $0x34] ss:$8 sps:$4 sm:$0xff]  }
  0x1b   : > { %v1751_v14 = vld [vmem:[%s2032_s25 + $0x144] ss:$8 sps:$4 sm:$0xff]   ;;  %v1754_v16 = vld [vmem:[%s2032_s25 + $0x140] ss:$8 sps:$4 sm:$0xff]   ;;  %v1757_v18 = vld [vmem:[%s2032_s25 + $0x134] ss:$8 sps:$4 sm:$0xff]  }
  0x1c   : > { %1190 = vmatpush1.bf16.msra.mxu0 %v1741_v7  ;;  %v1759_v19 = vld [vmem:[%s2032_s25 + $0x30] ss:$8 sps:$4 sm:$0xff]   ;;  %v1761_v21 = vld [vmem:[%s2032_s25 + $0x24] ss:$8 sps:$4 sm:$0xff]   ;;  %v1765_v23 = vld [vmem:[%s2032_s25 + $0x20] ss:$8 sps:$4 sm:$0xff]  }
  0x1d   : > { %1231 = vmatpush1.bf16.msra.mxu1 %v1742_v8  ;;  %1191 = vmatprep.subr.bf16.mxu0 %v1743_v9  ;;  %v1760_v20 = vld [vmem:[%s2032_s25 + $0x130] ss:$8 sps:$4 sm:$0xff]   ;;  %v1763_v22 = vld [vmem:[%s2032_s25 + $0x124] ss:$8 sps:$4 sm:$0xff]   ;;  %v1766_v24 = vld [vmem:[%s2032_s25 + $0x120] ss:$8 sps:$4 sm:$0xff]  }
  0x1e   : > { %1232 = vmatprep.subr.bf16.mxu1 %v1745_v10  ;;  %v1767_v25 = vld [vmem:[%s2032_s25 + $0x14] ss:$8 sps:$4 sm:$0xff]   ;;  %v1771_v27 = vld [vmem:[%s2032_s25 + $0x10] ss:$8 sps:$4 sm:$0xff]   ;;  %v1773_v29 = vld [vmem:[%s2032_s25 + $0x4] ss:$8 sps:$4 sm:$0xff]  }
  0x1f   : > { %v1769_v26 = vld [vmem:[%s2032_s25 + $0x114] ss:$8 sps:$4 sm:$0xff]   ;;  %v1772_v28 = vld [vmem:[%s2032_s25 + $0x110] ss:$8 sps:$4 sm:$0xff]   ;;  %v1775_v30 = vld [vmem:[%s2032_s25 + $0x104] ss:$8 sps:$4 sm:$0xff]  }
  0x20   : > { %1192 = vmatpush1.bf16.msra.mxu0 %v1747_v11  ;;  %v1777_v31 = vld [vmem:[%s2032_s25] ss:$8 sps:$4 sm:$0xff]   ;;  %v1779_v33 = vld [vmem:[%s2032_s25 + $0xf4] ss:$8 sps:$4 sm:$0xff]   ;;  %v1783_v35 = vld [vmem:[%s2032_s25 + $0xf0] ss:$8 sps:$4 sm:$0xff]  }
  0x21   : > { %1233 = vmatpush1.bf16.msra.mxu1 %v1748_v12  ;;  %1193 = vmatprep.subr.bf16.mxu0 %v1749_v13  ;;  %v1778_v32 = vld [vmem:[%s2032_s25 + $0x100] ss:$8 sps:$4 sm:$0xff]   ;;  %v1781_v34 = vld [vmem:[%s2032_s25 + $0x1f4] ss:$8 sps:$4 sm:$0xff]   ;;  %v1784_v36 = vld [vmem:[%s2032_s25 + $0x1f0] ss:$8 sps:$4 sm:$0xff]  }
  0x22   : > { %1234 = vmatprep.subr.bf16.mxu1 %v1751_v14  ;;  %v1785_v37 = vld [vmem:[%s2032_s25 + $0xe4] ss:$8 sps:$4 sm:$0xff]   ;;  %v1789_v39 = vld [vmem:[%s2032_s25 + $0xe0] ss:$8 sps:$4 sm:$0xff]   ;;  %v1791_v41 = vld [vmem:[%s2032_s25 + $0xd4] ss:$8 sps:$4 sm:$0xff]  }
  0x23   : > { %v1787_v38 = vld [vmem:[%s2032_s25 + $0x1e4] ss:$8 sps:$4 sm:$0xff]   ;;  %v1790_v40 = vld [vmem:[%s2032_s25 + $0x1e0] ss:$8 sps:$4 sm:$0xff]   ;;  %v1793_v42 = vld [vmem:[%s2032_s25 + $0x1d4] ss:$8 sps:$4 sm:$0xff]  }
  0x24   : > { %1194 = vmatpush1.bf16.msra.mxu0 %v1753_v15  ;;  %v1795_v43 = vld [vmem:[%s2032_s25 + $0xd0] ss:$8 sps:$4 sm:$0xff]   ;;  %v1797_v45 = vld [vmem:[%s2032_s25 + $0xc4] ss:$8 sps:$4 sm:$0xff]   ;;  %v1801_v50 = vld [vmem:[%s2032_s25 + $0xc0] ss:$8 sps:$4 sm:$0xff]  }
  0x25   : > { %1235 = vmatpush1.bf16.msra.mxu1 %v1754_v16  ;;  %1195 = vmatprep.subr.bf16.mxu0 %v1755_v17  ;;  %v1796_v44 = vld [vmem:[%s2032_s25 + $0x1d0] ss:$8 sps:$4 sm:$0xff]   ;;  %v1799_v46 = vld [vmem:[%s2032_s25 + $0x1c4] ss:$8 sps:$4 sm:$0xff]   ;;  %v1802_v51 = vld [vmem:[%s2032_s25 + $0x1c0] ss:$8 sps:$4 sm:$0xff]  }
  0x26   : > { %1236 = vmatprep.subr.bf16.mxu1 %v1757_v18  ;;  %v286_v47 = vld [vmem:[%s2027_s21] sm:$0xff]  ;;  %v287_v49 = vld [vmem:[%s2027_s21 + $0x8] sm:$0xff]  ;;  %v1803_v53 = vld [vmem:[%s2032_s25 + $0xb4] ss:$8 sps:$4 sm:$0xff]   ;;  %p1699_p7 = scmp.ne.s32.totalorder %s1970_s12, 1 }
  0x27   : > { %v1547_v48 = vcombine.high %v286_v47, %v286_v47  ;;  %v1549_v52 = vcombine.high %v287_v49, %v287_v49  ;;  %v1805_v54 = vld [vmem:[%s2032_s25 + $0x1b4] ss:$8 sps:$4 sm:$0xff]   ;;  %v1807_v55 = vld [vmem:[%s2032_s25 + $0xb0] ss:$8 sps:$4 sm:$0xff]   ;;  %v1809_v57 = vld [vmem:[%s2032_s25 + $0xa4] ss:$8 sps:$4 sm:$0xff]   ;;  %v1546_v7 = vcombine.low %v286_v47, %v286_v47  ;;  %v1548_v8 = vcombine.low %v287_v49, %v287_v49 }
  0x28   : > { %1196 = vmatpush1.bf16.msra.mxu0 %v1759_v19  ;;  %v1808_v56 = vld [vmem:[%s2032_s25 + $0x1b0] ss:$8 sps:$4 sm:$0xff]   ;;  %v1811_v58 = vld [vmem:[%s2032_s25 + $0x1a4] ss:$8 sps:$4 sm:$0xff]   ;;  %v1813_v59 = vld [vmem:[%s2032_s25 + $0xa0] ss:$8 sps:$4 sm:$0xff]  }
  0x29   : > { %1237 = vmatpush1.bf16.msra.mxu1 %v1760_v20  ;;  %1197 = vmatprep.subr.bf16.mxu0 %v1761_v21  ;;  %v1814_v60 = vld [vmem:[%s2032_s25 + $0x1a0] ss:$8 sps:$4 sm:$0xff]   ;;  %v1815_v61 = vld [vmem:[%s2032_s25 + $0x94] ss:$8 sps:$4 sm:$0xff]   ;;  %v1819_v63 = vld [vmem:[%s2032_s25 + $0x90] ss:$8 sps:$4 sm:$0xff]  }
  0x2a   : > { %1238 = vmatprep.subr.bf16.mxu1 %v1763_v22  ;;  %1219 = vmatprep.mubr.bf16.mxu0 %v1547_v48  ;;  %v1817_v62 = vld [vmem:[%s2032_s25 + $0x194] ss:$8 sps:$4 sm:$0xff]   ;;  %v1820_v0 = vld [vmem:[%s2032_s25 + $0x190] ss:$8 sps:$4 sm:$0xff]   ;;  %v1821_v1 = vld [vmem:[%s2032_s25 + $0x84] ss:$8 sps:$4 sm:$0xff]  }
  0x2b   : > { %1260 = vmatprep.mubr.bf16.mxu1 %v1549_v52  ;;  %v1823_v2 = vld [vmem:[%s2032_s25 + $0x184] ss:$8 sps:$4 sm:$0xff]   ;;  %v1825_v3 = vld [vmem:[%s2032_s25 + $0x80] ss:$8 sps:$4 sm:$0xff]   ;;  %v1833_v5 = vld [vmem:[%s2032_s25 + $0x274] ss:$8 sps:$4 sm:$0xff]  }
  0x2c   : > { %1198 = vmatpush1.bf16.msra.mxu0 %v1765_v23  ;;  %v1826_v4 = vld [vmem:[%s2032_s25 + $0x180] ss:$8 sps:$4 sm:$0xff]   ;;  %v1836_v6 = vld [vmem:[%s2032_s25 + $0x374] ss:$8 sps:$4 sm:$0xff]   ;;  %v1831_v9 = vld [vmem:[%s2032_s25 + $0x270] ss:$8 sps:$4 sm:$0xff]  }
  0x2d   : > { %1239 = vmatpush1.bf16.msra.mxu1 %v1766_v24  ;;  %1199 = vmatprep.subr.bf16.mxu0 %v1767_v25  ;;  %v1834_v10 = vld [vmem:[%s2032_s25 + $0x370] ss:$8 sps:$4 sm:$0xff]   ;;  %v1839_v11 = vld [vmem:[%s2032_s25 + $0x264] ss:$8 sps:$4 sm:$0xff]   ;;  %v1837_v13 = vld [vmem:[%s2032_s25 + $0x260] ss:$8 sps:$4 sm:$0xff]  }
  0x2e   : > { %1240 = vmatprep.subr.bf16.mxu1 %v1769_v26  ;;  %v1842_v12 = vld [vmem:[%s2032_s25 + $0x364] ss:$8 sps:$4 sm:$0xff]   ;;  %v1840_v14 = vld [vmem:[%s2032_s25 + $0x360] ss:$8 sps:$4 sm:$0xff]   ;;  %v1845_v15 = vld [vmem:[%s2032_s25 + $0x254] ss:$8 sps:$4 sm:$0xff]  }
  0x2f   : > { %v1848_v16 = vld [vmem:[%s2032_s25 + $0x354] ss:$8 sps:$4 sm:$0xff]   ;;  %v1843_v17 = vld [vmem:[%s2032_s25 + $0x250] ss:$8 sps:$4 sm:$0xff]   ;;  %v1851_v19 = vld [vmem:[%s2032_s25 + $0x244] ss:$8 sps:$4 sm:$0xff]  }
  0x30   : > { %1200 = vmatpush1.bf16.msra.mxu0 %v1771_v27  ;;  %v1846_v18 = vld [vmem:[%s2032_s25 + $0x350] ss:$8 sps:$4 sm:$0xff]   ;;  %v1854_v20 = vld [vmem:[%s2032_s25 + $0x344] ss:$8 sps:$4 sm:$0xff]   ;;  %v1849_v21 = vld [vmem:[%s2032_s25 + $0x240] ss:$8 sps:$4 sm:$0xff]  }
  0x31   : > { %1241 = vmatpush1.bf16.msra.mxu1 %v1772_v28  ;;  %1201 = vmatprep.subr.bf16.mxu0 %v1773_v29  ;;  %v1852_v22 = vld [vmem:[%s2032_s25 + $0x340] ss:$8 sps:$4 sm:$0xff]   ;;  %v1857_v23 = vld [vmem:[%s2032_s25 + $0x234] ss:$8 sps:$4 sm:$0xff]   ;;  %v1855_v25 = vld [vmem:[%s2032_s25 + $0x230] ss:$8 sps:$4 sm:$0xff]  }
  0x32   : > { %1242 = vmatprep.subr.bf16.mxu1 %v1775_v30  ;;  %v1860_v24 = vld [vmem:[%s2032_s25 + $0x334] ss:$8 sps:$4 sm:$0xff]   ;;  %v1858_v26 = vld [vmem:[%s2032_s25 + $0x330] ss:$8 sps:$4 sm:$0xff]   ;;  %v1863_v27 = vld [vmem:[%s2032_s25 + $0x224] ss:$8 sps:$4 sm:$0xff]  }
  0x33   : > { %v1866_v28 = vld [vmem:[%s2032_s25 + $0x324] ss:$8 sps:$4 sm:$0xff]   ;;  %v1861_v29 = vld [vmem:[%s2032_s25 + $0x220] ss:$8 sps:$4 sm:$0xff]   ;;  %v1896_v52 = vld [vmem:[%s2032_s25 + $0x3d4] ss:$8 sps:$4 sm:$0xff]  }
  0x34   : > { %1202 = vmatpush1.bf16.msra.mxu0 %v1777_v31  ;;  %v1864_v30 = vld [vmem:[%s2032_s25 + $0x320] ss:$8 sps:$4 sm:$0xff]   ;;  %v1869_v31 = vld [vmem:[%s2032_s25 + $0x214] ss:$8 sps:$4 sm:$0xff]   ;;  %v1887_v47 = vld [vmem:[%s2032_s25 + $0x2e4] ss:$8 sps:$4 sm:$0xff]  }
  0x35   : > { %1243 = vmatpush1.bf16.msra.mxu1 %v1778_v32  ;;  %1203 = vmatprep.subr.bf16.mxu0 %v1779_v33  ;;  %v1872_v32 = vld [vmem:[%s2032_s25 + $0x314] ss:$8 sps:$4 sm:$0xff]   ;;  %v1890_v48 = vld [vmem:[%s2032_s25 + $0x3e4] ss:$8 sps:$4 sm:$0xff]   ;;  %v1885_v49 = vld [vmem:[%s2032_s25 + $0x2e0] ss:$8 sps:$4 sm:$0xff]  }
  0x36   : > { %1244 = vmatprep.subr.bf16.mxu1 %v1781_v34  ;;  %v2128_v33 = vld [vmem:[%s2027_s21 + $0x10] sm:$0xff] }
  0x37   : > { %v1867_v34 = vld [vmem:[%s2032_s25 + $0x210] ss:$8 sps:$4 sm:$0xff]  }
  0x38   : > { %1204 = vmatpush2.bf16.msra.mxu0 %v1783_v35  ;;  %v1870_v35 = vld [vmem:[%s2032_s25 + $0x310] ss:$8 sps:$4 sm:$0xff]  }
  0x39   : > { %1245 = vmatpush2.bf16.msra.mxu1 %v1784_v36  ;;  %1205 = vmatprep.subr.bf16.mxu0 %v1785_v37  ;;  %v1551_v36 = vcombine.high %v2128_v33, %v2128_v33  ;;  %v2135_v37 = vld [vmem:[%s2027_s21 + $0x18] sm:$0xff] }
  0x3a   : > { %1246 = vmatprep.subr.bf16.mxu1 %v1787_v38  ;;  %v1875_v38 = vld [vmem:[%s2032_s25 + $0x204] ss:$8 sps:$4 sm:$0xff]  }
  0x3c   : > { %1206 = vmatpush2.bf16.msra.mxu0 %v1789_v39  ;;  %v1553_v39 = vcombine.high %v2135_v37, %v2135_v37 }
  0x3d   : > { %1247 = vmatpush2.bf16.msra.mxu1 %v1790_v40  ;;  %1207 = vmatprep.subr.bf16.mxu0 %v1791_v41  ;;  %v1878_v40 = vld [vmem:[%s2032_s25 + $0x304] ss:$8 sps:$4 sm:$0xff]   ;;  %v1873_v41 = vld [vmem:[%s2032_s25 + $0x200] ss:$8 sps:$4 sm:$0xff]  }
  0x3e   : > { %1248 = vmatprep.subr.bf16.mxu1 %v1793_v42  ;;  %v1876_v42 = vld [vmem:[%s2032_s25 + $0x300] ss:$8 sps:$4 sm:$0xff]  }
  0x40   : > { %1208 = vmatpush2.bf16.msra.mxu0 %v1795_v43  ;;  %v1881_v43 = vld [vmem:[%s2032_s25 + $0x2f4] ss:$8 sps:$4 sm:$0xff]  }
  0x41   : > { %1249 = vmatpush2.bf16.msra.mxu1 %v1796_v44  ;;  %1209 = vmatprep.subr.bf16.mxu0 %v1797_v45  ;;  %v1884_v44 = vld [vmem:[%s2032_s25 + $0x3f4] ss:$8 sps:$4 sm:$0xff]   ;;  %v1879_v45 = vld [vmem:[%s2032_s25 + $0x2f0] ss:$8 sps:$4 sm:$0xff]  }
  0x42   : > { %1250 = vmatprep.subr.bf16.mxu1 %v1799_v46  ;;  %v1882_v46 = vld [vmem:[%s2032_s25 + $0x3f0] ss:$8 sps:$4 sm:$0xff]  }
  0x44   : > { %1210 = vmatpush2.bf16.msra.mxu0 %v1801_v50  ;;  %v1888_v50 = vld [vmem:[%s2032_s25 + $0x3e0] ss:$8 sps:$4 sm:$0xff]  }
  0x45   : > { %1251 = vmatpush2.bf16.msra.mxu1 %v1802_v51  ;;  %1211 = vmatprep.subr.bf16.mxu0 %v1803_v53  ;;  %v1893_v51 = vld [vmem:[%s2032_s25 + $0x2d4] ss:$8 sps:$4 sm:$0xff]   ;;  %v1891_v53 = vld [vmem:[%s2032_s25 + $0x2d0] ss:$8 sps:$4 sm:$0xff]  }
  0x46   : > { %1252 = vmatprep.subr.bf16.mxu1 %v1805_v54  ;;  %v1894_v54 = vld [vmem:[%s2032_s25 + $0x3d0] ss:$8 sps:$4 sm:$0xff]  }
  0x48   : > { %1212 = vmatpush2.bf16.msra.mxu0 %v1807_v55  ;;  %v1899_v55 = vld [vmem:[%s2032_s25 + $0x2c4] ss:$8 sps:$4 sm:$0xff]  }
  0x49   : > { %1253 = vmatpush2.bf16.msra.mxu1 %v1808_v56  ;;  %1213 = vmatprep.subr.bf16.mxu0 %v1809_v57  ;;  %v1902_v56 = vld [vmem:[%s2032_s25 + $0x3c4] ss:$8 sps:$4 sm:$0xff]   ;;  %v1897_v57 = vld [vmem:[%s2032_s25 + $0x2c0] ss:$8 sps:$4 sm:$0xff]  }
  0x4a   : > { %1254 = vmatprep.subr.bf16.mxu1 %v1811_v58  ;;  %v1900_v58 = vld [vmem:[%s2032_s25 + $0x3c0] ss:$8 sps:$4 sm:$0xff]  }
  0x4c   : > { %1214 = vmatpush2.bf16.msra.mxu0 %v1813_v59  ;;  %v1905_v59 = vld [vmem:[%s2032_s25 + $0x2b4] ss:$8 sps:$4 sm:$0xff]  }
  0x4d   : > { %1255 = vmatpush2.bf16.msra.mxu1 %v1814_v60  ;;  %1215 = vmatprep.subr.bf16.mxu0 %v1815_v61  ;;  %v1908_v60 = vld [vmem:[%s2032_s25 + $0x3b4] ss:$8 sps:$4 sm:$0xff]   ;;  %v1903_v61 = vld [vmem:[%s2032_s25 + $0x2b0] ss:$8 sps:$4 sm:$0xff]  }
  0x4e   : > { %1256 = vmatprep.subr.bf16.mxu1 %v1817_v62  ;;  %v1906_v62 = vld [vmem:[%s2032_s25 + $0x3b0] ss:$8 sps:$4 sm:$0xff]  }
  0x50   : > { %1216 = vmatpush2.bf16.msra.mxu0 %v1819_v63  ;;  %v1911_v63 = vld [vmem:[%s2032_s25 + $0x2a4] ss:$8 sps:$4 sm:$0xff]  }
  0x51   : > { %1257 = vmatpush2.bf16.msra.mxu1 %v1820_v0  ;;  %1217 = vmatprep.subr.bf16.mxu0 %v1821_v1  ;;  %v1914_v0 = vld [vmem:[%s2032_s25 + $0x3a4] ss:$8 sps:$4 sm:$0xff]   ;;  %v1909_v1 = vld [vmem:[%s2032_s25 + $0x2a0] ss:$8 sps:$4 sm:$0xff]  }
  0x52   : > { %1258 = vmatprep.subr.bf16.mxu1 %v1823_v2  ;;  %v1912_v2 = vld [vmem:[%s2032_s25 + $0x3a0] ss:$8 sps:$4 sm:$0xff]  }
  0x54   : > { %1218 = vmatpush2.bf16.msra.mxu0 %v1825_v3  ;;  %v1917_v3 = vld [vmem:[%s2032_s25 + $0x294] ss:$8 sps:$4 sm:$0xff]  }
  0x55   : > { %1259 = vmatpush2.bf16.msra.mxu1 %v1826_v4  ;;  %1269 = vmatprep.subr.bf16.mxu0 %v1833_v5  ;;  %v1920_v4 = vld [vmem:[%s2032_s25 + $0x394] ss:$8 sps:$4 sm:$0xff]   ;;  %v1915_v5 = vld [vmem:[%s2032_s25 + $0x290] ss:$8 sps:$4 sm:$0xff]  }
  0x56   : > { %1310 = vmatprep.subr.bf16.mxu1 %v1836_v6  ;;  %v1918_v6 = vld [vmem:[%s2032_s25 + $0x390] ss:$8 sps:$4 sm:$0xff]  }
  0x57   : > { %1220 = vmatmul.mubr.bf16.vlgmr.msra.gmra.mxu0 %v1546_v7  ;;  %v1923_v7 = vld [vmem:[%s2032_s25 + $0x284] ss:$8 sps:$4 sm:$0xff]  }
  0x58   : > { %1261 = vmatmul.mubr.bf16.vlgmr.msra.gmra.mxu1 %v1548_v8  ;;  %1270 = vmatpush1.bf16.msra.mxu0 %v1831_v9  ;;  %v1926_v8 = vld [vmem:[%s2032_s25 + $0x384] ss:$8 sps:$4 sm:$0xff]   ;;  %v1921_v9 = vld [vmem:[%s2032_s25 + $0x280] ss:$8 sps:$4 sm:$0xff]  }
  0x59   : > { %1311 = vmatpush1.bf16.msra.mxu1 %v1834_v10  ;;  %1271 = vmatprep.subr.bf16.mxu0 %v1839_v11  ;;  %v1924_v10 = vld [vmem:[%s2032_s25 + $0x380] ss:$8 sps:$4 sm:$0xff]   ;;  %v1931_v11 = vld [vmem:[%s2032_s25 + $0x474] ss:$8 sps:$4 sm:$0xff]  }
  0x5a   : > { %1312 = vmatprep.subr.bf16.mxu1 %v1842_v12  ;;  %1301 = vmatprep.mubr.bf16.mxu0 %v1551_v36  ;;  %v1550_v12 = vcombine.low %v2128_v33, %v2128_v33 }
  0x5b   : > { %1342 = vmatprep.mubr.bf16.mxu1 %v1553_v39 }
  0x5c   : > { %1272 = vmatpush1.bf16.msra.mxu0 %v1837_v13  ;;  %v1552_v13 = vcombine.low %v2135_v37, %v2135_v37 }
  0x5d   : > { %1313 = vmatpush1.bf16.msra.mxu1 %v1840_v14  ;;  %1273 = vmatprep.subr.bf16.mxu0 %v1845_v15  ;;  %v1929_v14 = vld [vmem:[%s2032_s25 + $0x470] ss:$8 sps:$4 sm:$0xff]   ;;  %v1936_v15 = vld [vmem:[%s2032_s25 + $0x464] ss:$8 sps:$4 sm:$0xff]  }
  0x5e   : > { %1314 = vmatprep.subr.bf16.mxu1 %v1848_v16  ;;  %v1934_v16 = vld [vmem:[%s2032_s25 + $0x460] ss:$8 sps:$4 sm:$0xff]  }
  0x60   : > { %1274 = vmatpush1.bf16.msra.mxu0 %v1843_v17  ;;  %v1981_v17 = vmov 0  }
  0x61   : > { %1315 = vmatpush1.bf16.msra.mxu1 %v1846_v18  ;;  %1275 = vmatprep.subr.bf16.mxu0 %v1851_v19  ;;  %v1939_v18 = vld [vmem:[%s2032_s25 + $0x454] ss:$8 sps:$4 sm:$0xff]   ;;  %v1937_v19 = vld [vmem:[%s2032_s25 + $0x450] ss:$8 sps:$4 sm:$0xff]  }
  0x62   : > { %1316 = vmatprep.subr.bf16.mxu1 %v1854_v20  ;;  %v1942_v20 = vld [vmem:[%s2032_s25 + $0x444] ss:$8 sps:$4 sm:$0xff]  }
  0x64   : > { %1276 = vmatpush1.bf16.msra.mxu0 %v1849_v21  ;;  %v1940_v21 = vld [vmem:[%s2032_s25 + $0x440] ss:$8 sps:$4 sm:$0xff]  }
  0x65   : > { %1317 = vmatpush1.bf16.msra.mxu1 %v1852_v22  ;;  %1277 = vmatprep.subr.bf16.mxu0 %v1857_v23  ;;  %v1945_v22 = vld [vmem:[%s2032_s25 + $0x434] ss:$8 sps:$4 sm:$0xff]   ;;  %v1943_v23 = vld [vmem:[%s2032_s25 + $0x430] ss:$8 sps:$4 sm:$0xff]  }
  0x66   : > { %1318 = vmatprep.subr.bf16.mxu1 %v1860_v24  ;;  %v1948_v24 = vld [vmem:[%s2032_s25 + $0x424] ss:$8 sps:$4 sm:$0xff]  }
  0x68   : > { %1278 = vmatpush1.bf16.msra.mxu0 %v1855_v25  ;;  %v1946_v25 = vld [vmem:[%s2032_s25 + $0x420] ss:$8 sps:$4 sm:$0xff]  }
  0x69   : > { %1319 = vmatpush1.bf16.msra.mxu1 %v1858_v26  ;;  %1279 = vmatprep.subr.bf16.mxu0 %v1863_v27  ;;  %v1951_v26 = vld [vmem:[%s2032_s25 + $0x414] ss:$8 sps:$4 sm:$0xff]   ;;  %v1949_v27 = vld [vmem:[%s2032_s25 + $0x410] ss:$8 sps:$4 sm:$0xff]  }
  0x6a   : > { %1320 = vmatprep.subr.bf16.mxu1 %v1866_v28  ;;  %v1954_v28 = vld [vmem:[%s2032_s25 + $0x404] ss:$8 sps:$4 sm:$0xff]  }
  0x6c   : > { %1280 = vmatpush1.bf16.msra.mxu0 %v1861_v29  ;;  %v1952_v29 = vld [vmem:[%s2032_s25 + $0x400] ss:$8 sps:$4 sm:$0xff]  }
  0x6d   : > { %1321 = vmatpush1.bf16.msra.mxu1 %v1864_v30  ;;  %1281 = vmatprep.subr.bf16.mxu0 %v1869_v31  ;;  %v1955_v30 = vld [vmem:[%s2027_s21 + $0x20] ss:$0 sps:$4 sm:$0xff]  }
  0x6e   : > { %1322 = vmatprep.subr.bf16.mxu1 %v1872_v32 }
  0x70   : > { %1282 = vmatpush1.bf16.msra.mxu0 %v1867_v34 }
  0x71   : > { %1323 = vmatpush1.bf16.msra.mxu1 %v1870_v35  ;;  %1283 = vmatprep.subr.bf16.mxu0 %v1875_v38 }
  0x72   : > { %1324 = vmatprep.subr.bf16.mxu1 %v1878_v40 }
  0x74   : > { %1284 = vmatpush1.bf16.msra.mxu0 %v1873_v41 }
  0x75   : > { %1325 = vmatpush1.bf16.msra.mxu1 %v1876_v42  ;;  %1285 = vmatprep.subr.bf16.mxu0 %v1881_v43 }
  0x76   : > { %1326 = vmatprep.subr.bf16.mxu1 %v1884_v44 }
  0x78   : > { %1286 = vmatpush2.bf16.msra.mxu0 %v1879_v45 }
  0x79   : > { %1327 = vmatpush2.bf16.msra.mxu1 %v1882_v46  ;;  %1287 = vmatprep.subr.bf16.mxu0 %v1887_v47 }
  0x7a   : > { %1328 = vmatprep.subr.bf16.mxu1 %v1890_v48 }
  0x7c   : > { %1288 = vmatpush2.bf16.msra.mxu0 %v1885_v49 }
  0x7d   : > { %1329 = vmatpush2.bf16.msra.mxu1 %v1888_v50  ;;  %1289 = vmatprep.subr.bf16.mxu0 %v1893_v51 }
  0x7e   : > { %1330 = vmatprep.subr.bf16.mxu1 %v1896_v52  ;;  %v284_v52 = vld [vmem:[#allocation2] sm:$0xff] }
  0x80   : > { %1290 = vmatpush2.bf16.msra.mxu0 %v1891_v53 }
  0x81   : > { %1331 = vmatpush2.bf16.msra.mxu1 %v1894_v54  ;;  %1291 = vmatprep.subr.bf16.mxu0 %v1899_v55 }
  0x82   : > { %1332 = vmatprep.subr.bf16.mxu1 %v1902_v56  ;;  %v285_v56 = vld [vmem:[#allocation2 + $0x8] sm:$0xff] }
  0x84   : > { %1292 = vmatpush2.bf16.msra.mxu0 %v1897_v57 }
  0x85   : > { %1333 = vmatpush2.bf16.msra.mxu1 %v1900_v58  ;;  %1293 = vmatprep.subr.bf16.mxu0 %v1905_v59 }
  0x86   : > { %1334 = vmatprep.subr.bf16.mxu1 %v1908_v60 }
  0x88   : > { %1294 = vmatpush2.bf16.msra.mxu0 %v1903_v61 }
  0x89   : > { %1335 = vmatpush2.bf16.msra.mxu1 %v1906_v62  ;;  %1295 = vmatprep.subr.bf16.mxu0 %v1911_v63 }
  0x8a   : > { %1336 = vmatprep.subr.bf16.mxu1 %v1914_v0 }
  0x8c   : > { %1296 = vmatpush2.bf16.msra.mxu0 %v1909_v1 }
  0x8d   : > { %1337 = vmatpush2.bf16.msra.mxu1 %v1912_v2  ;;  %1297 = vmatprep.subr.bf16.mxu0 %v1917_v3 }
  0x8e   : > { %1338 = vmatprep.subr.bf16.mxu1 %v1920_v4 }
  0x90   : > { %1298 = vmatpush2.bf16.msra.mxu0 %v1915_v5 }
  0x91   : > { %1339 = vmatpush2.bf16.msra.mxu1 %v1918_v6  ;;  %1299 = vmatprep.subr.bf16.mxu0 %v1923_v7 }
  0x92   : > { %1340 = vmatprep.subr.bf16.mxu1 %v1926_v8 }
  0x94   : > { %1300 = vmatpush2.bf16.msra.mxu0 %v1921_v9 }
  0x95   : > { %1341 = vmatpush2.bf16.msra.mxu1 %v1924_v10  ;;  %1351 = vmatprep.subr.bf16.mxu0 %v1931_v11 }
  0x97   : > { %1302 = vmatmul.mubr.bf16.vlgmr.msra.gmra.mxu0 %v1550_v12 }
  0x98   : > { %1343 = vmatmul.mubr.bf16.vlgmr.msra.gmra.mxu1 %v1552_v13  ;;  %1352 = vmatpush1.bf16.msra.mxu0 %v1929_v14 }
  0x99   : > { %1383 = vmatprep.mubr.bf16.mxu0 %v1981_v17  ;;  %1353 = vmatprep.subr.bf16.mxu0 %v1936_v15 }
  0x9c   : > { %1354 = vmatpush1.bf16.msra.mxu0 %v1934_v16 }
  0x9d   : > { %1355 = vmatprep.subr.bf16.mxu0 %v1939_v18 }
  0xa0   : > { %1356 = vmatpush1.bf16.msra.mxu0 %v1937_v19 }
  0xa1   : > { %1357 = vmatprep.subr.bf16.mxu0 %v1942_v20 }
  0xa4   : > { %1358 = vmatpush1.bf16.msra.mxu0 %v1940_v21 }
  0xa5   : > { %1359 = vmatprep.subr.bf16.mxu0 %v1945_v22 }
  0xa8   : > { %1360 = vmatpush1.bf16.msra.mxu0 %v1943_v23 }
  0xa9   : > { %1361 = vmatprep.subr.bf16.mxu0 %v1948_v24 }
  0xac   : > { %1362 = vmatpush1.bf16.msra.mxu0 %v1946_v25 }
  0xad   : > { %1363 = vmatprep.subr.bf16.mxu0 %v1951_v26 }
  0xb0   : > { %1364 = vmatpush1.bf16.msra.mxu0 %v1949_v27 }
  0xb1   : > { %1365 = vmatprep.subr.bf16.mxu0 %v1954_v28 }
  0xb4   : > { %1366 = vmatpush1.bf16.msra.mxu0 %v1952_v29 }
  0xb7   : > { %1384 = vmatmul.mubr.bf16.vlgmr.msra.gmra.mxu0 %v1955_v30 }
 0x117   : > { %v1221_v31 = vpop.f32.mrf.mxu0 }
 0x118   : > { %v1262_v32 = vpop.f32.mrf.mxu1 }
 0x119   : > { %v1263_v33 = vadd.f32 %v1262_v32, %v1221_v31  ;;  %v1223_v34 = vpop.f32.mrf.mxu0 }
 0x11a   : > { %v1264_v35 = vpop.f32.mrf.mxu1 }
 0x11b   : > { %v1265_v36 = vadd.f32 %v1264_v35, %v1223_v34  ;;  %v1225_v37 = vpop.f32.mrf.mxu0 }
 0x11c   : > { %v1266_v38 = vpop.f32.mrf.mxu1 }
 0x11d   : > { %v1226_v39 = vpop.f32.mrf.mxu0 }
 0x11e   : > { %v1267_v40 = vpop.f32.mrf.mxu1 }
 0x157   : > { %v1303_v41 = vpop.f32.mrf.mxu0 }
 0x158   : > { %v1344_v42 = vpop.f32.mrf.mxu1  ;;  %v1304_v49 = vadd.f32 %v1303_v41, %v1263_v33 }
 0x159   : > { %v1305_v43 = vpop.f32.mrf.mxu0 }
 0x15a   : > { %v1346_v44 = vpop.f32.mrf.mxu1  ;;  %v1306_v50 = vadd.f32 %v1305_v43, %v1265_v36  ;;  %v1345_v51 = vadd.f32 %v1344_v42, %v1304_v49 }
 0x15b   : > { %v1307_v45 = vpop.f32.mrf.mxu0 }
 0x15c   : > { %v1348_v46 = vpop.f32.mrf.mxu1  ;;  %v1347_v54 = vadd.f32 %v1346_v44, %v1306_v50 }
 0x15d   : > { %v1308_v47 = vpop.f32.mrf.mxu0 }
 0x15e   : > { %v1349_v48 = vpop.f32.mrf.mxu1 }
 0x177   : > { %v1385_v53 = vpop.f32.mrf.mxu0 }
 0x178   : > { %v1386_v55 = vadd.f32 %v1385_v53, %v1345_v51 }
 0x179   : > { %v1387_v57 = vpop.f32.mrf.mxu0 }
 0x17a   : > { %v1392_v58 = vadd.f32 %v1386_v55, %v284_v52  ;;  %v1388_v59 = vadd.f32 %v1387_v57, %v1347_v54  ;;  %1399 = sbr.rel (%p1699_p7) target bundleno = 396 (0x18c), region = 40 }
 0x17b   : > { %v1389_v60 = vpop.f32.mrf.mxu0 }
 0x17c   : > { %1394 = vst [vmem:[#allocation2] sm:$0xff] %v1392_v58  ;;  %v1393_v61 = vadd.f32 %v1388_v59, %v285_v56 }
 0x17d   : > { %v1390_v62 = vpop.f32.mrf.mxu0 }
 0x17e   : > { %1395 = vst [vmem:[#allocation2 + $0x8] sm:$0xff] %v1393_v61 }
 0x17f   : > { %v1404_v63 = vlaneseq  ;;  %v1402_v1 = vld [vmem:[%s2217_s2] sm:$0x3] }
 0x181   : > { %v1405_v0 = vshrl.u32 %v1404_v63, 7 }
 0x183   : > { %v1406_v2 = vsub.s32 0, %v1405_v0  ;;  %v1410_v3 = vsub.s32 1, %v1405_v0  ;;  %v1400_v4 = vld [vmem:[#allocation2] sm:$0xff] }
 0x185   : > { %v1401_v5 = vld [vmem:[#allocation2 + $0x8] sm:$0xff]  ;;  %v1407_v6 = vrot.slane %v1402_v1, %v1406_v2  ;;  %v1411_v7 = vrot.slane %v1402_v1, %v1410_v3 }
 0x187   : > { %v1414_v8 = vadd.f32 %v1407_v6, %v1400_v4  ;;  %v1415_v9 = vadd.f32 %v1411_v7, %v1401_v5 }
 0x189   : > { %v1416_v10 = vmax.f32 %v1414_v8, 0.0  ;;  %v1417_v11 = vmax.f32 %v1415_v9, 0.0 }
 0x18b   : > { %1418 = vst [vmem:[%s2218_s3] sm:$0xff] %v1416_v10  ;;  %1419 = vst [vmem:[%s2218_s3 + $0x8] sm:$0xff] %v1417_v11 }
 0x18c PF: > { %s13_s14 = sadd.s32 1, %s1978_s14   ;;  %s2219_s12 = smov %s1974_s13 }
 0x18d   : > { %p10_p8 = scmp.ge.s32.totalorder %s13_s14, 4   ;;  %s2220_s13 = smov %s2222_s15 }
 0x18f   :  { %12 = sbr.rel (!%p10_p8) target bundleno = 2 (0x2), region = 76 }

// kernel: resnet34_forward.69
= control target key start
LH: loop header
LB: loop body
LE: loop exit
PB: predicated region body
PF: predicated region fallthrough
CT: control target
= control target key end

     0   :  { %s2700_s12 = smov 0   ;;  %s2702_s13 = smov 0   ;;  %s3271_s0 = inlined_call_operand.vmem [shape: bf16[2,2304], index: 0, kind: input, shape index: {}]   ;;  %s3272_s1 = inlined_call_operand.vmem [shape: bf16[2304,512], index: 1, kind: input, shape index: {}]   ;;  %s3273_s2 = inlined_call_operand.vmem [shape: f32[1,512], index: 2, kind: input, shape index: {}]   ;;  %s3274_s3 = inlined_call_operand.vmem [shape: f32[2,512], index: 3, kind: output, shape index: {}]  }
   0x1   :  { %s2704_s14 = smov 0   ;;  %s2706_s15 = smov 0  }
   0x2   :  { %s2708_s16 = smov 0   ;;  %s2710_s17 = smov 0  }
   0x3   :  { %s2712_s18 = smov 0  }
   0x4 LB: > { %s25_s19 = sadd.s32 1, %s2666_s16  ;;  %s28_s20 = sadd.s32 1, %s2670_s17  ;;  %s2674_s18 = sphi %s2712_s18, %s13_s18   ;;  %s2670_s17 = sphi %s2710_s17, %s3280_s17   ;;  %s2666_s16 = sphi %s2708_s16, %s3279_s16   ;;  %s2662_s15 = sphi %s2706_s15, %s3278_s15   ;;  %s2658_s14 = sphi %s2704_s14, %s3277_s14   ;;  %s2654_s13 = sphi %s2702_s13, %s3276_s13   ;;  %s2650_s12 = sphi %s2700_s12, %s3275_s12  }
   0x5   : > { %p26_p0 = scmp.ge.s32.totalorder %s25_s19, 2  ;;  %p76_p1 = scmp.ne.s32.totalorder %s2654_s13, %s2650_s12 }
   0x6   : > { %p77_p2 = scmp.eq.s32.totalorder %s2674_s18, 0  ;;  %s69_s24 = sadd.s32 1, %s2654_s13 }
   0x7   : > { %s3282_s19 = smov (%p26_p0, %s25_s19), 0  ;;  %s3284_s20 = smov (!%p26_p0, %s28_s20), %s2670_s17 }
   0x8   : > { %p78_p3 = por %p77_p2, %p76_p1  ;;  %p30_p4 = scmp.ge.s32.totalorder %s3284_s20, 2 }
   0x9   : > { %s64_s21 = ssub.s32 %s2666_s16, %s3282_s19  ;;  %p2183_p6 = scmp.ge.s32.totalorder %s2674_s18, 4 }
   0xa   : > { %s3286_s20 = smov (%p30_p4, %s3284_s20), 0 }
   0xb   : > { %s65_s22 = ssub.s32 %s2670_s17, %s3286_s20  ;;  %156 = sbr.rel (%p2183_p6) target bundleno = 96 (0x60), region = 16 }
   0xc   : > { %s66_s23 = sor.u32 %s65_s22, %s64_s21 }
   0xd   : > { %p67_p5 = scmp.eq.s32.totalorder %s66_s23, 0 }
   0xf   : > { %s2751_s25 = scalar_select %p67_p5, %s2654_s13, %s69_s24  }
  0x10   : > { %171 = sbr.rel (!%p78_p3) target bundleno = 96 (0x60), region = 24  ;;  %s173_s26 = sand.u32 (%p78_p3), 1, %s2654_s13  }
  0x11   : > { %s2341_s27 = smul.u32 (%p78_p3), 1152, %s173_s26  ;;  %s2184_s28 = sshll.u32 (%p78_p3), %s2670_s17, 1 }
  0x12   : > { %s2340_s29 = smul.u32 (%p78_p3), 576, %s2666_s16 }
  0x13   : > { %s2765_s8 = scalar_lea.vmem (%p78_p3), [#allocation3], %s2341_s27 }
  0x14   : > { %s179_s30 = sadd.s32 (%p78_p3), %s2340_s29, %s2184_s28 }
  0x15   : > { %s2186_s4 = sshll.u32 %s179_s30, 2 }
  0x16   : > { %s2760_s7 = scalar_lea.vmem %s3272_s1, %s2186_s4 }
  0x17   : > { %v496_v0 = vld [vmem:[%s2760_s7] sm:$0xff]  ;;  %v498_v1 = vld [vmem:[%s2760_s7 + $0x10] sm:$0xff] }
  0x18   : > { %v500_v2 = vld [vmem:[%s2760_s7 + $0x20] sm:$0xff]  ;;  %497 = vst [vmem:[%s2765_s8] sm:$0xff] %v496_v0  ;;  %499 = vst [vmem:[%s2765_s8 + $0x8] sm:$0xff] %v498_v1  ;;  %v502_v3 = vld [vmem:[%s2760_s7 + $0x30] sm:$0xff] }
  0x19   : > { %501 = vst [vmem:[%s2765_s8 + $0x10] sm:$0xff] %v500_v2  ;;  %v504_v4 = vld [vmem:[%s2760_s7 + $0x40] sm:$0xff]  ;;  %v506_v5 = vld [vmem:[%s2760_s7 + $0x50] sm:$0xff]  ;;  %503 = vst [vmem:[%s2765_s8 + $0x18] sm:$0xff] %v502_v3 }
  0x1a   : > { %505 = vst [vmem:[%s2765_s8 + $0x20] sm:$0xff] %v504_v4  ;;  %507 = vst [vmem:[%s2765_s8 + $0x28] sm:$0xff] %v506_v5  ;;  %v508_v6 = vld [vmem:[%s2760_s7 + $0x60] sm:$0xff]  ;;  %v510_v7 = vld [vmem:[%s2760_s7 + $0x70] sm:$0xff] }
  0x1b   : > { %v512_v8 = vld [vmem:[%s2760_s7 + $0x80] sm:$0xff]  ;;  %509 = vst [vmem:[%s2765_s8 + $0x30] sm:$0xff] %v508_v6  ;;  %511 = vst [vmem:[%s2765_s8 + $0x38] sm:$0xff] %v510_v7  ;;  %v514_v9 = vld [vmem:[%s2760_s7 + $0x90] sm:$0xff] }
  0x1c   : > { %513 = vst [vmem:[%s2765_s8 + $0x40] sm:$0xff] %v512_v8  ;;  %v516_v10 = vld [vmem:[%s2760_s7 + $0xa0] sm:$0xff]  ;;  %v518_v11 = vld [vmem:[%s2760_s7 + $0xb0] sm:$0xff]  ;;  %515 = vst [vmem:[%s2765_s8 + $0x48] sm:$0xff] %v514_v9 }
  0x1d   : > { %517 = vst [vmem:[%s2765_s8 + $0x50] sm:$0xff] %v516_v10  ;;  %519 = vst [vmem:[%s2765_s8 + $0x58] sm:$0xff] %v518_v11  ;;  %v520_v12 = vld [vmem:[%s2760_s7 + $0xc0] sm:$0xff]  ;;  %v522_v13 = vld [vmem:[%s2760_s7 + $0xd0] sm:$0xff] }
  0x1e   : > { %v524_v14 = vld [vmem:[%s2760_s7 + $0xe0] sm:$0xff]  ;;  %521 = vst [vmem:[%s2765_s8 + $0x60] sm:$0xff] %v520_v12  ;;  %523 = vst [vmem:[%s2765_s8 + $0x68] sm:$0xff] %v522_v13  ;;  %v526_v15 = vld [vmem:[%s2760_s7 + $0xf0] sm:$0xff] }
  0x1f   : > { %525 = vst [vmem:[%s2765_s8 + $0x70] sm:$0xff] %v524_v14  ;;  %v528_v16 = vld [vmem:[%s2760_s7 + $0x100] sm:$0xff]  ;;  %v530_v17 = vld [vmem:[%s2760_s7 + $0x110] sm:$0xff]  ;;  %527 = vst [vmem:[%s2765_s8 + $0x78] sm:$0xff] %v526_v15 }
  0x20   : > { %529 = vst [vmem:[%s2765_s8 + $0x80] sm:$0xff] %v528_v16  ;;  %531 = vst [vmem:[%s2765_s8 + $0x88] sm:$0xff] %v530_v17  ;;  %v532_v18 = vld [vmem:[%s2760_s7 + $0x120] sm:$0xff]  ;;  %v534_v19 = vld [vmem:[%s2760_s7 + $0x130] sm:$0xff] }
  0x21   : > { %v536_v20 = vld [vmem:[%s2760_s7 + $0x140] sm:$0xff]  ;;  %533 = vst [vmem:[%s2765_s8 + $0x90] sm:$0xff] %v532_v18  ;;  %535 = vst [vmem:[%s2765_s8 + $0x98] sm:$0xff] %v534_v19  ;;  %v538_v21 = vld [vmem:[%s2760_s7 + $0x150] sm:$0xff] }
  0x22   : > { %537 = vst [vmem:[%s2765_s8 + $0xa0] sm:$0xff] %v536_v20  ;;  %v540_v22 = vld [vmem:[%s2760_s7 + $0x160] sm:$0xff]  ;;  %v542_v23 = vld [vmem:[%s2760_s7 + $0x170] sm:$0xff]  ;;  %539 = vst [vmem:[%s2765_s8 + $0xa8] sm:$0xff] %v538_v21 }
  0x23   : > { %541 = vst [vmem:[%s2765_s8 + $0xb0] sm:$0xff] %v540_v22  ;;  %543 = vst [vmem:[%s2765_s8 + $0xb8] sm:$0xff] %v542_v23  ;;  %v544_v24 = vld [vmem:[%s2760_s7 + $0x180] sm:$0xff]  ;;  %v546_v25 = vld [vmem:[%s2760_s7 + $0x190] sm:$0xff] }
  0x24   : > { %v548_v26 = vld [vmem:[%s2760_s7 + $0x1a0] sm:$0xff]  ;;  %545 = vst [vmem:[%s2765_s8 + $0xc0] sm:$0xff] %v544_v24  ;;  %547 = vst [vmem:[%s2765_s8 + $0xc8] sm:$0xff] %v546_v25  ;;  %v550_v27 = vld [vmem:[%s2760_s7 + $0x1b0] sm:$0xff] }
  0x25   : > { %549 = vst [vmem:[%s2765_s8 + $0xd0] sm:$0xff] %v548_v26  ;;  %v552_v28 = vld [vmem:[%s2760_s7 + $0x1c0] sm:$0xff]  ;;  %v554_v29 = vld [vmem:[%s2760_s7 + $0x1d0] sm:$0xff]  ;;  %551 = vst [vmem:[%s2765_s8 + $0xd8] sm:$0xff] %v550_v27 }
  0x26   : > { %553 = vst [vmem:[%s2765_s8 + $0xe0] sm:$0xff] %v552_v28  ;;  %555 = vst [vmem:[%s2765_s8 + $0xe8] sm:$0xff] %v554_v29  ;;  %v556_v30 = vld [vmem:[%s2760_s7 + $0x1e0] sm:$0xff]  ;;  %v558_v31 = vld [vmem:[%s2760_s7 + $0x1f0] sm:$0xff] }
  0x27   : > { %v560_v32 = vld [vmem:[%s2760_s7 + $0x200] sm:$0xff]  ;;  %557 = vst [vmem:[%s2765_s8 + $0xf0] sm:$0xff] %v556_v30  ;;  %559 = vst [vmem:[%s2765_s8 + $0xf8] sm:$0xff] %v558_v31  ;;  %v562_v33 = vld [vmem:[%s2760_s7 + $0x210] sm:$0xff] }
  0x28   : > { %561 = vst [vmem:[%s2765_s8 + $0x100] sm:$0xff] %v560_v32  ;;  %v564_v34 = vld [vmem:[%s2760_s7 + $0x220] sm:$0xff]  ;;  %v566_v35 = vld [vmem:[%s2760_s7 + $0x230] sm:$0xff]  ;;  %563 = vst [vmem:[%s2765_s8 + $0x108] sm:$0xff] %v562_v33 }
  0x29   : > { %565 = vst [vmem:[%s2765_s8 + $0x110] sm:$0xff] %v564_v34  ;;  %567 = vst [vmem:[%s2765_s8 + $0x118] sm:$0xff] %v566_v35  ;;  %v568_v36 = vld [vmem:[%s2760_s7 + $0x240] sm:$0xff]  ;;  %v570_v37 = vld [vmem:[%s2760_s7 + $0x250] sm:$0xff] }
  0x2a   : > { %v572_v38 = vld [vmem:[%s2760_s7 + $0x260] sm:$0xff]  ;;  %569 = vst [vmem:[%s2765_s8 + $0x120] sm:$0xff] %v568_v36  ;;  %571 = vst [vmem:[%s2765_s8 + $0x128] sm:$0xff] %v570_v37  ;;  %v574_v39 = vld [vmem:[%s2760_s7 + $0x270] sm:$0xff] }
  0x2b   : > { %573 = vst [vmem:[%s2765_s8 + $0x130] sm:$0xff] %v572_v38  ;;  %v576_v40 = vld [vmem:[%s2760_s7 + $0x280] sm:$0xff]  ;;  %v578_v41 = vld [vmem:[%s2760_s7 + $0x290] sm:$0xff]  ;;  %575 = vst [vmem:[%s2765_s8 + $0x138] sm:$0xff] %v574_v39 }
  0x2c   : > { %577 = vst [vmem:[%s2765_s8 + $0x140] sm:$0xff] %v576_v40  ;;  %579 = vst [vmem:[%s2765_s8 + $0x148] sm:$0xff] %v578_v41  ;;  %v580_v42 = vld [vmem:[%s2760_s7 + $0x2a0] sm:$0xff]  ;;  %v582_v43 = vld [vmem:[%s2760_s7 + $0x2b0] sm:$0xff] }
  0x2d   : > { %v584_v44 = vld [vmem:[%s2760_s7 + $0x2c0] sm:$0xff]  ;;  %581 = vst [vmem:[%s2765_s8 + $0x150] sm:$0xff] %v580_v42  ;;  %583 = vst [vmem:[%s2765_s8 + $0x158] sm:$0xff] %v582_v43  ;;  %v586_v45 = vld [vmem:[%s2760_s7 + $0x2d0] sm:$0xff] }
  0x2e   : > { %585 = vst [vmem:[%s2765_s8 + $0x160] sm:$0xff] %v584_v44  ;;  %v588_v46 = vld [vmem:[%s2760_s7 + $0x2e0] sm:$0xff]  ;;  %v590_v47 = vld [vmem:[%s2760_s7 + $0x2f0] sm:$0xff]  ;;  %587 = vst [vmem:[%s2765_s8 + $0x168] sm:$0xff] %v586_v45 }
  0x2f   : > { %589 = vst [vmem:[%s2765_s8 + $0x170] sm:$0xff] %v588_v46  ;;  %591 = vst [vmem:[%s2765_s8 + $0x178] sm:$0xff] %v590_v47  ;;  %v592_v48 = vld [vmem:[%s2760_s7 + $0x300] sm:$0xff]  ;;  %v594_v49 = vld [vmem:[%s2760_s7 + $0x310] sm:$0xff] }
  0x30   : > { %v596_v50 = vld [vmem:[%s2760_s7 + $0x320] sm:$0xff]  ;;  %593 = vst [vmem:[%s2765_s8 + $0x180] sm:$0xff] %v592_v48  ;;  %595 = vst [vmem:[%s2765_s8 + $0x188] sm:$0xff] %v594_v49  ;;  %v598_v51 = vld [vmem:[%s2760_s7 + $0x330] sm:$0xff] }
  0x31   : > { %597 = vst [vmem:[%s2765_s8 + $0x190] sm:$0xff] %v596_v50  ;;  %v600_v52 = vld [vmem:[%s2760_s7 + $0x340] sm:$0xff]  ;;  %v602_v53 = vld [vmem:[%s2760_s7 + $0x350] sm:$0xff]  ;;  %599 = vst [vmem:[%s2765_s8 + $0x198] sm:$0xff] %v598_v51 }
  0x32   : > { %601 = vst [vmem:[%s2765_s8 + $0x1a0] sm:$0xff] %v600_v52  ;;  %603 = vst [vmem:[%s2765_s8 + $0x1a8] sm:$0xff] %v602_v53  ;;  %v604_v54 = vld [vmem:[%s2760_s7 + $0x360] sm:$0xff]  ;;  %v606_v55 = vld [vmem:[%s2760_s7 + $0x370] sm:$0xff] }
  0x33   : > { %v608_v56 = vld [vmem:[%s2760_s7 + $0x380] sm:$0xff]  ;;  %605 = vst [vmem:[%s2765_s8 + $0x1b0] sm:$0xff] %v604_v54  ;;  %607 = vst [vmem:[%s2765_s8 + $0x1b8] sm:$0xff] %v606_v55  ;;  %v610_v57 = vld [vmem:[%s2760_s7 + $0x390] sm:$0xff] }
  0x34   : > { %609 = vst [vmem:[%s2765_s8 + $0x1c0] sm:$0xff] %v608_v56  ;;  %v612_v58 = vld [vmem:[%s2760_s7 + $0x3a0] sm:$0xff]  ;;  %v614_v59 = vld [vmem:[%s2760_s7 + $0x3b0] sm:$0xff]  ;;  %611 = vst [vmem:[%s2765_s8 + $0x1c8] sm:$0xff] %v610_v57 }
  0x35   : > { %613 = vst [vmem:[%s2765_s8 + $0x1d0] sm:$0xff] %v612_v58  ;;  %615 = vst [vmem:[%s2765_s8 + $0x1d8] sm:$0xff] %v614_v59  ;;  %v616_v60 = vld [vmem:[%s2760_s7 + $0x3c0] sm:$0xff]  ;;  %v618_v61 = vld [vmem:[%s2760_s7 + $0x3d0] sm:$0xff] }
  0x36   : > { %v620_v62 = vld [vmem:[%s2760_s7 + $0x3e0] sm:$0xff]  ;;  %617 = vst [vmem:[%s2765_s8 + $0x1e0] sm:$0xff] %v616_v60  ;;  %619 = vst [vmem:[%s2765_s8 + $0x1e8] sm:$0xff] %v618_v61  ;;  %v622_v63 = vld [vmem:[%s2760_s7 + $0x3f0] sm:$0xff] }
  0x37   : > { %621 = vst [vmem:[%s2765_s8 + $0x1f0] sm:$0xff] %v620_v62  ;;  %v624_v0 = vld [vmem:[%s2760_s7 + $0x400] sm:$0xff]  ;;  %v626_v1 = vld [vmem:[%s2760_s7 + $0x410] sm:$0xff]  ;;  %623 = vst [vmem:[%s2765_s8 + $0x1f8] sm:$0xff] %v622_v63 }
  0x38   : > { %625 = vst [vmem:[%s2765_s8 + $0x200] sm:$0xff] %v624_v0  ;;  %627 = vst [vmem:[%s2765_s8 + $0x208] sm:$0xff] %v626_v1  ;;  %v628_v2 = vld [vmem:[%s2760_s7 + $0x420] sm:$0xff]  ;;  %v630_v3 = vld [vmem:[%s2760_s7 + $0x430] sm:$0xff] }
  0x39   : > { %v632_v4 = vld [vmem:[%s2760_s7 + $0x440] sm:$0xff]  ;;  %629 = vst [vmem:[%s2765_s8 + $0x210] sm:$0xff] %v628_v2  ;;  %631 = vst [vmem:[%s2765_s8 + $0x218] sm:$0xff] %v630_v3  ;;  %v634_v5 = vld [vmem:[%s2760_s7 + $0x450] sm:$0xff] }
  0x3a   : > { %633 = vst [vmem:[%s2765_s8 + $0x220] sm:$0xff] %v632_v4  ;;  %v636_v6 = vld [vmem:[%s2760_s7 + $0x460] sm:$0xff]  ;;  %v638_v7 = vld [vmem:[%s2760_s7 + $0x470] sm:$0xff]  ;;  %635 = vst [vmem:[%s2765_s8 + $0x228] sm:$0xff] %v634_v5 }
  0x3b   : > { %637 = vst [vmem:[%s2765_s8 + $0x230] sm:$0xff] %v636_v6  ;;  %639 = vst [vmem:[%s2765_s8 + $0x238] sm:$0xff] %v638_v7  ;;  %v640_v8 = vld [vmem:[%s2760_s7 + $0x480] sm:$0xff]  ;;  %v642_v9 = vld [vmem:[%s2760_s7 + $0x490] sm:$0xff] }
  0x3c   : > { %v644_v10 = vld [vmem:[%s2760_s7 + $0x4a0] sm:$0xff]  ;;  %641 = vst [vmem:[%s2765_s8 + $0x240] sm:$0xff] %v640_v8  ;;  %643 = vst [vmem:[%s2765_s8 + $0x248] sm:$0xff] %v642_v9  ;;  %v646_v11 = vld [vmem:[%s2760_s7 + $0x4b0] sm:$0xff] }
  0x3d   : > { %645 = vst [vmem:[%s2765_s8 + $0x250] sm:$0xff] %v644_v10  ;;  %v648_v12 = vld [vmem:[%s2760_s7 + $0x4c0] sm:$0xff]  ;;  %v650_v13 = vld [vmem:[%s2760_s7 + $0x4d0] sm:$0xff]  ;;  %647 = vst [vmem:[%s2765_s8 + $0x258] sm:$0xff] %v646_v11 }
  0x3e   : > { %649 = vst [vmem:[%s2765_s8 + $0x260] sm:$0xff] %v648_v12  ;;  %651 = vst [vmem:[%s2765_s8 + $0x268] sm:$0xff] %v650_v13  ;;  %v652_v14 = vld [vmem:[%s2760_s7 + $0x4e0] sm:$0xff]  ;;  %v654_v15 = vld [vmem:[%s2760_s7 + $0x4f0] sm:$0xff] }
  0x3f   : > { %v656_v16 = vld [vmem:[%s2760_s7 + $0x500] sm:$0xff]  ;;  %653 = vst [vmem:[%s2765_s8 + $0x270] sm:$0xff] %v652_v14  ;;  %655 = vst [vmem:[%s2765_s8 + $0x278] sm:$0xff] %v654_v15  ;;  %v658_v17 = vld [vmem:[%s2760_s7 + $0x510] sm:$0xff] }
  0x40   : > { %657 = vst [vmem:[%s2765_s8 + $0x280] sm:$0xff] %v656_v16  ;;  %v660_v18 = vld [vmem:[%s2760_s7 + $0x520] sm:$0xff]  ;;  %v662_v19 = vld [vmem:[%s2760_s7 + $0x530] sm:$0xff]  ;;  %659 = vst [vmem:[%s2765_s8 + $0x288] sm:$0xff] %v658_v17 }
  0x41   : > { %661 = vst [vmem:[%s2765_s8 + $0x290] sm:$0xff] %v660_v18  ;;  %663 = vst [vmem:[%s2765_s8 + $0x298] sm:$0xff] %v662_v19  ;;  %v664_v20 = vld [vmem:[%s2760_s7 + $0x540] sm:$0xff]  ;;  %v666_v21 = vld [vmem:[%s2760_s7 + $0x550] sm:$0xff] }
  0x42   : > { %v668_v22 = vld [vmem:[%s2760_s7 + $0x560] sm:$0xff]  ;;  %665 = vst [vmem:[%s2765_s8 + $0x2a0] sm:$0xff] %v664_v20  ;;  %667 = vst [vmem:[%s2765_s8 + $0x2a8] sm:$0xff] %v666_v21  ;;  %v670_v23 = vld [vmem:[%s2760_s7 + $0x570] sm:$0xff] }
  0x43   : > { %669 = vst [vmem:[%s2765_s8 + $0x2b0] sm:$0xff] %v668_v22  ;;  %v672_v24 = vld [vmem:[%s2760_s7 + $0x580] sm:$0xff]  ;;  %v674_v25 = vld [vmem:[%s2760_s7 + $0x590] sm:$0xff]  ;;  %671 = vst [vmem:[%s2765_s8 + $0x2b8] sm:$0xff] %v670_v23 }
  0x44   : > { %673 = vst [vmem:[%s2765_s8 + $0x2c0] sm:$0xff] %v672_v24  ;;  %675 = vst [vmem:[%s2765_s8 + $0x2c8] sm:$0xff] %v674_v25  ;;  %v676_v26 = vld [vmem:[%s2760_s7 + $0x5a0] sm:$0xff]  ;;  %v678_v27 = vld [vmem:[%s2760_s7 + $0x5b0] sm:$0xff] }
  0x45   : > { %v680_v28 = vld [vmem:[%s2760_s7 + $0x5c0] sm:$0xff]  ;;  %677 = vst [vmem:[%s2765_s8 + $0x2d0] sm:$0xff] %v676_v26  ;;  %679 = vst [vmem:[%s2765_s8 + $0x2d8] sm:$0xff] %v678_v27  ;;  %v682_v29 = vld [vmem:[%s2760_s7 + $0x5d0] sm:$0xff] }
  0x46   : > { %681 = vst [vmem:[%s2765_s8 + $0x2e0] sm:$0xff] %v680_v28  ;;  %v684_v30 = vld [vmem:[%s2760_s7 + $0x5e0] sm:$0xff]  ;;  %v686_v31 = vld [vmem:[%s2760_s7 + $0x5f0] sm:$0xff]  ;;  %683 = vst [vmem:[%s2765_s8 + $0x2e8] sm:$0xff] %v682_v29 }
  0x47   : > { %685 = vst [vmem:[%s2765_s8 + $0x2f0] sm:$0xff] %v684_v30  ;;  %687 = vst [vmem:[%s2765_s8 + $0x2f8] sm:$0xff] %v686_v31  ;;  %v688_v32 = vld [vmem:[%s2760_s7 + $0x600] sm:$0xff]  ;;  %v690_v33 = vld [vmem:[%s2760_s7 + $0x610] sm:$0xff] }
  0x48   : > { %v692_v34 = vld [vmem:[%s2760_s7 + $0x620] sm:$0xff]  ;;  %689 = vst [vmem:[%s2765_s8 + $0x300] sm:$0xff] %v688_v32  ;;  %691 = vst [vmem:[%s2765_s8 + $0x308] sm:$0xff] %v690_v33  ;;  %v694_v35 = vld [vmem:[%s2760_s7 + $0x630] sm:$0xff] }
  0x49   : > { %693 = vst [vmem:[%s2765_s8 + $0x310] sm:$0xff] %v692_v34  ;;  %v696_v36 = vld [vmem:[%s2760_s7 + $0x640] sm:$0xff]  ;;  %v698_v37 = vld [vmem:[%s2760_s7 + $0x650] sm:$0xff]  ;;  %695 = vst [vmem:[%s2765_s8 + $0x318] sm:$0xff] %v694_v35 }
  0x4a   : > { %697 = vst [vmem:[%s2765_s8 + $0x320] sm:$0xff] %v696_v36  ;;  %699 = vst [vmem:[%s2765_s8 + $0x328] sm:$0xff] %v698_v37  ;;  %v700_v38 = vld [vmem:[%s2760_s7 + $0x660] sm:$0xff]  ;;  %v702_v39 = vld [vmem:[%s2760_s7 + $0x670] sm:$0xff] }
  0x4b   : > { %v704_v40 = vld [vmem:[%s2760_s7 + $0x680] sm:$0xff]  ;;  %701 = vst [vmem:[%s2765_s8 + $0x330] sm:$0xff] %v700_v38  ;;  %703 = vst [vmem:[%s2765_s8 + $0x338] sm:$0xff] %v702_v39  ;;  %v706_v41 = vld [vmem:[%s2760_s7 + $0x690] sm:$0xff] }
  0x4c   : > { %705 = vst [vmem:[%s2765_s8 + $0x340] sm:$0xff] %v704_v40  ;;  %v708_v42 = vld [vmem:[%s2760_s7 + $0x6a0] sm:$0xff]  ;;  %v710_v43 = vld [vmem:[%s2760_s7 + $0x6b0] sm:$0xff]  ;;  %707 = vst [vmem:[%s2765_s8 + $0x348] sm:$0xff] %v706_v41 }
  0x4d   : > { %709 = vst [vmem:[%s2765_s8 + $0x350] sm:$0xff] %v708_v42  ;;  %711 = vst [vmem:[%s2765_s8 + $0x358] sm:$0xff] %v710_v43  ;;  %v712_v44 = vld [vmem:[%s2760_s7 + $0x6c0] sm:$0xff]  ;;  %v714_v45 = vld [vmem:[%s2760_s7 + $0x6d0] sm:$0xff] }
  0x4e   : > { %v716_v46 = vld [vmem:[%s2760_s7 + $0x6e0] sm:$0xff]  ;;  %713 = vst [vmem:[%s2765_s8 + $0x360] sm:$0xff] %v712_v44  ;;  %715 = vst [vmem:[%s2765_s8 + $0x368] sm:$0xff] %v714_v45  ;;  %v718_v47 = vld [vmem:[%s2760_s7 + $0x6f0] sm:$0xff] }
  0x4f   : > { %717 = vst [vmem:[%s2765_s8 + $0x370] sm:$0xff] %v716_v46  ;;  %v720_v48 = vld [vmem:[%s2760_s7 + $0x700] sm:$0xff]  ;;  %v722_v49 = vld [vmem:[%s2760_s7 + $0x710] sm:$0xff]  ;;  %719 = vst [vmem:[%s2765_s8 + $0x378] sm:$0xff] %v718_v47 }
  0x50   : > { %721 = vst [vmem:[%s2765_s8 + $0x380] sm:$0xff] %v720_v48  ;;  %723 = vst [vmem:[%s2765_s8 + $0x388] sm:$0xff] %v722_v49  ;;  %v724_v50 = vld [vmem:[%s2760_s7 + $0x720] sm:$0xff]  ;;  %v726_v51 = vld [vmem:[%s2760_s7 + $0x730] sm:$0xff] }
  0x51   : > { %v728_v52 = vld [vmem:[%s2760_s7 + $0x740] sm:$0xff]  ;;  %725 = vst [vmem:[%s2765_s8 + $0x390] sm:$0xff] %v724_v50  ;;  %727 = vst [vmem:[%s2765_s8 + $0x398] sm:$0xff] %v726_v51  ;;  %v730_v53 = vld [vmem:[%s2760_s7 + $0x750] sm:$0xff] }
  0x52   : > { %729 = vst [vmem:[%s2765_s8 + $0x3a0] sm:$0xff] %v728_v52  ;;  %v732_v54 = vld [vmem:[%s2760_s7 + $0x760] sm:$0xff]  ;;  %v734_v55 = vld [vmem:[%s2760_s7 + $0x770] sm:$0xff]  ;;  %731 = vst [vmem:[%s2765_s8 + $0x3a8] sm:$0xff] %v730_v53 }
  0x53   : > { %733 = vst [vmem:[%s2765_s8 + $0x3b0] sm:$0xff] %v732_v54  ;;  %735 = vst [vmem:[%s2765_s8 + $0x3b8] sm:$0xff] %v734_v55  ;;  %v736_v56 = vld [vmem:[%s2760_s7 + $0x780] sm:$0xff]  ;;  %v738_v57 = vld [vmem:[%s2760_s7 + $0x790] sm:$0xff] }
  0x54   : > { %v740_v58 = vld [vmem:[%s2760_s7 + $0x7a0] sm:$0xff]  ;;  %737 = vst [vmem:[%s2765_s8 + $0x3c0] sm:$0xff] %v736_v56  ;;  %739 = vst [vmem:[%s2765_s8 + $0x3c8] sm:$0xff] %v738_v57  ;;  %v742_v59 = vld [vmem:[%s2760_s7 + $0x7b0] sm:$0xff] }
  0x55   : > { %741 = vst [vmem:[%s2765_s8 + $0x3d0] sm:$0xff] %v740_v58  ;;  %v744_v60 = vld [vmem:[%s2760_s7 + $0x7c0] sm:$0xff]  ;;  %v746_v61 = vld [vmem:[%s2760_s7 + $0x7d0] sm:$0xff]  ;;  %743 = vst [vmem:[%s2765_s8 + $0x3d8] sm:$0xff] %v742_v59 }
  0x56   : > { %745 = vst [vmem:[%s2765_s8 + $0x3e0] sm:$0xff] %v744_v60  ;;  %747 = vst [vmem:[%s2765_s8 + $0x3e8] sm:$0xff] %v746_v61  ;;  %v748_v62 = vld [vmem:[%s2760_s7 + $0x7e0] sm:$0xff]  ;;  %v750_v63 = vld [vmem:[%s2760_s7 + $0x7f0] sm:$0xff] }
  0x57   : > { %v752_v0 = vld [vmem:[%s2760_s7 + $0x800] sm:$0xff]  ;;  %749 = vst [vmem:[%s2765_s8 + $0x3f0] sm:$0xff] %v748_v62  ;;  %751 = vst [vmem:[%s2765_s8 + $0x3f8] sm:$0xff] %v750_v63  ;;  %v754_v1 = vld [vmem:[%s2760_s7 + $0x810] sm:$0xff] }
  0x58   : > { %753 = vst [vmem:[%s2765_s8 + $0x400] sm:$0xff] %v752_v0  ;;  %v756_v2 = vld [vmem:[%s2760_s7 + $0x820] sm:$0xff]  ;;  %v758_v3 = vld [vmem:[%s2760_s7 + $0x830] sm:$0xff]  ;;  %755 = vst [vmem:[%s2765_s8 + $0x408] sm:$0xff] %v754_v1 }
  0x59   : > { %757 = vst [vmem:[%s2765_s8 + $0x410] sm:$0xff] %v756_v2  ;;  %759 = vst [vmem:[%s2765_s8 + $0x418] sm:$0xff] %v758_v3  ;;  %v760_v4 = vld [vmem:[%s2760_s7 + $0x840] sm:$0xff]  ;;  %v762_v5 = vld [vmem:[%s2760_s7 + $0x850] sm:$0xff] }
  0x5a   : > { %v764_v6 = vld [vmem:[%s2760_s7 + $0x860] sm:$0xff]  ;;  %761 = vst [vmem:[%s2765_s8 + $0x420] sm:$0xff] %v760_v4  ;;  %763 = vst [vmem:[%s2765_s8 + $0x428] sm:$0xff] %v762_v5  ;;  %v766_v7 = vld [vmem:[%s2760_s7 + $0x870] sm:$0xff] }
  0x5b   : > { %765 = vst [vmem:[%s2765_s8 + $0x430] sm:$0xff] %v764_v6  ;;  %v768_v8 = vld [vmem:[%s2760_s7 + $0x880] sm:$0xff]  ;;  %v770_v9 = vld [vmem:[%s2760_s7 + $0x890] sm:$0xff]  ;;  %767 = vst [vmem:[%s2765_s8 + $0x438] sm:$0xff] %v766_v7 }
  0x5c   : > { %769 = vst [vmem:[%s2765_s8 + $0x440] sm:$0xff] %v768_v8  ;;  %771 = vst [vmem:[%s2765_s8 + $0x448] sm:$0xff] %v770_v9  ;;  %v772_v10 = vld [vmem:[%s2760_s7 + $0x8a0] sm:$0xff]  ;;  %v774_v11 = vld [vmem:[%s2760_s7 + $0x8b0] sm:$0xff] }
  0x5d   : > { %v776_v12 = vld [vmem:[%s2760_s7 + $0x8c0] sm:$0xff]  ;;  %773 = vst [vmem:[%s2765_s8 + $0x450] sm:$0xff] %v772_v10  ;;  %775 = vst [vmem:[%s2765_s8 + $0x458] sm:$0xff] %v774_v11  ;;  %v778_v13 = vld [vmem:[%s2760_s7 + $0x8d0] sm:$0xff] }
  0x5e   : > { %777 = vst [vmem:[%s2765_s8 + $0x460] sm:$0xff] %v776_v12  ;;  %v780_v14 = vld [vmem:[%s2760_s7 + $0x8e0] sm:$0xff]  ;;  %v782_v15 = vld [vmem:[%s2760_s7 + $0x8f0] sm:$0xff]  ;;  %779 = vst [vmem:[%s2765_s8 + $0x468] sm:$0xff] %v778_v13 }
  0x5f   : > { %781 = vst [vmem:[%s2765_s8 + $0x470] sm:$0xff] %v780_v14  ;;  %783 = vst [vmem:[%s2765_s8 + $0x478] sm:$0xff] %v782_v15 }
  0x60 PF: > { %p2187_p7 = scmp.ge.s32.totalorder %s2674_s18, 1  ;;  %p796_p8 = scmp.lt.s32.totalorder %s2674_s18, 5 }
  0x62   : > { %p797_p9 = pnand %p2187_p7, %p796_p8 }
  0x63   : > { %s803_s9 = sand.u32 (!%p797_p9), 1, %s2650_s12   ;;  %s842_s10 = smul.u32 (!%p797_p9), 9, %s2658_s14 }
  0x64   : > { %800 = sbr.rel (%p797_p9) target bundleno = 492 (0x1ec), region = 66  ;;  %s2188_s21 = sshll.u32 (!%p797_p9), %s2662_s15, 1 }
  0x65   : > { %s2342_s11 = smul.u32 (!%p797_p9), 1152, %s803_s9  ;;  %p845_p10 = scmp.lt.s32.totalorder (!%p797_p9), %s842_s10, 17 }
  0x66   : > { %p854_p11 = scmp.lt.s32.totalorder (!%p797_p9), %s2188_s21, 3  ;;  %p2191_p12 = scmp.ne.s32.totalorder (!%p797_p9), %s2658_s14, 0 }
  0x67   : > { %s3074_s4 = scalar_lea.vmem (!%p797_p9), [#allocation3], %s2342_s11 }
  0x69   : > { %s3288_s10 = smov (!%p845_p10, %s842_s10), 17  ;;  %s3290_s21 = smov (!%p854_p11, %s2188_s21), 3 }
  0x6a   : > { %s3062_s24 = scalar_lea.vmem %s3271_s0, %s3288_s10  ;;  %s856_s28 = scalar_lea.vmem %s3273_s2, %s3290_s21 }
  0x6b   : > { %s2190_s12 = sshll.u32 %s3290_s21, 1  ;;  %872 = sbr.rel (%p2191_p12) target bundleno = 114 (0x72), region = 74 }
  0x6c   : > { %s3072_s15 = scalar_lea.vmem %s3274_s3, %s2190_s12 }
  0x70   : > { %v2676_v16 = vmov 0.0  }
  0x71   : > { %873 = vst [vmem:[#allocation2] sm:$0xf] %v2676_v16 }
  0x72 PF: > { %v2403_v17 = vld [vmem:[%s3074_s4 + $0x74] ss:$8 sps:$4 sm:$0xff]   ;;  %v2407_v19 = vld [vmem:[%s3074_s4 + $0x70] ss:$8 sps:$4 sm:$0xff]   ;;  %v2409_v21 = vld [vmem:[%s3074_s4 + $0x64] ss:$8 sps:$4 sm:$0xff]   ;;  %v1027_v55 = vlaneseq }
  0x73   : > { %v2405_v18 = vld [vmem:[%s3074_s4 + $0x174] ss:$8 sps:$4 sm:$0xff]   ;;  %1815 = vmatprep.subr.bf16.mxu0 %v2403_v17  ;;  %v2408_v20 = vld [vmem:[%s3074_s4 + $0x170] ss:$8 sps:$4 sm:$0xff]   ;;  %v2411_v22 = vld [vmem:[%s3074_s4 + $0x164] ss:$8 sps:$4 sm:$0xff]  }
  0x74   : > { %1856 = vmatprep.subr.bf16.mxu1 %v2405_v18  ;;  %1816 = vmatpush1.bf16.msra.mxu0 %v2407_v19  ;;  %v2413_v23 = vld [vmem:[%s3074_s4 + $0x60] ss:$8 sps:$4 sm:$0xff]   ;;  %v2415_v25 = vld [vmem:[%s3074_s4 + $0x54] ss:$8 sps:$4 sm:$0xff]   ;;  %v2419_v27 = vld [vmem:[%s3074_s4 + $0x50] ss:$8 sps:$4 sm:$0xff]  }
  0x75   : > { %1857 = vmatpush1.bf16.msra.mxu1 %v2408_v20  ;;  %1817 = vmatprep.subr.bf16.mxu0 %v2409_v21  ;;  %v2414_v24 = vld [vmem:[%s3074_s4 + $0x160] ss:$8 sps:$4 sm:$0xff]   ;;  %v2417_v26 = vld [vmem:[%s3074_s4 + $0x154] ss:$8 sps:$4 sm:$0xff]   ;;  %v2420_v28 = vld [vmem:[%s3074_s4 + $0x150] ss:$8 sps:$4 sm:$0xff]  }
  0x76   : > { %1858 = vmatprep.subr.bf16.mxu1 %v2411_v22  ;;  %v2421_v29 = vld [vmem:[%s3074_s4 + $0x44] ss:$8 sps:$4 sm:$0xff]   ;;  %v2425_v31 = vld [vmem:[%s3074_s4 + $0x40] ss:$8 sps:$4 sm:$0xff]   ;;  %v2427_v33 = vld [vmem:[%s3074_s4 + $0x34] ss:$8 sps:$4 sm:$0xff]  }
  0x77   : > { %v2423_v30 = vld [vmem:[%s3074_s4 + $0x144] ss:$8 sps:$4 sm:$0xff]   ;;  %v2426_v32 = vld [vmem:[%s3074_s4 + $0x140] ss:$8 sps:$4 sm:$0xff]   ;;  %v2429_v34 = vld [vmem:[%s3074_s4 + $0x134] ss:$8 sps:$4 sm:$0xff]  }
  0x78   : > { %1818 = vmatpush1.bf16.msra.mxu0 %v2413_v23  ;;  %v2431_v35 = vld [vmem:[%s3074_s4 + $0x30] ss:$8 sps:$4 sm:$0xff]   ;;  %v2433_v37 = vld [vmem:[%s3074_s4 + $0x24] ss:$8 sps:$4 sm:$0xff]   ;;  %v2437_v39 = vld [vmem:[%s3074_s4 + $0x20] ss:$8 sps:$4 sm:$0xff]  }
  0x79   : > { %1859 = vmatpush1.bf16.msra.mxu1 %v2414_v24  ;;  %1819 = vmatprep.subr.bf16.mxu0 %v2415_v25  ;;  %v2432_v36 = vld [vmem:[%s3074_s4 + $0x130] ss:$8 sps:$4 sm:$0xff]   ;;  %v2435_v38 = vld [vmem:[%s3074_s4 + $0x124] ss:$8 sps:$4 sm:$0xff]   ;;  %v2438_v40 = vld [vmem:[%s3074_s4 + $0x120] ss:$8 sps:$4 sm:$0xff]  }
  0x7a   : > { %1860 = vmatprep.subr.bf16.mxu1 %v2417_v26  ;;  %v2439_v41 = vld [vmem:[%s3074_s4 + $0x14] ss:$8 sps:$4 sm:$0xff]   ;;  %v2443_v43 = vld [vmem:[%s3074_s4 + $0x10] ss:$8 sps:$4 sm:$0xff]   ;;  %v2445_v45 = vld [vmem:[%s3074_s4 + $0x4] ss:$8 sps:$4 sm:$0xff]  }
  0x7b   : > { %v2441_v42 = vld [vmem:[%s3074_s4 + $0x114] ss:$8 sps:$4 sm:$0xff]   ;;  %v2444_v44 = vld [vmem:[%s3074_s4 + $0x110] ss:$8 sps:$4 sm:$0xff]   ;;  %v2447_v46 = vld [vmem:[%s3074_s4 + $0x104] ss:$8 sps:$4 sm:$0xff]  }
  0x7c   : > { %1820 = vmatpush1.bf16.msra.mxu0 %v2419_v27  ;;  %v2449_v47 = vld [vmem:[%s3074_s4] ss:$8 sps:$4 sm:$0xff]   ;;  %v2451_v49 = vld [vmem:[%s3074_s4 + $0xf4] ss:$8 sps:$4 sm:$0xff]   ;;  %v2455_v51 = vld [vmem:[%s3074_s4 + $0xf0] ss:$8 sps:$4 sm:$0xff]  }
  0x7d   : > { %1861 = vmatpush1.bf16.msra.mxu1 %v2420_v28  ;;  %1821 = vmatprep.subr.bf16.mxu0 %v2421_v29  ;;  %v2450_v48 = vld [vmem:[%s3074_s4 + $0x100] ss:$8 sps:$4 sm:$0xff]   ;;  %v2453_v50 = vld [vmem:[%s3074_s4 + $0x1f4] ss:$8 sps:$4 sm:$0xff]   ;;  %v2456_v52 = vld [vmem:[%s3074_s4 + $0x1f0] ss:$8 sps:$4 sm:$0xff]  }
  0x7e   : > { %1862 = vmatprep.subr.bf16.mxu1 %v2423_v30  ;;  %v2677_v53 = vmov 1966171168   ;;  %v2457_v56 = vld [vmem:[%s3074_s4 + $0xe4] ss:$8 sps:$4 sm:$0xff]   ;;  %v2461_v58 = vld [vmem:[%s3074_s4 + $0xe0] ss:$8 sps:$4 sm:$0xff]  }
  0x7f   : > { %v1025_v54 = vunpack.c.l.s4 %v2677_v53  ;;  %v2459_v57 = vld [vmem:[%s3074_s4 + $0x1e4] ss:$8 sps:$4 sm:$0xff]   ;;  %v3116_v60 = vshrl.u32 %v1027_v55, 7  ;;  %v2462_v61 = vld [vmem:[%s3074_s4 + $0x1e0] ss:$8 sps:$4 sm:$0xff]   ;;  %p2337_p13 = scmp.ne.s32.totalorder %s2658_s14, 1 }
  0x80   : > { %1822 = vmatpush1.bf16.msra.mxu0 %v2425_v31  ;;  %v2463_v62 = vld [vmem:[%s3074_s4 + $0xd4] ss:$8 sps:$4 sm:$0xff]   ;;  %v2467_v0 = vld [vmem:[%s3074_s4 + $0xd0] ss:$8 sps:$4 sm:$0xff]   ;;  %v2469_v3 = vld [vmem:[%s3074_s4 + $0xc4] ss:$8 sps:$4 sm:$0xff]  }
  0x81   : > { %1863 = vmatpush1.bf16.msra.mxu1 %v2426_v32  ;;  %1823 = vmatprep.subr.bf16.mxu0 %v2427_v33  ;;  %v1026_v59 = vunpack.c.0.s8 %v1025_v54  ;;  %v2465_v63 = vld [vmem:[%s3074_s4 + $0x1d4] ss:$8 sps:$4 sm:$0xff]   ;;  %v2468_v1 = vld [vmem:[%s3074_s4 + $0x1d0] ss:$8 sps:$4 sm:$0xff]   ;;  %v2471_v4 = vld [vmem:[%s3074_s4 + $0x1c4] ss:$8 sps:$4 sm:$0xff]  }
  0x82   : > { %1864 = vmatprep.subr.bf16.mxu1 %v2429_v34  ;;  %v875_v5 = vld [vmem:[%s3062_s24] sm:$0xff]  ;;  %v2479_v14 = vld [vmem:[%s3074_s4 + $0xb0] ss:$8 sps:$4 sm:$0xff]   ;;  %v2481_v18 = vld [vmem:[%s3074_s4 + $0xa4] ss:$8 sps:$4 sm:$0xff]  }
  0x83   : > { %v3124_v2 = vsub.s32 %v1026_v59, %v3116_v60  ;;  %v2473_v6 = vld [vmem:[%s3074_s4 + $0xc0] ss:$8 sps:$4 sm:$0xff]   ;;  %v1023_v7 = vcombine.high %v875_v5, %v875_v5  ;;  %v2475_v10 = vld [vmem:[%s3074_s4 + $0xb4] ss:$8 sps:$4 sm:$0xff]   ;;  %v2480_v17 = vld [vmem:[%s3074_s4 + $0x1b0] ss:$8 sps:$4 sm:$0xff]  }
  0x84   : > { %1824 = vmatpush1.bf16.msra.mxu0 %v2431_v35  ;;  %v2474_v9 = vld [vmem:[%s3074_s4 + $0x1c0] ss:$8 sps:$4 sm:$0xff]   ;;  %v2477_v11 = vld [vmem:[%s3074_s4 + $0x1b4] ss:$8 sps:$4 sm:$0xff]   ;;  %v2483_v19 = vld [vmem:[%s3074_s4 + $0x1a4] ss:$8 sps:$4 sm:$0xff]  }
  0x85   : > { %1865 = vmatpush1.bf16.msra.mxu1 %v2432_v36  ;;  %1825 = vmatprep.subr.bf16.mxu0 %v2433_v37  ;;  %v1030_v8 = vrot.slane %v875_v5, %v3124_v2  ;;  %v1037_v13 = vrot.slane %v1023_v7, %v3124_v2  ;;  %v2485_v21 = vld [vmem:[%s3074_s4 + $0xa0] ss:$8 sps:$4 sm:$0xff]   ;;  %v2487_v23 = vld [vmem:[%s3074_s4 + $0x94] ss:$8 sps:$4 sm:$0xff]   ;;  %v2491_v25 = vld [vmem:[%s3074_s4 + $0x90] ss:$8 sps:$4 sm:$0xff]  }
  0x86   : > { %1866 = vmatprep.subr.bf16.mxu1 %v2435_v38  ;;  %v2486_v22 = vld [vmem:[%s3074_s4 + $0x1a0] ss:$8 sps:$4 sm:$0xff]   ;;  %v2489_v24 = vld [vmem:[%s3074_s4 + $0x194] ss:$8 sps:$4 sm:$0xff]   ;;  %v2492_v26 = vld [vmem:[%s3074_s4 + $0x190] ss:$8 sps:$4 sm:$0xff]  }
  0x87   : > { %v1038_v12 = vcombine.high %v1030_v8, %v1030_v8  ;;  %v3138_v16 = vrot.slane %v1037_v13, %v3124_v2  ;;  %v2493_v27 = vld [vmem:[%s3074_s4 + $0x84] ss:$8 sps:$4 sm:$0xff]   ;;  %v1039_v29 = vcombine.high %v1037_v13, %v1037_v13  ;;  %v2497_v30 = vld [vmem:[%s3074_s4 + $0x80] ss:$8 sps:$4 sm:$0xff]   ;;  %v1046_v31 = vrot.slane %v1030_v8, %v3124_v2  ;;  %v2502_v33 = vld [vmem:[%s3074_s4 + $0x274] ss:$8 sps:$4 sm:$0xff]  }
  0x88   : > { %1826 = vmatpush1.bf16.msra.mxu0 %v2437_v39  ;;  %v2495_v28 = vld [vmem:[%s3074_s4 + $0x184] ss:$8 sps:$4 sm:$0xff]   ;;  %v2498_v32 = vld [vmem:[%s3074_s4 + $0x180] ss:$8 sps:$4 sm:$0xff]   ;;  %v2505_v34 = vld [vmem:[%s3074_s4 + $0x374] ss:$8 sps:$4 sm:$0xff]  }
  0x89   : > { %1867 = vmatpush1.bf16.msra.mxu1 %v2438_v40  ;;  %1827 = vmatprep.subr.bf16.mxu0 %v2439_v41  ;;  %v1060_v15 = vrot.slane %v1038_v12, %v3124_v2  ;;  %v1067_v35 = vrot.slane %v1039_v29, %v3124_v2  ;;  %v1068_v36 = vcombine.high %v1046_v31, %v1046_v31  ;;  %v2500_v37 = vld [vmem:[%s3074_s4 + $0x270] ss:$8 sps:$4 sm:$0xff]   ;;  %v2508_v39 = vld [vmem:[%s3074_s4 + $0x264] ss:$8 sps:$4 sm:$0xff]   ;;  %v2529_v53 = vld [vmem:[%s3074_s4 + $0x334] ss:$8 sps:$4 sm:$0xff]  }
  0x8a   : > { %1868 = vmatprep.subr.bf16.mxu1 %v2441_v42  ;;  %v2503_v38 = vld [vmem:[%s3074_s4 + $0x370] ss:$8 sps:$4 sm:$0xff]   ;;  %v2511_v40 = vld [vmem:[%s3074_s4 + $0x364] ss:$8 sps:$4 sm:$0xff]   ;;  %v2506_v42 = vld [vmem:[%s3074_s4 + $0x260] ss:$8 sps:$4 sm:$0xff]  }
  0x8b   : > { %v1070_v20 = vcombine.high %v1060_v15, %v1060_v15  ;;  %1847 = vmatprep.mubr.bf16.mxu0 %v1060_v15  ;;  %v1071_v41 = vcombine.high %v1067_v35, %v1067_v35  ;;  %v2524_v54 = vld [vmem:[%s3074_s4 + $0x230] ss:$8 sps:$4 sm:$0xff]   ;;  %v2533_v59 = vld [vmem:[%s3074_s4 + $0x320] ss:$8 sps:$4 sm:$0xff]   ;;  %v2553_v7 = vld [vmem:[%s3074_s4 + $0x3f4] ss:$8 sps:$4 sm:$0xff]  }
  0x8c   : > { %1828 = vmatpush1.bf16.msra.mxu0 %v2443_v43  ;;  %v2509_v43 = vld [vmem:[%s3074_s4 + $0x360] ss:$8 sps:$4 sm:$0xff]   ;;  %v2527_v55 = vld [vmem:[%s3074_s4 + $0x330] ss:$8 sps:$4 sm:$0xff]   ;;  %v2565_v15 = vld [vmem:[%s3074_s4 + $0x3d4] ss:$8 sps:$4 sm:$0xff]  }
  0x8d   : > { %1869 = vmatpush1.bf16.msra.mxu1 %v2444_v44  ;;  %1829 = vmatprep.subr.bf16.mxu0 %v2445_v45  ;;  %v2514_v44 = vld [vmem:[%s3074_s4 + $0x254] ss:$8 sps:$4 sm:$0xff]   ;;  %v2545_v5 = vld [vmem:[%s3074_s4 + $0x300] ss:$8 sps:$4 sm:$0xff]   ;;  %v2548_v8 = vld [vmem:[%s3074_s4 + $0x2f0] ss:$8 sps:$4 sm:$0xff]  }
  0x8e   : > { %1870 = vmatprep.subr.bf16.mxu1 %v2447_v46  ;;  %1888 = vmatprep.mubr.bf16.mxu1 %v1070_v20  ;;  %v2517_v45 = vld [vmem:[%s3074_s4 + $0x354] ss:$8 sps:$4 sm:$0xff]   ;;  %v2512_v46 = vld [vmem:[%s3074_s4 + $0x250] ss:$8 sps:$4 sm:$0xff]   ;;  %v2554_v12 = vld [vmem:[%s3074_s4 + $0x2e0] ss:$8 sps:$4 sm:$0xff]  }
  0x8f   : > { %v2557_v13 = vld [vmem:[%s3074_s4 + $0x3e0] ss:$8 sps:$4 sm:$0xff]   ;;  %v2571_v20 = vld [vmem:[%s3074_s4 + $0x3c4] ss:$8 sps:$4 sm:$0xff]  }
  0x90   : > { %1830 = vmatpush1.bf16.msra.mxu0 %v2449_v47  ;;  %v2515_v47 = vld [vmem:[%s3074_s4 + $0x350] ss:$8 sps:$4 sm:$0xff]   ;;  %v2578_v29 = vld [vmem:[%s3074_s4 + $0x2a0] ss:$8 sps:$4 sm:$0xff]  }
  0x91   : > { %1871 = vmatpush1.bf16.msra.mxu1 %v2450_v48  ;;  %1831 = vmatprep.subr.bf16.mxu0 %v2451_v49  ;;  %v2520_v48 = vld [vmem:[%s3074_s4 + $0x244] ss:$8 sps:$4 sm:$0xff]  }
  0x92   : > { %1872 = vmatprep.subr.bf16.mxu1 %v2453_v50  ;;  %v2523_v49 = vld [vmem:[%s3074_s4 + $0x344] ss:$8 sps:$4 sm:$0xff]   ;;  %v2518_v50 = vld [vmem:[%s3074_s4 + $0x240] ss:$8 sps:$4 sm:$0xff]  }
  0x94   : > { %1832 = vmatpush2.bf16.msra.mxu0 %v2455_v51  ;;  %v2521_v51 = vld [vmem:[%s3074_s4 + $0x340] ss:$8 sps:$4 sm:$0xff]  }
  0x95   : > { %1873 = vmatpush2.bf16.msra.mxu1 %v2456_v52  ;;  %1833 = vmatprep.subr.bf16.mxu0 %v2457_v56  ;;  %v2526_v52 = vld [vmem:[%s3074_s4 + $0x234] ss:$8 sps:$4 sm:$0xff]   ;;  %v2532_v56 = vld [vmem:[%s3074_s4 + $0x224] ss:$8 sps:$4 sm:$0xff]  }
  0x96   : > { %1874 = vmatprep.subr.bf16.mxu1 %v2459_v57  ;;  %v2535_v57 = vld [vmem:[%s3074_s4 + $0x324] ss:$8 sps:$4 sm:$0xff]  }
  0x98   : > { %1834 = vmatpush2.bf16.msra.mxu0 %v2461_v58  ;;  %v2530_v58 = vld [vmem:[%s3074_s4 + $0x220] ss:$8 sps:$4 sm:$0xff]  }
  0x99   : > { %1875 = vmatpush2.bf16.msra.mxu1 %v2462_v61  ;;  %1835 = vmatprep.subr.bf16.mxu0 %v2463_v62  ;;  %v2538_v61 = vld [vmem:[%s3074_s4 + $0x214] ss:$8 sps:$4 sm:$0xff]  }
  0x9a   : > { %1876 = vmatprep.subr.bf16.mxu1 %v2465_v63  ;;  %v2541_v62 = vld [vmem:[%s3074_s4 + $0x314] ss:$8 sps:$4 sm:$0xff]   ;;  %v2536_v63 = vld [vmem:[%s3074_s4 + $0x210] ss:$8 sps:$4 sm:$0xff]  }
  0x9c   : > { %1836 = vmatpush2.bf16.msra.mxu0 %v2467_v0  ;;  %v2539_v0 = vld [vmem:[%s3074_s4 + $0x310] ss:$8 sps:$4 sm:$0xff]  }
  0x9d   : > { %1877 = vmatpush2.bf16.msra.mxu1 %v2468_v1  ;;  %1837 = vmatprep.subr.bf16.mxu0 %v2469_v3  ;;  %v2544_v1 = vld [vmem:[%s3074_s4 + $0x204] ss:$8 sps:$4 sm:$0xff]  }
  0x9e   : > { %1878 = vmatprep.subr.bf16.mxu1 %v2471_v4  ;;  %v2547_v3 = vld [vmem:[%s3074_s4 + $0x304] ss:$8 sps:$4 sm:$0xff]   ;;  %v2542_v4 = vld [vmem:[%s3074_s4 + $0x200] ss:$8 sps:$4 sm:$0xff]  }
  0xa0   : > { %1838 = vmatpush2.bf16.msra.mxu0 %v2473_v6  ;;  %v2550_v6 = vld [vmem:[%s3074_s4 + $0x2f4] ss:$8 sps:$4 sm:$0xff]  }
  0xa1   : > { %1879 = vmatpush2.bf16.msra.mxu1 %v2474_v9  ;;  %1839 = vmatprep.subr.bf16.mxu0 %v2475_v10  ;;  %v2551_v9 = vld [vmem:[%s3074_s4 + $0x3f0] ss:$8 sps:$4 sm:$0xff]   ;;  %v2556_v10 = vld [vmem:[%s3074_s4 + $0x2e4] ss:$8 sps:$4 sm:$0xff]  }
  0xa2   : > { %1880 = vmatprep.subr.bf16.mxu1 %v2477_v11  ;;  %v2559_v11 = vld [vmem:[%s3074_s4 + $0x3e4] ss:$8 sps:$4 sm:$0xff]  }
  0xa4   : > { %1840 = vmatpush2.bf16.msra.mxu0 %v2479_v14  ;;  %v2562_v14 = vld [vmem:[%s3074_s4 + $0x2d4] ss:$8 sps:$4 sm:$0xff]  }
  0xa5   : > { %1881 = vmatpush2.bf16.msra.mxu1 %v2480_v17  ;;  %1841 = vmatprep.subr.bf16.mxu0 %v2481_v18  ;;  %v2560_v17 = vld [vmem:[%s3074_s4 + $0x2d0] ss:$8 sps:$4 sm:$0xff]  }
  0xa6   : > { %1882 = vmatprep.subr.bf16.mxu1 %v2483_v19  ;;  %v2563_v18 = vld [vmem:[%s3074_s4 + $0x3d0] ss:$8 sps:$4 sm:$0xff]   ;;  %v2568_v19 = vld [vmem:[%s3074_s4 + $0x2c4] ss:$8 sps:$4 sm:$0xff]  }
  0xa8   : > { %1842 = vmatpush2.bf16.msra.mxu0 %v2485_v21  ;;  %v2566_v21 = vld [vmem:[%s3074_s4 + $0x2c0] ss:$8 sps:$4 sm:$0xff]  }
  0xa9   : > { %1883 = vmatpush2.bf16.msra.mxu1 %v2486_v22  ;;  %1843 = vmatprep.subr.bf16.mxu0 %v2487_v23  ;;  %v2569_v22 = vld [vmem:[%s3074_s4 + $0x3c0] ss:$8 sps:$4 sm:$0xff]   ;;  %v2574_v23 = vld [vmem:[%s3074_s4 + $0x2b4] ss:$8 sps:$4 sm:$0xff]  }
  0xaa   : > { %1884 = vmatprep.subr.bf16.mxu1 %v2489_v24  ;;  %v2577_v24 = vld [vmem:[%s3074_s4 + $0x3b4] ss:$8 sps:$4 sm:$0xff]  }
  0xac   : > { %1844 = vmatpush2.bf16.msra.mxu0 %v2491_v25  ;;  %v2572_v25 = vld [vmem:[%s3074_s4 + $0x2b0] ss:$8 sps:$4 sm:$0xff]  }
  0xad   : > { %1885 = vmatpush2.bf16.msra.mxu1 %v2492_v26  ;;  %1845 = vmatprep.subr.bf16.mxu0 %v2493_v27  ;;  %v2575_v26 = vld [vmem:[%s3074_s4 + $0x3b0] ss:$8 sps:$4 sm:$0xff]   ;;  %v2580_v27 = vld [vmem:[%s3074_s4 + $0x2a4] ss:$8 sps:$4 sm:$0xff]  }
  0xae   : > { %1886 = vmatprep.subr.bf16.mxu1 %v2495_v28  ;;  %v2583_v28 = vld [vmem:[%s3074_s4 + $0x3a4] ss:$8 sps:$4 sm:$0xff]  }
  0xb0   : > { %1846 = vmatpush2.bf16.msra.mxu0 %v2497_v30  ;;  %v2581_v30 = vld [vmem:[%s3074_s4 + $0x3a0] ss:$8 sps:$4 sm:$0xff]  }
  0xb1   : > { %1887 = vmatpush2.bf16.msra.mxu1 %v2498_v32  ;;  %1897 = vmatprep.subr.bf16.mxu0 %v2502_v33  ;;  %v2589_v32 = vld [vmem:[%s3074_s4 + $0x394] ss:$8 sps:$4 sm:$0xff]   ;;  %v2584_v33 = vld [vmem:[%s3074_s4 + $0x290] ss:$8 sps:$4 sm:$0xff]  }
  0xb2   : > { %1938 = vmatprep.subr.bf16.mxu1 %v2505_v34  ;;  %v2587_v34 = vld [vmem:[%s3074_s4 + $0x390] ss:$8 sps:$4 sm:$0xff]  }
  0xb3   : > { %1848 = vmatmul.mubr.bf16.vlgmr.msra.gmra.mxu0 %v1046_v31  ;;  %v2586_v31 = vld [vmem:[%s3074_s4 + $0x294] ss:$8 sps:$4 sm:$0xff]  }
  0xb4   : > { %1889 = vmatmul.mubr.bf16.vlgmr.msra.gmra.mxu1 %v1068_v36  ;;  %1898 = vmatpush1.bf16.msra.mxu0 %v2500_v37  ;;  %v2595_v36 = vld [vmem:[%s3074_s4 + $0x384] ss:$8 sps:$4 sm:$0xff]   ;;  %v2590_v37 = vld [vmem:[%s3074_s4 + $0x280] ss:$8 sps:$4 sm:$0xff]  }
  0xb5   : > { %1939 = vmatpush1.bf16.msra.mxu1 %v2503_v38  ;;  %1899 = vmatprep.subr.bf16.mxu0 %v2508_v39  ;;  %v2593_v38 = vld [vmem:[%s3074_s4 + $0x380] ss:$8 sps:$4 sm:$0xff]   ;;  %v2598_v39 = vld [vmem:[%s3074_s4 + $0x474] ss:$8 sps:$4 sm:$0xff]  }
  0xb6   : > { %1940 = vmatprep.subr.bf16.mxu1 %v2511_v40  ;;  %1929 = vmatprep.mubr.bf16.mxu0 %v1067_v35  ;;  %v2592_v35 = vld [vmem:[%s3074_s4 + $0x284] ss:$8 sps:$4 sm:$0xff]   ;;  %v1069_v40 = vcombine.high %v3138_v16, %v3138_v16 }
  0xb7   : > { %1970 = vmatprep.mubr.bf16.mxu1 %v1071_v41  ;;  %v2596_v41 = vld [vmem:[%s3074_s4 + $0x470] ss:$8 sps:$4 sm:$0xff]  }
  0xb8   : > { %1900 = vmatpush1.bf16.msra.mxu0 %v2506_v42  ;;  %v2601_v42 = vld [vmem:[%s3074_s4 + $0x464] ss:$8 sps:$4 sm:$0xff]  }
  0xb9   : > { %1941 = vmatpush1.bf16.msra.mxu1 %v2509_v43  ;;  %1901 = vmatprep.subr.bf16.mxu0 %v2514_v44  ;;  %v2599_v43 = vld [vmem:[%s3074_s4 + $0x460] ss:$8 sps:$4 sm:$0xff]   ;;  %v2678_v44 = vmov 0  }
  0xba   : > { %1942 = vmatprep.subr.bf16.mxu1 %v2517_v45  ;;  %v2604_v45 = vld [vmem:[%s3074_s4 + $0x454] ss:$8 sps:$4 sm:$0xff]  }
  0xbc   : > { %1902 = vmatpush1.bf16.msra.mxu0 %v2512_v46  ;;  %v2602_v46 = vld [vmem:[%s3074_s4 + $0x450] ss:$8 sps:$4 sm:$0xff]  }
  0xbd   : > { %1943 = vmatpush1.bf16.msra.mxu1 %v2515_v47  ;;  %1903 = vmatprep.subr.bf16.mxu0 %v2520_v48  ;;  %v2607_v47 = vld [vmem:[%s3074_s4 + $0x444] ss:$8 sps:$4 sm:$0xff]   ;;  %v2605_v48 = vld [vmem:[%s3074_s4 + $0x440] ss:$8 sps:$4 sm:$0xff]  }
  0xbe   : > { %1944 = vmatprep.subr.bf16.mxu1 %v2523_v49  ;;  %v2608_v49 = vld [vmem:[%s3074_s4 + $0x430] ss:$8 sps:$4 sm:$0xff]  }
  0xc0   : > { %1904 = vmatpush1.bf16.msra.mxu0 %v2518_v50  ;;  %v2613_v50 = vld [vmem:[%s3074_s4 + $0x424] ss:$8 sps:$4 sm:$0xff]  }
  0xc1   : > { %1945 = vmatpush1.bf16.msra.mxu1 %v2521_v51  ;;  %1905 = vmatprep.subr.bf16.mxu0 %v2526_v52  ;;  %v2611_v51 = vld [vmem:[%s3074_s4 + $0x420] ss:$8 sps:$4 sm:$0xff]   ;;  %v2616_v52 = vld [vmem:[%s3074_s4 + $0x414] ss:$8 sps:$4 sm:$0xff]  }
  0xc2   : > { %1946 = vmatprep.subr.bf16.mxu1 %v2529_v53  ;;  %v2614_v53 = vld [vmem:[%s3074_s4 + $0x410] ss:$8 sps:$4 sm:$0xff]  }
  0xc4   : > { %1906 = vmatpush1.bf16.msra.mxu0 %v2524_v54  ;;  %v2619_v54 = vld [vmem:[%s3074_s4 + $0x404] ss:$8 sps:$4 sm:$0xff]  }
  0xc5   : > { %1947 = vmatpush1.bf16.msra.mxu1 %v2527_v55  ;;  %1907 = vmatprep.subr.bf16.mxu0 %v2532_v56  ;;  %v2617_v55 = vld [vmem:[%s3074_s4 + $0x400] ss:$8 sps:$4 sm:$0xff]   ;;  %v2192_v56 = vld.sshfl [vmem:[%s3062_s24 + $0x8] sm:$0x1 pattern:$0x75316420] }
  0xc6   : > { %1948 = vmatprep.subr.bf16.mxu1 %v2535_v57  ;;  %v1085_v57 = vrot.slane %v2192_v56, %v3124_v2 }
  0xc8   : > { %1908 = vmatpush1.bf16.msra.mxu0 %v2530_v58 }
  0xc9   : > { %1949 = vmatpush1.bf16.msra.mxu1 %v2533_v59  ;;  %1909 = vmatprep.subr.bf16.mxu0 %v2538_v61 }
  0xca   : > { %1950 = vmatprep.subr.bf16.mxu1 %v2541_v62 }
  0xcc   : > { %1910 = vmatpush1.bf16.msra.mxu0 %v2536_v63 }
  0xcd   : > { %1951 = vmatpush1.bf16.msra.mxu1 %v2539_v0  ;;  %1911 = vmatprep.subr.bf16.mxu0 %v2544_v1 }
  0xce   : > { %1952 = vmatprep.subr.bf16.mxu1 %v2547_v3 }
  0xd0   : > { %1912 = vmatpush1.bf16.msra.mxu0 %v2542_v4 }
  0xd1   : > { %1953 = vmatpush1.bf16.msra.mxu1 %v2545_v5  ;;  %1913 = vmatprep.subr.bf16.mxu0 %v2550_v6 }
  0xd2   : > { %1954 = vmatprep.subr.bf16.mxu1 %v2553_v7 }
  0xd4   : > { %1914 = vmatpush2.bf16.msra.mxu0 %v2548_v8 }
  0xd5   : > { %1955 = vmatpush2.bf16.msra.mxu1 %v2551_v9  ;;  %1915 = vmatprep.subr.bf16.mxu0 %v2556_v10 }
  0xd6   : > { %1956 = vmatprep.subr.bf16.mxu1 %v2559_v11 }
  0xd8   : > { %1916 = vmatpush2.bf16.msra.mxu0 %v2554_v12 }
  0xd9   : > { %1957 = vmatpush2.bf16.msra.mxu1 %v2557_v13  ;;  %1917 = vmatprep.subr.bf16.mxu0 %v2562_v14  ;;  %v2679_v13 = vmov 1983009808  }
  0xda   : > { %1958 = vmatprep.subr.bf16.mxu1 %v2565_v15  ;;  %v2024_v14 = vunpack.c.l.s4 %v2679_v13 }
  0xdc   : > { %1918 = vmatpush2.bf16.msra.mxu0 %v2560_v17 }
  0xdd   : > { %1959 = vmatpush2.bf16.msra.mxu1 %v2563_v18  ;;  %1919 = vmatprep.subr.bf16.mxu0 %v2568_v19  ;;  %v2025_v18 = vunpack.c.0.s8 %v2024_v14 }
  0xde   : > { %1960 = vmatprep.subr.bf16.mxu1 %v2571_v20 }
  0xe0   : > { %1920 = vmatpush2.bf16.msra.mxu0 %v2566_v21 }
  0xe1   : > { %1961 = vmatpush2.bf16.msra.mxu1 %v2569_v22  ;;  %1921 = vmatprep.subr.bf16.mxu0 %v2574_v23 }
  0xe2   : > { %1962 = vmatprep.subr.bf16.mxu1 %v2577_v24 }
  0xe4   : > { %1922 = vmatpush2.bf16.msra.mxu0 %v2572_v25  ;;  %v2028_v25 = vsub.s32 %v2025_v18, %v3116_v60 }
  0xe5   : > { %1963 = vmatpush2.bf16.msra.mxu1 %v2575_v26  ;;  %1923 = vmatprep.subr.bf16.mxu0 %v2580_v27 }
  0xe6   : > { %1964 = vmatprep.subr.bf16.mxu1 %v2583_v28  ;;  %v874_v28 = vld [vmem:[#allocation2] sm:$0xf] }
  0xe8   : > { %1924 = vmatpush2.bf16.msra.mxu0 %v2578_v29 }
  0xe9   : > { %1965 = vmatpush2.bf16.msra.mxu1 %v2581_v30  ;;  %1925 = vmatprep.subr.bf16.mxu0 %v2586_v31 }
  0xea   : > { %1966 = vmatprep.subr.bf16.mxu1 %v2589_v32 }
  0xec   : > { %1926 = vmatpush2.bf16.msra.mxu0 %v2584_v33 }
  0xed   : > { %1967 = vmatpush2.bf16.msra.mxu1 %v2587_v34  ;;  %1927 = vmatprep.subr.bf16.mxu0 %v2592_v35 }
  0xee   : > { %1968 = vmatprep.subr.bf16.mxu1 %v2595_v36 }
  0xf0   : > { %1928 = vmatpush2.bf16.msra.mxu0 %v2590_v37 }
  0xf1   : > { %1969 = vmatpush2.bf16.msra.mxu1 %v2593_v38  ;;  %1979 = vmatprep.subr.bf16.mxu0 %v2598_v39 }
  0xf3   : > { %1930 = vmatmul.mubr.bf16.vlgmr.msra.gmra.mxu0 %v3138_v16  ;;  %v2610_v16 = vld [vmem:[%s3074_s4 + $0x434] ss:$8 sps:$4 sm:$0xff]  }
  0xf4   : > { %1971 = vmatmul.mubr.bf16.vlgmr.msra.gmra.mxu1 %v1069_v40  ;;  %1980 = vmatpush1.bf16.msra.mxu0 %v2596_v41 }
  0xf5   : > { %2011 = vmatprep.mubr.bf16.mxu0 %v2678_v44  ;;  %1981 = vmatprep.subr.bf16.mxu0 %v2601_v42 }
  0xf8   : > { %1982 = vmatpush1.bf16.msra.mxu0 %v2599_v43 }
  0xf9   : > { %1983 = vmatprep.subr.bf16.mxu0 %v2604_v45 }
  0xfc   : > { %1984 = vmatpush1.bf16.msra.mxu0 %v2602_v46 }
  0xfd   : > { %1985 = vmatprep.subr.bf16.mxu0 %v2607_v47 }
 0x100   : > { %1986 = vmatpush1.bf16.msra.mxu0 %v2605_v48 }
 0x101   : > { %1987 = vmatprep.subr.bf16.mxu0 %v2610_v16 }
 0x104   : > { %1988 = vmatpush1.bf16.msra.mxu0 %v2608_v49 }
 0x105   : > { %1989 = vmatprep.subr.bf16.mxu0 %v2613_v50 }
 0x108   : > { %1990 = vmatpush1.bf16.msra.mxu0 %v2611_v51 }
 0x109   : > { %1991 = vmatprep.subr.bf16.mxu0 %v2616_v52 }
 0x10c   : > { %1992 = vmatpush1.bf16.msra.mxu0 %v2614_v53 }
 0x10d   : > { %1993 = vmatprep.subr.bf16.mxu0 %v2619_v54 }
 0x110   : > { %1994 = vmatpush1.bf16.msra.mxu0 %v2617_v55 }
 0x113   : > { %2012 = vmatmul.mubr.bf16.vlgmr.msra.gmra.mxu0 %v1085_v57 }
 0x173   : > { %v1849_v58 = vpop.f32.mrf.mxu0 }
 0x174   : > { %v1890_v59 = vpop.f32.mrf.mxu1 }
 0x175   : > { %v1891_v61 = vadd.f32 %v1890_v59, %v1849_v58  ;;  %v1851_v62 = vpop.f32.mrf.mxu0 }
 0x176   : > { %v1892_v63 = vpop.f32.mrf.mxu1 }
 0x177   : > { %v1893_v0 = vadd.f32 %v1892_v63, %v1851_v62  ;;  %v1853_v1 = vpop.f32.mrf.mxu0 }
 0x178   : > { %v1894_v3 = vpop.f32.mrf.mxu1 }
 0x179   : > { %v1854_v4 = vpop.f32.mrf.mxu0 }
 0x17a   : > { %v1895_v5 = vpop.f32.mrf.mxu1 }
 0x1b3   : > { %v1931_v6 = vpop.f32.mrf.mxu0 }
 0x1b4   : > { %v1972_v7 = vpop.f32.mrf.mxu1  ;;  %v1932_v15 = vadd.f32 %v1931_v6, %v1891_v61 }
 0x1b5   : > { %v1933_v8 = vpop.f32.mrf.mxu0 }
 0x1b6   : > { %v1974_v9 = vpop.f32.mrf.mxu1  ;;  %v1934_v17 = vadd.f32 %v1933_v8, %v1893_v0  ;;  %v1973_v20 = vadd.f32 %v1972_v7, %v1932_v15 }
 0x1b7   : > { %v1935_v10 = vpop.f32.mrf.mxu0 }
 0x1b8   : > { %v1976_v11 = vpop.f32.mrf.mxu1  ;;  %v1975_v21 = vadd.f32 %v1974_v9, %v1934_v17 }
 0x1b9   : > { %v1936_v12 = vpop.f32.mrf.mxu0 }
 0x1ba   : > { %v1977_v2 = vpop.f32.mrf.mxu1 }
 0x1d3   : > { %v2013_v19 = vpop.f32.mrf.mxu0 }
 0x1d4   : > { %v2014_v23 = vadd.f32 %v2013_v19, %v1973_v20 }
 0x1d5   : > { %v2015_v22 = vpop.f32.mrf.mxu0 }
 0x1d6   : > { %v2016_v24 = vadd.f32 %v2015_v22, %v1975_v21 }
 0x1d7   : > { %v2017_v26 = vpop.f32.mrf.mxu0 }
 0x1d8   : > { %v2022_v27 = vcombine.low %v2014_v23, %v2016_v24 }
 0x1d9   : > { %v2018_v29 = vpop.f32.mrf.mxu0 }
 0x1da   : > { %v2029_v30 = vrot.slane %v2022_v27, %v2028_v25  ;;  %2036 = sbr.rel (%p2337_p13) target bundleno = 492 (0x1ec), region = 78 }
 0x1dc   : > { %v2031_v31 = vadd.f32 %v2029_v30, %v874_v28 }
 0x1de   : > { %2032 = vst [vmem:[#allocation2] sm:$0xf] %v2031_v31 }
 0x1df   : > { %v2038_v32 = vld [vmem:[%s856_s28] sm:$0x3]  ;;  %v2042_v33 = vsub.s32 0, %v3116_v60  ;;  %v2046_v34 = vsub.s32 1, %v3116_v60 }
 0x1e1   : > { %v2043_v35 = vrot.slane %v2038_v32, %v2042_v33  ;;  %v2047_v36 = vrot.slane %v2038_v32, %v2046_v34 }
 0x1e3   : > { %v2048_v37 = vcombine.low %v2043_v35, %v2047_v36 }
 0x1e5   : > { %v2037_v38 = vld [vmem:[#allocation2] sm:$0xf]  ;;  %v2055_v39 = vrot.slane %v2048_v37, %v2028_v25 }
 0x1e7   : > { %v2057_v40 = vadd.f32 %v2055_v39, %v2037_v38 }
 0x1e9   : > { %v2058_v41 = vmax.f32 %v2057_v40, 0.0 }
 0x1eb   : > { %2059 = vst [vmem:[%s3072_s15] sm:$0xf] %v2058_v41 }
 0x1ec PF: > { %s13_s18 = sadd.s32 1, %s2674_s18   ;;  %s3275_s12 = smov %s2654_s13 }
 0x1ed   : > { %p10_p0 = scmp.ge.s32.totalorder %s13_s18, 6   ;;  %s3276_s13 = smov %s2751_s25 }
 0x1ee   : > { %s3277_s14 = smov %s2666_s16  ;;  %s3278_s15 = smov %s2670_s17 }
 0x1ef   : > { %s3279_s16 = smov %s3282_s19  ;;  %s3280_s17 = smov %s3286_s20 }
 0x1f0   :  { %12 = sbr.rel (!%p10_p0) target bundleno = 4 (0x4), region = 119 }

// kernel: resnet34_forward.70
= control target key start
LH: loop header
LB: loop body
LE: loop exit
PB: predicated region body
PF: predicated region fallthrough
CT: control target
= control target key end

     0   :  { %s1046_s12 = smov 0   ;;  %s1048_s13 = smov 0   ;;  %s1230_s0 = inlined_call_operand.vmem [shape: bf16[2,256], index: 0, kind: input, shape index: {}]   ;;  %s1231_s1 = inlined_call_operand.vmem [shape: bf16[256,512], index: 1, kind: input, shape index: {}]   ;;  %s1232_s2 = inlined_call_operand.vmem [shape: f32[1,512], index: 2, kind: input, shape index: {}]   ;;  %s1233_s3 = inlined_call_operand.vmem [shape: f32[2,512], index: 3, kind: output, shape index: {}]  }
   0x1   :  { %s1050_s14 = smov 0   ;;  %s1052_s15 = smov 0  }
   0x2   :  { %s1054_s16 = smov 0  }
   0x3 LB: > { %s28_s17 = sadd.s32 1, %s1017_s15  ;;  %p76_p1 = scmp.ne.s32.totalorder %s1009_s13, %s1005_s12  ;;  %s1021_s16 = sphi %s1054_s16, %s13_s16   ;;  %s1017_s15 = sphi %s1052_s15, %s1237_s15   ;;  %s1013_s14 = sphi %s1050_s14, %s1236_s14   ;;  %s1009_s13 = sphi %s1048_s13, %s1235_s13   ;;  %s1005_s12 = sphi %s1046_s12, %s1234_s12  }
   0x4   : > { %p30_p0 = scmp.ge.s32.totalorder %s28_s17, 2  ;;  %p77_p2 = scmp.eq.s32.totalorder %s1021_s16, 0 }
   0x5   : > { %s69_s19 = sadd.s32 1, %s1009_s13  ;;  %p847_p5 = scmp.ge.s32.totalorder %s1021_s16, 2 }
   0x6   : > { %s1239_s17 = smov (%p30_p0, %s28_s17), 0  ;;  %p78_p3 = por %p77_p2, %p76_p1 }
   0x7   : > { %s65_s18 = ssub.s32 %s1017_s15, %s1239_s17  ;;  %168 = sbr.rel (%p847_p5) target bundleno = 32 (0x20), region = 20 }
   0x8   : > { %p67_p4 = scmp.eq.s32.totalorder %s65_s18, 0 }
   0xa   : > { %s1081_s20 = scalar_select %p67_p4, %s1009_s13, %s69_s19  }
   0xc   : > { %171 = sbr.rel (!%p78_p3) target bundleno = 32 (0x20), region = 24  ;;  %s173_s21 = sand.u32 (%p78_p3), 1, %s1009_s13  }
   0xd   : > { %s891_s22 = sshll.u32 (%p78_p3), %s1017_s15, 3  ;;  %s848_s23 = sshll.u32 (%p78_p3), %s173_s21, 8 }
   0xe   : > { %s1089_s26 = scalar_lea.vmem (%p78_p3), %s1231_s1, %s891_s22  ;;  %s1094_s27 = scalar_lea.vmem (%p78_p3), [#allocation3], %s848_s23 }
   0xf   : > { %v272_v0 = vld [vmem:[%s1089_s26] sm:$0xff] (%p78_p3)  ;;  %v274_v1 = vld [vmem:[%s1089_s26 + $0x10] sm:$0xff] (%p78_p3) }
  0x10   : > { %v276_v2 = vld [vmem:[%s1089_s26 + $0x20] sm:$0xff] (%p78_p3)  ;;  %273 = vst [vmem:[%s1094_s27] sm:$0xff] (%p78_p3), %v272_v0  ;;  %275 = vst [vmem:[%s1094_s27 + $0x8] sm:$0xff] (%p78_p3), %v274_v1  ;;  %v278_v3 = vld [vmem:[%s1089_s26 + $0x30] sm:$0xff] (%p78_p3) }
  0x11   : > { %277 = vst [vmem:[%s1094_s27 + $0x10] sm:$0xff] %v276_v2  ;;  %v280_v4 = vld [vmem:[%s1089_s26 + $0x40] sm:$0xff]  ;;  %v282_v5 = vld [vmem:[%s1089_s26 + $0x50] sm:$0xff]  ;;  %279 = vst [vmem:[%s1094_s27 + $0x18] sm:$0xff] %v278_v3 }
  0x12   : > { %281 = vst [vmem:[%s1094_s27 + $0x20] sm:$0xff] %v280_v4  ;;  %283 = vst [vmem:[%s1094_s27 + $0x28] sm:$0xff] %v282_v5  ;;  %v284_v6 = vld [vmem:[%s1089_s26 + $0x60] sm:$0xff]  ;;  %v286_v7 = vld [vmem:[%s1089_s26 + $0x70] sm:$0xff] }
  0x13   : > { %v288_v8 = vld [vmem:[%s1089_s26 + $0x80] sm:$0xff]  ;;  %285 = vst [vmem:[%s1094_s27 + $0x30] sm:$0xff] %v284_v6  ;;  %287 = vst [vmem:[%s1094_s27 + $0x38] sm:$0xff] %v286_v7  ;;  %v290_v9 = vld [vmem:[%s1089_s26 + $0x90] sm:$0xff] }
  0x14   : > { %289 = vst [vmem:[%s1094_s27 + $0x40] sm:$0xff] %v288_v8  ;;  %v292_v10 = vld [vmem:[%s1089_s26 + $0xa0] sm:$0xff]  ;;  %v294_v11 = vld [vmem:[%s1089_s26 + $0xb0] sm:$0xff]  ;;  %291 = vst [vmem:[%s1094_s27 + $0x48] sm:$0xff] %v290_v9 }
  0x15   : > { %293 = vst [vmem:[%s1094_s27 + $0x50] sm:$0xff] %v292_v10  ;;  %295 = vst [vmem:[%s1094_s27 + $0x58] sm:$0xff] %v294_v11  ;;  %v296_v12 = vld [vmem:[%s1089_s26 + $0xc0] sm:$0xff]  ;;  %v298_v13 = vld [vmem:[%s1089_s26 + $0xd0] sm:$0xff] }
  0x16   : > { %v300_v14 = vld [vmem:[%s1089_s26 + $0xe0] sm:$0xff]  ;;  %297 = vst [vmem:[%s1094_s27 + $0x60] sm:$0xff] %v296_v12  ;;  %299 = vst [vmem:[%s1094_s27 + $0x68] sm:$0xff] %v298_v13  ;;  %v302_v15 = vld [vmem:[%s1089_s26 + $0xf0] sm:$0xff] }
  0x17   : > { %301 = vst [vmem:[%s1094_s27 + $0x70] sm:$0xff] %v300_v14  ;;  %v304_v16 = vld [vmem:[%s1089_s26 + $0x100] sm:$0xff]  ;;  %v306_v17 = vld [vmem:[%s1089_s26 + $0x110] sm:$0xff]  ;;  %303 = vst [vmem:[%s1094_s27 + $0x78] sm:$0xff] %v302_v15 }
  0x18   : > { %305 = vst [vmem:[%s1094_s27 + $0x80] sm:$0xff] %v304_v16  ;;  %307 = vst [vmem:[%s1094_s27 + $0x88] sm:$0xff] %v306_v17  ;;  %v308_v18 = vld [vmem:[%s1089_s26 + $0x120] sm:$0xff]  ;;  %v310_v19 = vld [vmem:[%s1089_s26 + $0x130] sm:$0xff] }
  0x19   : > { %v312_v20 = vld [vmem:[%s1089_s26 + $0x140] sm:$0xff]  ;;  %309 = vst [vmem:[%s1094_s27 + $0x90] sm:$0xff] %v308_v18  ;;  %311 = vst [vmem:[%s1094_s27 + $0x98] sm:$0xff] %v310_v19  ;;  %v314_v21 = vld [vmem:[%s1089_s26 + $0x150] sm:$0xff] }
  0x1a   : > { %313 = vst [vmem:[%s1094_s27 + $0xa0] sm:$0xff] %v312_v20  ;;  %v316_v22 = vld [vmem:[%s1089_s26 + $0x160] sm:$0xff]  ;;  %v318_v23 = vld [vmem:[%s1089_s26 + $0x170] sm:$0xff]  ;;  %315 = vst [vmem:[%s1094_s27 + $0xa8] sm:$0xff] %v314_v21 }
  0x1b   : > { %317 = vst [vmem:[%s1094_s27 + $0xb0] sm:$0xff] %v316_v22  ;;  %319 = vst [vmem:[%s1094_s27 + $0xb8] sm:$0xff] %v318_v23  ;;  %v320_v24 = vld [vmem:[%s1089_s26 + $0x180] sm:$0xff]  ;;  %v322_v25 = vld [vmem:[%s1089_s26 + $0x190] sm:$0xff] }
  0x1c   : > { %v324_v26 = vld [vmem:[%s1089_s26 + $0x1a0] sm:$0xff]  ;;  %321 = vst [vmem:[%s1094_s27 + $0xc0] sm:$0xff] %v320_v24  ;;  %323 = vst [vmem:[%s1094_s27 + $0xc8] sm:$0xff] %v322_v25  ;;  %v326_v27 = vld [vmem:[%s1089_s26 + $0x1b0] sm:$0xff] }
  0x1d   : > { %325 = vst [vmem:[%s1094_s27 + $0xd0] sm:$0xff] %v324_v26  ;;  %v328_v28 = vld [vmem:[%s1089_s26 + $0x1c0] sm:$0xff]  ;;  %v330_v29 = vld [vmem:[%s1089_s26 + $0x1d0] sm:$0xff]  ;;  %327 = vst [vmem:[%s1094_s27 + $0xd8] sm:$0xff] %v326_v27 }
  0x1e   : > { %329 = vst [vmem:[%s1094_s27 + $0xe0] sm:$0xff] %v328_v28  ;;  %331 = vst [vmem:[%s1094_s27 + $0xe8] sm:$0xff] %v330_v29  ;;  %v332_v30 = vld [vmem:[%s1089_s26 + $0x1e0] sm:$0xff]  ;;  %v334_v31 = vld [vmem:[%s1089_s26 + $0x1f0] sm:$0xff] }
  0x1f   : > { %333 = vst [vmem:[%s1094_s27 + $0xf0] sm:$0xff] %v332_v30  ;;  %335 = vst [vmem:[%s1094_s27 + $0xf8] sm:$0xff] %v334_v31 }
  0x20 PF: > { %p851_p6 = scmp.ge.s32.totalorder %s1021_s16, 1  ;;  %p348_p7 = scmp.lt.s32.totalorder %s1021_s16, 3 }
  0x22   : > { %p349_p8 = pnand %p851_p6, %p348_p7 }
  0x23   : > { %s355_s28 = sand.u32 (!%p349_p8), 1, %s1005_s12   ;;  %s853_s6 = sshll.u32 (!%p349_p8), %s1013_s14, 1 }
  0x24   : > { %352 = sbr.rel (%p349_p8) target bundleno = 319 (0x13f), region = 66  ;;  %s852_s4 = sshll.u32 (!%p349_p8), %s355_s28, 8 }
  0x25   : > { %s1167_s5 = scalar_lea.vmem (!%p349_p8), [#allocation3], %s852_s4  ;;  %p406_p9 = scmp.lt.s32.totalorder (!%p349_p8), %s853_s6, 3 }
  0x29   : > { %v1163_v32 = vld.sshfl [vmem:[%s1230_s0] sm:$0x11 pattern:$0x75316420]  ;;  %v471_v33 = vlaneseq  ;;  %v1023_v34 = vmov 1966171168  }
  0x2a   : > { %v469_v35 = vunpack.c.l.s4 %v1023_v34  ;;  %v935_v37 = vld [vmem:[%s1167_s5 + $0x74] ss:$8 sps:$4 sm:$0xff]   ;;  %v937_v38 = vld [vmem:[%s1167_s5 + $0x70] ss:$8 sps:$4 sm:$0xff]   ;;  %v467_v39 = vcombine.high %v1163_v32, %v1163_v32  ;;  %v938_v41 = vld [vmem:[%s1167_s5 + $0x64] ss:$8 sps:$4 sm:$0xff]  }
  0x2b   : > { %v1165_v36 = vshrl.u32 %v471_v33, 7  ;;  %644 = vmatprep.subr.bf16.mxu0 %v935_v37  ;;  %v940_v42 = vld [vmem:[%s1167_s5 + $0x60] ss:$8 sps:$4 sm:$0xff]   ;;  %v941_v44 = vld [vmem:[%s1167_s5 + $0x54] ss:$8 sps:$4 sm:$0xff]   ;;  %v1024_v10 = vmov 0.0  }
  0x2c   : > { %v470_v40 = vunpack.c.0.s8 %v469_v35  ;;  %645 = vmatpush1.bf16.msra.mxu0 %v937_v38  ;;  %v943_v46 = vld [vmem:[%s1167_s5 + $0x50] ss:$8 sps:$4 sm:$0xff]   ;;  %v944_v47 = vld [vmem:[%s1167_s5 + $0x44] ss:$8 sps:$4 sm:$0xff]   ;;  %v946_v48 = vld [vmem:[%s1167_s5 + $0x40] ss:$8 sps:$4 sm:$0xff]  }
  0x2d   : > { %646 = vmatprep.subr.bf16.mxu0 %v938_v41  ;;  %v947_v49 = vld [vmem:[%s1167_s5 + $0x34] ss:$8 sps:$4 sm:$0xff]   ;;  %v949_v50 = vld [vmem:[%s1167_s5 + $0x30] ss:$8 sps:$4 sm:$0xff]   ;;  %v950_v51 = vld [vmem:[%s1167_s5 + $0x24] ss:$8 sps:$4 sm:$0xff]  }
  0x2e   : > { %v473_v43 = vsub.s32 %v470_v40, %v1165_v36  ;;  %v952_v52 = vld [vmem:[%s1167_s5 + $0x20] ss:$8 sps:$4 sm:$0xff]   ;;  %v953_v53 = vld [vmem:[%s1167_s5 + $0x14] ss:$8 sps:$4 sm:$0xff]   ;;  %v955_v54 = vld [vmem:[%s1167_s5 + $0x10] ss:$8 sps:$4 sm:$0xff]  }
  0x2f   : > { %v956_v55 = vld [vmem:[%s1167_s5 + $0x4] ss:$8 sps:$4 sm:$0xff]   ;;  %v958_v56 = vld [vmem:[%s1167_s5] ss:$8 sps:$4 sm:$0xff]   ;;  %v959_v57 = vld [vmem:[%s1167_s5 + $0xf4] ss:$8 sps:$4 sm:$0xff]  }
  0x30   : > { %v481_v45 = vrot.slane %v467_v39, %v473_v43  ;;  %647 = vmatpush1.bf16.msra.mxu0 %v940_v42  ;;  %v961_v58 = vld [vmem:[%s1167_s5 + $0xf0] ss:$8 sps:$4 sm:$0xff]   ;;  %v962_v59 = vld [vmem:[%s1167_s5 + $0xe4] ss:$8 sps:$4 sm:$0xff]   ;;  %v964_v60 = vld [vmem:[%s1167_s5 + $0xe0] ss:$8 sps:$4 sm:$0xff]   ;;  %v474_v9 = vrot.slane %v1163_v32, %v473_v43 }
  0x31   : > { %648 = vmatprep.subr.bf16.mxu0 %v941_v44  ;;  %v965_v61 = vld [vmem:[%s1167_s5 + $0xd4] ss:$8 sps:$4 sm:$0xff]   ;;  %v967_v62 = vld [vmem:[%s1167_s5 + $0xd0] ss:$8 sps:$4 sm:$0xff]   ;;  %v968_v63 = vld [vmem:[%s1167_s5 + $0xc4] ss:$8 sps:$4 sm:$0xff]  }
  0x32   : > { %676 = vmatprep.mubr.bf16.mxu0 %v481_v45  ;;  %v970_v0 = vld [vmem:[%s1167_s5 + $0xc0] ss:$8 sps:$4 sm:$0xff]   ;;  %v971_v1 = vld [vmem:[%s1167_s5 + $0xb4] ss:$8 sps:$4 sm:$0xff]   ;;  %v973_v2 = vld [vmem:[%s1167_s5 + $0xb0] ss:$8 sps:$4 sm:$0xff]  }
  0x33   : > { %v974_v3 = vld [vmem:[%s1167_s5 + $0xa4] ss:$8 sps:$4 sm:$0xff]   ;;  %v976_v4 = vld [vmem:[%s1167_s5 + $0xa0] ss:$8 sps:$4 sm:$0xff]   ;;  %v977_v5 = vld [vmem:[%s1167_s5 + $0x94] ss:$8 sps:$4 sm:$0xff]  }
  0x34   : > { %649 = vmatpush1.bf16.msra.mxu0 %v943_v46  ;;  %v979_v6 = vld [vmem:[%s1167_s5 + $0x90] ss:$8 sps:$4 sm:$0xff]   ;;  %v980_v7 = vld [vmem:[%s1167_s5 + $0x84] ss:$8 sps:$4 sm:$0xff]   ;;  %v982_v8 = vld [vmem:[%s1167_s5 + $0x80] ss:$8 sps:$4 sm:$0xff]  }
  0x35   : > { %650 = vmatprep.subr.bf16.mxu0 %v944_v47  ;;  %424 = vst [vmem:[#allocation2] sm:$0xf] %v1024_v10  ;;  %v1025_v11 = vmov 1983009808   ;;  %s1241_s6 = smov (!%p406_p9, %s853_s6), 3  ;;  %v706_v16 = vsub.s32 0, %v1165_v36 }
  0x36   : > { %v689_v12 = vunpack.c.l.s4 %v1025_v11  ;;  %s408_s9 = scalar_lea.vmem %s1232_s2, %s1241_s6  ;;  %v710_v17 = vsub.s32 1, %v1165_v36  ;;  %s855_s10 = sshll.u32 %s1241_s6, 1 }
  0x37   : > { %v702_v19 = vld [vmem:[%s408_s9] sm:$0x3]  ;;  %s418_s14 = scalar_lea.vmem %s1233_s3, %s855_s10 }
  0x38   : > { %651 = vmatpush1.bf16.msra.mxu0 %v946_v48  ;;  %v690_v13 = vunpack.c.0.s8 %v689_v12  ;;  %v707_v24 = vrot.slane %v702_v19, %v706_v16  ;;  %v711_v25 = vrot.slane %v702_v19, %v710_v17 }
  0x39   : > { %652 = vmatprep.subr.bf16.mxu0 %v947_v49 }
  0x3a   : > { %v693_v15 = vsub.s32 %v690_v13, %v1165_v36  ;;  %v712_v28 = vcombine.low %v707_v24, %v711_v25 }
  0x3c   : > { %653 = vmatpush1.bf16.msra.mxu0 %v949_v50  ;;  %v425_v21 = vld [vmem:[#allocation2] sm:$0xf]  ;;  %v719_v29 = vrot.slane %v712_v28, %v693_v15 }
  0x3d   : > { %654 = vmatprep.subr.bf16.mxu0 %v950_v51 }
  0x40   : > { %655 = vmatpush1.bf16.msra.mxu0 %v952_v52 }
  0x41   : > { %656 = vmatprep.subr.bf16.mxu0 %v953_v53 }
  0x44   : > { %657 = vmatpush1.bf16.msra.mxu0 %v955_v54 }
  0x45   : > { %658 = vmatprep.subr.bf16.mxu0 %v956_v55 }
  0x48   : > { %659 = vmatpush1.bf16.msra.mxu0 %v958_v56 }
  0x49   : > { %660 = vmatprep.subr.bf16.mxu0 %v959_v57 }
  0x4c   : > { %661 = vmatpush2.bf16.msra.mxu0 %v961_v58 }
  0x4d   : > { %662 = vmatprep.subr.bf16.mxu0 %v962_v59 }
  0x50   : > { %663 = vmatpush2.bf16.msra.mxu0 %v964_v60 }
  0x51   : > { %664 = vmatprep.subr.bf16.mxu0 %v965_v61 }
  0x54   : > { %665 = vmatpush2.bf16.msra.mxu0 %v967_v62 }
  0x55   : > { %666 = vmatprep.subr.bf16.mxu0 %v968_v63 }
  0x58   : > { %667 = vmatpush2.bf16.msra.mxu0 %v970_v0 }
  0x59   : > { %668 = vmatprep.subr.bf16.mxu0 %v971_v1 }
  0x5c   : > { %669 = vmatpush2.bf16.msra.mxu0 %v973_v2 }
  0x5d   : > { %670 = vmatprep.subr.bf16.mxu0 %v974_v3 }
  0x60   : > { %671 = vmatpush2.bf16.msra.mxu0 %v976_v4 }
  0x61   : > { %672 = vmatprep.subr.bf16.mxu0 %v977_v5 }
  0x64   : > { %673 = vmatpush2.bf16.msra.mxu0 %v979_v6 }
  0x65   : > { %674 = vmatprep.subr.bf16.mxu0 %v980_v7 }
  0x68   : > { %675 = vmatpush2.bf16.msra.mxu0 %v982_v8 }
  0x6b   : > { %677 = vmatmul.mubr.bf16.vlgmr.msra.gmra.mxu0 %v474_v9 }
 0x12b   : > { %v678_v14 = vpop.f32.mrf.mxu0 }
 0x12d   : > { %v680_v18 = vpop.f32.mrf.mxu0 }
 0x12e   : > { %v687_v20 = vcombine.low %v678_v14, %v680_v18 }
 0x12f   : > { %v682_v22 = vpop.f32.mrf.mxu0 }
 0x130   : > { %v694_v23 = vrot.slane %v687_v20, %v693_v15 }
 0x131   : > { %v683_v26 = vpop.f32.mrf.mxu0 }
 0x132   : > { %v696_v27 = vadd.f32 %v694_v23, %v425_v21 }
 0x134   : > { %697 = vst [vmem:[#allocation2] sm:$0xf] %v696_v27 }
 0x13b   : > { %v701_v30 = vld [vmem:[#allocation2] sm:$0xf] }
 0x13c   : > { %v721_v31 = vadd.f32 %v719_v29, %v701_v30 }
 0x13e   : > { %722 = vst [vmem:[%s418_s14] sm:$0xf] %v721_v31 }
 0x13f PF: > { %s13_s16 = sadd.s32 1, %s1021_s16   ;;  %s1234_s12 = smov %s1009_s13 }
 0x140   : > { %p10_p10 = scmp.ge.s32.totalorder %s13_s16, 4   ;;  %s1235_s13 = smov %s1081_s20 }
 0x141   : > { %s1236_s14 = smov %s1017_s15  ;;  %s1237_s15 = smov %s1239_s17 }
 0x142   :  { %12 = sbr.rel (!%p10_p10) target bundleno = 3 (0x3), region = 119 }

// kernel: resnet34_forward.76
= control target key start
LH: loop header
LB: loop body
LE: loop exit
PB: predicated region body
PF: predicated region fallthrough
CT: control target
= control target key end

     0   :  { %s305_s6 = smov 0   ;;  %s307_s7 = smov 0   ;;  %s359_s0 = inlined_call_operand.vmem [shape: f32[2,1,512], index: 0, kind: input, shape index: {}]   ;;  %s360_s1 = inlined_call_operand.vmem [shape: f32[2,512], index: 1, kind: output, shape index: {}]  }
   0x1   :  { %s309_s8 = smov 0  }
   0x2 LB: > { %s234_s9 = sadd.s32 4294967295, %s292_s8   ;;  %s322_s10 = sadd.s32 1, %s292_s8   ;;  %s292_s8 = sphi %s309_s8, %s363_s8   ;;  %s288_s7 = sphi %s307_s7, %s362_s7   ;;  %s284_s6 = sphi %s305_s6, %s361_s6  }
   0x3   : > { %s15_s11 = ssub.s32 %s292_s8, %s322_s10  ;;  %s18_s12 = sadd.s32 1, %s288_s7 }
   0x4   : > { %p16_p0 = scmp.eq.s32.totalorder %s15_s11, 0  ;;  %p25_p1 = scmp.ne.s32.totalorder %s288_s7, %s284_s6 }
   0x5   : > { %p26_p2 = scmp.eq.s32.totalorder %s292_s8, 0  ;;  %p237_p4 = scmp.ge.s32.totalorder %s292_s8, 4 }
   0x6   : > { %s331_s13 = scalar_select %p16_p0, %s288_s7, %s18_s12  }
   0x7   : > { %p27_p3 = por %p26_p2, %p25_p1  ;;  %77 = sbr.rel (%p237_p4) target bundleno = 17 (0x11), region = 16 }
   0xc   : > { %80 = sbr.rel (!%p27_p3) target bundleno = 17 (0x11), region = 20  ;;  %s82_s14 = sand.u32 (%p27_p3), 1, %s288_s7  }
   0xd   : > { %s85_s17 = scalar_lea.vmem (%p27_p3), %s359_s0, %s292_s8  ;;  %s238_s18 = sshll.u32 (%p27_p3), %s82_s14, 1 }
   0xe   : > { %v102_v0 = vld [vmem:[%s85_s17] sm:$0x1] (%p27_p3)  ;;  %v104_v1 = vld [vmem:[%s85_s17 + $0x4] sm:$0x1] (%p27_p3)  ;;  %s84_s19 = scalar_lea.vmem (%p27_p3), [#allocation2], %s238_s18 }
   0xf   : > { %103 = vst [vmem:[%s84_s19] sm:$0x1] (%p27_p3), %v102_v0  ;;  %105 = vst [vmem:[%s84_s19 + $0x1] sm:$0x1] (%p27_p3), %v104_v1 }
  0x11 PF: > { %p239_p5 = scmp.ge.s32.totalorder %s292_s8, 1  ;;  %p124_p6 = scmp.lt.s32.totalorder %s292_s8, 5 }
  0x13   : > { %p125_p7 = pnand %p239_p5, %p124_p6 }
  0x14   : > { %s131_s20 = sand.u32 (!%p125_p7), 1, %s284_s6   ;;  %p149_p8 = scmp.lt.s32.totalorder (!%p125_p7), %s234_s9, 3 }
  0x15   : > { %128 = sbr.rel (%p125_p7) target bundleno = 36 (0x24), region = 54  ;;  %s240_s21 = sshll.u32 (!%p125_p7), %s131_s20, 1 }
  0x16   : > { %s133_s22 = scalar_lea.vmem (!%p125_p7), [#allocation2], %s240_s21 }
  0x1a   : > { %v163_v2 = vlaneseq  ;;  %v294_v3 = vmov 1966171168   ;;  %s365_s9 = smov (!%p149_p8, %s234_s9), 3  ;;  %v153_v6 = vld [vmem:[%s133_s22] sm:$0x1] }
  0x1b   : > { %v161_v4 = vunpack.c.l.s4 %v294_v3  ;;  %v154_v7 = vld [vmem:[%s133_s22 + $0x1] sm:$0x1]  ;;  %s241_s23 = sshll.u32 %s365_s9, 1 }
  0x1c   : > { %v164_v5 = vshrl.u32 %v163_v2, 7  ;;  %v159_v9 = vcombine.low %v153_v6, %v154_v7  ;;  %s152_s26 = scalar_lea.vmem %s360_s1, %s241_s23 }
  0x1d   : > { %v162_v8 = vunpack.c.0.s8 %v161_v4 }
  0x1f   : > { %v165_v10 = vsub.s32 %v162_v8, %v164_v5 }
  0x21   : > { %v166_v11 = vrot.slane %v159_v9, %v165_v10 }
  0x23   : > { %242 = vst.sshfl [vmem:[%s152_s26] sm:$0x5 pattern:$0x73625140] %v166_v11 }
  0x24 PF: > { %p8_p9 = scmp.ge.s32.totalorder %s322_s10, 6   ;;  %s361_s6 = smov %s288_s7 }
  0x25   : > { %s362_s7 = smov %s331_s13  ;;  %s363_s8 = smov %s322_s10 }
  0x26   :  { %10 = sbr.rel (!%p8_p9) target bundleno = 2 (0x2), region = 93 }

// kernel: resnet34_forward.71
= control target key start
LH: loop header
LB: loop body
LE: loop exit
PB: predicated region body
PF: predicated region fallthrough
CT: control target
= control target key end

     0   :  { %s2790_s15 = smov 0   ;;  %s2792_s16 = smov 0   ;;  %s3367_s0 = inlined_call_operand.vmem [shape: bf16[2,4608], index: 0, kind: input, shape index: {}]   ;;  %s3368_s1 = inlined_call_operand.vmem [shape: bf16[4608,512], index: 1, kind: input, shape index: {}]   ;;  %s3369_s2 = inlined_call_operand.vmem [shape: f32[1,512], index: 2, kind: input, shape index: {}]   ;;  %s3370_s3 = inlined_call_operand.vmem [shape: f32[2,512], index: 3, kind: input, shape index: {}]   ;;  %s3371_s4 = inlined_call_operand.vmem [shape: f32[2,512], index: 4, kind: output, shape index: {}]  }
   0x1   :  { %s2794_s17 = smov 0   ;;  %s2796_s18 = smov 0  }
   0x2   :  { %s2798_s19 = smov 0   ;;  %s2800_s20 = smov 0  }
   0x3   :  { %s2802_s21 = smov 0  }
   0x4 LB: > { %s26_s22 = sadd.s32 1, %s2751_s19  ;;  %s29_s23 = sadd.s32 1, %s2755_s20  ;;  %s2759_s21 = sphi %s2802_s21, %s14_s21   ;;  %s2755_s20 = sphi %s2800_s20, %s3377_s20   ;;  %s2751_s19 = sphi %s2798_s19, %s3376_s19   ;;  %s2747_s18 = sphi %s2796_s18, %s3375_s18   ;;  %s2743_s17 = sphi %s2794_s17, %s3374_s17   ;;  %s2739_s16 = sphi %s2792_s16, %s3373_s16   ;;  %s2735_s15 = sphi %s2790_s15, %s3372_s15  }
   0x5   : > { %p27_p0 = scmp.ge.s32.totalorder %s26_s22, 4  ;;  %p77_p1 = scmp.ne.s32.totalorder %s2739_s16, %s2735_s15 }
   0x6   : > { %p78_p2 = scmp.eq.s32.totalorder %s2759_s21, 0  ;;  %s70_s27 = sadd.s32 1, %s2739_s16 }
   0x7   : > { %s3379_s22 = smov (%p27_p0, %s26_s22), 0  ;;  %s3381_s23 = smov (!%p27_p0, %s29_s23), %s2755_s20 }
   0x8   : > { %p79_p3 = por %p78_p2, %p77_p1  ;;  %p31_p4 = scmp.ge.s32.totalorder %s3381_s23, 2 }
   0x9   : > { %s65_s24 = ssub.s32 %s2751_s19, %s3379_s22  ;;  %p2266_p6 = scmp.ge.s32.totalorder %s2759_s21, 8 }
   0xa   : > { %s3383_s23 = smov (%p31_p4, %s3381_s23), 0 }
   0xb   : > { %s66_s25 = ssub.s32 %s2755_s20, %s3383_s23  ;;  %185 = sbr.rel (%p2266_p6) target bundleno = 96 (0x60), region = 16 }
   0xc   : > { %s67_s26 = sor.u32 %s66_s25, %s65_s24 }
   0xd   : > { %p68_p5 = scmp.eq.s32.totalorder %s67_s26, 0 }
   0xf   : > { %s2841_s28 = scalar_select %p68_p5, %s2739_s16, %s70_s27  }
  0x10   : > { %200 = sbr.rel (!%p79_p3) target bundleno = 96 (0x60), region = 24  ;;  %s202_s29 = sand.u32 (%p79_p3), 1, %s2739_s16  }
  0x11   : > { %s2426_s30 = smul.u32 (%p79_p3), 1152, %s202_s29  ;;  %s2267_s5 = sshll.u32 (%p79_p3), %s2755_s20, 1 }
  0x12   : > { %s2425_s6 = smul.u32 (%p79_p3), 576, %s2751_s19 }
  0x13   : > { %s2855_s12 = scalar_lea.vmem (%p79_p3), [#allocation3], %s2426_s30 }
  0x14   : > { %s208_s7 = sadd.s32 (%p79_p3), %s2425_s6, %s2267_s5 }
  0x15   : > { %s2269_s8 = sshll.u32 %s208_s7, 2 }
  0x16   : > { %s2850_s11 = scalar_lea.vmem %s3368_s1, %s2269_s8 }
  0x17   : > { %v525_v0 = vld [vmem:[%s2850_s11] sm:$0xff]  ;;  %v527_v1 = vld [vmem:[%s2850_s11 + $0x10] sm:$0xff] }
  0x18   : > { %v529_v2 = vld [vmem:[%s2850_s11 + $0x20] sm:$0xff]  ;;  %526 = vst [vmem:[%s2855_s12] sm:$0xff] %v525_v0  ;;  %528 = vst [vmem:[%s2855_s12 + $0x8] sm:$0xff] %v527_v1  ;;  %v531_v3 = vld [vmem:[%s2850_s11 + $0x30] sm:$0xff] }
  0x19   : > { %530 = vst [vmem:[%s2855_s12 + $0x10] sm:$0xff] %v529_v2  ;;  %v533_v4 = vld [vmem:[%s2850_s11 + $0x40] sm:$0xff]  ;;  %v535_v5 = vld [vmem:[%s2850_s11 + $0x50] sm:$0xff]  ;;  %532 = vst [vmem:[%s2855_s12 + $0x18] sm:$0xff] %v531_v3 }
  0x1a   : > { %534 = vst [vmem:[%s2855_s12 + $0x20] sm:$0xff] %v533_v4  ;;  %536 = vst [vmem:[%s2855_s12 + $0x28] sm:$0xff] %v535_v5  ;;  %v537_v6 = vld [vmem:[%s2850_s11 + $0x60] sm:$0xff]  ;;  %v539_v7 = vld [vmem:[%s2850_s11 + $0x70] sm:$0xff] }
  0x1b   : > { %v541_v8 = vld [vmem:[%s2850_s11 + $0x80] sm:$0xff]  ;;  %538 = vst [vmem:[%s2855_s12 + $0x30] sm:$0xff] %v537_v6  ;;  %540 = vst [vmem:[%s2855_s12 + $0x38] sm:$0xff] %v539_v7  ;;  %v543_v9 = vld [vmem:[%s2850_s11 + $0x90] sm:$0xff] }
  0x1c   : > { %542 = vst [vmem:[%s2855_s12 + $0x40] sm:$0xff] %v541_v8  ;;  %v545_v10 = vld [vmem:[%s2850_s11 + $0xa0] sm:$0xff]  ;;  %v547_v11 = vld [vmem:[%s2850_s11 + $0xb0] sm:$0xff]  ;;  %544 = vst [vmem:[%s2855_s12 + $0x48] sm:$0xff] %v543_v9 }
  0x1d   : > { %546 = vst [vmem:[%s2855_s12 + $0x50] sm:$0xff] %v545_v10  ;;  %548 = vst [vmem:[%s2855_s12 + $0x58] sm:$0xff] %v547_v11  ;;  %v549_v12 = vld [vmem:[%s2850_s11 + $0xc0] sm:$0xff]  ;;  %v551_v13 = vld [vmem:[%s2850_s11 + $0xd0] sm:$0xff] }
  0x1e   : > { %v553_v14 = vld [vmem:[%s2850_s11 + $0xe0] sm:$0xff]  ;;  %550 = vst [vmem:[%s2855_s12 + $0x60] sm:$0xff] %v549_v12  ;;  %552 = vst [vmem:[%s2855_s12 + $0x68] sm:$0xff] %v551_v13  ;;  %v555_v15 = vld [vmem:[%s2850_s11 + $0xf0] sm:$0xff] }
  0x1f   : > { %554 = vst [vmem:[%s2855_s12 + $0x70] sm:$0xff] %v553_v14  ;;  %v557_v16 = vld [vmem:[%s2850_s11 + $0x100] sm:$0xff]  ;;  %v559_v17 = vld [vmem:[%s2850_s11 + $0x110] sm:$0xff]  ;;  %556 = vst [vmem:[%s2855_s12 + $0x78] sm:$0xff] %v555_v15 }
  0x20   : > { %558 = vst [vmem:[%s2855_s12 + $0x80] sm:$0xff] %v557_v16  ;;  %560 = vst [vmem:[%s2855_s12 + $0x88] sm:$0xff] %v559_v17  ;;  %v561_v18 = vld [vmem:[%s2850_s11 + $0x120] sm:$0xff]  ;;  %v563_v19 = vld [vmem:[%s2850_s11 + $0x130] sm:$0xff] }
  0x21   : > { %v565_v20 = vld [vmem:[%s2850_s11 + $0x140] sm:$0xff]  ;;  %562 = vst [vmem:[%s2855_s12 + $0x90] sm:$0xff] %v561_v18  ;;  %564 = vst [vmem:[%s2855_s12 + $0x98] sm:$0xff] %v563_v19  ;;  %v567_v21 = vld [vmem:[%s2850_s11 + $0x150] sm:$0xff] }
  0x22   : > { %566 = vst [vmem:[%s2855_s12 + $0xa0] sm:$0xff] %v565_v20  ;;  %v569_v22 = vld [vmem:[%s2850_s11 + $0x160] sm:$0xff]  ;;  %v571_v23 = vld [vmem:[%s2850_s11 + $0x170] sm:$0xff]  ;;  %568 = vst [vmem:[%s2855_s12 + $0xa8] sm:$0xff] %v567_v21 }
  0x23   : > { %570 = vst [vmem:[%s2855_s12 + $0xb0] sm:$0xff] %v569_v22  ;;  %572 = vst [vmem:[%s2855_s12 + $0xb8] sm:$0xff] %v571_v23  ;;  %v573_v24 = vld [vmem:[%s2850_s11 + $0x180] sm:$0xff]  ;;  %v575_v25 = vld [vmem:[%s2850_s11 + $0x190] sm:$0xff] }
  0x24   : > { %v577_v26 = vld [vmem:[%s2850_s11 + $0x1a0] sm:$0xff]  ;;  %574 = vst [vmem:[%s2855_s12 + $0xc0] sm:$0xff] %v573_v24  ;;  %576 = vst [vmem:[%s2855_s12 + $0xc8] sm:$0xff] %v575_v25  ;;  %v579_v27 = vld [vmem:[%s2850_s11 + $0x1b0] sm:$0xff] }
  0x25   : > { %578 = vst [vmem:[%s2855_s12 + $0xd0] sm:$0xff] %v577_v26  ;;  %v581_v28 = vld [vmem:[%s2850_s11 + $0x1c0] sm:$0xff]  ;;  %v583_v29 = vld [vmem:[%s2850_s11 + $0x1d0] sm:$0xff]  ;;  %580 = vst [vmem:[%s2855_s12 + $0xd8] sm:$0xff] %v579_v27 }
  0x26   : > { %582 = vst [vmem:[%s2855_s12 + $0xe0] sm:$0xff] %v581_v28  ;;  %584 = vst [vmem:[%s2855_s12 + $0xe8] sm:$0xff] %v583_v29  ;;  %v585_v30 = vld [vmem:[%s2850_s11 + $0x1e0] sm:$0xff]  ;;  %v587_v31 = vld [vmem:[%s2850_s11 + $0x1f0] sm:$0xff] }
  0x27   : > { %v589_v32 = vld [vmem:[%s2850_s11 + $0x200] sm:$0xff]  ;;  %586 = vst [vmem:[%s2855_s12 + $0xf0] sm:$0xff] %v585_v30  ;;  %588 = vst [vmem:[%s2855_s12 + $0xf8] sm:$0xff] %v587_v31  ;;  %v591_v33 = vld [vmem:[%s2850_s11 + $0x210] sm:$0xff] }
  0x28   : > { %590 = vst [vmem:[%s2855_s12 + $0x100] sm:$0xff] %v589_v32  ;;  %v593_v34 = vld [vmem:[%s2850_s11 + $0x220] sm:$0xff]  ;;  %v595_v35 = vld [vmem:[%s2850_s11 + $0x230] sm:$0xff]  ;;  %592 = vst [vmem:[%s2855_s12 + $0x108] sm:$0xff] %v591_v33 }
  0x29   : > { %594 = vst [vmem:[%s2855_s12 + $0x110] sm:$0xff] %v593_v34  ;;  %596 = vst [vmem:[%s2855_s12 + $0x118] sm:$0xff] %v595_v35  ;;  %v597_v36 = vld [vmem:[%s2850_s11 + $0x240] sm:$0xff]  ;;  %v599_v37 = vld [vmem:[%s2850_s11 + $0x250] sm:$0xff] }
  0x2a   : > { %v601_v38 = vld [vmem:[%s2850_s11 + $0x260] sm:$0xff]  ;;  %598 = vst [vmem:[%s2855_s12 + $0x120] sm:$0xff] %v597_v36  ;;  %600 = vst [vmem:[%s2855_s12 + $0x128] sm:$0xff] %v599_v37  ;;  %v603_v39 = vld [vmem:[%s2850_s11 + $0x270] sm:$0xff] }
  0x2b   : > { %602 = vst [vmem:[%s2855_s12 + $0x130] sm:$0xff] %v601_v38  ;;  %v605_v40 = vld [vmem:[%s2850_s11 + $0x280] sm:$0xff]  ;;  %v607_v41 = vld [vmem:[%s2850_s11 + $0x290] sm:$0xff]  ;;  %604 = vst [vmem:[%s2855_s12 + $0x138] sm:$0xff] %v603_v39 }
  0x2c   : > { %606 = vst [vmem:[%s2855_s12 + $0x140] sm:$0xff] %v605_v40  ;;  %608 = vst [vmem:[%s2855_s12 + $0x148] sm:$0xff] %v607_v41  ;;  %v609_v42 = vld [vmem:[%s2850_s11 + $0x2a0] sm:$0xff]  ;;  %v611_v43 = vld [vmem:[%s2850_s11 + $0x2b0] sm:$0xff] }
  0x2d   : > { %v613_v44 = vld [vmem:[%s2850_s11 + $0x2c0] sm:$0xff]  ;;  %610 = vst [vmem:[%s2855_s12 + $0x150] sm:$0xff] %v609_v42  ;;  %612 = vst [vmem:[%s2855_s12 + $0x158] sm:$0xff] %v611_v43  ;;  %v615_v45 = vld [vmem:[%s2850_s11 + $0x2d0] sm:$0xff] }
  0x2e   : > { %614 = vst [vmem:[%s2855_s12 + $0x160] sm:$0xff] %v613_v44  ;;  %v617_v46 = vld [vmem:[%s2850_s11 + $0x2e0] sm:$0xff]  ;;  %v619_v47 = vld [vmem:[%s2850_s11 + $0x2f0] sm:$0xff]  ;;  %616 = vst [vmem:[%s2855_s12 + $0x168] sm:$0xff] %v615_v45 }
  0x2f   : > { %618 = vst [vmem:[%s2855_s12 + $0x170] sm:$0xff] %v617_v46  ;;  %620 = vst [vmem:[%s2855_s12 + $0x178] sm:$0xff] %v619_v47  ;;  %v621_v48 = vld [vmem:[%s2850_s11 + $0x300] sm:$0xff]  ;;  %v623_v49 = vld [vmem:[%s2850_s11 + $0x310] sm:$0xff] }
  0x30   : > { %v625_v50 = vld [vmem:[%s2850_s11 + $0x320] sm:$0xff]  ;;  %622 = vst [vmem:[%s2855_s12 + $0x180] sm:$0xff] %v621_v48  ;;  %624 = vst [vmem:[%s2855_s12 + $0x188] sm:$0xff] %v623_v49  ;;  %v627_v51 = vld [vmem:[%s2850_s11 + $0x330] sm:$0xff] }
  0x31   : > { %626 = vst [vmem:[%s2855_s12 + $0x190] sm:$0xff] %v625_v50  ;;  %v629_v52 = vld [vmem:[%s2850_s11 + $0x340] sm:$0xff]  ;;  %v631_v53 = vld [vmem:[%s2850_s11 + $0x350] sm:$0xff]  ;;  %628 = vst [vmem:[%s2855_s12 + $0x198] sm:$0xff] %v627_v51 }
  0x32   : > { %630 = vst [vmem:[%s2855_s12 + $0x1a0] sm:$0xff] %v629_v52  ;;  %632 = vst [vmem:[%s2855_s12 + $0x1a8] sm:$0xff] %v631_v53  ;;  %v633_v54 = vld [vmem:[%s2850_s11 + $0x360] sm:$0xff]  ;;  %v635_v55 = vld [vmem:[%s2850_s11 + $0x370] sm:$0xff] }
  0x33   : > { %v637_v56 = vld [vmem:[%s2850_s11 + $0x380] sm:$0xff]  ;;  %634 = vst [vmem:[%s2855_s12 + $0x1b0] sm:$0xff] %v633_v54  ;;  %636 = vst [vmem:[%s2855_s12 + $0x1b8] sm:$0xff] %v635_v55  ;;  %v639_v57 = vld [vmem:[%s2850_s11 + $0x390] sm:$0xff] }
  0x34   : > { %638 = vst [vmem:[%s2855_s12 + $0x1c0] sm:$0xff] %v637_v56  ;;  %v641_v58 = vld [vmem:[%s2850_s11 + $0x3a0] sm:$0xff]  ;;  %v643_v59 = vld [vmem:[%s2850_s11 + $0x3b0] sm:$0xff]  ;;  %640 = vst [vmem:[%s2855_s12 + $0x1c8] sm:$0xff] %v639_v57 }
  0x35   : > { %642 = vst [vmem:[%s2855_s12 + $0x1d0] sm:$0xff] %v641_v58  ;;  %644 = vst [vmem:[%s2855_s12 + $0x1d8] sm:$0xff] %v643_v59  ;;  %v645_v60 = vld [vmem:[%s2850_s11 + $0x3c0] sm:$0xff]  ;;  %v647_v61 = vld [vmem:[%s2850_s11 + $0x3d0] sm:$0xff] }
  0x36   : > { %v649_v62 = vld [vmem:[%s2850_s11 + $0x3e0] sm:$0xff]  ;;  %646 = vst [vmem:[%s2855_s12 + $0x1e0] sm:$0xff] %v645_v60  ;;  %648 = vst [vmem:[%s2855_s12 + $0x1e8] sm:$0xff] %v647_v61  ;;  %v651_v63 = vld [vmem:[%s2850_s11 + $0x3f0] sm:$0xff] }
  0x37   : > { %650 = vst [vmem:[%s2855_s12 + $0x1f0] sm:$0xff] %v649_v62  ;;  %v653_v0 = vld [vmem:[%s2850_s11 + $0x400] sm:$0xff]  ;;  %v655_v1 = vld [vmem:[%s2850_s11 + $0x410] sm:$0xff]  ;;  %652 = vst [vmem:[%s2855_s12 + $0x1f8] sm:$0xff] %v651_v63 }
  0x38   : > { %654 = vst [vmem:[%s2855_s12 + $0x200] sm:$0xff] %v653_v0  ;;  %656 = vst [vmem:[%s2855_s12 + $0x208] sm:$0xff] %v655_v1  ;;  %v657_v2 = vld [vmem:[%s2850_s11 + $0x420] sm:$0xff]  ;;  %v659_v3 = vld [vmem:[%s2850_s11 + $0x430] sm:$0xff] }
  0x39   : > { %v661_v4 = vld [vmem:[%s2850_s11 + $0x440] sm:$0xff]  ;;  %658 = vst [vmem:[%s2855_s12 + $0x210] sm:$0xff] %v657_v2  ;;  %660 = vst [vmem:[%s2855_s12 + $0x218] sm:$0xff] %v659_v3  ;;  %v663_v5 = vld [vmem:[%s2850_s11 + $0x450] sm:$0xff] }
  0x3a   : > { %662 = vst [vmem:[%s2855_s12 + $0x220] sm:$0xff] %v661_v4  ;;  %v665_v6 = vld [vmem:[%s2850_s11 + $0x460] sm:$0xff]  ;;  %v667_v7 = vld [vmem:[%s2850_s11 + $0x470] sm:$0xff]  ;;  %664 = vst [vmem:[%s2855_s12 + $0x228] sm:$0xff] %v663_v5 }
  0x3b   : > { %666 = vst [vmem:[%s2855_s12 + $0x230] sm:$0xff] %v665_v6  ;;  %668 = vst [vmem:[%s2855_s12 + $0x238] sm:$0xff] %v667_v7  ;;  %v669_v8 = vld [vmem:[%s2850_s11 + $0x480] sm:$0xff]  ;;  %v671_v9 = vld [vmem:[%s2850_s11 + $0x490] sm:$0xff] }
  0x3c   : > { %v673_v10 = vld [vmem:[%s2850_s11 + $0x4a0] sm:$0xff]  ;;  %670 = vst [vmem:[%s2855_s12 + $0x240] sm:$0xff] %v669_v8  ;;  %672 = vst [vmem:[%s2855_s12 + $0x248] sm:$0xff] %v671_v9  ;;  %v675_v11 = vld [vmem:[%s2850_s11 + $0x4b0] sm:$0xff] }
  0x3d   : > { %674 = vst [vmem:[%s2855_s12 + $0x250] sm:$0xff] %v673_v10  ;;  %v677_v12 = vld [vmem:[%s2850_s11 + $0x4c0] sm:$0xff]  ;;  %v679_v13 = vld [vmem:[%s2850_s11 + $0x4d0] sm:$0xff]  ;;  %676 = vst [vmem:[%s2855_s12 + $0x258] sm:$0xff] %v675_v11 }
  0x3e   : > { %678 = vst [vmem:[%s2855_s12 + $0x260] sm:$0xff] %v677_v12  ;;  %680 = vst [vmem:[%s2855_s12 + $0x268] sm:$0xff] %v679_v13  ;;  %v681_v14 = vld [vmem:[%s2850_s11 + $0x4e0] sm:$0xff]  ;;  %v683_v15 = vld [vmem:[%s2850_s11 + $0x4f0] sm:$0xff] }
  0x3f   : > { %v685_v16 = vld [vmem:[%s2850_s11 + $0x500] sm:$0xff]  ;;  %682 = vst [vmem:[%s2855_s12 + $0x270] sm:$0xff] %v681_v14  ;;  %684 = vst [vmem:[%s2855_s12 + $0x278] sm:$0xff] %v683_v15  ;;  %v687_v17 = vld [vmem:[%s2850_s11 + $0x510] sm:$0xff] }
  0x40   : > { %686 = vst [vmem:[%s2855_s12 + $0x280] sm:$0xff] %v685_v16  ;;  %v689_v18 = vld [vmem:[%s2850_s11 + $0x520] sm:$0xff]  ;;  %v691_v19 = vld [vmem:[%s2850_s11 + $0x530] sm:$0xff]  ;;  %688 = vst [vmem:[%s2855_s12 + $0x288] sm:$0xff] %v687_v17 }
  0x41   : > { %690 = vst [vmem:[%s2855_s12 + $0x290] sm:$0xff] %v689_v18  ;;  %692 = vst [vmem:[%s2855_s12 + $0x298] sm:$0xff] %v691_v19  ;;  %v693_v20 = vld [vmem:[%s2850_s11 + $0x540] sm:$0xff]  ;;  %v695_v21 = vld [vmem:[%s2850_s11 + $0x550] sm:$0xff] }
  0x42   : > { %v697_v22 = vld [vmem:[%s2850_s11 + $0x560] sm:$0xff]  ;;  %694 = vst [vmem:[%s2855_s12 + $0x2a0] sm:$0xff] %v693_v20  ;;  %696 = vst [vmem:[%s2855_s12 + $0x2a8] sm:$0xff] %v695_v21  ;;  %v699_v23 = vld [vmem:[%s2850_s11 + $0x570] sm:$0xff] }
  0x43   : > { %698 = vst [vmem:[%s2855_s12 + $0x2b0] sm:$0xff] %v697_v22  ;;  %v701_v24 = vld [vmem:[%s2850_s11 + $0x580] sm:$0xff]  ;;  %v703_v25 = vld [vmem:[%s2850_s11 + $0x590] sm:$0xff]  ;;  %700 = vst [vmem:[%s2855_s12 + $0x2b8] sm:$0xff] %v699_v23 }
  0x44   : > { %702 = vst [vmem:[%s2855_s12 + $0x2c0] sm:$0xff] %v701_v24  ;;  %704 = vst [vmem:[%s2855_s12 + $0x2c8] sm:$0xff] %v703_v25  ;;  %v705_v26 = vld [vmem:[%s2850_s11 + $0x5a0] sm:$0xff]  ;;  %v707_v27 = vld [vmem:[%s2850_s11 + $0x5b0] sm:$0xff] }
  0x45   : > { %v709_v28 = vld [vmem:[%s2850_s11 + $0x5c0] sm:$0xff]  ;;  %706 = vst [vmem:[%s2855_s12 + $0x2d0] sm:$0xff] %v705_v26  ;;  %708 = vst [vmem:[%s2855_s12 + $0x2d8] sm:$0xff] %v707_v27  ;;  %v711_v29 = vld [vmem:[%s2850_s11 + $0x5d0] sm:$0xff] }
  0x46   : > { %710 = vst [vmem:[%s2855_s12 + $0x2e0] sm:$0xff] %v709_v28  ;;  %v713_v30 = vld [vmem:[%s2850_s11 + $0x5e0] sm:$0xff]  ;;  %v715_v31 = vld [vmem:[%s2850_s11 + $0x5f0] sm:$0xff]  ;;  %712 = vst [vmem:[%s2855_s12 + $0x2e8] sm:$0xff] %v711_v29 }
  0x47   : > { %714 = vst [vmem:[%s2855_s12 + $0x2f0] sm:$0xff] %v713_v30  ;;  %716 = vst [vmem:[%s2855_s12 + $0x2f8] sm:$0xff] %v715_v31  ;;  %v717_v32 = vld [vmem:[%s2850_s11 + $0x600] sm:$0xff]  ;;  %v719_v33 = vld [vmem:[%s2850_s11 + $0x610] sm:$0xff] }
  0x48   : > { %v721_v34 = vld [vmem:[%s2850_s11 + $0x620] sm:$0xff]  ;;  %718 = vst [vmem:[%s2855_s12 + $0x300] sm:$0xff] %v717_v32  ;;  %720 = vst [vmem:[%s2855_s12 + $0x308] sm:$0xff] %v719_v33  ;;  %v723_v35 = vld [vmem:[%s2850_s11 + $0x630] sm:$0xff] }
  0x49   : > { %722 = vst [vmem:[%s2855_s12 + $0x310] sm:$0xff] %v721_v34  ;;  %v725_v36 = vld [vmem:[%s2850_s11 + $0x640] sm:$0xff]  ;;  %v727_v37 = vld [vmem:[%s2850_s11 + $0x650] sm:$0xff]  ;;  %724 = vst [vmem:[%s2855_s12 + $0x318] sm:$0xff] %v723_v35 }
  0x4a   : > { %726 = vst [vmem:[%s2855_s12 + $0x320] sm:$0xff] %v725_v36  ;;  %728 = vst [vmem:[%s2855_s12 + $0x328] sm:$0xff] %v727_v37  ;;  %v729_v38 = vld [vmem:[%s2850_s11 + $0x660] sm:$0xff]  ;;  %v731_v39 = vld [vmem:[%s2850_s11 + $0x670] sm:$0xff] }
  0x4b   : > { %v733_v40 = vld [vmem:[%s2850_s11 + $0x680] sm:$0xff]  ;;  %730 = vst [vmem:[%s2855_s12 + $0x330] sm:$0xff] %v729_v38  ;;  %732 = vst [vmem:[%s2855_s12 + $0x338] sm:$0xff] %v731_v39  ;;  %v735_v41 = vld [vmem:[%s2850_s11 + $0x690] sm:$0xff] }
  0x4c   : > { %734 = vst [vmem:[%s2855_s12 + $0x340] sm:$0xff] %v733_v40  ;;  %v737_v42 = vld [vmem:[%s2850_s11 + $0x6a0] sm:$0xff]  ;;  %v739_v43 = vld [vmem:[%s2850_s11 + $0x6b0] sm:$0xff]  ;;  %736 = vst [vmem:[%s2855_s12 + $0x348] sm:$0xff] %v735_v41 }
  0x4d   : > { %738 = vst [vmem:[%s2855_s12 + $0x350] sm:$0xff] %v737_v42  ;;  %740 = vst [vmem:[%s2855_s12 + $0x358] sm:$0xff] %v739_v43  ;;  %v741_v44 = vld [vmem:[%s2850_s11 + $0x6c0] sm:$0xff]  ;;  %v743_v45 = vld [vmem:[%s2850_s11 + $0x6d0] sm:$0xff] }
  0x4e   : > { %v745_v46 = vld [vmem:[%s2850_s11 + $0x6e0] sm:$0xff]  ;;  %742 = vst [vmem:[%s2855_s12 + $0x360] sm:$0xff] %v741_v44  ;;  %744 = vst [vmem:[%s2855_s12 + $0x368] sm:$0xff] %v743_v45  ;;  %v747_v47 = vld [vmem:[%s2850_s11 + $0x6f0] sm:$0xff] }
  0x4f   : > { %746 = vst [vmem:[%s2855_s12 + $0x370] sm:$0xff] %v745_v46  ;;  %v749_v48 = vld [vmem:[%s2850_s11 + $0x700] sm:$0xff]  ;;  %v751_v49 = vld [vmem:[%s2850_s11 + $0x710] sm:$0xff]  ;;  %748 = vst [vmem:[%s2855_s12 + $0x378] sm:$0xff] %v747_v47 }
  0x50   : > { %750 = vst [vmem:[%s2855_s12 + $0x380] sm:$0xff] %v749_v48  ;;  %752 = vst [vmem:[%s2855_s12 + $0x388] sm:$0xff] %v751_v49  ;;  %v753_v50 = vld [vmem:[%s2850_s11 + $0x720] sm:$0xff]  ;;  %v755_v51 = vld [vmem:[%s2850_s11 + $0x730] sm:$0xff] }
  0x51   : > { %v757_v52 = vld [vmem:[%s2850_s11 + $0x740] sm:$0xff]  ;;  %754 = vst [vmem:[%s2855_s12 + $0x390] sm:$0xff] %v753_v50  ;;  %756 = vst [vmem:[%s2855_s12 + $0x398] sm:$0xff] %v755_v51  ;;  %v759_v53 = vld [vmem:[%s2850_s11 + $0x750] sm:$0xff] }
  0x52   : > { %758 = vst [vmem:[%s2855_s12 + $0x3a0] sm:$0xff] %v757_v52  ;;  %v761_v54 = vld [vmem:[%s2850_s11 + $0x760] sm:$0xff]  ;;  %v763_v55 = vld [vmem:[%s2850_s11 + $0x770] sm:$0xff]  ;;  %760 = vst [vmem:[%s2855_s12 + $0x3a8] sm:$0xff] %v759_v53 }
  0x53   : > { %762 = vst [vmem:[%s2855_s12 + $0x3b0] sm:$0xff] %v761_v54  ;;  %764 = vst [vmem:[%s2855_s12 + $0x3b8] sm:$0xff] %v763_v55  ;;  %v765_v56 = vld [vmem:[%s2850_s11 + $0x780] sm:$0xff]  ;;  %v767_v57 = vld [vmem:[%s2850_s11 + $0x790] sm:$0xff] }
  0x54   : > { %v769_v58 = vld [vmem:[%s2850_s11 + $0x7a0] sm:$0xff]  ;;  %766 = vst [vmem:[%s2855_s12 + $0x3c0] sm:$0xff] %v765_v56  ;;  %768 = vst [vmem:[%s2855_s12 + $0x3c8] sm:$0xff] %v767_v57  ;;  %v771_v59 = vld [vmem:[%s2850_s11 + $0x7b0] sm:$0xff] }
  0x55   : > { %770 = vst [vmem:[%s2855_s12 + $0x3d0] sm:$0xff] %v769_v58  ;;  %v773_v60 = vld [vmem:[%s2850_s11 + $0x7c0] sm:$0xff]  ;;  %v775_v61 = vld [vmem:[%s2850_s11 + $0x7d0] sm:$0xff]  ;;  %772 = vst [vmem:[%s2855_s12 + $0x3d8] sm:$0xff] %v771_v59 }
  0x56   : > { %774 = vst [vmem:[%s2855_s12 + $0x3e0] sm:$0xff] %v773_v60  ;;  %776 = vst [vmem:[%s2855_s12 + $0x3e8] sm:$0xff] %v775_v61  ;;  %v777_v62 = vld [vmem:[%s2850_s11 + $0x7e0] sm:$0xff]  ;;  %v779_v63 = vld [vmem:[%s2850_s11 + $0x7f0] sm:$0xff] }
  0x57   : > { %v781_v0 = vld [vmem:[%s2850_s11 + $0x800] sm:$0xff]  ;;  %778 = vst [vmem:[%s2855_s12 + $0x3f0] sm:$0xff] %v777_v62  ;;  %780 = vst [vmem:[%s2855_s12 + $0x3f8] sm:$0xff] %v779_v63  ;;  %v783_v1 = vld [vmem:[%s2850_s11 + $0x810] sm:$0xff] }
  0x58   : > { %782 = vst [vmem:[%s2855_s12 + $0x400] sm:$0xff] %v781_v0  ;;  %v785_v2 = vld [vmem:[%s2850_s11 + $0x820] sm:$0xff]  ;;  %v787_v3 = vld [vmem:[%s2850_s11 + $0x830] sm:$0xff]  ;;  %784 = vst [vmem:[%s2855_s12 + $0x408] sm:$0xff] %v783_v1 }
  0x59   : > { %786 = vst [vmem:[%s2855_s12 + $0x410] sm:$0xff] %v785_v2  ;;  %788 = vst [vmem:[%s2855_s12 + $0x418] sm:$0xff] %v787_v3  ;;  %v789_v4 = vld [vmem:[%s2850_s11 + $0x840] sm:$0xff]  ;;  %v791_v5 = vld [vmem:[%s2850_s11 + $0x850] sm:$0xff] }
  0x5a   : > { %v793_v6 = vld [vmem:[%s2850_s11 + $0x860] sm:$0xff]  ;;  %790 = vst [vmem:[%s2855_s12 + $0x420] sm:$0xff] %v789_v4  ;;  %792 = vst [vmem:[%s2855_s12 + $0x428] sm:$0xff] %v791_v5  ;;  %v795_v7 = vld [vmem:[%s2850_s11 + $0x870] sm:$0xff] }
  0x5b   : > { %794 = vst [vmem:[%s2855_s12 + $0x430] sm:$0xff] %v793_v6  ;;  %v797_v8 = vld [vmem:[%s2850_s11 + $0x880] sm:$0xff]  ;;  %v799_v9 = vld [vmem:[%s2850_s11 + $0x890] sm:$0xff]  ;;  %796 = vst [vmem:[%s2855_s12 + $0x438] sm:$0xff] %v795_v7 }
  0x5c   : > { %798 = vst [vmem:[%s2855_s12 + $0x440] sm:$0xff] %v797_v8  ;;  %800 = vst [vmem:[%s2855_s12 + $0x448] sm:$0xff] %v799_v9  ;;  %v801_v10 = vld [vmem:[%s2850_s11 + $0x8a0] sm:$0xff]  ;;  %v803_v11 = vld [vmem:[%s2850_s11 + $0x8b0] sm:$0xff] }
  0x5d   : > { %v805_v12 = vld [vmem:[%s2850_s11 + $0x8c0] sm:$0xff]  ;;  %802 = vst [vmem:[%s2855_s12 + $0x450] sm:$0xff] %v801_v10  ;;  %804 = vst [vmem:[%s2855_s12 + $0x458] sm:$0xff] %v803_v11  ;;  %v807_v13 = vld [vmem:[%s2850_s11 + $0x8d0] sm:$0xff] }
  0x5e   : > { %806 = vst [vmem:[%s2855_s12 + $0x460] sm:$0xff] %v805_v12  ;;  %v809_v14 = vld [vmem:[%s2850_s11 + $0x8e0] sm:$0xff]  ;;  %v811_v15 = vld [vmem:[%s2850_s11 + $0x8f0] sm:$0xff]  ;;  %808 = vst [vmem:[%s2855_s12 + $0x468] sm:$0xff] %v807_v13 }
  0x5f   : > { %810 = vst [vmem:[%s2855_s12 + $0x470] sm:$0xff] %v809_v14  ;;  %812 = vst [vmem:[%s2855_s12 + $0x478] sm:$0xff] %v811_v15 }
  0x60 PF: > { %p2270_p7 = scmp.ge.s32.totalorder %s2759_s21, 1  ;;  %p838_p8 = scmp.lt.s32.totalorder %s2759_s21, 9 }
  0x62   : > { %p839_p9 = pnand %p2270_p7, %p838_p8 }
  0x63   : > { %s845_s13 = sand.u32 (!%p839_p9), 1, %s2735_s15   ;;  %s895_s14 = smul.u32 (!%p839_p9), 9, %s2743_s17 }
  0x64   : > { %842 = sbr.rel (%p839_p9) target bundleno = 494 (0x1ee), region = 70  ;;  %s2271_s25 = sshll.u32 (!%p839_p9), %s2747_s18, 1 }
  0x65   : > { %s2427_s24 = smul.u32 (!%p839_p9), 1152, %s845_s13  ;;  %p898_p10 = scmp.lt.s32.totalorder (!%p839_p9), %s895_s14, 35 }
  0x66   : > { %p907_p11 = scmp.lt.s32.totalorder (!%p839_p9), %s2271_s25, 3  ;;  %p2276_p12 = scmp.ne.s32.totalorder (!%p839_p9), %s2743_s17, 0 }
  0x67   : > { %s3169_s12 = scalar_lea.vmem (!%p839_p9), [#allocation3], %s2427_s24 }
  0x69   : > { %s3385_s14 = smov (!%p898_p10, %s895_s14), 35  ;;  %s3387_s25 = smov (!%p907_p11, %s2271_s25), 3 }
  0x6a   : > { %s3152_s29 = scalar_lea.vmem %s3367_s0, %s3385_s14  ;;  %s909_s6 = scalar_lea.vmem %s3369_s2, %s3387_s25 }
  0x6b   : > { %s2273_s15 = sshll.u32 %s3387_s25, 1  ;;  %935 = sbr.rel (%p2276_p12) target bundleno = 114 (0x72), region = 78 }
  0x6c   : > { %s3162_s18 = scalar_lea.vmem %s3370_s3, %s2273_s15  ;;  %s3167_s11 = scalar_lea.vmem %s3371_s4, %s2273_s15 }
  0x70   : > { %v2761_v16 = vmov 0.0  }
  0x71   : > { %936 = vst [vmem:[#allocation2] sm:$0xf] %v2761_v16 }
  0x72 PF: > { %v2488_v17 = vld [vmem:[%s3169_s12 + $0x74] ss:$8 sps:$4 sm:$0xff]   ;;  %v2492_v19 = vld [vmem:[%s3169_s12 + $0x70] ss:$8 sps:$4 sm:$0xff]   ;;  %v2494_v21 = vld [vmem:[%s3169_s12 + $0x64] ss:$8 sps:$4 sm:$0xff]   ;;  %v1090_v55 = vlaneseq }
  0x73   : > { %v2490_v18 = vld [vmem:[%s3169_s12 + $0x174] ss:$8 sps:$4 sm:$0xff]   ;;  %1878 = vmatprep.subr.bf16.mxu0 %v2488_v17  ;;  %v2493_v20 = vld [vmem:[%s3169_s12 + $0x170] ss:$8 sps:$4 sm:$0xff]   ;;  %v2496_v22 = vld [vmem:[%s3169_s12 + $0x164] ss:$8 sps:$4 sm:$0xff]  }
  0x74   : > { %1919 = vmatprep.subr.bf16.mxu1 %v2490_v18  ;;  %1879 = vmatpush1.bf16.msra.mxu0 %v2492_v19  ;;  %v2498_v23 = vld [vmem:[%s3169_s12 + $0x60] ss:$8 sps:$4 sm:$0xff]   ;;  %v2500_v25 = vld [vmem:[%s3169_s12 + $0x54] ss:$8 sps:$4 sm:$0xff]   ;;  %v2504_v27 = vld [vmem:[%s3169_s12 + $0x50] ss:$8 sps:$4 sm:$0xff]  }
  0x75   : > { %1920 = vmatpush1.bf16.msra.mxu1 %v2493_v20  ;;  %1880 = vmatprep.subr.bf16.mxu0 %v2494_v21  ;;  %v2499_v24 = vld [vmem:[%s3169_s12 + $0x160] ss:$8 sps:$4 sm:$0xff]   ;;  %v2502_v26 = vld [vmem:[%s3169_s12 + $0x154] ss:$8 sps:$4 sm:$0xff]   ;;  %v2505_v28 = vld [vmem:[%s3169_s12 + $0x150] ss:$8 sps:$4 sm:$0xff]  }
  0x76   : > { %1921 = vmatprep.subr.bf16.mxu1 %v2496_v22  ;;  %v2506_v29 = vld [vmem:[%s3169_s12 + $0x44] ss:$8 sps:$4 sm:$0xff]   ;;  %v2510_v31 = vld [vmem:[%s3169_s12 + $0x40] ss:$8 sps:$4 sm:$0xff]   ;;  %v2512_v33 = vld [vmem:[%s3169_s12 + $0x34] ss:$8 sps:$4 sm:$0xff]  }
  0x77   : > { %v2508_v30 = vld [vmem:[%s3169_s12 + $0x144] ss:$8 sps:$4 sm:$0xff]   ;;  %v2511_v32 = vld [vmem:[%s3169_s12 + $0x140] ss:$8 sps:$4 sm:$0xff]   ;;  %v2514_v34 = vld [vmem:[%s3169_s12 + $0x134] ss:$8 sps:$4 sm:$0xff]  }
  0x78   : > { %1881 = vmatpush1.bf16.msra.mxu0 %v2498_v23  ;;  %v2516_v35 = vld [vmem:[%s3169_s12 + $0x30] ss:$8 sps:$4 sm:$0xff]   ;;  %v2518_v37 = vld [vmem:[%s3169_s12 + $0x24] ss:$8 sps:$4 sm:$0xff]   ;;  %v2522_v39 = vld [vmem:[%s3169_s12 + $0x20] ss:$8 sps:$4 sm:$0xff]  }
  0x79   : > { %1922 = vmatpush1.bf16.msra.mxu1 %v2499_v24  ;;  %1882 = vmatprep.subr.bf16.mxu0 %v2500_v25  ;;  %v2517_v36 = vld [vmem:[%s3169_s12 + $0x130] ss:$8 sps:$4 sm:$0xff]   ;;  %v2520_v38 = vld [vmem:[%s3169_s12 + $0x124] ss:$8 sps:$4 sm:$0xff]   ;;  %v2523_v40 = vld [vmem:[%s3169_s12 + $0x120] ss:$8 sps:$4 sm:$0xff]  }
  0x7a   : > { %1923 = vmatprep.subr.bf16.mxu1 %v2502_v26  ;;  %v2524_v41 = vld [vmem:[%s3169_s12 + $0x14] ss:$8 sps:$4 sm:$0xff]   ;;  %v2528_v43 = vld [vmem:[%s3169_s12 + $0x10] ss:$8 sps:$4 sm:$0xff]   ;;  %v2530_v45 = vld [vmem:[%s3169_s12 + $0x4] ss:$8 sps:$4 sm:$0xff]  }
  0x7b   : > { %v2526_v42 = vld [vmem:[%s3169_s12 + $0x114] ss:$8 sps:$4 sm:$0xff]   ;;  %v2529_v44 = vld [vmem:[%s3169_s12 + $0x110] ss:$8 sps:$4 sm:$0xff]   ;;  %v2532_v46 = vld [vmem:[%s3169_s12 + $0x104] ss:$8 sps:$4 sm:$0xff]  }
  0x7c   : > { %1883 = vmatpush1.bf16.msra.mxu0 %v2504_v27  ;;  %v2534_v47 = vld [vmem:[%s3169_s12] ss:$8 sps:$4 sm:$0xff]   ;;  %v2536_v49 = vld [vmem:[%s3169_s12 + $0xf4] ss:$8 sps:$4 sm:$0xff]   ;;  %v2540_v51 = vld [vmem:[%s3169_s12 + $0xf0] ss:$8 sps:$4 sm:$0xff]  }
  0x7d   : > { %1924 = vmatpush1.bf16.msra.mxu1 %v2505_v28  ;;  %1884 = vmatprep.subr.bf16.mxu0 %v2506_v29  ;;  %v2535_v48 = vld [vmem:[%s3169_s12 + $0x100] ss:$8 sps:$4 sm:$0xff]   ;;  %v2538_v50 = vld [vmem:[%s3169_s12 + $0x1f4] ss:$8 sps:$4 sm:$0xff]   ;;  %v2541_v52 = vld [vmem:[%s3169_s12 + $0x1f0] ss:$8 sps:$4 sm:$0xff]  }
  0x7e   : > { %1925 = vmatprep.subr.bf16.mxu1 %v2508_v30  ;;  %v2762_v53 = vmov 1966171168   ;;  %v2542_v56 = vld [vmem:[%s3169_s12 + $0xe4] ss:$8 sps:$4 sm:$0xff]   ;;  %v2546_v58 = vld [vmem:[%s3169_s12 + $0xe0] ss:$8 sps:$4 sm:$0xff]  }
  0x7f   : > { %v1088_v54 = vunpack.c.l.s4 %v2762_v53  ;;  %v2544_v57 = vld [vmem:[%s3169_s12 + $0x1e4] ss:$8 sps:$4 sm:$0xff]   ;;  %v3211_v60 = vshrl.u32 %v1090_v55, 7  ;;  %v2547_v61 = vld [vmem:[%s3169_s12 + $0x1e0] ss:$8 sps:$4 sm:$0xff]   ;;  %p2422_p13 = scmp.ne.s32.totalorder %s2743_s17, 3 }
  0x80   : > { %1885 = vmatpush1.bf16.msra.mxu0 %v2510_v31  ;;  %v2548_v62 = vld [vmem:[%s3169_s12 + $0xd4] ss:$8 sps:$4 sm:$0xff]   ;;  %v2552_v0 = vld [vmem:[%s3169_s12 + $0xd0] ss:$8 sps:$4 sm:$0xff]   ;;  %v2554_v3 = vld [vmem:[%s3169_s12 + $0xc4] ss:$8 sps:$4 sm:$0xff]  }
  0x81   : > { %1926 = vmatpush1.bf16.msra.mxu1 %v2511_v32  ;;  %1886 = vmatprep.subr.bf16.mxu0 %v2512_v33  ;;  %v1089_v59 = vunpack.c.0.s8 %v1088_v54  ;;  %v2550_v63 = vld [vmem:[%s3169_s12 + $0x1d4] ss:$8 sps:$4 sm:$0xff]   ;;  %v2553_v1 = vld [vmem:[%s3169_s12 + $0x1d0] ss:$8 sps:$4 sm:$0xff]   ;;  %v2556_v4 = vld [vmem:[%s3169_s12 + $0x1c4] ss:$8 sps:$4 sm:$0xff]  }
  0x82   : > { %1927 = vmatprep.subr.bf16.mxu1 %v2514_v34  ;;  %v938_v5 = vld [vmem:[%s3152_s29] sm:$0xff]  ;;  %v2564_v14 = vld [vmem:[%s3169_s12 + $0xb0] ss:$8 sps:$4 sm:$0xff]   ;;  %v2566_v18 = vld [vmem:[%s3169_s12 + $0xa4] ss:$8 sps:$4 sm:$0xff]  }
  0x83   : > { %v3219_v2 = vsub.s32 %v1089_v59, %v3211_v60  ;;  %v2558_v6 = vld [vmem:[%s3169_s12 + $0xc0] ss:$8 sps:$4 sm:$0xff]   ;;  %v1086_v7 = vcombine.high %v938_v5, %v938_v5  ;;  %v2560_v10 = vld [vmem:[%s3169_s12 + $0xb4] ss:$8 sps:$4 sm:$0xff]   ;;  %v2565_v17 = vld [vmem:[%s3169_s12 + $0x1b0] ss:$8 sps:$4 sm:$0xff]  }
  0x84   : > { %1887 = vmatpush1.bf16.msra.mxu0 %v2516_v35  ;;  %v2559_v9 = vld [vmem:[%s3169_s12 + $0x1c0] ss:$8 sps:$4 sm:$0xff]   ;;  %v2562_v11 = vld [vmem:[%s3169_s12 + $0x1b4] ss:$8 sps:$4 sm:$0xff]   ;;  %v2568_v19 = vld [vmem:[%s3169_s12 + $0x1a4] ss:$8 sps:$4 sm:$0xff]  }
  0x85   : > { %1928 = vmatpush1.bf16.msra.mxu1 %v2517_v36  ;;  %1888 = vmatprep.subr.bf16.mxu0 %v2518_v37  ;;  %v1093_v8 = vrot.slane %v938_v5, %v3219_v2  ;;  %v1100_v13 = vrot.slane %v1086_v7, %v3219_v2  ;;  %v2570_v21 = vld [vmem:[%s3169_s12 + $0xa0] ss:$8 sps:$4 sm:$0xff]   ;;  %v2572_v23 = vld [vmem:[%s3169_s12 + $0x94] ss:$8 sps:$4 sm:$0xff]   ;;  %v2576_v25 = vld [vmem:[%s3169_s12 + $0x90] ss:$8 sps:$4 sm:$0xff]  }
  0x86   : > { %1929 = vmatprep.subr.bf16.mxu1 %v2520_v38  ;;  %v2571_v22 = vld [vmem:[%s3169_s12 + $0x1a0] ss:$8 sps:$4 sm:$0xff]   ;;  %v2574_v24 = vld [vmem:[%s3169_s12 + $0x194] ss:$8 sps:$4 sm:$0xff]   ;;  %v2577_v26 = vld [vmem:[%s3169_s12 + $0x190] ss:$8 sps:$4 sm:$0xff]  }
  0x87   : > { %v1101_v12 = vcombine.high %v1093_v8, %v1093_v8  ;;  %v3233_v16 = vrot.slane %v1100_v13, %v3219_v2  ;;  %v2578_v27 = vld [vmem:[%s3169_s12 + $0x84] ss:$8 sps:$4 sm:$0xff]   ;;  %v1102_v29 = vcombine.high %v1100_v13, %v1100_v13  ;;  %v2582_v30 = vld [vmem:[%s3169_s12 + $0x80] ss:$8 sps:$4 sm:$0xff]   ;;  %v1109_v31 = vrot.slane %v1093_v8, %v3219_v2  ;;  %v2587_v33 = vld [vmem:[%s3169_s12 + $0x274] ss:$8 sps:$4 sm:$0xff]  }
  0x88   : > { %1889 = vmatpush1.bf16.msra.mxu0 %v2522_v39  ;;  %v2580_v28 = vld [vmem:[%s3169_s12 + $0x184] ss:$8 sps:$4 sm:$0xff]   ;;  %v2583_v32 = vld [vmem:[%s3169_s12 + $0x180] ss:$8 sps:$4 sm:$0xff]   ;;  %v2590_v34 = vld [vmem:[%s3169_s12 + $0x374] ss:$8 sps:$4 sm:$0xff]  }
  0x89   : > { %1930 = vmatpush1.bf16.msra.mxu1 %v2523_v40  ;;  %1890 = vmatprep.subr.bf16.mxu0 %v2524_v41  ;;  %v1123_v15 = vrot.slane %v1101_v12, %v3219_v2  ;;  %v1130_v35 = vrot.slane %v1102_v29, %v3219_v2  ;;  %v1131_v36 = vcombine.high %v1109_v31, %v1109_v31  ;;  %v2585_v37 = vld [vmem:[%s3169_s12 + $0x270] ss:$8 sps:$4 sm:$0xff]   ;;  %v2593_v39 = vld [vmem:[%s3169_s12 + $0x264] ss:$8 sps:$4 sm:$0xff]   ;;  %v2614_v53 = vld [vmem:[%s3169_s12 + $0x334] ss:$8 sps:$4 sm:$0xff]  }
  0x8a   : > { %1931 = vmatprep.subr.bf16.mxu1 %v2526_v42  ;;  %v2588_v38 = vld [vmem:[%s3169_s12 + $0x370] ss:$8 sps:$4 sm:$0xff]   ;;  %v2596_v40 = vld [vmem:[%s3169_s12 + $0x364] ss:$8 sps:$4 sm:$0xff]   ;;  %v2591_v42 = vld [vmem:[%s3169_s12 + $0x260] ss:$8 sps:$4 sm:$0xff]  }
  0x8b   : > { %v1133_v20 = vcombine.high %v1123_v15, %v1123_v15  ;;  %1910 = vmatprep.mubr.bf16.mxu0 %v1123_v15  ;;  %v1134_v41 = vcombine.high %v1130_v35, %v1130_v35  ;;  %v2609_v54 = vld [vmem:[%s3169_s12 + $0x230] ss:$8 sps:$4 sm:$0xff]   ;;  %v2618_v59 = vld [vmem:[%s3169_s12 + $0x320] ss:$8 sps:$4 sm:$0xff]   ;;  %v2638_v7 = vld [vmem:[%s3169_s12 + $0x3f4] ss:$8 sps:$4 sm:$0xff]  }
  0x8c   : > { %1891 = vmatpush1.bf16.msra.mxu0 %v2528_v43  ;;  %v2594_v43 = vld [vmem:[%s3169_s12 + $0x360] ss:$8 sps:$4 sm:$0xff]   ;;  %v2612_v55 = vld [vmem:[%s3169_s12 + $0x330] ss:$8 sps:$4 sm:$0xff]   ;;  %v2650_v15 = vld [vmem:[%s3169_s12 + $0x3d4] ss:$8 sps:$4 sm:$0xff]  }
  0x8d   : > { %1932 = vmatpush1.bf16.msra.mxu1 %v2529_v44  ;;  %1892 = vmatprep.subr.bf16.mxu0 %v2530_v45  ;;  %v2599_v44 = vld [vmem:[%s3169_s12 + $0x254] ss:$8 sps:$4 sm:$0xff]   ;;  %v2630_v5 = vld [vmem:[%s3169_s12 + $0x300] ss:$8 sps:$4 sm:$0xff]   ;;  %v2633_v8 = vld [vmem:[%s3169_s12 + $0x2f0] ss:$8 sps:$4 sm:$0xff]  }
  0x8e   : > { %1933 = vmatprep.subr.bf16.mxu1 %v2532_v46  ;;  %1951 = vmatprep.mubr.bf16.mxu1 %v1133_v20  ;;  %v2602_v45 = vld [vmem:[%s3169_s12 + $0x354] ss:$8 sps:$4 sm:$0xff]   ;;  %v2597_v46 = vld [vmem:[%s3169_s12 + $0x250] ss:$8 sps:$4 sm:$0xff]   ;;  %v2639_v12 = vld [vmem:[%s3169_s12 + $0x2e0] ss:$8 sps:$4 sm:$0xff]  }
  0x8f   : > { %v2642_v13 = vld [vmem:[%s3169_s12 + $0x3e0] ss:$8 sps:$4 sm:$0xff]   ;;  %v2656_v20 = vld [vmem:[%s3169_s12 + $0x3c4] ss:$8 sps:$4 sm:$0xff]  }
  0x90   : > { %1893 = vmatpush1.bf16.msra.mxu0 %v2534_v47  ;;  %v2600_v47 = vld [vmem:[%s3169_s12 + $0x350] ss:$8 sps:$4 sm:$0xff]   ;;  %v2663_v29 = vld [vmem:[%s3169_s12 + $0x2a0] ss:$8 sps:$4 sm:$0xff]  }
  0x91   : > { %1934 = vmatpush1.bf16.msra.mxu1 %v2535_v48  ;;  %1894 = vmatprep.subr.bf16.mxu0 %v2536_v49  ;;  %v2605_v48 = vld [vmem:[%s3169_s12 + $0x244] ss:$8 sps:$4 sm:$0xff]  }
  0x92   : > { %1935 = vmatprep.subr.bf16.mxu1 %v2538_v50  ;;  %v2608_v49 = vld [vmem:[%s3169_s12 + $0x344] ss:$8 sps:$4 sm:$0xff]   ;;  %v2603_v50 = vld [vmem:[%s3169_s12 + $0x240] ss:$8 sps:$4 sm:$0xff]  }
  0x94   : > { %1895 = vmatpush2.bf16.msra.mxu0 %v2540_v51  ;;  %v2606_v51 = vld [vmem:[%s3169_s12 + $0x340] ss:$8 sps:$4 sm:$0xff]  }
  0x95   : > { %1936 = vmatpush2.bf16.msra.mxu1 %v2541_v52  ;;  %1896 = vmatprep.subr.bf16.mxu0 %v2542_v56  ;;  %v2611_v52 = vld [vmem:[%s3169_s12 + $0x234] ss:$8 sps:$4 sm:$0xff]   ;;  %v2617_v56 = vld [vmem:[%s3169_s12 + $0x224] ss:$8 sps:$4 sm:$0xff]  }
  0x96   : > { %1937 = vmatprep.subr.bf16.mxu1 %v2544_v57  ;;  %v2620_v57 = vld [vmem:[%s3169_s12 + $0x324] ss:$8 sps:$4 sm:$0xff]  }
  0x98   : > { %1897 = vmatpush2.bf16.msra.mxu0 %v2546_v58  ;;  %v2615_v58 = vld [vmem:[%s3169_s12 + $0x220] ss:$8 sps:$4 sm:$0xff]  }
  0x99   : > { %1938 = vmatpush2.bf16.msra.mxu1 %v2547_v61  ;;  %1898 = vmatprep.subr.bf16.mxu0 %v2548_v62  ;;  %v2623_v61 = vld [vmem:[%s3169_s12 + $0x214] ss:$8 sps:$4 sm:$0xff]  }
  0x9a   : > { %1939 = vmatprep.subr.bf16.mxu1 %v2550_v63  ;;  %v2626_v62 = vld [vmem:[%s3169_s12 + $0x314] ss:$8 sps:$4 sm:$0xff]   ;;  %v2621_v63 = vld [vmem:[%s3169_s12 + $0x210] ss:$8 sps:$4 sm:$0xff]  }
  0x9c   : > { %1899 = vmatpush2.bf16.msra.mxu0 %v2552_v0  ;;  %v2624_v0 = vld [vmem:[%s3169_s12 + $0x310] ss:$8 sps:$4 sm:$0xff]  }
  0x9d   : > { %1940 = vmatpush2.bf16.msra.mxu1 %v2553_v1  ;;  %1900 = vmatprep.subr.bf16.mxu0 %v2554_v3  ;;  %v2629_v1 = vld [vmem:[%s3169_s12 + $0x204] ss:$8 sps:$4 sm:$0xff]  }
  0x9e   : > { %1941 = vmatprep.subr.bf16.mxu1 %v2556_v4  ;;  %v2632_v3 = vld [vmem:[%s3169_s12 + $0x304] ss:$8 sps:$4 sm:$0xff]   ;;  %v2627_v4 = vld [vmem:[%s3169_s12 + $0x200] ss:$8 sps:$4 sm:$0xff]  }
  0xa0   : > { %1901 = vmatpush2.bf16.msra.mxu0 %v2558_v6  ;;  %v2635_v6 = vld [vmem:[%s3169_s12 + $0x2f4] ss:$8 sps:$4 sm:$0xff]  }
  0xa1   : > { %1942 = vmatpush2.bf16.msra.mxu1 %v2559_v9  ;;  %1902 = vmatprep.subr.bf16.mxu0 %v2560_v10  ;;  %v2636_v9 = vld [vmem:[%s3169_s12 + $0x3f0] ss:$8 sps:$4 sm:$0xff]   ;;  %v2641_v10 = vld [vmem:[%s3169_s12 + $0x2e4] ss:$8 sps:$4 sm:$0xff]  }
  0xa2   : > { %1943 = vmatprep.subr.bf16.mxu1 %v2562_v11  ;;  %v2644_v11 = vld [vmem:[%s3169_s12 + $0x3e4] ss:$8 sps:$4 sm:$0xff]  }
  0xa4   : > { %1903 = vmatpush2.bf16.msra.mxu0 %v2564_v14  ;;  %v2647_v14 = vld [vmem:[%s3169_s12 + $0x2d4] ss:$8 sps:$4 sm:$0xff]  }
  0xa5   : > { %1944 = vmatpush2.bf16.msra.mxu1 %v2565_v17  ;;  %1904 = vmatprep.subr.bf16.mxu0 %v2566_v18  ;;  %v2645_v17 = vld [vmem:[%s3169_s12 + $0x2d0] ss:$8 sps:$4 sm:$0xff]  }
  0xa6   : > { %1945 = vmatprep.subr.bf16.mxu1 %v2568_v19  ;;  %v2648_v18 = vld [vmem:[%s3169_s12 + $0x3d0] ss:$8 sps:$4 sm:$0xff]   ;;  %v2653_v19 = vld [vmem:[%s3169_s12 + $0x2c4] ss:$8 sps:$4 sm:$0xff]  }
  0xa8   : > { %1905 = vmatpush2.bf16.msra.mxu0 %v2570_v21  ;;  %v2651_v21 = vld [vmem:[%s3169_s12 + $0x2c0] ss:$8 sps:$4 sm:$0xff]  }
  0xa9   : > { %1946 = vmatpush2.bf16.msra.mxu1 %v2571_v22  ;;  %1906 = vmatprep.subr.bf16.mxu0 %v2572_v23  ;;  %v2654_v22 = vld [vmem:[%s3169_s12 + $0x3c0] ss:$8 sps:$4 sm:$0xff]   ;;  %v2659_v23 = vld [vmem:[%s3169_s12 + $0x2b4] ss:$8 sps:$4 sm:$0xff]  }
  0xaa   : > { %1947 = vmatprep.subr.bf16.mxu1 %v2574_v24  ;;  %v2662_v24 = vld [vmem:[%s3169_s12 + $0x3b4] ss:$8 sps:$4 sm:$0xff]  }
  0xac   : > { %1907 = vmatpush2.bf16.msra.mxu0 %v2576_v25  ;;  %v2657_v25 = vld [vmem:[%s3169_s12 + $0x2b0] ss:$8 sps:$4 sm:$0xff]  }
  0xad   : > { %1948 = vmatpush2.bf16.msra.mxu1 %v2577_v26  ;;  %1908 = vmatprep.subr.bf16.mxu0 %v2578_v27  ;;  %v2660_v26 = vld [vmem:[%s3169_s12 + $0x3b0] ss:$8 sps:$4 sm:$0xff]   ;;  %v2665_v27 = vld [vmem:[%s3169_s12 + $0x2a4] ss:$8 sps:$4 sm:$0xff]  }
  0xae   : > { %1949 = vmatprep.subr.bf16.mxu1 %v2580_v28  ;;  %v2668_v28 = vld [vmem:[%s3169_s12 + $0x3a4] ss:$8 sps:$4 sm:$0xff]  }
  0xb0   : > { %1909 = vmatpush2.bf16.msra.mxu0 %v2582_v30  ;;  %v2666_v30 = vld [vmem:[%s3169_s12 + $0x3a0] ss:$8 sps:$4 sm:$0xff]  }
  0xb1   : > { %1950 = vmatpush2.bf16.msra.mxu1 %v2583_v32  ;;  %1960 = vmatprep.subr.bf16.mxu0 %v2587_v33  ;;  %v2674_v32 = vld [vmem:[%s3169_s12 + $0x394] ss:$8 sps:$4 sm:$0xff]   ;;  %v2669_v33 = vld [vmem:[%s3169_s12 + $0x290] ss:$8 sps:$4 sm:$0xff]  }
  0xb2   : > { %2001 = vmatprep.subr.bf16.mxu1 %v2590_v34  ;;  %v2672_v34 = vld [vmem:[%s3169_s12 + $0x390] ss:$8 sps:$4 sm:$0xff]  }
  0xb3   : > { %1911 = vmatmul.mubr.bf16.vlgmr.msra.gmra.mxu0 %v1109_v31  ;;  %v2671_v31 = vld [vmem:[%s3169_s12 + $0x294] ss:$8 sps:$4 sm:$0xff]  }
  0xb4   : > { %1952 = vmatmul.mubr.bf16.vlgmr.msra.gmra.mxu1 %v1131_v36  ;;  %1961 = vmatpush1.bf16.msra.mxu0 %v2585_v37  ;;  %v2680_v36 = vld [vmem:[%s3169_s12 + $0x384] ss:$8 sps:$4 sm:$0xff]   ;;  %v2675_v37 = vld [vmem:[%s3169_s12 + $0x280] ss:$8 sps:$4 sm:$0xff]  }
  0xb5   : > { %2002 = vmatpush1.bf16.msra.mxu1 %v2588_v38  ;;  %1962 = vmatprep.subr.bf16.mxu0 %v2593_v39  ;;  %v2678_v38 = vld [vmem:[%s3169_s12 + $0x380] ss:$8 sps:$4 sm:$0xff]   ;;  %v2683_v39 = vld [vmem:[%s3169_s12 + $0x474] ss:$8 sps:$4 sm:$0xff]  }
  0xb6   : > { %2003 = vmatprep.subr.bf16.mxu1 %v2596_v40  ;;  %1992 = vmatprep.mubr.bf16.mxu0 %v1130_v35  ;;  %v2677_v35 = vld [vmem:[%s3169_s12 + $0x284] ss:$8 sps:$4 sm:$0xff]   ;;  %v1132_v40 = vcombine.high %v3233_v16, %v3233_v16 }
  0xb7   : > { %2033 = vmatprep.mubr.bf16.mxu1 %v1134_v41  ;;  %v2681_v41 = vld [vmem:[%s3169_s12 + $0x470] ss:$8 sps:$4 sm:$0xff]  }
  0xb8   : > { %1963 = vmatpush1.bf16.msra.mxu0 %v2591_v42  ;;  %v2686_v42 = vld [vmem:[%s3169_s12 + $0x464] ss:$8 sps:$4 sm:$0xff]  }
  0xb9   : > { %2004 = vmatpush1.bf16.msra.mxu1 %v2594_v43  ;;  %1964 = vmatprep.subr.bf16.mxu0 %v2599_v44  ;;  %v2684_v43 = vld [vmem:[%s3169_s12 + $0x460] ss:$8 sps:$4 sm:$0xff]   ;;  %v2763_v44 = vmov 0  }
  0xba   : > { %2005 = vmatprep.subr.bf16.mxu1 %v2602_v45  ;;  %v2689_v45 = vld [vmem:[%s3169_s12 + $0x454] ss:$8 sps:$4 sm:$0xff]  }
  0xbc   : > { %1965 = vmatpush1.bf16.msra.mxu0 %v2597_v46  ;;  %v2687_v46 = vld [vmem:[%s3169_s12 + $0x450] ss:$8 sps:$4 sm:$0xff]  }
  0xbd   : > { %2006 = vmatpush1.bf16.msra.mxu1 %v2600_v47  ;;  %1966 = vmatprep.subr.bf16.mxu0 %v2605_v48  ;;  %v2692_v47 = vld [vmem:[%s3169_s12 + $0x444] ss:$8 sps:$4 sm:$0xff]   ;;  %v2690_v48 = vld [vmem:[%s3169_s12 + $0x440] ss:$8 sps:$4 sm:$0xff]  }
  0xbe   : > { %2007 = vmatprep.subr.bf16.mxu1 %v2608_v49  ;;  %v2693_v49 = vld [vmem:[%s3169_s12 + $0x430] ss:$8 sps:$4 sm:$0xff]  }
  0xc0   : > { %1967 = vmatpush1.bf16.msra.mxu0 %v2603_v50  ;;  %v2698_v50 = vld [vmem:[%s3169_s12 + $0x424] ss:$8 sps:$4 sm:$0xff]  }
  0xc1   : > { %2008 = vmatpush1.bf16.msra.mxu1 %v2606_v51  ;;  %1968 = vmatprep.subr.bf16.mxu0 %v2611_v52  ;;  %v2696_v51 = vld [vmem:[%s3169_s12 + $0x420] ss:$8 sps:$4 sm:$0xff]   ;;  %v2701_v52 = vld [vmem:[%s3169_s12 + $0x414] ss:$8 sps:$4 sm:$0xff]  }
  0xc2   : > { %2009 = vmatprep.subr.bf16.mxu1 %v2614_v53  ;;  %v2699_v53 = vld [vmem:[%s3169_s12 + $0x410] ss:$8 sps:$4 sm:$0xff]  }
  0xc4   : > { %1969 = vmatpush1.bf16.msra.mxu0 %v2609_v54  ;;  %v2704_v54 = vld [vmem:[%s3169_s12 + $0x404] ss:$8 sps:$4 sm:$0xff]  }
  0xc5   : > { %2010 = vmatpush1.bf16.msra.mxu1 %v2612_v55  ;;  %1970 = vmatprep.subr.bf16.mxu0 %v2617_v56  ;;  %v2702_v55 = vld [vmem:[%s3169_s12 + $0x400] ss:$8 sps:$4 sm:$0xff]   ;;  %v2277_v56 = vld.sshfl [vmem:[%s3152_s29 + $0x8] sm:$0x1 pattern:$0x75316420] }
  0xc6   : > { %2011 = vmatprep.subr.bf16.mxu1 %v2620_v57  ;;  %v1148_v57 = vrot.slane %v2277_v56, %v3219_v2 }
  0xc8   : > { %1971 = vmatpush1.bf16.msra.mxu0 %v2615_v58 }
  0xc9   : > { %2012 = vmatpush1.bf16.msra.mxu1 %v2618_v59  ;;  %1972 = vmatprep.subr.bf16.mxu0 %v2623_v61 }
  0xca   : > { %2013 = vmatprep.subr.bf16.mxu1 %v2626_v62 }
  0xcc   : > { %1973 = vmatpush1.bf16.msra.mxu0 %v2621_v63 }
  0xcd   : > { %2014 = vmatpush1.bf16.msra.mxu1 %v2624_v0  ;;  %1974 = vmatprep.subr.bf16.mxu0 %v2629_v1 }
  0xce   : > { %2015 = vmatprep.subr.bf16.mxu1 %v2632_v3 }
  0xd0   : > { %1975 = vmatpush1.bf16.msra.mxu0 %v2627_v4 }
  0xd1   : > { %2016 = vmatpush1.bf16.msra.mxu1 %v2630_v5  ;;  %1976 = vmatprep.subr.bf16.mxu0 %v2635_v6 }
  0xd2   : > { %2017 = vmatprep.subr.bf16.mxu1 %v2638_v7 }
  0xd4   : > { %1977 = vmatpush2.bf16.msra.mxu0 %v2633_v8 }
  0xd5   : > { %2018 = vmatpush2.bf16.msra.mxu1 %v2636_v9  ;;  %1978 = vmatprep.subr.bf16.mxu0 %v2641_v10 }
  0xd6   : > { %2019 = vmatprep.subr.bf16.mxu1 %v2644_v11 }
  0xd8   : > { %1979 = vmatpush2.bf16.msra.mxu0 %v2639_v12 }
  0xd9   : > { %2020 = vmatpush2.bf16.msra.mxu1 %v2642_v13  ;;  %1980 = vmatprep.subr.bf16.mxu0 %v2647_v14  ;;  %v2764_v13 = vmov 1983009808  }
  0xda   : > { %2021 = vmatprep.subr.bf16.mxu1 %v2650_v15  ;;  %v2087_v14 = vunpack.c.l.s4 %v2764_v13 }
  0xdc   : > { %1981 = vmatpush2.bf16.msra.mxu0 %v2645_v17 }
  0xdd   : > { %2022 = vmatpush2.bf16.msra.mxu1 %v2648_v18  ;;  %1982 = vmatprep.subr.bf16.mxu0 %v2653_v19  ;;  %v2088_v18 = vunpack.c.0.s8 %v2087_v14 }
  0xde   : > { %2023 = vmatprep.subr.bf16.mxu1 %v2656_v20 }
  0xe0   : > { %1983 = vmatpush2.bf16.msra.mxu0 %v2651_v21 }
  0xe1   : > { %2024 = vmatpush2.bf16.msra.mxu1 %v2654_v22  ;;  %1984 = vmatprep.subr.bf16.mxu0 %v2659_v23 }
  0xe2   : > { %2025 = vmatprep.subr.bf16.mxu1 %v2662_v24 }
  0xe4   : > { %1985 = vmatpush2.bf16.msra.mxu0 %v2657_v25  ;;  %v2091_v25 = vsub.s32 %v2088_v18, %v3211_v60 }
  0xe5   : > { %2026 = vmatpush2.bf16.msra.mxu1 %v2660_v26  ;;  %1986 = vmatprep.subr.bf16.mxu0 %v2665_v27 }
  0xe6   : > { %2027 = vmatprep.subr.bf16.mxu1 %v2668_v28  ;;  %v937_v28 = vld [vmem:[#allocation2] sm:$0xf] }
  0xe8   : > { %1987 = vmatpush2.bf16.msra.mxu0 %v2663_v29 }
  0xe9   : > { %2028 = vmatpush2.bf16.msra.mxu1 %v2666_v30  ;;  %1988 = vmatprep.subr.bf16.mxu0 %v2671_v31 }
  0xea   : > { %2029 = vmatprep.subr.bf16.mxu1 %v2674_v32 }
  0xec   : > { %1989 = vmatpush2.bf16.msra.mxu0 %v2669_v33 }
  0xed   : > { %2030 = vmatpush2.bf16.msra.mxu1 %v2672_v34  ;;  %1990 = vmatprep.subr.bf16.mxu0 %v2677_v35 }
  0xee   : > { %2031 = vmatprep.subr.bf16.mxu1 %v2680_v36 }
  0xf0   : > { %1991 = vmatpush2.bf16.msra.mxu0 %v2675_v37 }
  0xf1   : > { %2032 = vmatpush2.bf16.msra.mxu1 %v2678_v38  ;;  %2042 = vmatprep.subr.bf16.mxu0 %v2683_v39 }
  0xf3   : > { %1993 = vmatmul.mubr.bf16.vlgmr.msra.gmra.mxu0 %v3233_v16  ;;  %v2695_v16 = vld [vmem:[%s3169_s12 + $0x434] ss:$8 sps:$4 sm:$0xff]  }
  0xf4   : > { %2034 = vmatmul.mubr.bf16.vlgmr.msra.gmra.mxu1 %v1132_v40  ;;  %2043 = vmatpush1.bf16.msra.mxu0 %v2681_v41 }
  0xf5   : > { %2074 = vmatprep.mubr.bf16.mxu0 %v2763_v44  ;;  %2044 = vmatprep.subr.bf16.mxu0 %v2686_v42 }
  0xf8   : > { %2045 = vmatpush1.bf16.msra.mxu0 %v2684_v43 }
  0xf9   : > { %2046 = vmatprep.subr.bf16.mxu0 %v2689_v45 }
  0xfc   : > { %2047 = vmatpush1.bf16.msra.mxu0 %v2687_v46 }
  0xfd   : > { %2048 = vmatprep.subr.bf16.mxu0 %v2692_v47 }
 0x100   : > { %2049 = vmatpush1.bf16.msra.mxu0 %v2690_v48 }
 0x101   : > { %2050 = vmatprep.subr.bf16.mxu0 %v2695_v16 }
 0x104   : > { %2051 = vmatpush1.bf16.msra.mxu0 %v2693_v49 }
 0x105   : > { %2052 = vmatprep.subr.bf16.mxu0 %v2698_v50 }
 0x108   : > { %2053 = vmatpush1.bf16.msra.mxu0 %v2696_v51 }
 0x109   : > { %2054 = vmatprep.subr.bf16.mxu0 %v2701_v52 }
 0x10c   : > { %2055 = vmatpush1.bf16.msra.mxu0 %v2699_v53 }
 0x10d   : > { %2056 = vmatprep.subr.bf16.mxu0 %v2704_v54 }
 0x110   : > { %2057 = vmatpush1.bf16.msra.mxu0 %v2702_v55 }
 0x113   : > { %2075 = vmatmul.mubr.bf16.vlgmr.msra.gmra.mxu0 %v1148_v57 }
 0x173   : > { %v1912_v58 = vpop.f32.mrf.mxu0 }
 0x174   : > { %v1953_v59 = vpop.f32.mrf.mxu1 }
 0x175   : > { %v1954_v61 = vadd.f32 %v1953_v59, %v1912_v58  ;;  %v1914_v62 = vpop.f32.mrf.mxu0 }
 0x176   : > { %v1955_v63 = vpop.f32.mrf.mxu1 }
 0x177   : > { %v1956_v0 = vadd.f32 %v1955_v63, %v1914_v62  ;;  %v1916_v1 = vpop.f32.mrf.mxu0 }
 0x178   : > { %v1957_v3 = vpop.f32.mrf.mxu1 }
 0x179   : > { %v1917_v4 = vpop.f32.mrf.mxu0 }
 0x17a   : > { %v1958_v5 = vpop.f32.mrf.mxu1 }
 0x1b3   : > { %v1994_v6 = vpop.f32.mrf.mxu0 }
 0x1b4   : > { %v2035_v7 = vpop.f32.mrf.mxu1  ;;  %v1995_v15 = vadd.f32 %v1994_v6, %v1954_v61 }
 0x1b5   : > { %v1996_v8 = vpop.f32.mrf.mxu0 }
 0x1b6   : > { %v2037_v9 = vpop.f32.mrf.mxu1  ;;  %v1997_v17 = vadd.f32 %v1996_v8, %v1956_v0  ;;  %v2036_v20 = vadd.f32 %v2035_v7, %v1995_v15 }
 0x1b7   : > { %v1998_v10 = vpop.f32.mrf.mxu0 }
 0x1b8   : > { %v2039_v11 = vpop.f32.mrf.mxu1  ;;  %v2038_v21 = vadd.f32 %v2037_v9, %v1997_v17 }
 0x1b9   : > { %v1999_v12 = vpop.f32.mrf.mxu0 }
 0x1ba   : > { %v2040_v2 = vpop.f32.mrf.mxu1 }
 0x1d3   : > { %v2076_v19 = vpop.f32.mrf.mxu0 }
 0x1d4   : > { %v2077_v23 = vadd.f32 %v2076_v19, %v2036_v20 }
 0x1d5   : > { %v2078_v22 = vpop.f32.mrf.mxu0 }
 0x1d6   : > { %v2079_v24 = vadd.f32 %v2078_v22, %v2038_v21 }
 0x1d7   : > { %v2080_v26 = vpop.f32.mrf.mxu0 }
 0x1d8   : > { %v2085_v27 = vcombine.low %v2077_v23, %v2079_v24 }
 0x1d9   : > { %v2081_v29 = vpop.f32.mrf.mxu0 }
 0x1da   : > { %v2092_v30 = vrot.slane %v2085_v27, %v2091_v25  ;;  %2099 = sbr.rel (%p2422_p13) target bundleno = 494 (0x1ee), region = 82 }
 0x1dc   : > { %v2094_v31 = vadd.f32 %v2092_v30, %v937_v28 }
 0x1de   : > { %2095 = vst [vmem:[#allocation2] sm:$0xf] %v2094_v31 }
 0x1df   : > { %v2101_v32 = vld [vmem:[%s909_s6] sm:$0x3]  ;;  %v2105_v33 = vsub.s32 0, %v3211_v60  ;;  %v2109_v34 = vsub.s32 1, %v3211_v60 }
 0x1e0   : > { %v2121_v40 = vld [vmem:[%s3162_s18] sm:$0xf] }
 0x1e1   : > { %v2106_v35 = vrot.slane %v2101_v32, %v2105_v33  ;;  %v2110_v36 = vrot.slane %v2101_v32, %v2109_v34 }
 0x1e3   : > { %v2111_v37 = vcombine.low %v2106_v35, %v2110_v36 }
 0x1e5   : > { %v2100_v38 = vld [vmem:[#allocation2] sm:$0xf]  ;;  %v2118_v39 = vrot.slane %v2111_v37, %v2091_v25 }
 0x1e7   : > { %v2120_v41 = vadd.f32 %v2118_v39, %v2100_v38 }
 0x1e9   : > { %v2122_v42 = vadd.f32 %v2121_v40, %v2120_v41 }
 0x1eb   : > { %v2123_v43 = vmax.f32 %v2122_v42, 0.0 }
 0x1ed   : > { %2124 = vst [vmem:[%s3167_s11] sm:$0xf] %v2123_v43 }
 0x1ee PF: > { %s14_s21 = sadd.s32 1, %s2759_s21   ;;  %s3372_s15 = smov %s2739_s16 }
 0x1ef   : > { %p11_p0 = scmp.ge.s32.totalorder %s14_s21, 10   ;;  %s3373_s16 = smov %s2841_s28 }
 0x1f0   : > { %s3374_s17 = smov %s2751_s19  ;;  %s3375_s18 = smov %s2755_s20 }
 0x1f1   : > { %s3376_s19 = smov %s3379_s22  ;;  %s3377_s20 = smov %s3383_s23 }
 0x1f2   :  { %13 = sbr.rel (!%p11_p0) target bundleno = 4 (0x4), region = 126 }

// kernel: resnet34_forward.72
= control target key start
LH: loop header
LB: loop body
LE: loop exit
PB: predicated region body
PF: predicated region fallthrough
CT: control target
= control target key end

     0   :  { %s2700_s12 = smov 0   ;;  %s2702_s13 = smov 0   ;;  %s3271_s0 = inlined_call_operand.vmem [shape: bf16[2,4608], index: 0, kind: input, shape index: {}]   ;;  %s3272_s1 = inlined_call_operand.vmem [shape: bf16[4608,512], index: 1, kind: input, shape index: {}]   ;;  %s3273_s2 = inlined_call_operand.vmem [shape: f32[1,512], index: 2, kind: input, shape index: {}]   ;;  %s3274_s3 = inlined_call_operand.vmem [shape: f32[2,512], index: 3, kind: output, shape index: {}]  }
   0x1   :  { %s2704_s14 = smov 0   ;;  %s2706_s15 = smov 0  }
   0x2   :  { %s2708_s16 = smov 0   ;;  %s2710_s17 = smov 0  }
   0x3   :  { %s2712_s18 = smov 0  }
   0x4 LB: > { %s25_s19 = sadd.s32 1, %s2666_s16  ;;  %s28_s20 = sadd.s32 1, %s2670_s17  ;;  %s2674_s18 = sphi %s2712_s18, %s13_s18   ;;  %s2670_s17 = sphi %s2710_s17, %s3280_s17   ;;  %s2666_s16 = sphi %s2708_s16, %s3279_s16   ;;  %s2662_s15 = sphi %s2706_s15, %s3278_s15   ;;  %s2658_s14 = sphi %s2704_s14, %s3277_s14   ;;  %s2654_s13 = sphi %s2702_s13, %s3276_s13   ;;  %s2650_s12 = sphi %s2700_s12, %s3275_s12  }
   0x5   : > { %p26_p0 = scmp.ge.s32.totalorder %s25_s19, 4  ;;  %p76_p1 = scmp.ne.s32.totalorder %s2654_s13, %s2650_s12 }
   0x6   : > { %p77_p2 = scmp.eq.s32.totalorder %s2674_s18, 0  ;;  %s69_s24 = sadd.s32 1, %s2654_s13 }
   0x7   : > { %s3282_s19 = smov (%p26_p0, %s25_s19), 0  ;;  %s3284_s20 = smov (!%p26_p0, %s28_s20), %s2670_s17 }
   0x8   : > { %p78_p3 = por %p77_p2, %p76_p1  ;;  %p30_p4 = scmp.ge.s32.totalorder %s3284_s20, 2 }
   0x9   : > { %s64_s21 = ssub.s32 %s2666_s16, %s3282_s19  ;;  %p2183_p6 = scmp.ge.s32.totalorder %s2674_s18, 8 }
   0xa   : > { %s3286_s20 = smov (%p30_p4, %s3284_s20), 0 }
   0xb   : > { %s65_s22 = ssub.s32 %s2670_s17, %s3286_s20  ;;  %156 = sbr.rel (%p2183_p6) target bundleno = 96 (0x60), region = 16 }
   0xc   : > { %s66_s23 = sor.u32 %s65_s22, %s64_s21 }
   0xd   : > { %p67_p5 = scmp.eq.s32.totalorder %s66_s23, 0 }
   0xf   : > { %s2751_s25 = scalar_select %p67_p5, %s2654_s13, %s69_s24  }
  0x10   : > { %171 = sbr.rel (!%p78_p3) target bundleno = 96 (0x60), region = 24  ;;  %s173_s26 = sand.u32 (%p78_p3), 1, %s2654_s13  }
  0x11   : > { %s2341_s27 = smul.u32 (%p78_p3), 1152, %s173_s26  ;;  %s2184_s28 = sshll.u32 (%p78_p3), %s2670_s17, 1 }
  0x12   : > { %s2340_s29 = smul.u32 (%p78_p3), 576, %s2666_s16 }
  0x13   : > { %s2765_s8 = scalar_lea.vmem (%p78_p3), [#allocation3], %s2341_s27 }
  0x14   : > { %s179_s30 = sadd.s32 (%p78_p3), %s2340_s29, %s2184_s28 }
  0x15   : > { %s2186_s4 = sshll.u32 %s179_s30, 2 }
  0x16   : > { %s2760_s7 = scalar_lea.vmem %s3272_s1, %s2186_s4 }
  0x17   : > { %v496_v0 = vld [vmem:[%s2760_s7] sm:$0xff]  ;;  %v498_v1 = vld [vmem:[%s2760_s7 + $0x10] sm:$0xff] }
  0x18   : > { %v500_v2 = vld [vmem:[%s2760_s7 + $0x20] sm:$0xff]  ;;  %497 = vst [vmem:[%s2765_s8] sm:$0xff] %v496_v0  ;;  %499 = vst [vmem:[%s2765_s8 + $0x8] sm:$0xff] %v498_v1  ;;  %v502_v3 = vld [vmem:[%s2760_s7 + $0x30] sm:$0xff] }
  0x19   : > { %501 = vst [vmem:[%s2765_s8 + $0x10] sm:$0xff] %v500_v2  ;;  %v504_v4 = vld [vmem:[%s2760_s7 + $0x40] sm:$0xff]  ;;  %v506_v5 = vld [vmem:[%s2760_s7 + $0x50] sm:$0xff]  ;;  %503 = vst [vmem:[%s2765_s8 + $0x18] sm:$0xff] %v502_v3 }
  0x1a   : > { %505 = vst [vmem:[%s2765_s8 + $0x20] sm:$0xff] %v504_v4  ;;  %507 = vst [vmem:[%s2765_s8 + $0x28] sm:$0xff] %v506_v5  ;;  %v508_v6 = vld [vmem:[%s2760_s7 + $0x60] sm:$0xff]  ;;  %v510_v7 = vld [vmem:[%s2760_s7 + $0x70] sm:$0xff] }
  0x1b   : > { %v512_v8 = vld [vmem:[%s2760_s7 + $0x80] sm:$0xff]  ;;  %509 = vst [vmem:[%s2765_s8 + $0x30] sm:$0xff] %v508_v6  ;;  %511 = vst [vmem:[%s2765_s8 + $0x38] sm:$0xff] %v510_v7  ;;  %v514_v9 = vld [vmem:[%s2760_s7 + $0x90] sm:$0xff] }
  0x1c   : > { %513 = vst [vmem:[%s2765_s8 + $0x40] sm:$0xff] %v512_v8  ;;  %v516_v10 = vld [vmem:[%s2760_s7 + $0xa0] sm:$0xff]  ;;  %v518_v11 = vld [vmem:[%s2760_s7 + $0xb0] sm:$0xff]  ;;  %515 = vst [vmem:[%s2765_s8 + $0x48] sm:$0xff] %v514_v9 }
  0x1d   : > { %517 = vst [vmem:[%s2765_s8 + $0x50] sm:$0xff] %v516_v10  ;;  %519 = vst [vmem:[%s2765_s8 + $0x58] sm:$0xff] %v518_v11  ;;  %v520_v12 = vld [vmem:[%s2760_s7 + $0xc0] sm:$0xff]  ;;  %v522_v13 = vld [vmem:[%s2760_s7 + $0xd0] sm:$0xff] }
  0x1e   : > { %v524_v14 = vld [vmem:[%s2760_s7 + $0xe0] sm:$0xff]  ;;  %521 = vst [vmem:[%s2765_s8 + $0x60] sm:$0xff] %v520_v12  ;;  %523 = vst [vmem:[%s2765_s8 + $0x68] sm:$0xff] %v522_v13  ;;  %v526_v15 = vld [vmem:[%s2760_s7 + $0xf0] sm:$0xff] }
  0x1f   : > { %525 = vst [vmem:[%s2765_s8 + $0x70] sm:$0xff] %v524_v14  ;;  %v528_v16 = vld [vmem:[%s2760_s7 + $0x100] sm:$0xff]  ;;  %v530_v17 = vld [vmem:[%s2760_s7 + $0x110] sm:$0xff]  ;;  %527 = vst [vmem:[%s2765_s8 + $0x78] sm:$0xff] %v526_v15 }
  0x20   : > { %529 = vst [vmem:[%s2765_s8 + $0x80] sm:$0xff] %v528_v16  ;;  %531 = vst [vmem:[%s2765_s8 + $0x88] sm:$0xff] %v530_v17  ;;  %v532_v18 = vld [vmem:[%s2760_s7 + $0x120] sm:$0xff]  ;;  %v534_v19 = vld [vmem:[%s2760_s7 + $0x130] sm:$0xff] }
  0x21   : > { %v536_v20 = vld [vmem:[%s2760_s7 + $0x140] sm:$0xff]  ;;  %533 = vst [vmem:[%s2765_s8 + $0x90] sm:$0xff] %v532_v18  ;;  %535 = vst [vmem:[%s2765_s8 + $0x98] sm:$0xff] %v534_v19  ;;  %v538_v21 = vld [vmem:[%s2760_s7 + $0x150] sm:$0xff] }
  0x22   : > { %537 = vst [vmem:[%s2765_s8 + $0xa0] sm:$0xff] %v536_v20  ;;  %v540_v22 = vld [vmem:[%s2760_s7 + $0x160] sm:$0xff]  ;;  %v542_v23 = vld [vmem:[%s2760_s7 + $0x170] sm:$0xff]  ;;  %539 = vst [vmem:[%s2765_s8 + $0xa8] sm:$0xff] %v538_v21 }
  0x23   : > { %541 = vst [vmem:[%s2765_s8 + $0xb0] sm:$0xff] %v540_v22  ;;  %543 = vst [vmem:[%s2765_s8 + $0xb8] sm:$0xff] %v542_v23  ;;  %v544_v24 = vld [vmem:[%s2760_s7 + $0x180] sm:$0xff]  ;;  %v546_v25 = vld [vmem:[%s2760_s7 + $0x190] sm:$0xff] }
  0x24   : > { %v548_v26 = vld [vmem:[%s2760_s7 + $0x1a0] sm:$0xff]  ;;  %545 = vst [vmem:[%s2765_s8 + $0xc0] sm:$0xff] %v544_v24  ;;  %547 = vst [vmem:[%s2765_s8 + $0xc8] sm:$0xff] %v546_v25  ;;  %v550_v27 = vld [vmem:[%s2760_s7 + $0x1b0] sm:$0xff] }
  0x25   : > { %549 = vst [vmem:[%s2765_s8 + $0xd0] sm:$0xff] %v548_v26  ;;  %v552_v28 = vld [vmem:[%s2760_s7 + $0x1c0] sm:$0xff]  ;;  %v554_v29 = vld [vmem:[%s2760_s7 + $0x1d0] sm:$0xff]  ;;  %551 = vst [vmem:[%s2765_s8 + $0xd8] sm:$0xff] %v550_v27 }
  0x26   : > { %553 = vst [vmem:[%s2765_s8 + $0xe0] sm:$0xff] %v552_v28  ;;  %555 = vst [vmem:[%s2765_s8 + $0xe8] sm:$0xff] %v554_v29  ;;  %v556_v30 = vld [vmem:[%s2760_s7 + $0x1e0] sm:$0xff]  ;;  %v558_v31 = vld [vmem:[%s2760_s7 + $0x1f0] sm:$0xff] }
  0x27   : > { %v560_v32 = vld [vmem:[%s2760_s7 + $0x200] sm:$0xff]  ;;  %557 = vst [vmem:[%s2765_s8 + $0xf0] sm:$0xff] %v556_v30  ;;  %559 = vst [vmem:[%s2765_s8 + $0xf8] sm:$0xff] %v558_v31  ;;  %v562_v33 = vld [vmem:[%s2760_s7 + $0x210] sm:$0xff] }
  0x28   : > { %561 = vst [vmem:[%s2765_s8 + $0x100] sm:$0xff] %v560_v32  ;;  %v564_v34 = vld [vmem:[%s2760_s7 + $0x220] sm:$0xff]  ;;  %v566_v35 = vld [vmem:[%s2760_s7 + $0x230] sm:$0xff]  ;;  %563 = vst [vmem:[%s2765_s8 + $0x108] sm:$0xff] %v562_v33 }
  0x29   : > { %565 = vst [vmem:[%s2765_s8 + $0x110] sm:$0xff] %v564_v34  ;;  %567 = vst [vmem:[%s2765_s8 + $0x118] sm:$0xff] %v566_v35  ;;  %v568_v36 = vld [vmem:[%s2760_s7 + $0x240] sm:$0xff]  ;;  %v570_v37 = vld [vmem:[%s2760_s7 + $0x250] sm:$0xff] }
  0x2a   : > { %v572_v38 = vld [vmem:[%s2760_s7 + $0x260] sm:$0xff]  ;;  %569 = vst [vmem:[%s2765_s8 + $0x120] sm:$0xff] %v568_v36  ;;  %571 = vst [vmem:[%s2765_s8 + $0x128] sm:$0xff] %v570_v37  ;;  %v574_v39 = vld [vmem:[%s2760_s7 + $0x270] sm:$0xff] }
  0x2b   : > { %573 = vst [vmem:[%s2765_s8 + $0x130] sm:$0xff] %v572_v38  ;;  %v576_v40 = vld [vmem:[%s2760_s7 + $0x280] sm:$0xff]  ;;  %v578_v41 = vld [vmem:[%s2760_s7 + $0x290] sm:$0xff]  ;;  %575 = vst [vmem:[%s2765_s8 + $0x138] sm:$0xff] %v574_v39 }
  0x2c   : > { %577 = vst [vmem:[%s2765_s8 + $0x140] sm:$0xff] %v576_v40  ;;  %579 = vst [vmem:[%s2765_s8 + $0x148] sm:$0xff] %v578_v41  ;;  %v580_v42 = vld [vmem:[%s2760_s7 + $0x2a0] sm:$0xff]  ;;  %v582_v43 = vld [vmem:[%s2760_s7 + $0x2b0] sm:$0xff] }
  0x2d   : > { %v584_v44 = vld [vmem:[%s2760_s7 + $0x2c0] sm:$0xff]  ;;  %581 = vst [vmem:[%s2765_s8 + $0x150] sm:$0xff] %v580_v42  ;;  %583 = vst [vmem:[%s2765_s8 + $0x158] sm:$0xff] %v582_v43  ;;  %v586_v45 = vld [vmem:[%s2760_s7 + $0x2d0] sm:$0xff] }
  0x2e   : > { %585 = vst [vmem:[%s2765_s8 + $0x160] sm:$0xff] %v584_v44  ;;  %v588_v46 = vld [vmem:[%s2760_s7 + $0x2e0] sm:$0xff]  ;;  %v590_v47 = vld [vmem:[%s2760_s7 + $0x2f0] sm:$0xff]  ;;  %587 = vst [vmem:[%s2765_s8 + $0x168] sm:$0xff] %v586_v45 }
  0x2f   : > { %589 = vst [vmem:[%s2765_s8 + $0x170] sm:$0xff] %v588_v46  ;;  %591 = vst [vmem:[%s2765_s8 + $0x178] sm:$0xff] %v590_v47  ;;  %v592_v48 = vld [vmem:[%s2760_s7 + $0x300] sm:$0xff]  ;;  %v594_v49 = vld [vmem:[%s2760_s7 + $0x310] sm:$0xff] }
  0x30   : > { %v596_v50 = vld [vmem:[%s2760_s7 + $0x320] sm:$0xff]  ;;  %593 = vst [vmem:[%s2765_s8 + $0x180] sm:$0xff] %v592_v48  ;;  %595 = vst [vmem:[%s2765_s8 + $0x188] sm:$0xff] %v594_v49  ;;  %v598_v51 = vld [vmem:[%s2760_s7 + $0x330] sm:$0xff] }
  0x31   : > { %597 = vst [vmem:[%s2765_s8 + $0x190] sm:$0xff] %v596_v50  ;;  %v600_v52 = vld [vmem:[%s2760_s7 + $0x340] sm:$0xff]  ;;  %v602_v53 = vld [vmem:[%s2760_s7 + $0x350] sm:$0xff]  ;;  %599 = vst [vmem:[%s2765_s8 + $0x198] sm:$0xff] %v598_v51 }
  0x32   : > { %601 = vst [vmem:[%s2765_s8 + $0x1a0] sm:$0xff] %v600_v52  ;;  %603 = vst [vmem:[%s2765_s8 + $0x1a8] sm:$0xff] %v602_v53  ;;  %v604_v54 = vld [vmem:[%s2760_s7 + $0x360] sm:$0xff]  ;;  %v606_v55 = vld [vmem:[%s2760_s7 + $0x370] sm:$0xff] }
  0x33   : > { %v608_v56 = vld [vmem:[%s2760_s7 + $0x380] sm:$0xff]  ;;  %605 = vst [vmem:[%s2765_s8 + $0x1b0] sm:$0xff] %v604_v54  ;;  %607 = vst [vmem:[%s2765_s8 + $0x1b8] sm:$0xff] %v606_v55  ;;  %v610_v57 = vld [vmem:[%s2760_s7 + $0x390] sm:$0xff] }
  0x34   : > { %609 = vst [vmem:[%s2765_s8 + $0x1c0] sm:$0xff] %v608_v56  ;;  %v612_v58 = vld [vmem:[%s2760_s7 + $0x3a0] sm:$0xff]  ;;  %v614_v59 = vld [vmem:[%s2760_s7 + $0x3b0] sm:$0xff]  ;;  %611 = vst [vmem:[%s2765_s8 + $0x1c8] sm:$0xff] %v610_v57 }
  0x35   : > { %613 = vst [vmem:[%s2765_s8 + $0x1d0] sm:$0xff] %v612_v58  ;;  %615 = vst [vmem:[%s2765_s8 + $0x1d8] sm:$0xff] %v614_v59  ;;  %v616_v60 = vld [vmem:[%s2760_s7 + $0x3c0] sm:$0xff]  ;;  %v618_v61 = vld [vmem:[%s2760_s7 + $0x3d0] sm:$0xff] }
  0x36   : > { %v620_v62 = vld [vmem:[%s2760_s7 + $0x3e0] sm:$0xff]  ;;  %617 = vst [vmem:[%s2765_s8 + $0x1e0] sm:$0xff] %v616_v60  ;;  %619 = vst [vmem:[%s2765_s8 + $0x1e8] sm:$0xff] %v618_v61  ;;  %v622_v63 = vld [vmem:[%s2760_s7 + $0x3f0] sm:$0xff] }
  0x37   : > { %621 = vst [vmem:[%s2765_s8 + $0x1f0] sm:$0xff] %v620_v62  ;;  %v624_v0 = vld [vmem:[%s2760_s7 + $0x400] sm:$0xff]  ;;  %v626_v1 = vld [vmem:[%s2760_s7 + $0x410] sm:$0xff]  ;;  %623 = vst [vmem:[%s2765_s8 + $0x1f8] sm:$0xff] %v622_v63 }
  0x38   : > { %625 = vst [vmem:[%s2765_s8 + $0x200] sm:$0xff] %v624_v0  ;;  %627 = vst [vmem:[%s2765_s8 + $0x208] sm:$0xff] %v626_v1  ;;  %v628_v2 = vld [vmem:[%s2760_s7 + $0x420] sm:$0xff]  ;;  %v630_v3 = vld [vmem:[%s2760_s7 + $0x430] sm:$0xff] }
  0x39   : > { %v632_v4 = vld [vmem:[%s2760_s7 + $0x440] sm:$0xff]  ;;  %629 = vst [vmem:[%s2765_s8 + $0x210] sm:$0xff] %v628_v2  ;;  %631 = vst [vmem:[%s2765_s8 + $0x218] sm:$0xff] %v630_v3  ;;  %v634_v5 = vld [vmem:[%s2760_s7 + $0x450] sm:$0xff] }
  0x3a   : > { %633 = vst [vmem:[%s2765_s8 + $0x220] sm:$0xff] %v632_v4  ;;  %v636_v6 = vld [vmem:[%s2760_s7 + $0x460] sm:$0xff]  ;;  %v638_v7 = vld [vmem:[%s2760_s7 + $0x470] sm:$0xff]  ;;  %635 = vst [vmem:[%s2765_s8 + $0x228] sm:$0xff] %v634_v5 }
  0x3b   : > { %637 = vst [vmem:[%s2765_s8 + $0x230] sm:$0xff] %v636_v6  ;;  %639 = vst [vmem:[%s2765_s8 + $0x238] sm:$0xff] %v638_v7  ;;  %v640_v8 = vld [vmem:[%s2760_s7 + $0x480] sm:$0xff]  ;;  %v642_v9 = vld [vmem:[%s2760_s7 + $0x490] sm:$0xff] }
  0x3c   : > { %v644_v10 = vld [vmem:[%s2760_s7 + $0x4a0] sm:$0xff]  ;;  %641 = vst [vmem:[%s2765_s8 + $0x240] sm:$0xff] %v640_v8  ;;  %643 = vst [vmem:[%s2765_s8 + $0x248] sm:$0xff] %v642_v9  ;;  %v646_v11 = vld [vmem:[%s2760_s7 + $0x4b0] sm:$0xff] }
  0x3d   : > { %645 = vst [vmem:[%s2765_s8 + $0x250] sm:$0xff] %v644_v10  ;;  %v648_v12 = vld [vmem:[%s2760_s7 + $0x4c0] sm:$0xff]  ;;  %v650_v13 = vld [vmem:[%s2760_s7 + $0x4d0] sm:$0xff]  ;;  %647 = vst [vmem:[%s2765_s8 + $0x258] sm:$0xff] %v646_v11 }
  0x3e   : > { %649 = vst [vmem:[%s2765_s8 + $0x260] sm:$0xff] %v648_v12  ;;  %651 = vst [vmem:[%s2765_s8 + $0x268] sm:$0xff] %v650_v13  ;;  %v652_v14 = vld [vmem:[%s2760_s7 + $0x4e0] sm:$0xff]  ;;  %v654_v15 = vld [vmem:[%s2760_s7 + $0x4f0] sm:$0xff] }
  0x3f   : > { %v656_v16 = vld [vmem:[%s2760_s7 + $0x500] sm:$0xff]  ;;  %653 = vst [vmem:[%s2765_s8 + $0x270] sm:$0xff] %v652_v14  ;;  %655 = vst [vmem:[%s2765_s8 + $0x278] sm:$0xff] %v654_v15  ;;  %v658_v17 = vld [vmem:[%s2760_s7 + $0x510] sm:$0xff] }
  0x40   : > { %657 = vst [vmem:[%s2765_s8 + $0x280] sm:$0xff] %v656_v16  ;;  %v660_v18 = vld [vmem:[%s2760_s7 + $0x520] sm:$0xff]  ;;  %v662_v19 = vld [vmem:[%s2760_s7 + $0x530] sm:$0xff]  ;;  %659 = vst [vmem:[%s2765_s8 + $0x288] sm:$0xff] %v658_v17 }
  0x41   : > { %661 = vst [vmem:[%s2765_s8 + $0x290] sm:$0xff] %v660_v18  ;;  %663 = vst [vmem:[%s2765_s8 + $0x298] sm:$0xff] %v662_v19  ;;  %v664_v20 = vld [vmem:[%s2760_s7 + $0x540] sm:$0xff]  ;;  %v666_v21 = vld [vmem:[%s2760_s7 + $0x550] sm:$0xff] }
  0x42   : > { %v668_v22 = vld [vmem:[%s2760_s7 + $0x560] sm:$0xff]  ;;  %665 = vst [vmem:[%s2765_s8 + $0x2a0] sm:$0xff] %v664_v20  ;;  %667 = vst [vmem:[%s2765_s8 + $0x2a8] sm:$0xff] %v666_v21  ;;  %v670_v23 = vld [vmem:[%s2760_s7 + $0x570] sm:$0xff] }
  0x43   : > { %669 = vst [vmem:[%s2765_s8 + $0x2b0] sm:$0xff] %v668_v22  ;;  %v672_v24 = vld [vmem:[%s2760_s7 + $0x580] sm:$0xff]  ;;  %v674_v25 = vld [vmem:[%s2760_s7 + $0x590] sm:$0xff]  ;;  %671 = vst [vmem:[%s2765_s8 + $0x2b8] sm:$0xff] %v670_v23 }
  0x44   : > { %673 = vst [vmem:[%s2765_s8 + $0x2c0] sm:$0xff] %v672_v24  ;;  %675 = vst [vmem:[%s2765_s8 + $0x2c8] sm:$0xff] %v674_v25  ;;  %v676_v26 = vld [vmem:[%s2760_s7 + $0x5a0] sm:$0xff]  ;;  %v678_v27 = vld [vmem:[%s2760_s7 + $0x5b0] sm:$0xff] }
  0x45   : > { %v680_v28 = vld [vmem:[%s2760_s7 + $0x5c0] sm:$0xff]  ;;  %677 = vst [vmem:[%s2765_s8 + $0x2d0] sm:$0xff] %v676_v26  ;;  %679 = vst [vmem:[%s2765_s8 + $0x2d8] sm:$0xff] %v678_v27  ;;  %v682_v29 = vld [vmem:[%s2760_s7 + $0x5d0] sm:$0xff] }
  0x46   : > { %681 = vst [vmem:[%s2765_s8 + $0x2e0] sm:$0xff] %v680_v28  ;;  %v684_v30 = vld [vmem:[%s2760_s7 + $0x5e0] sm:$0xff]  ;;  %v686_v31 = vld [vmem:[%s2760_s7 + $0x5f0] sm:$0xff]  ;;  %683 = vst [vmem:[%s2765_s8 + $0x2e8] sm:$0xff] %v682_v29 }
  0x47   : > { %685 = vst [vmem:[%s2765_s8 + $0x2f0] sm:$0xff] %v684_v30  ;;  %687 = vst [vmem:[%s2765_s8 + $0x2f8] sm:$0xff] %v686_v31  ;;  %v688_v32 = vld [vmem:[%s2760_s7 + $0x600] sm:$0xff]  ;;  %v690_v33 = vld [vmem:[%s2760_s7 + $0x610] sm:$0xff] }
  0x48   : > { %v692_v34 = vld [vmem:[%s2760_s7 + $0x620] sm:$0xff]  ;;  %689 = vst [vmem:[%s2765_s8 + $0x300] sm:$0xff] %v688_v32  ;;  %691 = vst [vmem:[%s2765_s8 + $0x308] sm:$0xff] %v690_v33  ;;  %v694_v35 = vld [vmem:[%s2760_s7 + $0x630] sm:$0xff] }
  0x49   : > { %693 = vst [vmem:[%s2765_s8 + $0x310] sm:$0xff] %v692_v34  ;;  %v696_v36 = vld [vmem:[%s2760_s7 + $0x640] sm:$0xff]  ;;  %v698_v37 = vld [vmem:[%s2760_s7 + $0x650] sm:$0xff]  ;;  %695 = vst [vmem:[%s2765_s8 + $0x318] sm:$0xff] %v694_v35 }
  0x4a   : > { %697 = vst [vmem:[%s2765_s8 + $0x320] sm:$0xff] %v696_v36  ;;  %699 = vst [vmem:[%s2765_s8 + $0x328] sm:$0xff] %v698_v37  ;;  %v700_v38 = vld [vmem:[%s2760_s7 + $0x660] sm:$0xff]  ;;  %v702_v39 = vld [vmem:[%s2760_s7 + $0x670] sm:$0xff] }
  0x4b   : > { %v704_v40 = vld [vmem:[%s2760_s7 + $0x680] sm:$0xff]  ;;  %701 = vst [vmem:[%s2765_s8 + $0x330] sm:$0xff] %v700_v38  ;;  %703 = vst [vmem:[%s2765_s8 + $0x338] sm:$0xff] %v702_v39  ;;  %v706_v41 = vld [vmem:[%s2760_s7 + $0x690] sm:$0xff] }
  0x4c   : > { %705 = vst [vmem:[%s2765_s8 + $0x340] sm:$0xff] %v704_v40  ;;  %v708_v42 = vld [vmem:[%s2760_s7 + $0x6a0] sm:$0xff]  ;;  %v710_v43 = vld [vmem:[%s2760_s7 + $0x6b0] sm:$0xff]  ;;  %707 = vst [vmem:[%s2765_s8 + $0x348] sm:$0xff] %v706_v41 }
  0x4d   : > { %709 = vst [vmem:[%s2765_s8 + $0x350] sm:$0xff] %v708_v42  ;;  %711 = vst [vmem:[%s2765_s8 + $0x358] sm:$0xff] %v710_v43  ;;  %v712_v44 = vld [vmem:[%s2760_s7 + $0x6c0] sm:$0xff]  ;;  %v714_v45 = vld [vmem:[%s2760_s7 + $0x6d0] sm:$0xff] }
  0x4e   : > { %v716_v46 = vld [vmem:[%s2760_s7 + $0x6e0] sm:$0xff]  ;;  %713 = vst [vmem:[%s2765_s8 + $0x360] sm:$0xff] %v712_v44  ;;  %715 = vst [vmem:[%s2765_s8 + $0x368] sm:$0xff] %v714_v45  ;;  %v718_v47 = vld [vmem:[%s2760_s7 + $0x6f0] sm:$0xff] }
  0x4f   : > { %717 = vst [vmem:[%s2765_s8 + $0x370] sm:$0xff] %v716_v46  ;;  %v720_v48 = vld [vmem:[%s2760_s7 + $0x700] sm:$0xff]  ;;  %v722_v49 = vld [vmem:[%s2760_s7 + $0x710] sm:$0xff]  ;;  %719 = vst [vmem:[%s2765_s8 + $0x378] sm:$0xff] %v718_v47 }
  0x50   : > { %721 = vst [vmem:[%s2765_s8 + $0x380] sm:$0xff] %v720_v48  ;;  %723 = vst [vmem:[%s2765_s8 + $0x388] sm:$0xff] %v722_v49  ;;  %v724_v50 = vld [vmem:[%s2760_s7 + $0x720] sm:$0xff]  ;;  %v726_v51 = vld [vmem:[%s2760_s7 + $0x730] sm:$0xff] }
  0x51   : > { %v728_v52 = vld [vmem:[%s2760_s7 + $0x740] sm:$0xff]  ;;  %725 = vst [vmem:[%s2765_s8 + $0x390] sm:$0xff] %v724_v50  ;;  %727 = vst [vmem:[%s2765_s8 + $0x398] sm:$0xff] %v726_v51  ;;  %v730_v53 = vld [vmem:[%s2760_s7 + $0x750] sm:$0xff] }
  0x52   : > { %729 = vst [vmem:[%s2765_s8 + $0x3a0] sm:$0xff] %v728_v52  ;;  %v732_v54 = vld [vmem:[%s2760_s7 + $0x760] sm:$0xff]  ;;  %v734_v55 = vld [vmem:[%s2760_s7 + $0x770] sm:$0xff]  ;;  %731 = vst [vmem:[%s2765_s8 + $0x3a8] sm:$0xff] %v730_v53 }
  0x53   : > { %733 = vst [vmem:[%s2765_s8 + $0x3b0] sm:$0xff] %v732_v54  ;;  %735 = vst [vmem:[%s2765_s8 + $0x3b8] sm:$0xff] %v734_v55  ;;  %v736_v56 = vld [vmem:[%s2760_s7 + $0x780] sm:$0xff]  ;;  %v738_v57 = vld [vmem:[%s2760_s7 + $0x790] sm:$0xff] }
  0x54   : > { %v740_v58 = vld [vmem:[%s2760_s7 + $0x7a0] sm:$0xff]  ;;  %737 = vst [vmem:[%s2765_s8 + $0x3c0] sm:$0xff] %v736_v56  ;;  %739 = vst [vmem:[%s2765_s8 + $0x3c8] sm:$0xff] %v738_v57  ;;  %v742_v59 = vld [vmem:[%s2760_s7 + $0x7b0] sm:$0xff] }
  0x55   : > { %741 = vst [vmem:[%s2765_s8 + $0x3d0] sm:$0xff] %v740_v58  ;;  %v744_v60 = vld [vmem:[%s2760_s7 + $0x7c0] sm:$0xff]  ;;  %v746_v61 = vld [vmem:[%s2760_s7 + $0x7d0] sm:$0xff]  ;;  %743 = vst [vmem:[%s2765_s8 + $0x3d8] sm:$0xff] %v742_v59 }
  0x56   : > { %745 = vst [vmem:[%s2765_s8 + $0x3e0] sm:$0xff] %v744_v60  ;;  %747 = vst [vmem:[%s2765_s8 + $0x3e8] sm:$0xff] %v746_v61  ;;  %v748_v62 = vld [vmem:[%s2760_s7 + $0x7e0] sm:$0xff]  ;;  %v750_v63 = vld [vmem:[%s2760_s7 + $0x7f0] sm:$0xff] }
  0x57   : > { %v752_v0 = vld [vmem:[%s2760_s7 + $0x800] sm:$0xff]  ;;  %749 = vst [vmem:[%s2765_s8 + $0x3f0] sm:$0xff] %v748_v62  ;;  %751 = vst [vmem:[%s2765_s8 + $0x3f8] sm:$0xff] %v750_v63  ;;  %v754_v1 = vld [vmem:[%s2760_s7 + $0x810] sm:$0xff] }
  0x58   : > { %753 = vst [vmem:[%s2765_s8 + $0x400] sm:$0xff] %v752_v0  ;;  %v756_v2 = vld [vmem:[%s2760_s7 + $0x820] sm:$0xff]  ;;  %v758_v3 = vld [vmem:[%s2760_s7 + $0x830] sm:$0xff]  ;;  %755 = vst [vmem:[%s2765_s8 + $0x408] sm:$0xff] %v754_v1 }
  0x59   : > { %757 = vst [vmem:[%s2765_s8 + $0x410] sm:$0xff] %v756_v2  ;;  %759 = vst [vmem:[%s2765_s8 + $0x418] sm:$0xff] %v758_v3  ;;  %v760_v4 = vld [vmem:[%s2760_s7 + $0x840] sm:$0xff]  ;;  %v762_v5 = vld [vmem:[%s2760_s7 + $0x850] sm:$0xff] }
  0x5a   : > { %v764_v6 = vld [vmem:[%s2760_s7 + $0x860] sm:$0xff]  ;;  %761 = vst [vmem:[%s2765_s8 + $0x420] sm:$0xff] %v760_v4  ;;  %763 = vst [vmem:[%s2765_s8 + $0x428] sm:$0xff] %v762_v5  ;;  %v766_v7 = vld [vmem:[%s2760_s7 + $0x870] sm:$0xff] }
  0x5b   : > { %765 = vst [vmem:[%s2765_s8 + $0x430] sm:$0xff] %v764_v6  ;;  %v768_v8 = vld [vmem:[%s2760_s7 + $0x880] sm:$0xff]  ;;  %v770_v9 = vld [vmem:[%s2760_s7 + $0x890] sm:$0xff]  ;;  %767 = vst [vmem:[%s2765_s8 + $0x438] sm:$0xff] %v766_v7 }
  0x5c   : > { %769 = vst [vmem:[%s2765_s8 + $0x440] sm:$0xff] %v768_v8  ;;  %771 = vst [vmem:[%s2765_s8 + $0x448] sm:$0xff] %v770_v9  ;;  %v772_v10 = vld [vmem:[%s2760_s7 + $0x8a0] sm:$0xff]  ;;  %v774_v11 = vld [vmem:[%s2760_s7 + $0x8b0] sm:$0xff] }
  0x5d   : > { %v776_v12 = vld [vmem:[%s2760_s7 + $0x8c0] sm:$0xff]  ;;  %773 = vst [vmem:[%s2765_s8 + $0x450] sm:$0xff] %v772_v10  ;;  %775 = vst [vmem:[%s2765_s8 + $0x458] sm:$0xff] %v774_v11  ;;  %v778_v13 = vld [vmem:[%s2760_s7 + $0x8d0] sm:$0xff] }
  0x5e   : > { %777 = vst [vmem:[%s2765_s8 + $0x460] sm:$0xff] %v776_v12  ;;  %v780_v14 = vld [vmem:[%s2760_s7 + $0x8e0] sm:$0xff]  ;;  %v782_v15 = vld [vmem:[%s2760_s7 + $0x8f0] sm:$0xff]  ;;  %779 = vst [vmem:[%s2765_s8 + $0x468] sm:$0xff] %v778_v13 }
  0x5f   : > { %781 = vst [vmem:[%s2765_s8 + $0x470] sm:$0xff] %v780_v14  ;;  %783 = vst [vmem:[%s2765_s8 + $0x478] sm:$0xff] %v782_v15 }
  0x60 PF: > { %p2187_p7 = scmp.ge.s32.totalorder %s2674_s18, 1  ;;  %p796_p8 = scmp.lt.s32.totalorder %s2674_s18, 9 }
  0x62   : > { %p797_p9 = pnand %p2187_p7, %p796_p8 }
  0x63   : > { %s803_s9 = sand.u32 (!%p797_p9), 1, %s2650_s12   ;;  %s842_s10 = smul.u32 (!%p797_p9), 9, %s2658_s14 }
  0x64   : > { %800 = sbr.rel (%p797_p9) target bundleno = 492 (0x1ec), region = 66  ;;  %s2188_s21 = sshll.u32 (!%p797_p9), %s2662_s15, 1 }
  0x65   : > { %s2342_s11 = smul.u32 (!%p797_p9), 1152, %s803_s9  ;;  %p845_p10 = scmp.lt.s32.totalorder (!%p797_p9), %s842_s10, 35 }
  0x66   : > { %p854_p11 = scmp.lt.s32.totalorder (!%p797_p9), %s2188_s21, 3  ;;  %p2191_p12 = scmp.ne.s32.totalorder (!%p797_p9), %s2658_s14, 0 }
  0x67   : > { %s3074_s4 = scalar_lea.vmem (!%p797_p9), [#allocation3], %s2342_s11 }
  0x69   : > { %s3288_s10 = smov (!%p845_p10, %s842_s10), 35  ;;  %s3290_s21 = smov (!%p854_p11, %s2188_s21), 3 }
  0x6a   : > { %s3062_s24 = scalar_lea.vmem %s3271_s0, %s3288_s10  ;;  %s856_s28 = scalar_lea.vmem %s3273_s2, %s3290_s21 }
  0x6b   : > { %s2190_s12 = sshll.u32 %s3290_s21, 1  ;;  %872 = sbr.rel (%p2191_p12) target bundleno = 114 (0x72), region = 74 }
  0x6c   : > { %s3072_s15 = scalar_lea.vmem %s3274_s3, %s2190_s12 }
  0x70   : > { %v2676_v16 = vmov 0.0  }
  0x71   : > { %873 = vst [vmem:[#allocation2] sm:$0xf] %v2676_v16 }
  0x72 PF: > { %v2403_v17 = vld [vmem:[%s3074_s4 + $0x74] ss:$8 sps:$4 sm:$0xff]   ;;  %v2407_v19 = vld [vmem:[%s3074_s4 + $0x70] ss:$8 sps:$4 sm:$0xff]   ;;  %v2409_v21 = vld [vmem:[%s3074_s4 + $0x64] ss:$8 sps:$4 sm:$0xff]   ;;  %v1027_v55 = vlaneseq }
  0x73   : > { %v2405_v18 = vld [vmem:[%s3074_s4 + $0x174] ss:$8 sps:$4 sm:$0xff]   ;;  %1815 = vmatprep.subr.bf16.mxu0 %v2403_v17  ;;  %v2408_v20 = vld [vmem:[%s3074_s4 + $0x170] ss:$8 sps:$4 sm:$0xff]   ;;  %v2411_v22 = vld [vmem:[%s3074_s4 + $0x164] ss:$8 sps:$4 sm:$0xff]  }
  0x74   : > { %1856 = vmatprep.subr.bf16.mxu1 %v2405_v18  ;;  %1816 = vmatpush1.bf16.msra.mxu0 %v2407_v19  ;;  %v2413_v23 = vld [vmem:[%s3074_s4 + $0x60] ss:$8 sps:$4 sm:$0xff]   ;;  %v2415_v25 = vld [vmem:[%s3074_s4 + $0x54] ss:$8 sps:$4 sm:$0xff]   ;;  %v2419_v27 = vld [vmem:[%s3074_s4 + $0x50] ss:$8 sps:$4 sm:$0xff]  }
  0x75   : > { %1857 = vmatpush1.bf16.msra.mxu1 %v2408_v20  ;;  %1817 = vmatprep.subr.bf16.mxu0 %v2409_v21  ;;  %v2414_v24 = vld [vmem:[%s3074_s4 + $0x160] ss:$8 sps:$4 sm:$0xff]   ;;  %v2417_v26 = vld [vmem:[%s3074_s4 + $0x154] ss:$8 sps:$4 sm:$0xff]   ;;  %v2420_v28 = vld [vmem:[%s3074_s4 + $0x150] ss:$8 sps:$4 sm:$0xff]  }
  0x76   : > { %1858 = vmatprep.subr.bf16.mxu1 %v2411_v22  ;;  %v2421_v29 = vld [vmem:[%s3074_s4 + $0x44] ss:$8 sps:$4 sm:$0xff]   ;;  %v2425_v31 = vld [vmem:[%s3074_s4 + $0x40] ss:$8 sps:$4 sm:$0xff]   ;;  %v2427_v33 = vld [vmem:[%s3074_s4 + $0x34] ss:$8 sps:$4 sm:$0xff]  }
  0x77   : > { %v2423_v30 = vld [vmem:[%s3074_s4 + $0x144] ss:$8 sps:$4 sm:$0xff]   ;;  %v2426_v32 = vld [vmem:[%s3074_s4 + $0x140] ss:$8 sps:$4 sm:$0xff]   ;;  %v2429_v34 = vld [vmem:[%s3074_s4 + $0x134] ss:$8 sps:$4 sm:$0xff]  }
  0x78   : > { %1818 = vmatpush1.bf16.msra.mxu0 %v2413_v23  ;;  %v2431_v35 = vld [vmem:[%s3074_s4 + $0x30] ss:$8 sps:$4 sm:$0xff]   ;;  %v2433_v37 = vld [vmem:[%s3074_s4 + $0x24] ss:$8 sps:$4 sm:$0xff]   ;;  %v2437_v39 = vld [vmem:[%s3074_s4 + $0x20] ss:$8 sps:$4 sm:$0xff]  }
  0x79   : > { %1859 = vmatpush1.bf16.msra.mxu1 %v2414_v24  ;;  %1819 = vmatprep.subr.bf16.mxu0 %v2415_v25  ;;  %v2432_v36 = vld [vmem:[%s3074_s4 + $0x130] ss:$8 sps:$4 sm:$0xff]   ;;  %v2435_v38 = vld [vmem:[%s3074_s4 + $0x124] ss:$8 sps:$4 sm:$0xff]   ;;  %v2438_v40 = vld [vmem:[%s3074_s4 + $0x120] ss:$8 sps:$4 sm:$0xff]  }
  0x7a   : > { %1860 = vmatprep.subr.bf16.mxu1 %v2417_v26  ;;  %v2439_v41 = vld [vmem:[%s3074_s4 + $0x14] ss:$8 sps:$4 sm:$0xff]   ;;  %v2443_v43 = vld [vmem:[%s3074_s4 + $0x10] ss:$8 sps:$4 sm:$0xff]   ;;  %v2445_v45 = vld [vmem:[%s3074_s4 + $0x4] ss:$8 sps:$4 sm:$0xff]  }
  0x7b   : > { %v2441_v42 = vld [vmem:[%s3074_s4 + $0x114] ss:$8 sps:$4 sm:$0xff]   ;;  %v2444_v44 = vld [vmem:[%s3074_s4 + $0x110] ss:$8 sps:$4 sm:$0xff]   ;;  %v2447_v46 = vld [vmem:[%s3074_s4 + $0x104] ss:$8 sps:$4 sm:$0xff]  }
  0x7c   : > { %1820 = vmatpush1.bf16.msra.mxu0 %v2419_v27  ;;  %v2449_v47 = vld [vmem:[%s3074_s4] ss:$8 sps:$4 sm:$0xff]   ;;  %v2451_v49 = vld [vmem:[%s3074_s4 + $0xf4] ss:$8 sps:$4 sm:$0xff]   ;;  %v2455_v51 = vld [vmem:[%s3074_s4 + $0xf0] ss:$8 sps:$4 sm:$0xff]  }
  0x7d   : > { %1861 = vmatpush1.bf16.msra.mxu1 %v2420_v28  ;;  %1821 = vmatprep.subr.bf16.mxu0 %v2421_v29  ;;  %v2450_v48 = vld [vmem:[%s3074_s4 + $0x100] ss:$8 sps:$4 sm:$0xff]   ;;  %v2453_v50 = vld [vmem:[%s3074_s4 + $0x1f4] ss:$8 sps:$4 sm:$0xff]   ;;  %v2456_v52 = vld [vmem:[%s3074_s4 + $0x1f0] ss:$8 sps:$4 sm:$0xff]  }
  0x7e   : > { %1862 = vmatprep.subr.bf16.mxu1 %v2423_v30  ;;  %v2677_v53 = vmov 1966171168   ;;  %v2457_v56 = vld [vmem:[%s3074_s4 + $0xe4] ss:$8 sps:$4 sm:$0xff]   ;;  %v2461_v58 = vld [vmem:[%s3074_s4 + $0xe0] ss:$8 sps:$4 sm:$0xff]  }
  0x7f   : > { %v1025_v54 = vunpack.c.l.s4 %v2677_v53  ;;  %v2459_v57 = vld [vmem:[%s3074_s4 + $0x1e4] ss:$8 sps:$4 sm:$0xff]   ;;  %v3116_v60 = vshrl.u32 %v1027_v55, 7  ;;  %v2462_v61 = vld [vmem:[%s3074_s4 + $0x1e0] ss:$8 sps:$4 sm:$0xff]   ;;  %p2337_p13 = scmp.ne.s32.totalorder %s2658_s14, 3 }
  0x80   : > { %1822 = vmatpush1.bf16.msra.mxu0 %v2425_v31  ;;  %v2463_v62 = vld [vmem:[%s3074_s4 + $0xd4] ss:$8 sps:$4 sm:$0xff]   ;;  %v2467_v0 = vld [vmem:[%s3074_s4 + $0xd0] ss:$8 sps:$4 sm:$0xff]   ;;  %v2469_v3 = vld [vmem:[%s3074_s4 + $0xc4] ss:$8 sps:$4 sm:$0xff]  }
  0x81   : > { %1863 = vmatpush1.bf16.msra.mxu1 %v2426_v32  ;;  %1823 = vmatprep.subr.bf16.mxu0 %v2427_v33  ;;  %v1026_v59 = vunpack.c.0.s8 %v1025_v54  ;;  %v2465_v63 = vld [vmem:[%s3074_s4 + $0x1d4] ss:$8 sps:$4 sm:$0xff]   ;;  %v2468_v1 = vld [vmem:[%s3074_s4 + $0x1d0] ss:$8 sps:$4 sm:$0xff]   ;;  %v2471_v4 = vld [vmem:[%s3074_s4 + $0x1c4] ss:$8 sps:$4 sm:$0xff]  }
  0x82   : > { %1864 = vmatprep.subr.bf16.mxu1 %v2429_v34  ;;  %v875_v5 = vld [vmem:[%s3062_s24] sm:$0xff]  ;;  %v2479_v14 = vld [vmem:[%s3074_s4 + $0xb0] ss:$8 sps:$4 sm:$0xff]   ;;  %v2481_v18 = vld [vmem:[%s3074_s4 + $0xa4] ss:$8 sps:$4 sm:$0xff]  }
  0x83   : > { %v3124_v2 = vsub.s32 %v1026_v59, %v3116_v60  ;;  %v2473_v6 = vld [vmem:[%s3074_s4 + $0xc0] ss:$8 sps:$4 sm:$0xff]   ;;  %v1023_v7 = vcombine.high %v875_v5, %v875_v5  ;;  %v2475_v10 = vld [vmem:[%s3074_s4 + $0xb4] ss:$8 sps:$4 sm:$0xff]   ;;  %v2480_v17 = vld [vmem:[%s3074_s4 + $0x1b0] ss:$8 sps:$4 sm:$0xff]  }
  0x84   : > { %1824 = vmatpush1.bf16.msra.mxu0 %v2431_v35  ;;  %v2474_v9 = vld [vmem:[%s3074_s4 + $0x1c0] ss:$8 sps:$4 sm:$0xff]   ;;  %v2477_v11 = vld [vmem:[%s3074_s4 + $0x1b4] ss:$8 sps:$4 sm:$0xff]   ;;  %v2483_v19 = vld [vmem:[%s3074_s4 + $0x1a4] ss:$8 sps:$4 sm:$0xff]  }
  0x85   : > { %1865 = vmatpush1.bf16.msra.mxu1 %v2432_v36  ;;  %1825 = vmatprep.subr.bf16.mxu0 %v2433_v37  ;;  %v1030_v8 = vrot.slane %v875_v5, %v3124_v2  ;;  %v1037_v13 = vrot.slane %v1023_v7, %v3124_v2  ;;  %v2485_v21 = vld [vmem:[%s3074_s4 + $0xa0] ss:$8 sps:$4 sm:$0xff]   ;;  %v2487_v23 = vld [vmem:[%s3074_s4 + $0x94] ss:$8 sps:$4 sm:$0xff]   ;;  %v2491_v25 = vld [vmem:[%s3074_s4 + $0x90] ss:$8 sps:$4 sm:$0xff]  }
  0x86   : > { %1866 = vmatprep.subr.bf16.mxu1 %v2435_v38  ;;  %v2486_v22 = vld [vmem:[%s3074_s4 + $0x1a0] ss:$8 sps:$4 sm:$0xff]   ;;  %v2489_v24 = vld [vmem:[%s3074_s4 + $0x194] ss:$8 sps:$4 sm:$0xff]   ;;  %v2492_v26 = vld [vmem:[%s3074_s4 + $0x190] ss:$8 sps:$4 sm:$0xff]  }
  0x87   : > { %v1038_v12 = vcombine.high %v1030_v8, %v1030_v8  ;;  %v3138_v16 = vrot.slane %v1037_v13, %v3124_v2  ;;  %v2493_v27 = vld [vmem:[%s3074_s4 + $0x84] ss:$8 sps:$4 sm:$0xff]   ;;  %v1039_v29 = vcombine.high %v1037_v13, %v1037_v13  ;;  %v2497_v30 = vld [vmem:[%s3074_s4 + $0x80] ss:$8 sps:$4 sm:$0xff]   ;;  %v1046_v31 = vrot.slane %v1030_v8, %v3124_v2  ;;  %v2502_v33 = vld [vmem:[%s3074_s4 + $0x274] ss:$8 sps:$4 sm:$0xff]  }
  0x88   : > { %1826 = vmatpush1.bf16.msra.mxu0 %v2437_v39  ;;  %v2495_v28 = vld [vmem:[%s3074_s4 + $0x184] ss:$8 sps:$4 sm:$0xff]   ;;  %v2498_v32 = vld [vmem:[%s3074_s4 + $0x180] ss:$8 sps:$4 sm:$0xff]   ;;  %v2505_v34 = vld [vmem:[%s3074_s4 + $0x374] ss:$8 sps:$4 sm:$0xff]  }
  0x89   : > { %1867 = vmatpush1.bf16.msra.mxu1 %v2438_v40  ;;  %1827 = vmatprep.subr.bf16.mxu0 %v2439_v41  ;;  %v1060_v15 = vrot.slane %v1038_v12, %v3124_v2  ;;  %v1067_v35 = vrot.slane %v1039_v29, %v3124_v2  ;;  %v1068_v36 = vcombine.high %v1046_v31, %v1046_v31  ;;  %v2500_v37 = vld [vmem:[%s3074_s4 + $0x270] ss:$8 sps:$4 sm:$0xff]   ;;  %v2508_v39 = vld [vmem:[%s3074_s4 + $0x264] ss:$8 sps:$4 sm:$0xff]   ;;  %v2529_v53 = vld [vmem:[%s3074_s4 + $0x334] ss:$8 sps:$4 sm:$0xff]  }
  0x8a   : > { %1868 = vmatprep.subr.bf16.mxu1 %v2441_v42  ;;  %v2503_v38 = vld [vmem:[%s3074_s4 + $0x370] ss:$8 sps:$4 sm:$0xff]   ;;  %v2511_v40 = vld [vmem:[%s3074_s4 + $0x364] ss:$8 sps:$4 sm:$0xff]   ;;  %v2506_v42 = vld [vmem:[%s3074_s4 + $0x260] ss:$8 sps:$4 sm:$0xff]  }
  0x8b   : > { %v1070_v20 = vcombine.high %v1060_v15, %v1060_v15  ;;  %1847 = vmatprep.mubr.bf16.mxu0 %v1060_v15  ;;  %v1071_v41 = vcombine.high %v1067_v35, %v1067_v35  ;;  %v2524_v54 = vld [vmem:[%s3074_s4 + $0x230] ss:$8 sps:$4 sm:$0xff]   ;;  %v2533_v59 = vld [vmem:[%s3074_s4 + $0x320] ss:$8 sps:$4 sm:$0xff]   ;;  %v2553_v7 = vld [vmem:[%s3074_s4 + $0x3f4] ss:$8 sps:$4 sm:$0xff]  }
  0x8c   : > { %1828 = vmatpush1.bf16.msra.mxu0 %v2443_v43  ;;  %v2509_v43 = vld [vmem:[%s3074_s4 + $0x360] ss:$8 sps:$4 sm:$0xff]   ;;  %v2527_v55 = vld [vmem:[%s3074_s4 + $0x330] ss:$8 sps:$4 sm:$0xff]   ;;  %v2565_v15 = vld [vmem:[%s3074_s4 + $0x3d4] ss:$8 sps:$4 sm:$0xff]  }
  0x8d   : > { %1869 = vmatpush1.bf16.msra.mxu1 %v2444_v44  ;;  %1829 = vmatprep.subr.bf16.mxu0 %v2445_v45  ;;  %v2514_v44 = vld [vmem:[%s3074_s4 + $0x254] ss:$8 sps:$4 sm:$0xff]   ;;  %v2545_v5 = vld [vmem:[%s3074_s4 + $0x300] ss:$8 sps:$4 sm:$0xff]   ;;  %v2548_v8 = vld [vmem:[%s3074_s4 + $0x2f0] ss:$8 sps:$4 sm:$0xff]  }
  0x8e   : > { %1870 = vmatprep.subr.bf16.mxu1 %v2447_v46  ;;  %1888 = vmatprep.mubr.bf16.mxu1 %v1070_v20  ;;  %v2517_v45 = vld [vmem:[%s3074_s4 + $0x354] ss:$8 sps:$4 sm:$0xff]   ;;  %v2512_v46 = vld [vmem:[%s3074_s4 + $0x250] ss:$8 sps:$4 sm:$0xff]   ;;  %v2554_v12 = vld [vmem:[%s3074_s4 + $0x2e0] ss:$8 sps:$4 sm:$0xff]  }
  0x8f   : > { %v2557_v13 = vld [vmem:[%s3074_s4 + $0x3e0] ss:$8 sps:$4 sm:$0xff]   ;;  %v2571_v20 = vld [vmem:[%s3074_s4 + $0x3c4] ss:$8 sps:$4 sm:$0xff]  }
  0x90   : > { %1830 = vmatpush1.bf16.msra.mxu0 %v2449_v47  ;;  %v2515_v47 = vld [vmem:[%s3074_s4 + $0x350] ss:$8 sps:$4 sm:$0xff]   ;;  %v2578_v29 = vld [vmem:[%s3074_s4 + $0x2a0] ss:$8 sps:$4 sm:$0xff]  }
  0x91   : > { %1871 = vmatpush1.bf16.msra.mxu1 %v2450_v48  ;;  %1831 = vmatprep.subr.bf16.mxu0 %v2451_v49  ;;  %v2520_v48 = vld [vmem:[%s3074_s4 + $0x244] ss:$8 sps:$4 sm:$0xff]  }
  0x92   : > { %1872 = vmatprep.subr.bf16.mxu1 %v2453_v50  ;;  %v2523_v49 = vld [vmem:[%s3074_s4 + $0x344] ss:$8 sps:$4 sm:$0xff]   ;;  %v2518_v50 = vld [vmem:[%s3074_s4 + $0x240] ss:$8 sps:$4 sm:$0xff]  }
  0x94   : > { %1832 = vmatpush2.bf16.msra.mxu0 %v2455_v51  ;;  %v2521_v51 = vld [vmem:[%s3074_s4 + $0x340] ss:$8 sps:$4 sm:$0xff]  }
  0x95   : > { %1873 = vmatpush2.bf16.msra.mxu1 %v2456_v52  ;;  %1833 = vmatprep.subr.bf16.mxu0 %v2457_v56  ;;  %v2526_v52 = vld [vmem:[%s3074_s4 + $0x234] ss:$8 sps:$4 sm:$0xff]   ;;  %v2532_v56 = vld [vmem:[%s3074_s4 + $0x224] ss:$8 sps:$4 sm:$0xff]  }
  0x96   : > { %1874 = vmatprep.subr.bf16.mxu1 %v2459_v57  ;;  %v2535_v57 = vld [vmem:[%s3074_s4 + $0x324] ss:$8 sps:$4 sm:$0xff]  }
  0x98   : > { %1834 = vmatpush2.bf16.msra.mxu0 %v2461_v58  ;;  %v2530_v58 = vld [vmem:[%s3074_s4 + $0x220] ss:$8 sps:$4 sm:$0xff]  }
  0x99   : > { %1875 = vmatpush2.bf16.msra.mxu1 %v2462_v61  ;;  %1835 = vmatprep.subr.bf16.mxu0 %v2463_v62  ;;  %v2538_v61 = vld [vmem:[%s3074_s4 + $0x214] ss:$8 sps:$4 sm:$0xff]  }
  0x9a   : > { %1876 = vmatprep.subr.bf16.mxu1 %v2465_v63  ;;  %v2541_v62 = vld [vmem:[%s3074_s4 + $0x314] ss:$8 sps:$4 sm:$0xff]   ;;  %v2536_v63 = vld [vmem:[%s3074_s4 + $0x210] ss:$8 sps:$4 sm:$0xff]  }
  0x9c   : > { %1836 = vmatpush2.bf16.msra.mxu0 %v2467_v0  ;;  %v2539_v0 = vld [vmem:[%s3074_s4 + $0x310] ss:$8 sps:$4 sm:$0xff]  }
  0x9d   : > { %1877 = vmatpush2.bf16.msra.mxu1 %v2468_v1  ;;  %1837 = vmatprep.subr.bf16.mxu0 %v2469_v3  ;;  %v2544_v1 = vld [vmem:[%s3074_s4 + $0x204] ss:$8 sps:$4 sm:$0xff]  }
  0x9e   : > { %1878 = vmatprep.subr.bf16.mxu1 %v2471_v4  ;;  %v2547_v3 = vld [vmem:[%s3074_s4 + $0x304] ss:$8 sps:$4 sm:$0xff]   ;;  %v2542_v4 = vld [vmem:[%s3074_s4 + $0x200] ss:$8 sps:$4 sm:$0xff]  }
  0xa0   : > { %1838 = vmatpush2.bf16.msra.mxu0 %v2473_v6  ;;  %v2550_v6 = vld [vmem:[%s3074_s4 + $0x2f4] ss:$8 sps:$4 sm:$0xff]  }
  0xa1   : > { %1879 = vmatpush2.bf16.msra.mxu1 %v2474_v9  ;;  %1839 = vmatprep.subr.bf16.mxu0 %v2475_v10  ;;  %v2551_v9 = vld [vmem:[%s3074_s4 + $0x3f0] ss:$8 sps:$4 sm:$0xff]   ;;  %v2556_v10 = vld [vmem:[%s3074_s4 + $0x2e4] ss:$8 sps:$4 sm:$0xff]  }
  0xa2   : > { %1880 = vmatprep.subr.bf16.mxu1 %v2477_v11  ;;  %v2559_v11 = vld [vmem:[%s3074_s4 + $0x3e4] ss:$8 sps:$4 sm:$0xff]  }
  0xa4   : > { %1840 = vmatpush2.bf16.msra.mxu0 %v2479_v14  ;;  %v2562_v14 = vld [vmem:[%s3074_s4 + $0x2d4] ss:$8 sps:$4 sm:$0xff]  }
  0xa5   : > { %1881 = vmatpush2.bf16.msra.mxu1 %v2480_v17  ;;  %1841 = vmatprep.subr.bf16.mxu0 %v2481_v18  ;;  %v2560_v17 = vld [vmem:[%s3074_s4 + $0x2d0] ss:$8 sps:$4 sm:$0xff]  }
  0xa6   : > { %1882 = vmatprep.subr.bf16.mxu1 %v2483_v19  ;;  %v2563_v18 = vld [vmem:[%s3074_s4 + $0x3d0] ss:$8 sps:$4 sm:$0xff]   ;;  %v2568_v19 = vld [vmem:[%s3074_s4 + $0x2c4] ss:$8 sps:$4 sm:$0xff]  }
  0xa8   : > { %1842 = vmatpush2.bf16.msra.mxu0 %v2485_v21  ;;  %v2566_v21 = vld [vmem:[%s3074_s4 + $0x2c0] ss:$8 sps:$4 sm:$0xff]  }
  0xa9   : > { %1883 = vmatpush2.bf16.msra.mxu1 %v2486_v22  ;;  %1843 = vmatprep.subr.bf16.mxu0 %v2487_v23  ;;  %v2569_v22 = vld [vmem:[%s3074_s4 + $0x3c0] ss:$8 sps:$4 sm:$0xff]   ;;  %v2574_v23 = vld [vmem:[%s3074_s4 + $0x2b4] ss:$8 sps:$4 sm:$0xff]  }
  0xaa   : > { %1884 = vmatprep.subr.bf16.mxu1 %v2489_v24  ;;  %v2577_v24 = vld [vmem:[%s3074_s4 + $0x3b4] ss:$8 sps:$4 sm:$0xff]  }
  0xac   : > { %1844 = vmatpush2.bf16.msra.mxu0 %v2491_v25  ;;  %v2572_v25 = vld [vmem:[%s3074_s4 + $0x2b0] ss:$8 sps:$4 sm:$0xff]  }
  0xad   : > { %1885 = vmatpush2.bf16.msra.mxu1 %v2492_v26  ;;  %1845 = vmatprep.subr.bf16.mxu0 %v2493_v27  ;;  %v2575_v26 = vld [vmem:[%s3074_s4 + $0x3b0] ss:$8 sps:$4 sm:$0xff]   ;;  %v2580_v27 = vld [vmem:[%s3074_s4 + $0x2a4] ss:$8 sps:$4 sm:$0xff]  }
  0xae   : > { %1886 = vmatprep.subr.bf16.mxu1 %v2495_v28  ;;  %v2583_v28 = vld [vmem:[%s3074_s4 + $0x3a4] ss:$8 sps:$4 sm:$0xff]  }
  0xb0   : > { %1846 = vmatpush2.bf16.msra.mxu0 %v2497_v30  ;;  %v2581_v30 = vld [vmem:[%s3074_s4 + $0x3a0] ss:$8 sps:$4 sm:$0xff]  }
  0xb1   : > { %1887 = vmatpush2.bf16.msra.mxu1 %v2498_v32  ;;  %1897 = vmatprep.subr.bf16.mxu0 %v2502_v33  ;;  %v2589_v32 = vld [vmem:[%s3074_s4 + $0x394] ss:$8 sps:$4 sm:$0xff]   ;;  %v2584_v33 = vld [vmem:[%s3074_s4 + $0x290] ss:$8 sps:$4 sm:$0xff]  }
  0xb2   : > { %1938 = vmatprep.subr.bf16.mxu1 %v2505_v34  ;;  %v2587_v34 = vld [vmem:[%s3074_s4 + $0x390] ss:$8 sps:$4 sm:$0xff]  }
  0xb3   : > { %1848 = vmatmul.mubr.bf16.vlgmr.msra.gmra.mxu0 %v1046_v31  ;;  %v2586_v31 = vld [vmem:[%s3074_s4 + $0x294] ss:$8 sps:$4 sm:$0xff]  }
  0xb4   : > { %1889 = vmatmul.mubr.bf16.vlgmr.msra.gmra.mxu1 %v1068_v36  ;;  %1898 = vmatpush1.bf16.msra.mxu0 %v2500_v37  ;;  %v2595_v36 = vld [vmem:[%s3074_s4 + $0x384] ss:$8 sps:$4 sm:$0xff]   ;;  %v2590_v37 = vld [vmem:[%s3074_s4 + $0x280] ss:$8 sps:$4 sm:$0xff]  }
  0xb5   : > { %1939 = vmatpush1.bf16.msra.mxu1 %v2503_v38  ;;  %1899 = vmatprep.subr.bf16.mxu0 %v2508_v39  ;;  %v2593_v38 = vld [vmem:[%s3074_s4 + $0x380] ss:$8 sps:$4 sm:$0xff]   ;;  %v2598_v39 = vld [vmem:[%s3074_s4 + $0x474] ss:$8 sps:$4 sm:$0xff]  }
  0xb6   : > { %1940 = vmatprep.subr.bf16.mxu1 %v2511_v40  ;;  %1929 = vmatprep.mubr.bf16.mxu0 %v1067_v35  ;;  %v2592_v35 = vld [vmem:[%s3074_s4 + $0x284] ss:$8 sps:$4 sm:$0xff]   ;;  %v1069_v40 = vcombine.high %v3138_v16, %v3138_v16 }
  0xb7   : > { %1970 = vmatprep.mubr.bf16.mxu1 %v1071_v41  ;;  %v2596_v41 = vld [vmem:[%s3074_s4 + $0x470] ss:$8 sps:$4 sm:$0xff]  }
  0xb8   : > { %1900 = vmatpush1.bf16.msra.mxu0 %v2506_v42  ;;  %v2601_v42 = vld [vmem:[%s3074_s4 + $0x464] ss:$8 sps:$4 sm:$0xff]  }
  0xb9   : > { %1941 = vmatpush1.bf16.msra.mxu1 %v2509_v43  ;;  %1901 = vmatprep.subr.bf16.mxu0 %v2514_v44  ;;  %v2599_v43 = vld [vmem:[%s3074_s4 + $0x460] ss:$8 sps:$4 sm:$0xff]   ;;  %v2678_v44 = vmov 0  }
  0xba   : > { %1942 = vmatprep.subr.bf16.mxu1 %v2517_v45  ;;  %v2604_v45 = vld [vmem:[%s3074_s4 + $0x454] ss:$8 sps:$4 sm:$0xff]  }
  0xbc   : > { %1902 = vmatpush1.bf16.msra.mxu0 %v2512_v46  ;;  %v2602_v46 = vld [vmem:[%s3074_s4 + $0x450] ss:$8 sps:$4 sm:$0xff]  }
  0xbd   : > { %1943 = vmatpush1.bf16.msra.mxu1 %v2515_v47  ;;  %1903 = vmatprep.subr.bf16.mxu0 %v2520_v48  ;;  %v2607_v47 = vld [vmem:[%s3074_s4 + $0x444] ss:$8 sps:$4 sm:$0xff]   ;;  %v2605_v48 = vld [vmem:[%s3074_s4 + $0x440] ss:$8 sps:$4 sm:$0xff]  }
  0xbe   : > { %1944 = vmatprep.subr.bf16.mxu1 %v2523_v49  ;;  %v2608_v49 = vld [vmem:[%s3074_s4 + $0x430] ss:$8 sps:$4 sm:$0xff]  }
  0xc0   : > { %1904 = vmatpush1.bf16.msra.mxu0 %v2518_v50  ;;  %v2613_v50 = vld [vmem:[%s3074_s4 + $0x424] ss:$8 sps:$4 sm:$0xff]  }
  0xc1   : > { %1945 = vmatpush1.bf16.msra.mxu1 %v2521_v51  ;;  %1905 = vmatprep.subr.bf16.mxu0 %v2526_v52  ;;  %v2611_v51 = vld [vmem:[%s3074_s4 + $0x420] ss:$8 sps:$4 sm:$0xff]   ;;  %v2616_v52 = vld [vmem:[%s3074_s4 + $0x414] ss:$8 sps:$4 sm:$0xff]  }
  0xc2   : > { %1946 = vmatprep.subr.bf16.mxu1 %v2529_v53  ;;  %v2614_v53 = vld [vmem:[%s3074_s4 + $0x410] ss:$8 sps:$4 sm:$0xff]  }
  0xc4   : > { %1906 = vmatpush1.bf16.msra.mxu0 %v2524_v54  ;;  %v2619_v54 = vld [vmem:[%s3074_s4 + $0x404] ss:$8 sps:$4 sm:$0xff]  }
  0xc5   : > { %1947 = vmatpush1.bf16.msra.mxu1 %v2527_v55  ;;  %1907 = vmatprep.subr.bf16.mxu0 %v2532_v56  ;;  %v2617_v55 = vld [vmem:[%s3074_s4 + $0x400] ss:$8 sps:$4 sm:$0xff]   ;;  %v2192_v56 = vld.sshfl [vmem:[%s3062_s24 + $0x8] sm:$0x1 pattern:$0x75316420] }
  0xc6   : > { %1948 = vmatprep.subr.bf16.mxu1 %v2535_v57  ;;  %v1085_v57 = vrot.slane %v2192_v56, %v3124_v2 }
  0xc8   : > { %1908 = vmatpush1.bf16.msra.mxu0 %v2530_v58 }
  0xc9   : > { %1949 = vmatpush1.bf16.msra.mxu1 %v2533_v59  ;;  %1909 = vmatprep.subr.bf16.mxu0 %v2538_v61 }
  0xca   : > { %1950 = vmatprep.subr.bf16.mxu1 %v2541_v62 }
  0xcc   : > { %1910 = vmatpush1.bf16.msra.mxu0 %v2536_v63 }
  0xcd   : > { %1951 = vmatpush1.bf16.msra.mxu1 %v2539_v0  ;;  %1911 = vmatprep.subr.bf16.mxu0 %v2544_v1 }
  0xce   : > { %1952 = vmatprep.subr.bf16.mxu1 %v2547_v3 }
  0xd0   : > { %1912 = vmatpush1.bf16.msra.mxu0 %v2542_v4 }
  0xd1   : > { %1953 = vmatpush1.bf16.msra.mxu1 %v2545_v5  ;;  %1913 = vmatprep.subr.bf16.mxu0 %v2550_v6 }
  0xd2   : > { %1954 = vmatprep.subr.bf16.mxu1 %v2553_v7 }
  0xd4   : > { %1914 = vmatpush2.bf16.msra.mxu0 %v2548_v8 }
  0xd5   : > { %1955 = vmatpush2.bf16.msra.mxu1 %v2551_v9  ;;  %1915 = vmatprep.subr.bf16.mxu0 %v2556_v10 }
  0xd6   : > { %1956 = vmatprep.subr.bf16.mxu1 %v2559_v11 }
  0xd8   : > { %1916 = vmatpush2.bf16.msra.mxu0 %v2554_v12 }
  0xd9   : > { %1957 = vmatpush2.bf16.msra.mxu1 %v2557_v13  ;;  %1917 = vmatprep.subr.bf16.mxu0 %v2562_v14  ;;  %v2679_v13 = vmov 1983009808  }
  0xda   : > { %1958 = vmatprep.subr.bf16.mxu1 %v2565_v15  ;;  %v2024_v14 = vunpack.c.l.s4 %v2679_v13 }
  0xdc   : > { %1918 = vmatpush2.bf16.msra.mxu0 %v2560_v17 }
  0xdd   : > { %1959 = vmatpush2.bf16.msra.mxu1 %v2563_v18  ;;  %1919 = vmatprep.subr.bf16.mxu0 %v2568_v19  ;;  %v2025_v18 = vunpack.c.0.s8 %v2024_v14 }
  0xde   : > { %1960 = vmatprep.subr.bf16.mxu1 %v2571_v20 }
  0xe0   : > { %1920 = vmatpush2.bf16.msra.mxu0 %v2566_v21 }
  0xe1   : > { %1961 = vmatpush2.bf16.msra.mxu1 %v2569_v22  ;;  %1921 = vmatprep.subr.bf16.mxu0 %v2574_v23 }
  0xe2   : > { %1962 = vmatprep.subr.bf16.mxu1 %v2577_v24 }
  0xe4   : > { %1922 = vmatpush2.bf16.msra.mxu0 %v2572_v25  ;;  %v2028_v25 = vsub.s32 %v2025_v18, %v3116_v60 }
  0xe5   : > { %1963 = vmatpush2.bf16.msra.mxu1 %v2575_v26  ;;  %1923 = vmatprep.subr.bf16.mxu0 %v2580_v27 }
  0xe6   : > { %1964 = vmatprep.subr.bf16.mxu1 %v2583_v28  ;;  %v874_v28 = vld [vmem:[#allocation2] sm:$0xf] }
  0xe8   : > { %1924 = vmatpush2.bf16.msra.mxu0 %v2578_v29 }
  0xe9   : > { %1965 = vmatpush2.bf16.msra.mxu1 %v2581_v30  ;;  %1925 = vmatprep.subr.bf16.mxu0 %v2586_v31 }
  0xea   : > { %1966 = vmatprep.subr.bf16.mxu1 %v2589_v32 }
  0xec   : > { %1926 = vmatpush2.bf16.msra.mxu0 %v2584_v33 }
  0xed   : > { %1967 = vmatpush2.bf16.msra.mxu1 %v2587_v34  ;;  %1927 = vmatprep.subr.bf16.mxu0 %v2592_v35 }
  0xee   : > { %1968 = vmatprep.subr.bf16.mxu1 %v2595_v36 }
  0xf0   : > { %1928 = vmatpush2.bf16.msra.mxu0 %v2590_v37 }
  0xf1   : > { %1969 = vmatpush2.bf16.msra.mxu1 %v2593_v38  ;;  %1979 = vmatprep.subr.bf16.mxu0 %v2598_v39 }
  0xf3   : > { %1930 = vmatmul.mubr.bf16.vlgmr.msra.gmra.mxu0 %v3138_v16  ;;  %v2610_v16 = vld [vmem:[%s3074_s4 + $0x434] ss:$8 sps:$4 sm:$0xff]  }
  0xf4   : > { %1971 = vmatmul.mubr.bf16.vlgmr.msra.gmra.mxu1 %v1069_v40  ;;  %1980 = vmatpush1.bf16.msra.mxu0 %v2596_v41 }
  0xf5   : > { %2011 = vmatprep.mubr.bf16.mxu0 %v2678_v44  ;;  %1981 = vmatprep.subr.bf16.mxu0 %v2601_v42 }
  0xf8   : > { %1982 = vmatpush1.bf16.msra.mxu0 %v2599_v43 }
  0xf9   : > { %1983 = vmatprep.subr.bf16.mxu0 %v2604_v45 }
  0xfc   : > { %1984 = vmatpush1.bf16.msra.mxu0 %v2602_v46 }
  0xfd   : > { %1985 = vmatprep.subr.bf16.mxu0 %v2607_v47 }
 0x100   : > { %1986 = vmatpush1.bf16.msra.mxu0 %v2605_v48 }
 0x101   : > { %1987 = vmatprep.subr.bf16.mxu0 %v2610_v16 }
 0x104   : > { %1988 = vmatpush1.bf16.msra.mxu0 %v2608_v49 }
 0x105   : > { %1989 = vmatprep.subr.bf16.mxu0 %v2613_v50 }
 0x108   : > { %1990 = vmatpush1.bf16.msra.mxu0 %v2611_v51 }
 0x109   : > { %1991 = vmatprep.subr.bf16.mxu0 %v2616_v52 }
 0x10c   : > { %1992 = vmatpush1.bf16.msra.mxu0 %v2614_v53 }
 0x10d   : > { %1993 = vmatprep.subr.bf16.mxu0 %v2619_v54 }
 0x110   : > { %1994 = vmatpush1.bf16.msra.mxu0 %v2617_v55 }
 0x113   : > { %2012 = vmatmul.mubr.bf16.vlgmr.msra.gmra.mxu0 %v1085_v57 }
 0x173   : > { %v1849_v58 = vpop.f32.mrf.mxu0 }
 0x174   : > { %v1890_v59 = vpop.f32.mrf.mxu1 }
 0x175   : > { %v1891_v61 = vadd.f32 %v1890_v59, %v1849_v58  ;;  %v1851_v62 = vpop.f32.mrf.mxu0 }
 0x176   : > { %v1892_v63 = vpop.f32.mrf.mxu1 }
 0x177   : > { %v1893_v0 = vadd.f32 %v1892_v63, %v1851_v62  ;;  %v1853_v1 = vpop.f32.mrf.mxu0 }
 0x178   : > { %v1894_v3 = vpop.f32.mrf.mxu1 }
 0x179   : > { %v1854_v4 = vpop.f32.mrf.mxu0 }
 0x17a   : > { %v1895_v5 = vpop.f32.mrf.mxu1 }
 0x1b3   : > { %v1931_v6 = vpop.f32.mrf.mxu0 }
 0x1b4   : > { %v1972_v7 = vpop.f32.mrf.mxu1  ;;  %v1932_v15 = vadd.f32 %v1931_v6, %v1891_v61 }
 0x1b5   : > { %v1933_v8 = vpop.f32.mrf.mxu0 }
 0x1b6   : > { %v1974_v9 = vpop.f32.mrf.mxu1  ;;  %v1934_v17 = vadd.f32 %v1933_v8, %v1893_v0  ;;  %v1973_v20 = vadd.f32 %v1972_v7, %v1932_v15 }
 0x1b7   : > { %v1935_v10 = vpop.f32.mrf.mxu0 }
 0x1b8   : > { %v1976_v11 = vpop.f32.mrf.mxu1  ;;  %v1975_v21 = vadd.f32 %v1974_v9, %v1934_v17 }
 0x1b9   : > { %v1936_v12 = vpop.f32.mrf.mxu0 }
 0x1ba   : > { %v1977_v2 = vpop.f32.mrf.mxu1 }
 0x1d3   : > { %v2013_v19 = vpop.f32.mrf.mxu0 }
 0x1d4   : > { %v2014_v23 = vadd.f32 %v2013_v19, %v1973_v20 }
 0x1d5   : > { %v2015_v22 = vpop.f32.mrf.mxu0 }
 0x1d6   : > { %v2016_v24 = vadd.f32 %v2015_v22, %v1975_v21 }
 0x1d7   : > { %v2017_v26 = vpop.f32.mrf.mxu0 }
 0x1d8   : > { %v2022_v27 = vcombine.low %v2014_v23, %v2016_v24 }
 0x1d9   : > { %v2018_v29 = vpop.f32.mrf.mxu0 }
 0x1da   : > { %v2029_v30 = vrot.slane %v2022_v27, %v2028_v25  ;;  %2036 = sbr.rel (%p2337_p13) target bundleno = 492 (0x1ec), region = 78 }
 0x1dc   : > { %v2031_v31 = vadd.f32 %v2029_v30, %v874_v28 }
 0x1de   : > { %2032 = vst [vmem:[#allocation2] sm:$0xf] %v2031_v31 }
 0x1df   : > { %v2038_v32 = vld [vmem:[%s856_s28] sm:$0x3]  ;;  %v2042_v33 = vsub.s32 0, %v3116_v60  ;;  %v2046_v34 = vsub.s32 1, %v3116_v60 }
 0x1e1   : > { %v2043_v35 = vrot.slane %v2038_v32, %v2042_v33  ;;  %v2047_v36 = vrot.slane %v2038_v32, %v2046_v34 }
 0x1e3   : > { %v2048_v37 = vcombine.low %v2043_v35, %v2047_v36 }
 0x1e5   : > { %v2037_v38 = vld [vmem:[#allocation2] sm:$0xf]  ;;  %v2055_v39 = vrot.slane %v2048_v37, %v2028_v25 }
 0x1e7   : > { %v2057_v40 = vadd.f32 %v2055_v39, %v2037_v38 }
 0x1e9   : > { %v2058_v41 = vmax.f32 %v2057_v40, 0.0 }
 0x1eb   : > { %2059 = vst [vmem:[%s3072_s15] sm:$0xf] %v2058_v41 }
 0x1ec PF: > { %s13_s18 = sadd.s32 1, %s2674_s18   ;;  %s3275_s12 = smov %s2654_s13 }
 0x1ed   : > { %p10_p0 = scmp.ge.s32.totalorder %s13_s18, 10   ;;  %s3276_s13 = smov %s2751_s25 }
 0x1ee   : > { %s3277_s14 = smov %s2666_s16  ;;  %s3278_s15 = smov %s2670_s17 }
 0x1ef   : > { %s3279_s16 = smov %s3282_s19  ;;  %s3280_s17 = smov %s3286_s20 }
 0x1f0   :  { %12 = sbr.rel (!%p10_p0) target bundleno = 4 (0x4), region = 119 }

// kernel: resnet34_forward.77
= control target key start
LH: loop header
LB: loop body
LE: loop exit
PB: predicated region body
PF: predicated region fallthrough
CT: control target
= control target key end

     0   :  { %v99_v30 = vlaneseq  ;;  %v552_v34 = vmov 1966171168   ;;  %s680_s0 = inlined_call_operand.vmem [shape: bf16[2,512], index: 0, kind: input, shape index: {}]   ;;  %s681_s1 = inlined_call_operand.vmem [shape: bf16[512,128], index: 1, kind: input, shape index: {}]   ;;  %s682_s2 = inlined_call_operand.vmem [shape: f32[1,128], index: 2, kind: input, shape index: {}]   ;;  %s683_s3 = inlined_call_operand.hbm [shape: f32[2,128], index: 3, kind: output, shape index: {}]  }
   0x1   :  { %v498_v0 = vld [vmem:[%s681_s1 + $0x78] sm:$0xff]   ;;  %v502_v4 = vld [vmem:[%s681_s1 + $0x70] sm:$0xff]   ;;  %v506_v8 = vld [vmem:[%s681_s1 + $0x68] sm:$0xff]   ;;  %v97_v35 = vunpack.c.l.s4 %v552_v34 }
   0x2   :  { %v499_v1 = vld [vmem:[%s681_s1 + $0xf8] sm:$0xff]   ;;  %451 = vmatprep.subr.bf16.mxu0 %v498_v0  ;;  %v503_v5 = vld [vmem:[%s681_s1 + $0xf0] sm:$0xff]   ;;  %v507_v9 = vld [vmem:[%s681_s1 + $0xe8] sm:$0xff]   ;;  %v100_v36 = vshrl.u32 %v99_v30, 7 }
   0x3   :  { %v500_v2 = vld [vmem:[%s681_s1 + $0x38] sm:$0xff]   ;;  %473 = vmatprep.subr.bf16.mxu1 %v499_v1  ;;  %v504_v6 = vld [vmem:[%s681_s1 + $0x30] sm:$0xff]   ;;  %v508_v10 = vld [vmem:[%s681_s1 + $0x28] sm:$0xff]  }
   0x4   :  { %v501_v3 = vld [vmem:[%s681_s1 + $0xb8] sm:$0xff]   ;;  %452 = vmatpush3.bf16.msra.mxu0 %v500_v2  ;;  %v505_v7 = vld [vmem:[%s681_s1 + $0xb0] sm:$0xff]   ;;  %v509_v11 = vld [vmem:[%s681_s1 + $0xa8] sm:$0xff]  }
   0x5   :  { %474 = vmatpush3.bf16.msra.mxu1 %v501_v3  ;;  %453 = vmatprep.subr.bf16.mxu0 %v502_v4  ;;  %v510_v12 = vld [vmem:[%s681_s1 + $0x60] sm:$0xff]   ;;  %v514_v16 = vld [vmem:[%s681_s1 + $0x58] sm:$0xff]   ;;  %v518_v20 = vld [vmem:[%s681_s1 + $0x50] sm:$0xff]  }
   0x6   :  { %475 = vmatprep.subr.bf16.mxu1 %v503_v5  ;;  %v511_v13 = vld [vmem:[%s681_s1 + $0xe0] sm:$0xff]   ;;  %v515_v17 = vld [vmem:[%s681_s1 + $0xd8] sm:$0xff]   ;;  %v519_v21 = vld [vmem:[%s681_s1 + $0xd0] sm:$0xff]  }
   0x7   :  { %v512_v14 = vld [vmem:[%s681_s1 + $0x20] sm:$0xff]   ;;  %v516_v18 = vld [vmem:[%s681_s1 + $0x18] sm:$0xff]   ;;  %v520_v22 = vld [vmem:[%s681_s1 + $0x10] sm:$0xff]  }
   0x8   :  { %454 = vmatpush3.bf16.msra.mxu0 %v504_v6  ;;  %v513_v15 = vld [vmem:[%s681_s1 + $0xa0] sm:$0xff]   ;;  %v517_v19 = vld [vmem:[%s681_s1 + $0x98] sm:$0xff]   ;;  %v521_v23 = vld [vmem:[%s681_s1 + $0x90] sm:$0xff]  }
   0x9   :  { %476 = vmatpush3.bf16.msra.mxu1 %v505_v7  ;;  %455 = vmatprep.subr.bf16.mxu0 %v506_v8  ;;  %v522_v24 = vld [vmem:[%s681_s1 + $0x48] sm:$0xff]   ;;  %v526_v28 = vld [vmem:[%s681_s1 + $0x40] sm:$0xff]  }
   0xa   :  { %477 = vmatprep.subr.bf16.mxu1 %v507_v9  ;;  %v523_v25 = vld [vmem:[%s681_s1 + $0xc8] sm:$0xff]   ;;  %v527_v29 = vld [vmem:[%s681_s1 + $0xc0] sm:$0xff]  }
   0xb   :  { %v524_v26 = vld [vmem:[%s681_s1 + $0x8] sm:$0xff]   ;;  %v528_v31 = vld [vmem:[%s681_s1] sm:$0xff]  }
   0xc   :  { %456 = vmatpush3.bf16.msra.mxu0 %v508_v10  ;;  %v525_v27 = vld [vmem:[%s681_s1 + $0x88] sm:$0xff]   ;;  %v529_v32 = vld [vmem:[%s681_s1 + $0x80] sm:$0xff]  }
   0xd   :  { %478 = vmatpush3.bf16.msra.mxu1 %v509_v11  ;;  %457 = vmatprep.subr.bf16.mxu0 %v510_v12  ;;  %v417_v33 = vld.sshfl [vmem:[%s680_s0] sm:$0x33 pattern:$0x75316420] }
   0xe   :  { %479 = vmatprep.subr.bf16.mxu1 %v511_v13 }
  0x10   :  { %458 = vmatpush3.bf16.msra.mxu0 %v512_v14 }
  0x11   :  { %480 = vmatpush3.bf16.msra.mxu1 %v513_v15  ;;  %459 = vmatprep.subr.bf16.mxu0 %v514_v16 }
  0x12   :  { %481 = vmatprep.subr.bf16.mxu1 %v515_v17 }
  0x14   :  { %460 = vmatpush3.bf16.msra.mxu0 %v516_v18 }
  0x15   :  { %482 = vmatpush3.bf16.msra.mxu1 %v517_v19  ;;  %461 = vmatprep.subr.bf16.mxu0 %v518_v20 }
  0x16   :  { %483 = vmatprep.subr.bf16.mxu1 %v519_v21 }
  0x18   :  { %462 = vmatpush3.bf16.msra.mxu0 %v520_v22 }
  0x19   :  { %484 = vmatpush3.bf16.msra.mxu1 %v521_v23  ;;  %463 = vmatprep.subr.bf16.mxu0 %v522_v24 }
  0x1a   :  { %485 = vmatprep.subr.bf16.mxu1 %v523_v25 }
  0x1c   :  { %464 = vmatpush3.bf16.msra.mxu0 %v524_v26 }
  0x1d   :  { %486 = vmatpush3.bf16.msra.mxu1 %v525_v27  ;;  %465 = vmatprep.subr.bf16.mxu0 %v526_v28 }
  0x1e   :  { %487 = vmatprep.subr.bf16.mxu1 %v527_v29 }
  0x20   :  { %466 = vmatpush3.bf16.msra.mxu0 %v528_v31 }
  0x21   :  { %488 = vmatpush3.bf16.msra.mxu1 %v529_v32 }
  0x22   :  { %8 = vsyncpa [#allocation4], 0  ;;  %v95_v37 = vcombine.high %v417_v33, %v417_v33  ;;  %v98_v38 = vunpack.c.0.s8 %v97_v35  ;;  %v553_v44 = vmov 0.0   ;;  %v450_v58 = vld [vmem:[%s682_s2] ss:$0 sm:$0xff]  ;;  %s554_s24 = smov [#allocation3]  }
  0x23   :  { %20 = vst [vmem:[#allocation2] sm:$0x3] %v553_v44  ;;  %s409_s25 = sshll.u32 %s554_s24, 4  ;;  %s410_s25 = int_to_ptr.vmem [resolvable:$true] %s409_s25 }
  0x24   :  { %v101_v39 = vsub.s32 %v98_v38, %v100_v36  ;;  %s530_s26 = scalar_lea.vmem %s410_s25, 32  ;;  %p535_p1 = scmp.lt.s32.totalorder %s410_s25, %s410_s25 }
  0x25   :  { %p531_p0 = scmp.ne.s32.totalorder %s410_s25, %s530_s26  ;;  %p536_p2 = scmp.lt.s32.totalorder %s530_s26, %s530_s26 }
  0x26   :  { %v109_v40 = vrot.slane %v95_v37, %v101_v39  ;;  %v102_v41 = vrot.slane %v417_v33, %v101_v39 }
  0x27   :  { %p537_p3 = por %p536_p2, %p535_p1 }
  0x28   :  { %340 = vmatprep.mubr.bf16.mxu0 %v109_v40  ;;  %v111_v42 = vcombine.high %v109_v40, %v109_v40  ;;  %v110_v43 = vcombine.high %v102_v41, %v102_v41 }
  0x29   :  { %341 = vmatmul.mubr.bf16.vlgmr.msra.gmra.mxu0 %v102_v41  ;;  %p538_p4 = pnand %p537_p3, %p531_p0 }
  0x2a   :  { %380 = vmatprep.mubr.bf16.mxu1 %v111_v42  ;;  %v21_v52 = vld [vmem:[#allocation2] sm:$0x3] }
  0x2b   :  { %381 = vmatmul.mubr.bf16.vlgmr.msra.gmra.mxu1 %v110_v43 }
  0xe9   :  { %v467_v45 = vpop.f32.mrf.mxu0 }
  0xeb   :  { %v489_v46 = vpop.f32.mrf.mxu1  ;;  %v468_v47 = vpop.f32.mrf.mxu0 }
  0xec   :  { %v469_v48 = vadd.f32 %v468_v47, %v467_v45 }
  0xed   :  { %v490_v49 = vpop.f32.mrf.mxu1  ;;  %v470_v50 = vpop.f32.mrf.mxu0 }
  0xee   :  { %v491_v51 = vadd.f32 %v490_v49, %v489_v46 }
  0xef   :  { %v492_v53 = vpop.f32.mrf.mxu1  ;;  %v471_v54 = vpop.f32.mrf.mxu0 }
  0xf0   :  { %v383_v55 = vadd.f32 %v491_v51, %v469_v48 }
  0xf1   :  { %v493_v56 = vpop.f32.mrf.mxu1 }
  0xf2   :  { %v388_v57 = vadd.f32 %v383_v55, %v21_v52 }
  0xf4   :  { %389 = vst [vmem:[#allocation2] sm:$0x3] %v388_v57 }
  0xfb   :  { %v393_v59 = vld [vmem:[#allocation2] sm:$0x3] }
  0xfc   :  { %v401_v60 = vadd.f32 %v450_v58, %v393_v59 }
  0xfe   :  { %402 = vst [vmem:[#allocation3] sm:$0x3] %v401_v60 }
  0xff   :  { %541 = shalt.err (!%p538_p4)
}
 0x100   :  { %412 = dma.vmem_to_hbm [thread:$0]  %s410_s25, 32, %s683_s3, [#allocation4]  }
 0x101   :  { %550 = dma.done.wait [#allocation4], 32  }
 0x102   :  { %551 = vsyncadd [#allocation4], 4294967264 }
 0x103   :  { %416 = vsyncpa [#allocation4], 1 }

</bundles_post_ra>
